<compile_context>
chip_gen: v7x
topology: tpu7x:2x2x1
jax: 0.10.0
libtpu: 0.0.40
codegen_flags: <defaults>
</compile_context>

<pallas_src>
import functools

import jax
import jax.numpy as jnp
from jax.experimental import pallas as pl
from jax.experimental.pallas import tpu as pltpu

EMB_DIM = 64
HID_DIM = 128
LANE = 128


def _round_up(x, m):
    return ((x + m - 1) // m) * m


def cnn1d_kernel(ids_ref, mask_ref, emb_ref,
                 w0_ref, b0_ref, wr_ref, br_ref,
                 wl1_ref, bl1_ref, wl2_ref, bl2_ref,
                 w21_ref, b21_ref,
                 out_ref, *, fuse_taps):
    TB, L = mask_ref.shape          # sequences per tile, sequence length
    M = ids_ref.shape[0]            # TB * L flattened rows (sequence-major)
    NT = emb_ref.shape[0]           # padded vocabulary size
    H = wl1_ref.shape[0]

    # ---- Embedding gather fused into the kernel: exact one-hot MXU matmul ----
    # (table rows are selected exactly; the table itself is bf16).
    ids = ids_ref[...]                                             # (M, 1) i32
    tok = jax.lax.broadcasted_iota(jnp.int32, (M, NT), 1)
    onehot = (tok == ids).astype(jnp.bfloat16)                     # (M, NT)
    x = jnp.dot(onehot, emb_ref[...],
                preferred_element_type=jnp.float32).astype(jnp.bfloat16)  # (M, E_pad)

    # Per-row sequence-boundary masks for the kernel=3 / padding=1 halo.
    row = jax.lax.broadcasted_iota(jnp.int32, (M, 1), 0)
    is_first = (row % L) == 0
    is_last = (row % L) == (L - 1)

    def conv_relu(h, w_slab, b):
        """Conv1d(k=3, pad=1) + ReLU on flattened (M, Cin) bf16 rows.

        w_slab: (3*Cin, Cout) bf16, tap k in rows [k*Cin, (k+1)*Cin).
        b: (1, Cout) f32.
        """
        cin = h.shape[1]
        # Shift by one sequence position; rows that wrapped across a sequence
        # boundary are zeroed (== the conv's zero padding).
        h_prev = jnp.where(is_first, 0.0, jnp.roll(h, 1, axis=0))    # h[l-1]
        h_next = jnp.where(is_last, 0.0, jnp.roll(h, -1, axis=0))    # h[l+1]
        if fuse_taps:
            # One K=3*Cin matmul per layer (fills the 256-deep v6e/v7x MXU).
            hc = jnp.concatenate([h_prev, h, h_next], axis=-1)       # (M, 3*Cin)
            y = jnp.dot(hc, w_slab, preferred_element_type=jnp.float32)
        else:
            # Three K=Cin matmuls: native fill for 128-deep MXUs (<= v5).
            y = (jnp.dot(h_prev, w_slab[0:cin, :],
                         preferred_element_type=jnp.float32)
                 + jnp.dot(h, w_slab[cin:2 * cin, :],
                           preferred_element_type=jnp.float32)
                 + jnp.dot(h_next, w_slab[2 * cin:3 * cin, :],
                           preferred_element_type=jnp.float32))
        # Bias + ReLU in f32, then a single f32->bf16 cast per layer.
        return jnp.maximum(y + b, 0.0).astype(jnp.bfloat16)

    # Conv stack: Conv1d(E->H)+ReLU, then 3x [Conv1d(H->H)+ReLU+Dropout(id)].
    h = conv_relu(x, w0_ref[...], b0_ref[...])
    for layer in range(3):
        h = conv_relu(h, wr_ref[layer], br_ref[layer])

    # Linear(H, H) + ReLU on the MXU.
    h1 = jnp.maximum(
        jnp.dot(h, wl1_ref[...], preferred_element_type=jnp.float32)
        + bl1_ref[...], 0.0)                                         # (M, H) f32

    # Linear(H, 1) + ReLU as a VPU multiply + lane reduction.
    h1g = h1.reshape(TB, L, H)                                       # free leading-dim split
    h2 = jnp.maximum(
        jnp.sum(h1g * wl2_ref[...], axis=-1) + bl2_ref[...], 0.0)    # (TB, L)

    # Masked sum over the sequence, then the final Linear(1, 1).
    s = jnp.sum(h2 * mask_ref[...], axis=1, keepdims=True)           # (TB, 1)
    out_ref[...] = s * w21_ref[...] + b21_ref[...]                   # (TB, 1)


def _default_fuse_taps():
    """Fuse the 3 conv taps into one K=3*Cin dot on 256-deep MXUs (v6e/v7x);
    keep three K=Cin dots on 128-deep MXUs (v5e and older)."""
    try:
        kind = jax.devices()[0].device_kind.lower()
    except Exception:
        return True
    return not any(tag in kind for tag in ("v2", "v3", "v4", "v5"))


def cnn1d_forward(epitope, mask, emb_table, params, tile_b=None, fuse_taps=None):
    """epitope: (B, L) int32 token ids, mask: (B, L) f32 -> (B,) f32."""
    B, L = epitope.shape
    NT, E = emb_table.shape
    w0, b0, wr, br, wl1, bl1, wl2, bl2, w21, b21 = params
    H = wl1.shape[0]

    if fuse_taps is None:
        fuse_taps = _default_fuse_taps()

    # Batch tile: rows = tile_b*L per grid step lands in the 512..2048 sweet
    # spot (per-step overhead amortized, MXU M dimension full) while keeping
    # >= 2 balanced grid steps when the batch allows, so v7x can shard the
    # "parallel" batch axis across both TensorCores.  VMEM is not binding:
    # live f32 intermediates are only a few MiB even at rows=2048.
    if tile_b is None:
        tile_b = max(8, min(2048 // L, pl.cdiv(B, 2)))
        tile_b = _round_up(tile_b, 8)
    B_pad = _round_up(B, tile_b)
    rows = tile_b * L

    E_pad = _round_up(max(E, LANE), LANE)   # lane-align conv input channels
    NT_pad = _round_up(NT, LANE)            # lane-align the one-hot K dim
    # NOTE: the in-kernel one-hot gather assumes a small vocabulary (fits VMEM).

    # Token ids, flattened sequence-major into the matmul M dimension.  The
    # embedding gather happens inside the kernel, so the (B, L, E) embeds
    # array never round-trips through HBM.
    ids = jnp.pad(epitope.astype(jnp.int32), ((0, B_pad - B), (0, 0)))
    ids = ids.reshape(B_pad * L, 1)
    m = jnp.pad(mask.astype(jnp.float32), ((0, B_pad - B), (0, 0)))

    # Embedding table padded to (NT_pad, E_pad), bf16 (selection is exact).
    emb_p = jnp.pad(emb_table, ((0, NT_pad - NT), (0, E_pad - E))).astype(jnp.bfloat16)

    # Conv taps stacked along K: rows [k*Cin, (k+1)*Cin) hold tap k, matching
    # the in-kernel [h_prev, h, h_next] concatenation order.
    w0_p = jnp.pad(w0, ((0, 0), (0, E_pad - E), (0, 0)))             # (3, E_pad, H)
    w0_s = w0_p.reshape(3 * E_pad, H).astype(jnp.bfloat16)
    wr_s = wr.reshape(3, 3 * H, H).astype(jnp.bfloat16)
    wl1_b = wl1.astype(jnp.bfloat16)
    wl2_r = wl2.reshape(1, H).astype(jnp.float32)                    # VPU head
    b0_r = b0.reshape(1, H).astype(jnp.float32)
    br_r = br.reshape(3, 1, H).astype(jnp.float32)
    bl1_r = bl1.reshape(1, H).astype(jnp.float32)
    bl2_r = bl2.reshape(1, 1).astype(jnp.float32)
    w21_r = w21.reshape(1, 1).astype(jnp.float32)
    b21_r = b21.reshape(1, 1).astype(jnp.float32)

    def _full(a):
        nd = a.ndim
        return pl.BlockSpec(a.shape, lambda b, _nd=nd: (0,) * _nd)

    out = pl.pallas_call(
        functools.partial(cnn1d_kernel, fuse_taps=fuse_taps),
        out_shape=jax.ShapeDtypeStruct((B_pad, 1), jnp.float32),
        grid_spec=pltpu.PrefetchScalarGridSpec(
            num_scalar_prefetch=0,
            grid=(B_pad // tile_b,),
            in_specs=[
                pl.BlockSpec((rows, 1), lambda b: (b, 0)),    # token ids (flattened)
                pl.BlockSpec((tile_b, L), lambda b: (b, 0)),  # mask
                _full(emb_p),   # (NT_pad, E_pad) bf16
                _full(w0_s),    # (3*E_pad, H)    bf16
                _full(b0_r),    # (1, H)          f32
                _full(wr_s),    # (3, 3*H, H)     bf16
                _full(br_r),    # (3, 1, H)       f32
                _full(wl1_b),   # (H, H)          bf16
                _full(bl1_r),   # (1, H)          f32
                _full(wl2_r),   # (1, H)          f32
                _full(bl2_r),   # (1, 1)          f32
                _full(w21_r),   # (1, 1)          f32
                _full(b21_r),   # (1, 1)          f32
            ],
            out_specs=pl.BlockSpec((tile_b, 1), lambda b: (b, 0)),
        ),
        compiler_params=pltpu.CompilerParams(
            dimension_semantics=("parallel",)),
    )(ids, m, emb_p, w0_s, b0_r, wr_s, br_r, wl1_b, bl1_r, wl2_r, bl2_r,
      w21_r, b21_r)
    return out[:B, 0]


def init_params(key, n_tokens, E=EMB_DIM, H=HID_DIM):
    keys = jax.random.split(key, 11)
    # Embedding table with padding_idx=0 zeroed.
    emb = (jax.random.normal(keys[0], (n_tokens, E), jnp.float32) * 0.1).at[0].set(0.0)

    # conv0: torch weight (H, E, 3) -> per-tap (3, E, H)
    c0 = jax.random.normal(keys[1], (H, E, 3), jnp.float32) / jnp.sqrt(3.0 * E)
    w0 = jnp.transpose(c0, (2, 1, 0))
    b0 = (jax.random.normal(keys[2], (H,), jnp.float32) * 0.01).reshape(1, H)

    # 3 ConvBlocks: torch weights (3 layers, H, H, 3) -> (3, 3 taps, H_in, H_out)
    cr = jax.random.normal(keys[3], (3, H, H, 3), jnp.float32) / jnp.sqrt(3.0 * H)
    wr = jnp.transpose(cr, (0, 3, 2, 1))
    br = (jax.random.normal(keys[4], (3, H), jnp.float32) * 0.01).reshape(3, 1, H)

    # linear head: torch Linear weight (out, in) -> (in, out)
    wl1 = (jax.random.normal(keys[5], (H, H), jnp.float32) / jnp.sqrt(1.0 * H)).T
    bl1 = (jax.random.normal(keys[6], (H,), jnp.float32) * 0.01).reshape(1, H)
    wl2 = (jax.random.normal(keys[7], (1, H), jnp.float32) / jnp.sqrt(1.0 * H)).T
    bl2 = (jax.random.normal(keys[8], (1,), jnp.float32) * 0.01).reshape(1, 1)

    # final Linear(1, 1)
    w21 = jax.random.normal(keys[9], (1, 1), jnp.float32)
    b21 = jax.random.normal(keys[10], (1, 1), jnp.float32) * 0.01
    return emb, (w0, b0, wr, br, wl1, bl1, wl2, bl2, w21, b21)


def reference_forward(epitope, mask, emb_table, params):
    """Pure-JAX f32 reference (embedding gather + lax conv) for validation."""
    w0, b0, wr, br, wl1, bl1, wl2, bl2, w21, b21 = params
    embeds = emb_table[epitope]                  # (B, L, E)
    x = jnp.swapaxes(embeds, 1, 2)               # (B, C, L)

    def conv_relu(x, taps, b):
        w = jnp.transpose(taps, (2, 1, 0))       # (Cout, Cin, 3)
        y = jax.lax.conv_general_dilated(
            x, w, window_strides=(1,), padding=[(1, 1)],
            dimension_numbers=("NCH", "OIH", "NCH"))
        return jax.nn.relu(y + b.reshape(1, -1, 1))

    h = conv_relu(x, w0, b0)
    for l in range(3):
        h = conv_relu(h, wr[l], br[l])
    h = jnp.swapaxes(h, 1, 2)                    # (B, L, H)
    h1 = jax.nn.relu(h @ wl1 + bl1)
    h2 = jax.nn.relu(h1 @ wl2 + bl2)             # (B, L, 1)
    s = jnp.sum(h2[..., 0] * mask, axis=1)       # (B,)
    return s * w21[0, 0] + b21[0, 0]


if __name__ == "__main__":
    key = jax.random.PRNGKey(0)
    k_param, k_tok = jax.random.split(key)

    n_tokens, B, L = 16, 64, 16
    emb_table, params = init_params(k_param, n_tokens)

    epitope = jax.random.randint(k_tok, (B, L), 0, n_tokens, dtype=jnp.int32)
    mask = (epitope != 0).astype(jnp.float32)
    antigen = jnp.zeros((B, L), jnp.int32)   # accepted by the module but unused

    out = jax.block_until_ready(cnn1d_forward(epitope, mask, emb_table, params))
    ref = jax.block_until_ready(reference_forward(epitope, mask, emb_table, params))

    assert out.shape == (B,)
    # bf16 matmul operands (f32 accumulation) vs an all-f32 reference.
    assert jnp.allclose(out, ref, atol=5e-2, rtol=5e-2), (out, ref)

    print("KERNEL_OK")
</pallas_src>

<mosaic_0001>
module attributes {stable_mosaic.version = 11 : i64} {
  func.func @cnn1d_kernel(%arg0: i32, %arg1: memref<512x1xi32, #tpu.memory_space<vmem>>, %arg2: memref<32x16xf32, #tpu.memory_space<vmem>>, %arg3: memref<128x128xbf16, #tpu.memory_space<vmem>>, %arg4: memref<384x128xbf16, #tpu.memory_space<vmem>>, %arg5: memref<1x128xf32, #tpu.memory_space<vmem>>, %arg6: memref<3x384x128xbf16, #tpu.memory_space<vmem>>, %arg7: memref<3x1x128xf32, #tpu.memory_space<vmem>>, %arg8: memref<128x128xbf16, #tpu.memory_space<vmem>>, %arg9: memref<1x128xf32, #tpu.memory_space<vmem>>, %arg10: memref<1x128xf32, #tpu.memory_space<vmem>>, %arg11: memref<1x1xf32, #tpu.memory_space<vmem>>, %arg12: memref<1x1xf32, #tpu.memory_space<vmem>>, %arg13: memref<1x1xf32, #tpu.memory_space<vmem>>, %arg14: memref<32x1xf32, #tpu.memory_space<vmem>>) attributes {dimension_semantics = [#tpu.dimension_semantics<parallel>], iteration_bounds = array<i64: 2>, scalar_prefetch = 0 : i64, scratch_operands = 0 : i64, tpu.core_type = #tpu.core_type<tc>, window_params = [{transform_indices = @transform_0, window_bounds = array<i64: 512, 1>}, {transform_indices = @transform_1, window_bounds = array<i64: 32, 16>}, {pipeline_mode = #tpu.pipeline_mode<synchronous>, transform_indices = @transform_2, window_bounds = array<i64: 128, 128>}, {pipeline_mode = #tpu.pipeline_mode<synchronous>, transform_indices = @transform_3, window_bounds = array<i64: 384, 128>}, {pipeline_mode = #tpu.pipeline_mode<synchronous>, transform_indices = @transform_4, window_bounds = array<i64: 1, 128>}, {pipeline_mode = #tpu.pipeline_mode<synchronous>, transform_indices = @transform_5, window_bounds = array<i64: 3, 384, 128>}, {pipeline_mode = #tpu.pipeline_mode<synchronous>, transform_indices = @transform_6, window_bounds = array<i64: 3, 1, 128>}, {pipeline_mode = #tpu.pipeline_mode<synchronous>, transform_indices = @transform_7, window_bounds = array<i64: 128, 128>}, {pipeline_mode = #tpu.pipeline_mode<synchronous>, transform_indices = @transform_8, window_bounds = array<i64: 1, 128>}, {pipeline_mode = #tpu.pipeline_mode<synchronous>, transform_indices = @transform_9, window_bounds = array<i64: 1, 128>}, {pipeline_mode = #tpu.pipeline_mode<synchronous>, transform_indices = @transform_10, window_bounds = array<i64: 1, 1>}, {pipeline_mode = #tpu.pipeline_mode<synchronous>, transform_indices = @transform_11, window_bounds = array<i64: 1, 1>}, {pipeline_mode = #tpu.pipeline_mode<synchronous>, transform_indices = @transform_12, window_bounds = array<i64: 1, 1>}, {transform_indices = @transform_13, window_bounds = array<i64: 32, 1>}]} {
    %c0 = arith.constant 0 : index
    %c0_0 = arith.constant 0 : index
    %0 = vector.load %arg1[%c0, %c0_0] : memref<512x1xi32, #tpu.memory_space<vmem>>, vector<512x1xi32>
    %1 = tpu.iota {dimensions = array<i32: 1>} : vector<512x128xi32>
    %2 = vector.broadcast %0 : vector<512x1xi32> to vector<512x128xi32>
    %3 = arith.cmpi eq, %1, %2 : vector<512x128xi32>
    %4 = arith.extui %3 : vector<512x128xi1> to vector<512x128xi32>
    %5 = arith.sitofp %4 : vector<512x128xi32> to vector<512x128xf32>
    %6 = arith.truncf %5 : vector<512x128xf32> to vector<512x128xbf16>
    %c0_1 = arith.constant 0 : index
    %c0_2 = arith.constant 0 : index
    %7 = vector.load %arg3[%c0_1, %c0_2] : memref<128x128xbf16, #tpu.memory_space<vmem>>, vector<128x128xbf16>
    %cst = arith.constant dense<0.000000e+00> : vector<512x128xf32>
    %8 = tpu.matmul %6, %7, %cst {dimension_numbers = #tpu.dot_dimension_numbers<[1], [0], [0], [1], [0, 0, 1, 1], [], []>} : vector<512x128xbf16>, vector<128x128xbf16>, vector<512x128xf32> -> vector<512x128xf32>
    %9 = arith.truncf %8 : vector<512x128xf32> to vector<512x128xbf16>
    %10 = tpu.iota {dimensions = array<i32: 0>} : vector<512x1xi32>
    %c16_i32 = arith.constant 16 : i32
    %c0_i32 = arith.constant 0 : i32
    %11 = arith.cmpi eq, %c16_i32, %c0_i32 : i32
    %c1_i32 = arith.constant 1 : i32
    %12 = arith.select %11, %c1_i32, %c16_i32 : i32
    %13 = vector.broadcast %12 : i32 to vector<512x1xi32>
    %14 = arith.remsi %10, %13 : vector<512x1xi32>
    %c0_i32_3 = arith.constant 0 : i32
    %15 = vector.broadcast %c0_i32_3 : i32 to vector<512x1xi32>
    %16 = arith.cmpi ne, %14, %15 : vector<512x1xi32>
    %c0_i32_4 = arith.constant 0 : i32
    %17 = vector.broadcast %c0_i32_4 : i32 to vector<512x1xi32>
    %18 = arith.cmpi slt, %14, %17 : vector<512x1xi32>
    %c0_i32_5 = arith.constant 0 : i32
    %19 = arith.cmpi slt, %12, %c0_i32_5 : i32
    %20 = vector.broadcast %19 : i1 to vector<512x1xi1>
    %21 = vector.broadcast %20 : vector<512x1xi1> to vector<512x1xi1>
    %22 = arith.xori %18, %21 : vector<512x1xi1>
    %23 = arith.andi %22, %16 : vector<512x1xi1>
    %24 = vector.broadcast %12 : i32 to vector<512x1xi32>
    %25 = arith.addi %14, %24 : vector<512x1xi32>
    %26 = arith.select %23, %25, %14 : vector<512x1xi1>, vector<512x1xi32>
    %c0_i32_6 = arith.constant 0 : i32
    %27 = vector.broadcast %c0_i32_6 : i32 to vector<512x1xi32>
    %28 = arith.cmpi eq, %26, %27 : vector<512x1xi32>
    %c16_i32_7 = arith.constant 16 : i32
    %c0_i32_8 = arith.constant 0 : i32
    %29 = arith.cmpi eq, %c16_i32_7, %c0_i32_8 : i32
    %c1_i32_9 = arith.constant 1 : i32
    %30 = arith.select %29, %c1_i32_9, %c16_i32_7 : i32
    %31 = vector.broadcast %30 : i32 to vector<512x1xi32>
    %32 = arith.remsi %10, %31 : vector<512x1xi32>
    %c0_i32_10 = arith.constant 0 : i32
    %33 = vector.broadcast %c0_i32_10 : i32 to vector<512x1xi32>
    %34 = arith.cmpi ne, %32, %33 : vector<512x1xi32>
    %c0_i32_11 = arith.constant 0 : i32
    %35 = vector.broadcast %c0_i32_11 : i32 to vector<512x1xi32>
    %36 = arith.cmpi slt, %32, %35 : vector<512x1xi32>
    %c0_i32_12 = arith.constant 0 : i32
    %37 = arith.cmpi slt, %30, %c0_i32_12 : i32
    %38 = vector.broadcast %37 : i1 to vector<512x1xi1>
    %39 = vector.broadcast %38 : vector<512x1xi1> to vector<512x1xi1>
    %40 = arith.xori %36, %39 : vector<512x1xi1>
    %41 = arith.andi %40, %34 : vector<512x1xi1>
    %42 = vector.broadcast %30 : i32 to vector<512x1xi32>
    %43 = arith.addi %32, %42 : vector<512x1xi32>
    %44 = arith.select %41, %43, %32 : vector<512x1xi1>, vector<512x1xi32>
    %c15_i32 = arith.constant 15 : i32
    %45 = vector.broadcast %c15_i32 : i32 to vector<512x1xi32>
    %46 = arith.cmpi eq, %44, %45 : vector<512x1xi32>
    %c0_13 = arith.constant 0 : index
    %c0_14 = arith.constant 0 : index
    %47 = vector.load %arg4[%c0_13, %c0_14] : memref<384x128xbf16, #tpu.memory_space<vmem>>, vector<384x128xbf16>
    %c0_15 = arith.constant 0 : index
    %c0_16 = arith.constant 0 : index
    %48 = vector.load %arg5[%c0_15, %c0_16] : memref<1x128xf32, #tpu.memory_space<vmem>>, vector<1x128xf32>
    %49 = vector.extract_strided_slice %9 {offsets = [511, 0], sizes = [1, 128], strides = [1, 1]} : vector<512x128xbf16> to vector<1x128xbf16>
    %50 = vector.extract_strided_slice %9 {offsets = [0, 0], sizes = [511, 128], strides = [1, 1]} : vector<512x128xbf16> to vector<511x128xbf16>
    %51 = tpu.concatenate %49, %50 in 0 : vector<1x128xbf16>, vector<511x128xbf16> -> vector<512x128xbf16>
    %cst_17 = arith.constant 0.000000e+00 : f32
    %52 = arith.truncf %cst_17 : f32 to bf16
    %53 = vector.shape_cast %28 : vector<512x1xi1> to vector<512x1xi1>
    %54 = vector.broadcast %53 : vector<512x1xi1> to vector<512x128xi1>
    %55 = vector.broadcast %52 : bf16 to vector<512x128xbf16>
    %56 = arith.select %54, %55, %51 : vector<512x128xi1>, vector<512x128xbf16>
    %57 = vector.extract_strided_slice %9 {offsets = [1, 0], sizes = [511, 128], strides = [1, 1]} : vector<512x128xbf16> to vector<511x128xbf16>
    %58 = vector.extract_strided_slice %9 {offsets = [0, 0], sizes = [1, 128], strides = [1, 1]} : vector<512x128xbf16> to vector<1x128xbf16>
    %59 = tpu.concatenate %57, %58 in 0 : vector<511x128xbf16>, vector<1x128xbf16> -> vector<512x128xbf16>
    %cst_18 = arith.constant 0.000000e+00 : f32
    %60 = arith.truncf %cst_18 : f32 to bf16
    %61 = vector.shape_cast %46 : vector<512x1xi1> to vector<512x1xi1>
    %62 = vector.broadcast %61 : vector<512x1xi1> to vector<512x128xi1>
    %63 = vector.broadcast %60 : bf16 to vector<512x128xbf16>
    %64 = arith.select %62, %63, %59 : vector<512x128xi1>, vector<512x128xbf16>
    %65 = tpu.concatenate %56, %9, %64 in 1 : vector<512x128xbf16>, vector<512x128xbf16>, vector<512x128xbf16> -> vector<512x384xbf16>
    %cst_19 = arith.constant dense<0.000000e+00> : vector<512x128xf32>
    %66 = tpu.matmul %65, %47, %cst_19 {dimension_numbers = #tpu.dot_dimension_numbers<[1], [0], [0], [1], [0, 0, 1, 1], [], []>} : vector<512x384xbf16>, vector<384x128xbf16>, vector<512x128xf32> -> vector<512x128xf32>
    %67 = vector.broadcast %48 : vector<1x128xf32> to vector<512x128xf32>
    %68 = arith.addf %66, %67 : vector<512x128xf32>
    %cst_20 = arith.constant 0.000000e+00 : f32
    %69 = vector.broadcast %cst_20 : f32 to vector<512x128xf32>
    %70 = arith.maximumf %68, %69 : vector<512x128xf32>
    %71 = arith.truncf %70 : vector<512x128xf32> to vector<512x128xbf16>
    %c0_21 = arith.constant 0 : index
    %c0_22 = arith.constant 0 : index
    %c0_23 = arith.constant 0 : index
    %72 = vector.load %arg6[%c0_21, %c0_22, %c0_23] : memref<3x384x128xbf16, #tpu.memory_space<vmem>>, vector<1x384x128xbf16>
    %73 = vector.shape_cast %72 : vector<1x384x128xbf16> to vector<384x128xbf16>
    %c0_24 = arith.constant 0 : index
    %c0_25 = arith.constant 0 : index
    %c0_26 = arith.constant 0 : index
    %74 = vector.load %arg7[%c0_24, %c0_25, %c0_26] : memref<3x1x128xf32, #tpu.memory_space<vmem>>, vector<1x1x128xf32>
    %75 = vector.shape_cast %74 : vector<1x1x128xf32> to vector<1x128xf32>
    %76 = vector.extract_strided_slice %71 {offsets = [511, 0], sizes = [1, 128], strides = [1, 1]} : vector<512x128xbf16> to vector<1x128xbf16>
    %77 = vector.extract_strided_slice %71 {offsets = [0, 0], sizes = [511, 128], strides = [1, 1]} : vector<512x128xbf16> to vector<511x128xbf16>
    %78 = tpu.concatenate %76, %77 in 0 : vector<1x128xbf16>, vector<511x128xbf16> -> vector<512x128xbf16>
    %cst_27 = arith.constant 0.000000e+00 : f32
    %79 = arith.truncf %cst_27 : f32 to bf16
    %80 = vector.shape_cast %28 : vector<512x1xi1> to vector<512x1xi1>
    %81 = vector.broadcast %80 : vector<512x1xi1> to vector<512x128xi1>
    %82 = vector.broadcast %79 : bf16 to vector<512x128xbf16>
    %83 = arith.select %81, %82, %78 : vector<512x128xi1>, vector<512x128xbf16>
    %84 = vector.extract_strided_slice %71 {offsets = [1, 0], sizes = [511, 128], strides = [1, 1]} : vector<512x128xbf16> to vector<511x128xbf16>
    %85 = vector.extract_strided_slice %71 {offsets = [0, 0], sizes = [1, 128], strides = [1, 1]} : vector<512x128xbf16> to vector<1x128xbf16>
    %86 = tpu.concatenate %84, %85 in 0 : vector<511x128xbf16>, vector<1x128xbf16> -> vector<512x128xbf16>
    %cst_28 = arith.constant 0.000000e+00 : f32
    %87 = arith.truncf %cst_28 : f32 to bf16
    %88 = vector.shape_cast %46 : vector<512x1xi1> to vector<512x1xi1>
    %89 = vector.broadcast %88 : vector<512x1xi1> to vector<512x128xi1>
    %90 = vector.broadcast %87 : bf16 to vector<512x128xbf16>
    %91 = arith.select %89, %90, %86 : vector<512x128xi1>, vector<512x128xbf16>
    %92 = tpu.concatenate %83, %71, %91 in 1 : vector<512x128xbf16>, vector<512x128xbf16>, vector<512x128xbf16> -> vector<512x384xbf16>
    %cst_29 = arith.constant dense<0.000000e+00> : vector<512x128xf32>
    %93 = tpu.matmul %92, %73, %cst_29 {dimension_numbers = #tpu.dot_dimension_numbers<[1], [0], [0], [1], [0, 0, 1, 1], [], []>} : vector<512x384xbf16>, vector<384x128xbf16>, vector<512x128xf32> -> vector<512x128xf32>
    %94 = vector.broadcast %75 : vector<1x128xf32> to vector<512x128xf32>
    %95 = arith.addf %93, %94 : vector<512x128xf32>
    %cst_30 = arith.constant 0.000000e+00 : f32
    %96 = vector.broadcast %cst_30 : f32 to vector<512x128xf32>
    %97 = arith.maximumf %95, %96 : vector<512x128xf32>
    %98 = arith.truncf %97 : vector<512x128xf32> to vector<512x128xbf16>
    %c1 = arith.constant 1 : index
    %c0_31 = arith.constant 0 : index
    %c0_32 = arith.constant 0 : index
    %99 = vector.load %arg6[%c1, %c0_31, %c0_32] : memref<3x384x128xbf16, #tpu.memory_space<vmem>>, vector<1x384x128xbf16>
    %100 = vector.shape_cast %99 : vector<1x384x128xbf16> to vector<384x128xbf16>
    %c1_33 = arith.constant 1 : index
    %c0_34 = arith.constant 0 : index
    %c0_35 = arith.constant 0 : index
    %101 = vector.load %arg7[%c1_33, %c0_34, %c0_35] : memref<3x1x128xf32, #tpu.memory_space<vmem>>, vector<1x1x128xf32>
    %102 = vector.shape_cast %101 : vector<1x1x128xf32> to vector<1x128xf32>
    %103 = vector.extract_strided_slice %98 {offsets = [511, 0], sizes = [1, 128], strides = [1, 1]} : vector<512x128xbf16> to vector<1x128xbf16>
    %104 = vector.extract_strided_slice %98 {offsets = [0, 0], sizes = [511, 128], strides = [1, 1]} : vector<512x128xbf16> to vector<511x128xbf16>
    %105 = tpu.concatenate %103, %104 in 0 : vector<1x128xbf16>, vector<511x128xbf16> -> vector<512x128xbf16>
    %cst_36 = arith.constant 0.000000e+00 : f32
    %106 = arith.truncf %cst_36 : f32 to bf16
    %107 = vector.shape_cast %28 : vector<512x1xi1> to vector<512x1xi1>
    %108 = vector.broadcast %107 : vector<512x1xi1> to vector<512x128xi1>
    %109 = vector.broadcast %106 : bf16 to vector<512x128xbf16>
    %110 = arith.select %108, %109, %105 : vector<512x128xi1>, vector<512x128xbf16>
    %111 = vector.extract_strided_slice %98 {offsets = [1, 0], sizes = [511, 128], strides = [1, 1]} : vector<512x128xbf16> to vector<511x128xbf16>
    %112 = vector.extract_strided_slice %98 {offsets = [0, 0], sizes = [1, 128], strides = [1, 1]} : vector<512x128xbf16> to vector<1x128xbf16>
    %113 = tpu.concatenate %111, %112 in 0 : vector<511x128xbf16>, vector<1x128xbf16> -> vector<512x128xbf16>
    %cst_37 = arith.constant 0.000000e+00 : f32
    %114 = arith.truncf %cst_37 : f32 to bf16
    %115 = vector.shape_cast %46 : vector<512x1xi1> to vector<512x1xi1>
    %116 = vector.broadcast %115 : vector<512x1xi1> to vector<512x128xi1>
    %117 = vector.broadcast %114 : bf16 to vector<512x128xbf16>
    %118 = arith.select %116, %117, %113 : vector<512x128xi1>, vector<512x128xbf16>
    %119 = tpu.concatenate %110, %98, %118 in 1 : vector<512x128xbf16>, vector<512x128xbf16>, vector<512x128xbf16> -> vector<512x384xbf16>
    %cst_38 = arith.constant dense<0.000000e+00> : vector<512x128xf32>
    %120 = tpu.matmul %119, %100, %cst_38 {dimension_numbers = #tpu.dot_dimension_numbers<[1], [0], [0], [1], [0, 0, 1, 1], [], []>} : vector<512x384xbf16>, vector<384x128xbf16>, vector<512x128xf32> -> vector<512x128xf32>
    %121 = vector.broadcast %102 : vector<1x128xf32> to vector<512x128xf32>
    %122 = arith.addf %120, %121 : vector<512x128xf32>
    %cst_39 = arith.constant 0.000000e+00 : f32
    %123 = vector.broadcast %cst_39 : f32 to vector<512x128xf32>
    %124 = arith.maximumf %122, %123 : vector<512x128xf32>
    %125 = arith.truncf %124 : vector<512x128xf32> to vector<512x128xbf16>
    %c2 = arith.constant 2 : index
    %c0_40 = arith.constant 0 : index
    %c0_41 = arith.constant 0 : index
    %126 = vector.load %arg6[%c2, %c0_40, %c0_41] : memref<3x384x128xbf16, #tpu.memory_space<vmem>>, vector<1x384x128xbf16>
    %127 = vector.shape_cast %126 : vector<1x384x128xbf16> to vector<384x128xbf16>
    %c2_42 = arith.constant 2 : index
    %c0_43 = arith.constant 0 : index
    %c0_44 = arith.constant 0 : index
    %128 = vector.load %arg7[%c2_42, %c0_43, %c0_44] : memref<3x1x128xf32, #tpu.memory_space<vmem>>, vector<1x1x128xf32>
    %129 = vector.shape_cast %128 : vector<1x1x128xf32> to vector<1x128xf32>
    %130 = vector.extract_strided_slice %125 {offsets = [511, 0], sizes = [1, 128], strides = [1, 1]} : vector<512x128xbf16> to vector<1x128xbf16>
    %131 = vector.extract_strided_slice %125 {offsets = [0, 0], sizes = [511, 128], strides = [1, 1]} : vector<512x128xbf16> to vector<511x128xbf16>
    %132 = tpu.concatenate %130, %131 in 0 : vector<1x128xbf16>, vector<511x128xbf16> -> vector<512x128xbf16>
    %cst_45 = arith.constant 0.000000e+00 : f32
    %133 = arith.truncf %cst_45 : f32 to bf16
    %134 = vector.shape_cast %28 : vector<512x1xi1> to vector<512x1xi1>
    %135 = vector.broadcast %134 : vector<512x1xi1> to vector<512x128xi1>
    %136 = vector.broadcast %133 : bf16 to vector<512x128xbf16>
    %137 = arith.select %135, %136, %132 : vector<512x128xi1>, vector<512x128xbf16>
    %138 = vector.extract_strided_slice %125 {offsets = [1, 0], sizes = [511, 128], strides = [1, 1]} : vector<512x128xbf16> to vector<511x128xbf16>
    %139 = vector.extract_strided_slice %125 {offsets = [0, 0], sizes = [1, 128], strides = [1, 1]} : vector<512x128xbf16> to vector<1x128xbf16>
    %140 = tpu.concatenate %138, %139 in 0 : vector<511x128xbf16>, vector<1x128xbf16> -> vector<512x128xbf16>
    %cst_46 = arith.constant 0.000000e+00 : f32
    %141 = arith.truncf %cst_46 : f32 to bf16
    %142 = vector.shape_cast %46 : vector<512x1xi1> to vector<512x1xi1>
    %143 = vector.broadcast %142 : vector<512x1xi1> to vector<512x128xi1>
    %144 = vector.broadcast %141 : bf16 to vector<512x128xbf16>
    %145 = arith.select %143, %144, %140 : vector<512x128xi1>, vector<512x128xbf16>
    %146 = tpu.concatenate %137, %125, %145 in 1 : vector<512x128xbf16>, vector<512x128xbf16>, vector<512x128xbf16> -> vector<512x384xbf16>
    %cst_47 = arith.constant dense<0.000000e+00> : vector<512x128xf32>
    %147 = tpu.matmul %146, %127, %cst_47 {dimension_numbers = #tpu.dot_dimension_numbers<[1], [0], [0], [1], [0, 0, 1, 1], [], []>} : vector<512x384xbf16>, vector<384x128xbf16>, vector<512x128xf32> -> vector<512x128xf32>
    %148 = vector.broadcast %129 : vector<1x128xf32> to vector<512x128xf32>
    %149 = arith.addf %147, %148 : vector<512x128xf32>
    %cst_48 = arith.constant 0.000000e+00 : f32
    %150 = vector.broadcast %cst_48 : f32 to vector<512x128xf32>
    %151 = arith.maximumf %149, %150 : vector<512x128xf32>
    %152 = arith.truncf %151 : vector<512x128xf32> to vector<512x128xbf16>
    %c0_49 = arith.constant 0 : index
    %c0_50 = arith.constant 0 : index
    %153 = vector.load %arg8[%c0_49, %c0_50] : memref<128x128xbf16, #tpu.memory_space<vmem>>, vector<128x128xbf16>
    %cst_51 = arith.constant dense<0.000000e+00> : vector<512x128xf32>
    %154 = tpu.matmul %152, %153, %cst_51 {dimension_numbers = #tpu.dot_dimension_numbers<[1], [0], [0], [1], [0, 0, 1, 1], [], []>} : vector<512x128xbf16>, vector<128x128xbf16>, vector<512x128xf32> -> vector<512x128xf32>
    %c0_52 = arith.constant 0 : index
    %c0_53 = arith.constant 0 : index
    %155 = vector.load %arg9[%c0_52, %c0_53] : memref<1x128xf32, #tpu.memory_space<vmem>>, vector<1x128xf32>
    %156 = vector.broadcast %155 : vector<1x128xf32> to vector<512x128xf32>
    %157 = arith.addf %154, %156 : vector<512x128xf32>
    %cst_54 = arith.constant 0.000000e+00 : f32
    %158 = vector.broadcast %cst_54 : f32 to vector<512x128xf32>
    %159 = arith.maximumf %157, %158 : vector<512x128xf32>
    %160 = vector.shape_cast %159 : vector<512x128xf32> to vector<32x16x128xf32>
    %c0_55 = arith.constant 0 : index
    %c0_56 = arith.constant 0 : index
    %161 = vector.load %arg10[%c0_55, %c0_56] : memref<1x128xf32, #tpu.memory_space<vmem>>, vector<1x128xf32>
    %162 = vector.shape_cast %161 : vector<1x128xf32> to vector<1x1x128xf32>
    %163 = vector.broadcast %162 : vector<1x1x128xf32> to vector<32x16x128xf32>
    %164 = arith.mulf %160, %163 : vector<32x16x128xf32>
    %cst_57 = arith.constant dense<0.000000e+00> : vector<32x16xf32>
    %165 = vector.multi_reduction <add>, %164, %cst_57 [2] : vector<32x16x128xf32> to vector<32x16xf32>
    %c0_58 = arith.constant 0 : index
    %c0_59 = arith.constant 0 : index
    %166 = vector.load %arg11[%c0_58, %c0_59] : memref<1x1xf32, #tpu.memory_space<vmem>>, vector<1x1xf32>
    %167 = vector.broadcast %166 : vector<1x1xf32> to vector<32x16xf32>
    %168 = arith.addf %165, %167 : vector<32x16xf32>
    %cst_60 = arith.constant 0.000000e+00 : f32
    %169 = vector.broadcast %cst_60 : f32 to vector<32x16xf32>
    %170 = arith.maximumf %168, %169 : vector<32x16xf32>
    %c0_61 = arith.constant 0 : index
    %c0_62 = arith.constant 0 : index
    %171 = vector.load %arg2[%c0_61, %c0_62] : memref<32x16xf32, #tpu.memory_space<vmem>>, vector<32x16xf32>
    %172 = arith.mulf %170, %171 : vector<32x16xf32>
    %cst_63 = arith.constant dense<0.000000e+00> : vector<32xf32>
    %173 = vector.multi_reduction <add>, %172, %cst_63 [1] : vector<32x16xf32> to vector<32xf32>
    %174 = vector.shape_cast %173 : vector<32xf32> to vector<32x1xf32>
    %c0_64 = arith.constant 0 : index
    %c0_65 = arith.constant 0 : index
    %175 = vector.load %arg12[%c0_64, %c0_65] : memref<1x1xf32, #tpu.memory_space<vmem>>, vector<1x1xf32>
    %176 = vector.broadcast %175 : vector<1x1xf32> to vector<32x1xf32>
    %177 = arith.mulf %174, %176 : vector<32x1xf32>
    %c0_66 = arith.constant 0 : index
    %c0_67 = arith.constant 0 : index
    %178 = vector.load %arg13[%c0_66, %c0_67] : memref<1x1xf32, #tpu.memory_space<vmem>>, vector<1x1xf32>
    %179 = vector.broadcast %178 : vector<1x1xf32> to vector<32x1xf32>
    %180 = arith.addf %177, %179 : vector<32x1xf32>
    %c0_68 = arith.constant 0 : index
    %c0_69 = arith.constant 0 : index
    %181 = vector.load %arg14[%c0_68, %c0_69] : memref<32x1xf32, #tpu.memory_space<vmem>>, vector<32x1xf32>
    tpu.vector_store %arg14[%c0_68, %c0_69], %180 {strides = array<i32>} : memref<32x1xf32, #tpu.memory_space<vmem>>, vector<32x1xf32>,
    return
  }
  func.func @transform_0(%arg0: i32) -> (i32, i32) {
    %c0_i32 = arith.constant 0 : i32
    %c0_i32_0 = arith.constant 0 : i32
    return %arg0, %c0_i32 : i32, i32
  }
  func.func @transform_1(%arg0: i32) -> (i32, i32) {
    %c0_i32 = arith.constant 0 : i32
    %c0_i32_0 = arith.constant 0 : i32
    return %arg0, %c0_i32 : i32, i32
  }
  func.func @transform_2(%arg0: i32) -> (i32, i32) {
    %c0_i32 = arith.constant 0 : i32
    %c0_i32_0 = arith.constant 0 : i32
    %c0_i32_1 = arith.constant 0 : i32
    return %c0_i32, %c0_i32_0 : i32, i32
  }
  func.func @transform_3(%arg0: i32) -> (i32, i32) {
    %c0_i32 = arith.constant 0 : i32
    %c0_i32_0 = arith.constant 0 : i32
    %c0_i32_1 = arith.constant 0 : i32
    return %c0_i32, %c0_i32_0 : i32, i32
  }
  func.func @transform_4(%arg0: i32) -> (i32, i32) {
    %c0_i32 = arith.constant 0 : i32
    %c0_i32_0 = arith.constant 0 : i32
    %c0_i32_1 = arith.constant 0 : i32
    return %c0_i32, %c0_i32_0 : i32, i32
  }
  func.func @transform_5(%arg0: i32) -> (i32, i32, i32) {
    %c0_i32 = arith.constant 0 : i32
    %c0_i32_0 = arith.constant 0 : i32
    %c0_i32_1 = arith.constant 0 : i32
    %c0_i32_2 = arith.constant 0 : i32
    return %c0_i32, %c0_i32_0, %c0_i32_1 : i32, i32, i32
  }
  func.func @transform_6(%arg0: i32) -> (i32, i32, i32) {
    %c0_i32 = arith.constant 0 : i32
    %c0_i32_0 = arith.constant 0 : i32
    %c0_i32_1 = arith.constant 0 : i32
    %c0_i32_2 = arith.constant 0 : i32
    return %c0_i32, %c0_i32_0, %c0_i32_1 : i32, i32, i32
  }
  func.func @transform_7(%arg0: i32) -> (i32, i32) {
    %c0_i32 = arith.constant 0 : i32
    %c0_i32_0 = arith.constant 0 : i32
    %c0_i32_1 = arith.constant 0 : i32
    return %c0_i32, %c0_i32_0 : i32, i32
  }
  func.func @transform_8(%arg0: i32) -> (i32, i32) {
    %c0_i32 = arith.constant 0 : i32
    %c0_i32_0 = arith.constant 0 : i32
    %c0_i32_1 = arith.constant 0 : i32
    return %c0_i32, %c0_i32_0 : i32, i32
  }
  func.func @transform_9(%arg0: i32) -> (i32, i32) {
    %c0_i32 = arith.constant 0 : i32
    %c0_i32_0 = arith.constant 0 : i32
    %c0_i32_1 = arith.constant 0 : i32
    return %c0_i32, %c0_i32_0 : i32, i32
  }
  func.func @transform_10(%arg0: i32) -> (i32, i32) {
    %c0_i32 = arith.constant 0 : i32
    %c0_i32_0 = arith.constant 0 : i32
    %c0_i32_1 = arith.constant 0 : i32
    return %c0_i32, %c0_i32_0 : i32, i32
  }
  func.func @transform_11(%arg0: i32) -> (i32, i32) {
    %c0_i32 = arith.constant 0 : i32
    %c0_i32_0 = arith.constant 0 : i32
    %c0_i32_1 = arith.constant 0 : i32
    return %c0_i32, %c0_i32_0 : i32, i32
  }
  func.func @transform_12(%arg0: i32) -> (i32, i32) {
    %c0_i32 = arith.constant 0 : i32
    %c0_i32_0 = arith.constant 0 : i32
    %c0_i32_1 = arith.constant 0 : i32
    return %c0_i32, %c0_i32_0 : i32, i32
  }
  func.func @transform_13(%arg0: i32) -> (i32, i32) {
    %c0_i32 = arith.constant 0 : i32
    %c0_i32_0 = arith.constant 0 : i32
    return %arg0, %c0_i32 : i32, i32
  }
}

</mosaic_0001>

<bundles_post_ra>
// kernel: tpu_custom_call.1
= control target key start
LH: loop header
LB: loop body
LE: loop exit
PB: predicated region body
PF: predicated region fallthrough
CT: control target
= control target key end

     0   :  { %s12405_s14 = smov 0   ;;  %s17481_s0 = inlined_call_operand.vmem [shape: s32[1024,1], index: 0, kind: input, shape index: {}]   ;;  %s17482_s1 = inlined_call_operand.vmem [shape: f32[64,16], index: 1, kind: input, shape index: {}]   ;;  %s17483_s2 = inlined_call_operand.vmem [shape: bf16[128,128], index: 2, kind: input, shape index: {}]   ;;  %s17484_s3 = inlined_call_operand.vmem [shape: bf16[384,128], index: 3, kind: input, shape index: {}]   ;;  %s17485_s4 = inlined_call_operand.vmem [shape: f32[1,128], index: 4, kind: input, shape index: {}]   ;;  %s17486_s5 = inlined_call_operand.vmem [shape: bf16[3,384,128], index: 5, kind: input, shape index: {}]   ;;  %s17487_s6 = inlined_call_operand.vmem [shape: f32[3,1,128], index: 6, kind: input, shape index: {}]   ;;  %s17488_s7 = inlined_call_operand.vmem [shape: bf16[128,128], index: 7, kind: input, shape index: {}]   ;;  %s17489_s8 = inlined_call_operand.vmem [shape: f32[1,128], index: 8, kind: input, shape index: {}]   ;;  %s17490_s9 = inlined_call_operand.vmem [shape: f32[1,128], index: 9, kind: input, shape index: {}]   ;;  %s17491_s10 = inlined_call_operand.<no memory space> [shape: f32[1,1], index: 10, kind: input, shape index: {}]   ;;  %s17492_s13 = inlined_call_operand.vmem [shape: f32[64,1], index: 13, kind: output, shape index: {}]   ;;  %s17493_s11 = inlined_call_operand.<no memory space> [shape: f32[1,1], index: 11, kind: input, shape index: {}]   ;;  %s17494_s12 = inlined_call_operand.<no memory space> [shape: f32[1,1], index: 12, kind: input, shape index: {}]  }
   0x1   :  { %v18_v0 = vstv %s17491_s10  ;;  %v20_v1 = vstv %s17493_s11  ;;  %v22_v2 = vstv %s17494_s12 }
   0x2   :  { %19 = vst [vmem:[#allocation2] sm:$0x1] %v18_v0  ;;  %21 = vst [vmem:[#allocation3] sm:$0x1] %v20_v1 }
   0x3   :  { %23 = vst [vmem:[#allocation4] sm:$0x1] %v22_v2 }
   0x4 LB: > { %s10443_s10 = sadd.s32 4294967295, %s12321_s14   ;;  %p10447_p0 = scmp.ge.s32.totalorder %s12321_s14, 1  ;;  %s12321_s14 = sphi %s12405_s14, %s29_s14  }
   0x5   : > { %p405_p1 = scmp.lt.s32.totalorder %s12321_s14, 3 }
   0x7   : > { %p406_p2 = pnand %p10447_p0, %p405_p1 }
   0x9   : > { %409 = sbr.rel (%p406_p2) target bundleno = 3189 (0xc75), region = 72 }
  0x10   : > { %s10448_s11 = sshll.u32 %s10443_s10, 6  ;;  %v17511_v3 = vmov 0   ;;  %v12192_v4 = vld [vmem:[%s17483_s2] sm:$0xff]   ;;  %v12193_v5 = vld [vmem:[%s17483_s2 + $0x8] sm:$0xff]   ;;  %v12194_v6 = vld [vmem:[%s17483_s2 + $0x10] sm:$0xff]   ;;  %s10450_s20 = sshll.u32 %s10443_s10, 2 }
  0x11   : > { %12191 = vset.pattern.permute.xlu1 %v17511_v3  ;;  %12190 = vset.pattern.permute.xlu0 %v17511_v3  ;;  %p455_p3 = scmp.lt.s32.totalorder %s10448_s11, 127  ;;  %v12195_v11 = vld [vmem:[%s17483_s2 + $0x18] sm:$0xff]   ;;  %v12196_v14 = vld [vmem:[%s17483_s2 + $0x20] sm:$0xff]   ;;  %v12197_v17 = vld [vmem:[%s17483_s2 + $0x28] sm:$0xff]   ;;  %p461_p4 = scmp.lt.s32.totalorder %s10450_s20, 7 }
  0x12   : > { %3758 = vmatprep.subr.bf16.mxu1 %v17511_v3  ;;  %11683 = vmatprep.subr.bf16.mxu0 %v12192_v4  ;;  %v12198_v24 = vld [vmem:[%s17483_s2 + $0x30] sm:$0xff]   ;;  %v12199_v25 = vld [vmem:[%s17483_s2 + $0x38] sm:$0xff]  }
  0x13   : > { %s19000_s11 = smov (!%p455_p3, %s10448_s11), 127  ;;  %11684 = vmatpush3.bf16.msra.mxu0 %v12192_v4  ;;  %s19002_s20 = smov (!%p461_p4, %s10450_s20), 7 }
  0x14   : > { %s10449_s18 = sshll.u32 %s19000_s11, 3  ;;  %11685 = vmatprep.subr.bf16.mxu0 %v12193_v5  ;;  %s10451_s10 = sshll.u32 %s19002_s20, 3 }
  0x15   : > { %s12427_s21 = scalar_lea.vmem %s17481_s0, %s10449_s18  ;;  %s16770_s23 = scalar_lea.vmem %s17482_s1, %s10451_s10 }
  0x16   : > { %v477_v7 = vld [vmem:[%s12427_s21 + $0x10] sm:$0xff]  ;;  %v475_v8 = vld [vmem:[%s12427_s21] sm:$0xff]  ;;  %v478_v9 = vld [vmem:[%s12427_s21 + $0x18] sm:$0xff]  ;;  %s470_s30 = scalar_lea.vmem %s17492_s13, %s10451_s10 }
  0x17   : > { %548 = vperm.xlu1 %12191, %v477_v7   ;;  %542 = vperm.xlu0 %12190, %v475_v8   ;;  %v476_v10 = vld [vmem:[%s12427_s21 + $0x8] sm:$0xff]  ;;  %v479_v13 = vld [vmem:[%s12427_s21 + $0x20] sm:$0xff]  ;;  %v482_v15 = vld [vmem:[%s12427_s21 + $0x38] sm:$0xff] }
  0x18   : > { %11686 = vmatpush3.bf16.msra.mxu0 %v12193_v5  ;;  %v480_v12 = vld [vmem:[%s12427_s21 + $0x28] sm:$0xff]  ;;  %v481_v16 = vld [vmem:[%s12427_s21 + $0x30] sm:$0xff]  ;;  %v483_v19 = vld [vmem:[%s12427_s21 + $0x40] sm:$0xff] }
  0x19   : > { %11687 = vmatprep.subr.bf16.mxu0 %v12194_v6  ;;  %v484_v18 = vld [vmem:[%s12427_s21 + $0x48] sm:$0xff]  ;;  %v486_v20 = vld [vmem:[%s12427_s21 + $0x58] sm:$0xff]  ;;  %v485_v21 = vld [vmem:[%s12427_s21 + $0x50] sm:$0xff] }
  0x1a   : > { %v488_v22 = vld [vmem:[%s12427_s21 + $0x68] sm:$0xff]  ;;  %v487_v23 = vld [vmem:[%s12427_s21 + $0x60] sm:$0xff]  ;;  %v490_v26 = vld [vmem:[%s12427_s21 + $0x78] sm:$0xff] }
  0x1b   : > { %551 = vperm.xlu1 %12191, %v478_v9   ;;  %545 = vperm.xlu0 %12190, %v476_v10   ;;  %v489_v27 = vld [vmem:[%s12427_s21 + $0x70] sm:$0xff]  ;;  %v492_v28 = vld [vmem:[%s12427_s21 + $0x88] sm:$0xff]  ;;  %v491_v29 = vld [vmem:[%s12427_s21 + $0x80] sm:$0xff] }
  0x1c   : > { %11688 = vmatpush3.bf16.msra.mxu0 %v12194_v6  ;;  %v494_v30 = vld [vmem:[%s12427_s21 + $0x98] sm:$0xff]  ;;  %v493_v31 = vld [vmem:[%s12427_s21 + $0x90] sm:$0xff]  ;;  %v496_v32 = vld [vmem:[%s12427_s21 + $0xa8] sm:$0xff] }
  0x1d   : > { %11689 = vmatprep.subr.bf16.mxu0 %v12195_v11  ;;  %v495_v33 = vld [vmem:[%s12427_s21 + $0xa0] sm:$0xff]  ;;  %v498_v34 = vld [vmem:[%s12427_s21 + $0xb8] sm:$0xff]  ;;  %v497_v35 = vld [vmem:[%s12427_s21 + $0xb0] sm:$0xff] }
  0x1e   : > { %v500_v36 = vld [vmem:[%s12427_s21 + $0xc8] sm:$0xff]  ;;  %v499_v37 = vld [vmem:[%s12427_s21 + $0xc0] sm:$0xff]  ;;  %v502_v38 = vld [vmem:[%s12427_s21 + $0xd8] sm:$0xff] }
  0x1f   : > { %557 = vperm.xlu1 %12191, %v480_v12   ;;  %554 = vperm.xlu0 %12190, %v479_v13   ;;  %v501_v39 = vld [vmem:[%s12427_s21 + $0xd0] sm:$0xff]  ;;  %v504_v40 = vld [vmem:[%s12427_s21 + $0xe8] sm:$0xff]  ;;  %v503_v41 = vld [vmem:[%s12427_s21 + $0xe0] sm:$0xff]  ;;  %v539_v13 = vlaneseq }
  0x20   : > { %11690 = vmatpush3.bf16.msra.mxu0 %v12195_v11  ;;  %v506_v42 = vld [vmem:[%s12427_s21 + $0xf8] sm:$0xff]  ;;  %v505_v43 = vld [vmem:[%s12427_s21 + $0xf0] sm:$0xff]  ;;  %v508_v44 = vld [vmem:[%s12427_s21 + $0x108] sm:$0xff] }
  0x21   : > { %11691 = vmatprep.subr.bf16.mxu0 %v12196_v14  ;;  %v507_v45 = vld [vmem:[%s12427_s21 + $0x100] sm:$0xff]  ;;  %v510_v46 = vld [vmem:[%s12427_s21 + $0x118] sm:$0xff]  ;;  %v509_v47 = vld [vmem:[%s12427_s21 + $0x110] sm:$0xff] }
  0x22   : > { %v512_v48 = vld [vmem:[%s12427_s21 + $0x128] sm:$0xff]  ;;  %v511_v49 = vld [vmem:[%s12427_s21 + $0x120] sm:$0xff]  ;;  %v514_v50 = vld [vmem:[%s12427_s21 + $0x138] sm:$0xff] }
  0x23   : > { %563 = vperm.xlu1 %12191, %v482_v15   ;;  %560 = vperm.xlu0 %12190, %v481_v16   ;;  %v513_v51 = vld [vmem:[%s12427_s21 + $0x130] sm:$0xff]  ;;  %v516_v52 = vld [vmem:[%s12427_s21 + $0x148] sm:$0xff]  ;;  %v515_v53 = vld [vmem:[%s12427_s21 + $0x140] sm:$0xff] }
  0x24   : > { %11692 = vmatpush3.bf16.msra.mxu0 %v12196_v14  ;;  %v518_v54 = vld [vmem:[%s12427_s21 + $0x158] sm:$0xff]  ;;  %v517_v55 = vld [vmem:[%s12427_s21 + $0x150] sm:$0xff]  ;;  %v520_v56 = vld [vmem:[%s12427_s21 + $0x168] sm:$0xff] }
  0x25   : > { %11693 = vmatprep.subr.bf16.mxu0 %v12197_v17  ;;  %v519_v57 = vld [vmem:[%s12427_s21 + $0x160] sm:$0xff]  ;;  %v522_v58 = vld [vmem:[%s12427_s21 + $0x178] sm:$0xff]  ;;  %v521_v59 = vld [vmem:[%s12427_s21 + $0x170] sm:$0xff] }
  0x26   : > { %v524_v60 = vld [vmem:[%s12427_s21 + $0x188] sm:$0xff]  ;;  %v523_v61 = vld [vmem:[%s12427_s21 + $0x180] sm:$0xff]  ;;  %v526_v62 = vld [vmem:[%s12427_s21 + $0x198] sm:$0xff] }
  0x27   : > { %569 = vperm.xlu1 %12191, %v484_v18   ;;  %566 = vperm.xlu0 %12190, %v483_v19   ;;  %v525_v63 = vld [vmem:[%s12427_s21 + $0x190] sm:$0xff]  ;;  %v528_v0 = vld [vmem:[%s12427_s21 + $0x1a8] sm:$0xff]  ;;  %v527_v1 = vld [vmem:[%s12427_s21 + $0x1a0] sm:$0xff] }
  0x28   : > { %11694 = vmatpush3.bf16.msra.mxu0 %v12197_v17  ;;  %v530_v2 = vld [vmem:[%s12427_s21 + $0x1b8] sm:$0xff]  ;;  %v529_v4 = vld [vmem:[%s12427_s21 + $0x1b0] sm:$0xff]  ;;  %v532_v5 = vld [vmem:[%s12427_s21 + $0x1c8] sm:$0xff]  ;;  %v12512_v17 = vand.u32 127, %v539_v13 }
  0x29   : > { %11695 = vmatprep.subr.bf16.mxu0 %v12198_v24  ;;  %v531_v6 = vld [vmem:[%s12427_s21 + $0x1c0] sm:$0xff]  ;;  %v534_v7 = vld [vmem:[%s12427_s21 + $0x1d8] sm:$0xff]  ;;  %v533_v8 = vld [vmem:[%s12427_s21 + $0x1d0] sm:$0xff] }
  0x2a   : > { %v536_v9 = vld [vmem:[%s12427_s21 + $0x1e8] sm:$0xff]  ;;  %v535_v10 = vld [vmem:[%s12427_s21 + $0x1e0] sm:$0xff]  ;;  %v538_v11 = vld [vmem:[%s12427_s21 + $0x1f8] sm:$0xff]  ;;  %17810 = vst [vmem:[#allocation5_spill] sm:$0xff] %v12512_v17 }
  0x2b   : > { %575 = vperm.xlu1 %12191, %v486_v20   ;;  %572 = vperm.xlu0 %12190, %v485_v21   ;;  %v537_v12 = vld [vmem:[%s12427_s21 + $0x1f0] sm:$0xff]  ;;  %v11374_v14 = vld [vmem:[#allocation2] ss:$0 sm:$0xff]  ;;  %v12201_v21 = vld [vmem:[%s17484_s3 + $0x88] sm:$0xff]  }
  0x2c   : > { %11696 = vmatpush3.bf16.msra.mxu0 %v12198_v24  ;;  %v12200_v18 = vld [vmem:[%s17484_s3 + $0x80] sm:$0xff]  }
  0x2d   : > { %11697 = vmatprep.subr.bf16.mxu0 %v12199_v25 }
  0x2f   : > { %581 = vperm.xlu1 %12191, %v488_v22   ;;  %578 = vperm.xlu0 %12190, %v487_v23   ;;  %v12324_v22 = vmov 1.0|1.0  }
  0x30   : > { %11698 = vmatpush3.bf16.msra.mxu0 %v12199_v25  ;;  %v12202_v25 = vld [vmem:[%s17484_s3 + $0x90] sm:$0xff]  }
  0x31   : > { %11763 = vmatprep.subr.bf16.mxu0 %v12200_v18 }
  0x33   : > { %587 = vperm.xlu1 %12191, %v490_v26   ;;  %584 = vperm.xlu0 %12190, %v489_v27  }
  0x37   : > { %593 = vperm.xlu1 %12191, %v492_v28   ;;  %590 = vperm.xlu0 %12190, %v491_v29   ;;  %v12203_v28 = vld [vmem:[%s17484_s3 + $0x98] sm:$0xff]  }
  0x3b   : > { %599 = vperm.xlu1 %12191, %v494_v30   ;;  %596 = vperm.xlu0 %12190, %v493_v31  }
  0x3f   : > { %605 = vperm.xlu1 %12191, %v496_v32   ;;  %602 = vperm.xlu0 %12190, %v495_v33  }
  0x43   : > { %611 = vperm.xlu1 %12191, %v498_v34   ;;  %608 = vperm.xlu0 %12190, %v497_v35  }
  0x47   : > { %617 = vperm.xlu1 %12191, %v500_v36   ;;  %614 = vperm.xlu0 %12190, %v499_v37  }
  0x4b   : > { %623 = vperm.xlu1 %12191, %v502_v38   ;;  %620 = vperm.xlu0 %12190, %v501_v39  }
  0x4f   : > { %629 = vperm.xlu1 %12191, %v504_v40   ;;  %626 = vperm.xlu0 %12190, %v503_v41  }
  0x53   : > { %635 = vperm.xlu1 %12191, %v506_v42   ;;  %632 = vperm.xlu0 %12190, %v505_v43  }
  0x57   : > { %641 = vperm.xlu1 %12191, %v508_v44   ;;  %638 = vperm.xlu0 %12190, %v507_v45  }
  0x5b   : > { %647 = vperm.xlu1 %12191, %v510_v46   ;;  %644 = vperm.xlu0 %12190, %v509_v47  }
  0x5f   : > { %653 = vperm.xlu1 %12191, %v512_v48   ;;  %650 = vperm.xlu0 %12190, %v511_v49  }
  0x63   : > { %659 = vperm.xlu1 %12191, %v514_v50   ;;  %656 = vperm.xlu0 %12190, %v513_v51  }
  0x67   : > { %665 = vperm.xlu1 %12191, %v516_v52   ;;  %662 = vperm.xlu0 %12190, %v515_v53  }
  0x6b   : > { %671 = vperm.xlu1 %12191, %v518_v54   ;;  %668 = vperm.xlu0 %12190, %v517_v55  }
  0x6f   : > { %677 = vperm.xlu1 %12191, %v520_v56   ;;  %674 = vperm.xlu0 %12190, %v519_v57  }
  0x73   : > { %683 = vperm.xlu1 %12191, %v522_v58   ;;  %680 = vperm.xlu0 %12190, %v521_v59  }
  0x77   : > { %689 = vperm.xlu1 %12191, %v524_v60   ;;  %686 = vperm.xlu0 %12190, %v523_v61  }
  0x7b   : > { %695 = vperm.xlu1 %12191, %v526_v62   ;;  %692 = vperm.xlu0 %12190, %v525_v63  }
  0x7f   : > { %701 = vperm.xlu1 %12191, %v528_v0   ;;  %698 = vperm.xlu0 %12190, %v527_v1  }
  0x83   : > { %707 = vperm.xlu1 %12191, %v530_v2   ;;  %704 = vperm.xlu0 %12190, %v529_v4  }
  0x87   : > { %713 = vperm.xlu1 %12191, %v532_v5   ;;  %710 = vperm.xlu0 %12190, %v531_v6   ;;  %v12204_v6 = vld [vmem:[%s17484_s3 + $0xa0] sm:$0xff]  }
  0x8b   : > { %719 = vperm.xlu1 %12191, %v534_v7   ;;  %716 = vperm.xlu0 %12190, %v533_v8  }
  0x8f   : > { %725 = vperm.xlu1 %12191, %v536_v9   ;;  %722 = vperm.xlu0 %12190, %v535_v10   ;;  %v12205_v9 = vld [vmem:[%s17484_s3 + $0xa8] sm:$0xff]  }
  0x93   : > { %731 = vperm.xlu1 %12191, %v538_v11   ;;  %728 = vperm.xlu0 %12190, %v537_v12   ;;  %v12206_v12 = vld [vmem:[%s17484_s3 + $0xb0] sm:$0xff]  }
  0x96   : > { %v549_v15 = vpop.permute.xlu1 %548  ;;  %v543_v16 = vpop.permute.xlu0 %542 }
  0x97   : > { %9131 = vperm.xlu1 %12191, %v11374_v14   ;;  %vm735_vm0 = vcmp.eq.s32.totalorder %v12512_v17, %v549_v15  ;;  %vm733_vm4 = vcmp.eq.s32.totalorder %v12512_v17, %v543_v16  ;;  %v12207_v16 = vld [vmem:[%s17484_s3 + $0xb8] sm:$0xff]  }
  0x9a   : > { %v552_v19 = vpop.permute.xlu1 %551  ;;  %v546_v20 = vpop.permute.xlu0 %545 }
  0x9b   : > { %vm736_vm1 = vcmp.eq.s32.totalorder %v12512_v17, %v552_v19  ;;  %vm734_vm2 = vcmp.eq.s32.totalorder %v12512_v17, %v546_v20 }
  0x9c   : > { %vm10528_vm3 = vmpackc.low %vm736_vm1, %vm735_vm0 }
  0x9d   : > { %vm10526_vm5 = vmpackc.low %vm734_vm2, %vm733_vm4 }
  0x9e   : > { %11699 = vmatprep.mubr.msk.bf16.mxu0 %vm10526_vm5, %v12324_v22  ;;  %v558_v23 = vpop.permute.xlu1 %557  ;;  %v555_v24 = vpop.permute.xlu0 %554 }
  0x9f   : > { %vm738_vm6 = vcmp.eq.s32.totalorder %v12512_v17, %v558_v23  ;;  %11700 = vmatmul.mubr.msk.bf16.vlgmr.msra.gmra.mrb[0].mxu0 %vm10528_vm3, %v12324_v22  ;;  %vm737_vm7 = vcmp.eq.s32.totalorder %v12512_v17, %v555_v24 }
  0xa0   : > { %vm10530_vm8 = vmpackc.low %vm738_vm6, %vm737_vm7  ;;  %11764 = vmatpush3.bf16.msra.mxu0 %v12200_v18 }
  0xa1   : > { %11703 = vmatprep.mubr.msk.bf16.mxu0 %vm10530_vm8, %v12324_v22  ;;  %11765 = vmatprep.subr.bf16.mxu0 %v12201_v21 }
  0xa2   : > { %v564_v26 = vpop.permute.xlu1 %563  ;;  %v561_v27 = vpop.permute.xlu0 %560 }
  0xa3   : > { %vm740_vm9 = vcmp.eq.s32.totalorder %v12512_v17, %v564_v26  ;;  %vm739_vm10 = vcmp.eq.s32.totalorder %v12512_v17, %v561_v27 }
  0xa4   : > { %vm10532_vm11 = vmpackc.low %vm740_vm9, %vm739_vm10  ;;  %11766 = vmatpush3.bf16.msra.mxu0 %v12201_v21 }
  0xa5   : > { %11767 = vmatprep.subr.bf16.mxu0 %v12202_v25 }
  0xa6   : > { %v570_v29 = vpop.permute.xlu1 %569  ;;  %v567_v30 = vpop.permute.xlu0 %566 }
  0xa7   : > { %vm742_vm12 = vcmp.eq.s32.totalorder %v12512_v17, %v570_v29  ;;  %11704 = vmatmul.mubr.msk.bf16.gmra.mrb[4].mxu0 %vm10532_vm11, %v12324_v22  ;;  %vm741_vm13 = vcmp.eq.s32.totalorder %v12512_v17, %v567_v30  ;;  %v12208_v29 = vld [vmem:[%s17484_s3] sm:$0xff]   ;;  %v12209_v30 = vld [vmem:[%s17484_s3 + $0x8] sm:$0xff]  }
  0xa8   : > { %vm10534_vm14 = vmpackc.low %vm742_vm12, %vm741_vm13  ;;  %11768 = vmatpush3.bf16.msra.mxu0 %v12202_v25  ;;  %3759 = vmatpush1.bf16.msra.mxu1 %v12208_v29 }
  0xa9   : > { %11707 = vmatprep.mubr.msk.bf16.mxu0 %vm10534_vm14, %v12324_v22  ;;  %11769 = vmatprep.subr.bf16.mxu0 %v12203_v28 }
  0xaa   : > { %v576_v31 = vpop.permute.xlu1 %575  ;;  %v573_v32 = vpop.permute.xlu0 %572  ;;  %3760 = vmatprep.subr.bf16.mxu1 %v17511_v3 }
  0xab   : > { %vm744_vm15 = vcmp.eq.s32.totalorder %v12512_v17, %v576_v31  ;;  %vm743_vm0 = vcmp.eq.s32.totalorder %v12512_v17, %v573_v32  ;;  %v12210_v31 = vld [vmem:[%s17484_s3 + $0x10] sm:$0xff]   ;;  %v12212_v32 = vld [vmem:[%s17484_s3 + $0x20] sm:$0xff]  }
  0xac   : > { %vm10536_vm1 = vmpackc.low %vm744_vm15, %vm743_vm0  ;;  %11770 = vmatpush3.bf16.msra.mxu0 %v12203_v28  ;;  %3761 = vmatpush1.bf16.msra.mxu1 %v12209_v30 }
  0xad   : > { %11771 = vmatprep.subr.bf16.mxu0 %v12204_v6  ;;  %3762 = vmatprep.subr.bf16.mxu1 %v17511_v3 }
  0xae   : > { %v582_v33 = vpop.permute.xlu1 %581  ;;  %v579_v34 = vpop.permute.xlu0 %578 }
  0xaf   : > { %vm746_vm2 = vcmp.eq.s32.totalorder %v12512_v17, %v582_v33  ;;  %11708 = vmatmul.mubr.msk.bf16.gmra.mrb[8].mxu0 %vm10536_vm1, %v12324_v22  ;;  %vm745_vm3 = vcmp.eq.s32.totalorder %v12512_v17, %v579_v34  ;;  %v12213_v33 = vld [vmem:[%s17484_s3 + $0x28] sm:$0xff]   ;;  %v12214_v34 = vld [vmem:[%s17484_s3 + $0x30] sm:$0xff]  }
  0xb0   : > { %vm10538_vm4 = vmpackc.low %vm746_vm2, %vm745_vm3  ;;  %11772 = vmatpush3.bf16.msra.mxu0 %v12204_v6  ;;  %3763 = vmatpush1.bf16.msra.mxu1 %v12210_v31 }
  0xb1   : > { %11711 = vmatprep.mubr.msk.bf16.mxu0 %vm10538_vm4, %v12324_v22  ;;  %11773 = vmatprep.subr.bf16.mxu0 %v12205_v9 }
  0xb2   : > { %v588_v35 = vpop.permute.xlu1 %587  ;;  %v585_v36 = vpop.permute.xlu0 %584  ;;  %3764 = vmatprep.subr.bf16.mxu1 %v17511_v3 }
  0xb3   : > { %vm748_vm5 = vcmp.eq.s32.totalorder %v12512_v17, %v588_v35  ;;  %vm747_vm6 = vcmp.eq.s32.totalorder %v12512_v17, %v585_v36  ;;  %v12215_v35 = vld [vmem:[%s17484_s3 + $0x38] sm:$0xff]   ;;  %v12216_v36 = vld [vmem:[%s17484_s3 + $0x40] sm:$0xff]  }
  0xb4   : > { %vm10540_vm7 = vmpackc.low %vm748_vm5, %vm747_vm6  ;;  %11774 = vmatpush3.bf16.msra.mxu0 %v12205_v9 }
  0xb5   : > { %11775 = vmatprep.subr.bf16.mxu0 %v12206_v12 }
  0xb6   : > { %v594_v37 = vpop.permute.xlu1 %593  ;;  %v591_v38 = vpop.permute.xlu0 %590 }
  0xb7   : > { %vm750_vm8 = vcmp.eq.s32.totalorder %v12512_v17, %v594_v37  ;;  %11712 = vmatmul.mubr.msk.bf16.gmra.mrb[12].mxu0 %vm10540_vm7, %v12324_v22  ;;  %vm749_vm9 = vcmp.eq.s32.totalorder %v12512_v17, %v591_v38  ;;  %v12217_v37 = vld [vmem:[%s17484_s3 + $0x48] sm:$0xff]   ;;  %v12218_v38 = vld [vmem:[%s17484_s3 + $0x50] sm:$0xff]  }
  0xb8   : > { %vm10542_vm10 = vmpackc.low %vm750_vm8, %vm749_vm9  ;;  %11776 = vmatpush3.bf16.msra.mxu0 %v12206_v12 }
  0xb9   : > { %11715 = vmatprep.mubr.msk.bf16.mxu0 %vm10542_vm10, %v12324_v22  ;;  %11777 = vmatprep.subr.bf16.mxu0 %v12207_v16 }
  0xba   : > { %v600_v39 = vpop.permute.xlu1 %599  ;;  %v597_v40 = vpop.permute.xlu0 %596 }
  0xbb   : > { %vm752_vm11 = vcmp.eq.s32.totalorder %v12512_v17, %v600_v39  ;;  %vm751_vm12 = vcmp.eq.s32.totalorder %v12512_v17, %v597_v40  ;;  %v12219_v39 = vld [vmem:[%s17484_s3 + $0x58] sm:$0xff]   ;;  %v12683_v40 = vshrl.u32 %v539_v13, 7 }
  0xbc   : > { %vm10544_vm13 = vmpackc.low %vm752_vm11, %vm751_vm12  ;;  %11778 = vmatpush3.bf16.msra.mxu0 %v12207_v16 }
  0xbd   : > { %5113 = vmatprep.subr.bf16.mxu0 %v17511_v3  ;;  %17811 = vst [vmem:[#allocation6_spill] sm:$0xff] %v12683_v40  ;;  %v1346_v13 = vadd.s32 24, %v12683_v40  ;;  %v1354_v9 = vadd.s32 88, %v12683_v40  ;;  %v1356_v30 = vadd.s32 104, %v12683_v40 }
  0xbe   : > { %v606_v41 = vpop.permute.xlu1 %605  ;;  %v603_v42 = vpop.permute.xlu0 %602 }
  0xbf   : > { %vm754_vm14 = vcmp.eq.s32.totalorder %v12512_v17, %v606_v41  ;;  %11716 = vmatmul.mubr.msk.bf16.gmra.mrb[16].mxu0 %vm10544_vm13, %v12324_v22  ;;  %vm753_vm15 = vcmp.eq.s32.totalorder %v12512_v17, %v603_v42  ;;  %v12220_v41 = vld [vmem:[%s17484_s3 + $0x60] sm:$0xff]   ;;  %v1344_v42 = vadd.s32 8, %v12683_v40  ;;  %v1488_v29 = vand.u32 15, %v1354_v9 }
  0xc0   : > { %vm10546_vm0 = vmpackc.low %vm754_vm14, %vm753_vm15 }
  0xc1   : > { %11719 = vmatprep.mubr.msk.bf16.mxu0 %vm10546_vm0, %v12324_v22 }
  0xc2   : > { %v612_v43 = vpop.permute.xlu1 %611  ;;  %v609_v44 = vpop.permute.xlu0 %608 }
  0xc3   : > { %vm756_vm1 = vcmp.eq.s32.totalorder %v12512_v17, %v612_v43  ;;  %vm755_vm2 = vcmp.eq.s32.totalorder %v12512_v17, %v609_v44  ;;  %v12221_v43 = vld [vmem:[%s17484_s3 + $0x68] sm:$0xff]   ;;  %v1418_v44 = vand.u32 15, %v1344_v42 }
  0xc4   : > { %vm10548_vm3 = vmpackc.low %vm756_vm1, %vm755_vm2 }
  0xc6   : > { %v618_v45 = vpop.permute.xlu1 %617  ;;  %v615_v46 = vpop.permute.xlu0 %614 }
  0xc7   : > { %vm758_vm4 = vcmp.eq.s32.totalorder %v12512_v17, %v618_v45  ;;  %11720 = vmatmul.mubr.msk.bf16.gmra.mrb[20].mxu0 %vm10548_vm3, %v12324_v22  ;;  %vm757_vm5 = vcmp.eq.s32.totalorder %v12512_v17, %v615_v46  ;;  %v12222_v45 = vld [vmem:[%s17484_s3 + $0x70] sm:$0xff]   ;;  %v1348_v46 = vadd.s32 40, %v12683_v40 }
  0xc8   : > { %vm10550_vm6 = vmpackc.low %vm758_vm4, %vm757_vm5 }
  0xc9   : > { %11723 = vmatprep.mubr.msk.bf16.mxu0 %vm10550_vm6, %v12324_v22 }
  0xca   : > { %v624_v47 = vpop.permute.xlu1 %623  ;;  %v621_v48 = vpop.permute.xlu0 %620 }
  0xcb   : > { %vm760_vm7 = vcmp.eq.s32.totalorder %v12512_v17, %v624_v47  ;;  %vm759_vm8 = vcmp.eq.s32.totalorder %v12512_v17, %v621_v48  ;;  %v1432_v48 = vand.u32 15, %v1346_v13  ;;  %v17830_v47 = vmov 0 }
  0xcc   : > { %vm10552_vm9 = vmpackc.low %vm760_vm7, %vm759_vm8 }
  0xce   : > { %v630_v49 = vpop.permute.xlu1 %629  ;;  %v627_v50 = vpop.permute.xlu0 %626 }
  0xcf   : > { %vm762_vm10 = vcmp.eq.s32.totalorder %v12512_v17, %v630_v49  ;;  %11724 = vmatmul.mubr.msk.bf16.gmra.mrb[24].mxu0 %vm10552_vm9, %v12324_v22  ;;  %vm761_vm11 = vcmp.eq.s32.totalorder %v12512_v17, %v627_v50  ;;  %v12223_v49 = vld [vmem:[%s17484_s3 + $0x78] sm:$0xff]   ;;  %v1446_v50 = vand.u32 15, %v1348_v46 }
  0xd0   : > { %vm10554_vm12 = vmpackc.low %vm762_vm10, %vm761_vm11 }
  0xd1   : > { %11727 = vmatprep.mubr.msk.bf16.mxu0 %vm10554_vm12, %v12324_v22 }
  0xd2   : > { %v636_v51 = vpop.permute.xlu1 %635  ;;  %v633_v52 = vpop.permute.xlu0 %632 }
  0xd3   : > { %vm764_vm13 = vcmp.eq.s32.totalorder %v12512_v17, %v636_v51  ;;  %vm763_vm14 = vcmp.eq.s32.totalorder %v12512_v17, %v633_v52  ;;  %v1350_v51 = vadd.s32 56, %v12683_v40 }
  0xd4   : > { %vm10556_vm15 = vmpackc.low %vm764_vm13, %vm763_vm14 }
  0xd6   : > { %v642_v53 = vpop.permute.xlu1 %641  ;;  %v639_v54 = vpop.permute.xlu0 %638 }
  0xd7   : > { %vm766_vm0 = vcmp.eq.s32.totalorder %v12512_v17, %v642_v53  ;;  %11728 = vmatmul.mubr.msk.bf16.gmra.mrb[28].mxu0 %vm10556_vm15, %v12324_v22  ;;  %vm765_vm1 = vcmp.eq.s32.totalorder %v12512_v17, %v639_v54  ;;  %v1352_v53 = vadd.s32 72, %v12683_v40 }
  0xd8   : > { %vm10558_vm2 = vmpackc.low %vm766_vm0, %vm765_vm1 }
  0xd9   : > { %11731 = vmatprep.mubr.msk.bf16.mxu0 %vm10558_vm2, %v12324_v22 }
  0xda   : > { %v648_v55 = vpop.permute.xlu1 %647  ;;  %v645_v56 = vpop.permute.xlu0 %644 }
  0xdb   : > { %vm768_vm3 = vcmp.eq.s32.totalorder %v12512_v17, %v648_v55  ;;  %vm767_vm4 = vcmp.eq.s32.totalorder %v12512_v17, %v645_v56 }
  0xdc   : > { %vm10560_vm5 = vmpackc.low %vm768_vm3, %vm767_vm4 }
  0xde   : > { %v654_v57 = vpop.permute.xlu1 %653  ;;  %v651_v58 = vpop.permute.xlu0 %650 }
  0xdf   : > { %vm770_vm6 = vcmp.eq.s32.totalorder %v12512_v17, %v654_v57  ;;  %11732 = vmatmul.mubr.msk.bf16.gmra.mrb[32].mxu0 %vm10560_vm5, %v12324_v22  ;;  %vm769_vm7 = vcmp.eq.s32.totalorder %v12512_v17, %v651_v58 }
  0xe0   : > { %vm10562_vm8 = vmpackc.low %vm770_vm6, %vm769_vm7 }
  0xe1   : > { %11735 = vmatprep.mubr.msk.bf16.mxu0 %vm10562_vm8, %v12324_v22 }
  0xe2   : > { %v660_v59 = vpop.permute.xlu1 %659  ;;  %v657_v60 = vpop.permute.xlu0 %656 }
  0xe3   : > { %vm772_vm9 = vcmp.eq.s32.totalorder %v12512_v17, %v660_v59  ;;  %vm771_vm10 = vcmp.eq.s32.totalorder %v12512_v17, %v657_v60 }
  0xe4   : > { %vm10564_vm11 = vmpackc.low %vm772_vm9, %vm771_vm10 }
  0xe6   : > { %v666_v61 = vpop.permute.xlu1 %665  ;;  %v663_v62 = vpop.permute.xlu0 %662 }
  0xe7   : > { %vm774_vm12 = vcmp.eq.s32.totalorder %v12512_v17, %v666_v61  ;;  %11736 = vmatmul.mubr.msk.bf16.gmra.mrb[36].mxu0 %vm10564_vm11, %v12324_v22  ;;  %vm773_vm13 = vcmp.eq.s32.totalorder %v12512_v17, %v663_v62  ;;  %v1460_v62 = vand.u32 15, %v1350_v51 }
  0xe8   : > { %vm10566_vm14 = vmpackc.low %vm774_vm12, %vm773_vm13 }
  0xe9   : > { %11739 = vmatprep.mubr.msk.bf16.mxu0 %vm10566_vm14, %v12324_v22 }
  0xea   : > { %v672_v63 = vpop.permute.xlu1 %671  ;;  %v669_v0 = vpop.permute.xlu0 %668 }
  0xeb   : > { %vm776_vm15 = vcmp.eq.s32.totalorder %v12512_v17, %v672_v63  ;;  %vm775_vm0 = vcmp.eq.s32.totalorder %v12512_v17, %v669_v0  ;;  %v1474_v0 = vand.u32 15, %v1352_v53 }
  0xec   : > { %vm10568_vm1 = vmpackc.low %vm776_vm15, %vm775_vm0 }
  0xee   : > { %v678_v1 = vpop.permute.xlu1 %677  ;;  %v675_v2 = vpop.permute.xlu0 %674 }
  0xef   : > { %vm778_vm2 = vcmp.eq.s32.totalorder %v12512_v17, %v678_v1  ;;  %11740 = vmatmul.mubr.msk.bf16.gmra.mrb[40].mxu0 %vm10568_vm1, %v12324_v22  ;;  %vm777_vm3 = vcmp.eq.s32.totalorder %v12512_v17, %v675_v2 }
  0xf0   : > { %vm10570_vm4 = vmpackc.low %vm778_vm2, %vm777_vm3 }
  0xf1   : > { %11743 = vmatprep.mubr.msk.bf16.mxu0 %vm10570_vm4, %v12324_v22 }
  0xf2   : > { %v684_v4 = vpop.permute.xlu1 %683  ;;  %v681_v5 = vpop.permute.xlu0 %680 }
  0xf3   : > { %vm780_vm5 = vcmp.eq.s32.totalorder %v12512_v17, %v684_v4  ;;  %vm779_vm6 = vcmp.eq.s32.totalorder %v12512_v17, %v681_v5 }
  0xf4   : > { %vm10572_vm7 = vmpackc.low %vm780_vm5, %vm779_vm6 }
  0xf6   : > { %v690_v7 = vpop.permute.xlu1 %689  ;;  %v687_v8 = vpop.permute.xlu0 %686 }
  0xf7   : > { %vm782_vm8 = vcmp.eq.s32.totalorder %v12512_v17, %v690_v7  ;;  %11744 = vmatmul.mubr.msk.bf16.gmra.mrb[44].mxu0 %vm10572_vm7, %v12324_v22  ;;  %vm781_vm9 = vcmp.eq.s32.totalorder %v12512_v17, %v687_v8 }
  0xf8   : > { %vm10574_vm10 = vmpackc.low %vm782_vm8, %vm781_vm9 }
  0xf9   : > { %11747 = vmatprep.mubr.msk.bf16.mxu0 %vm10574_vm10, %v12324_v22 }
  0xfa   : > { %v696_v10 = vpop.permute.xlu1 %695  ;;  %v693_v11 = vpop.permute.xlu0 %692 }
  0xfb   : > { %vm784_vm11 = vcmp.eq.s32.totalorder %v12512_v17, %v696_v10  ;;  %vm783_vm12 = vcmp.eq.s32.totalorder %v12512_v17, %v693_v11 }
  0xfc   : > { %vm10576_vm13 = vmpackc.low %vm784_vm11, %vm783_vm12 }
  0xfe   : > { %v702_v14 = vpop.permute.xlu1 %701  ;;  %v699_v15 = vpop.permute.xlu0 %698 }
  0xff   : > { %vm786_vm14 = vcmp.eq.s32.totalorder %v12512_v17, %v702_v14  ;;  %11748 = vmatmul.mubr.msk.bf16.gmra.mrb[48].mxu0 %vm10576_vm13, %v12324_v22  ;;  %vm785_vm15 = vcmp.eq.s32.totalorder %v12512_v17, %v699_v15 }
 0x100   : > { %vm10578_vm0 = vmpackc.low %vm786_vm14, %vm785_vm15 }
 0x101   : > { %11751 = vmatprep.mubr.msk.bf16.mxu0 %vm10578_vm0, %v12324_v22  ;;  %vm12700_vm0 = vcmp.eq.s32.totalorder %v1418_v44, 15 }
 0x102   : > { %v708_v18 = vpop.permute.xlu1 %707  ;;  %v705_v19 = vpop.permute.xlu0 %704 }
 0x103   : > { %vm788_vm1 = vcmp.eq.s32.totalorder %v12512_v17, %v708_v18  ;;  %vm787_vm2 = vcmp.eq.s32.totalorder %v12512_v17, %v705_v19  ;;  %v17822_v18 = vmov 0 }
 0x104   : > { %vm10580_vm3 = vmpackc.low %vm788_vm1, %vm787_vm2  ;;  %vm12325_vm1 = vmmov 0  }
 0x105   : > { %vm2773_vm2 = vmpackc.low %vm12325_vm1, %vm12325_vm1 }
 0x106   : > { %v714_v20 = vpop.permute.xlu1 %713  ;;  %v711_v21 = vpop.permute.xlu0 %710  ;;  %v12718_v57 = vsel %vm2773_vm2, 65537, %v17511_v3 }
 0x107   : > { %vm790_vm4 = vcmp.eq.s32.totalorder %v12512_v17, %v714_v20  ;;  %11752 = vmatmul.mubr.msk.bf16.gmra.mrb[52].mxu0 %vm10580_vm3, %v12324_v22  ;;  %vm789_vm5 = vcmp.eq.s32.totalorder %v12512_v17, %v711_v21  ;;  %vm3321_vm3 = vmpackc.low %vm12700_vm0, %vm12700_vm0  ;;  %vm12785_vm0 = vcmp.eq.s32.totalorder %v1488_v29, 15 }
 0x108   : > { %vm10582_vm6 = vmpackc.low %vm790_vm4, %vm789_vm5  ;;  %vm12713_vm4 = vcmp.eq.s32.totalorder %v1432_v48, 15  ;;  %v3385_v58 = vsel %vm3321_vm3, 65537, %v17511_v3  ;;  %vm12723_vm5 = vcmp.eq.s32.totalorder %v1446_v50, 15 }
 0x109   : > { %11755 = vmatprep.mubr.msk.bf16.mxu0 %vm10582_vm6, %v12324_v22  ;;  %vm3323_vm6 = vmpackc.low %vm12713_vm4, %vm12713_vm4  ;;  %v10622_v2 = vcombine.low %v12718_v57, %v3385_v58 }
 0x10a   : > { %v720_v23 = vpop.permute.xlu1 %719  ;;  %v717_v24 = vpop.permute.xlu0 %716  ;;  %v3387_v7 = vsel %vm3323_vm6, 65537, %v17511_v3  ;;  %vm3331_vm2 = vmpackc.low %vm12785_vm0, %vm12785_vm0 }
 0x10b   : > { %vm792_vm7 = vcmp.eq.s32.totalorder %v12512_v17, %v720_v23  ;;  %vm791_vm8 = vcmp.eq.s32.totalorder %v12512_v17, %v717_v24 }
 0x10c   : > { %vm10584_vm9 = vmpackc.low %vm792_vm7, %vm791_vm8  ;;  %vm12737_vm8 = vcmp.eq.s32.totalorder %v1460_v62, 15 }
 0x10d   : > { %vm3325_vm7 = vmpackc.low %vm12723_vm5, %vm12723_vm5 }
 0x10e   : > { %v726_v25 = vpop.permute.xlu1 %725  ;;  %v723_v26 = vpop.permute.xlu0 %722  ;;  %v3389_v19 = vsel %vm3325_vm7, 65537, %v17511_v3 }
 0x10f   : > { %vm794_vm10 = vcmp.eq.s32.totalorder %v12512_v17, %v726_v25  ;;  %11756 = vmatmul.mubr.msk.bf16.gmra.mrb[56].mxu0 %vm10584_vm9, %v12324_v22  ;;  %vm793_vm11 = vcmp.eq.s32.totalorder %v12512_v17, %v723_v26  ;;  %vm12744_vm9 = vcmp.eq.s32.totalorder %v1474_v0, 15  ;;  %v10623_v25 = vcombine.low %v12718_v57, %v3387_v7 }
 0x110   : > { %vm10586_vm12 = vmpackc.low %vm794_vm10, %vm793_vm11  ;;  %vm17495_vm10 = vsmask.f32 256  ;;  %vm17496_vm11 = vsmask.f32 7424  ;;  %v1360_v0 = vadd.s32 136, %v12683_v40  ;;  %v3395_v7 = vsel %vm3331_vm2, 65537, %v17511_v3 }
 0x111   : > { %11759 = vmatprep.mubr.msk.bf16.mxu0 %vm10586_vm12, %v12324_v22  ;;  %vm12748_vm12 = vcmp.eq.s16.totalorder %v10622_v2, 0 }
 0x112   : > { %v732_v27 = vpop.permute.xlu1 %731  ;;  %v729_v28 = vpop.permute.xlu0 %728  ;;  %v17823_v18 = vsel %vm12748_vm12, 4294967295, %v17822_v18 }
 0x113   : > { %vm796_vm13 = vcmp.eq.s32.totalorder %v12512_v17, %v732_v27  ;;  %vm795_vm14 = vcmp.eq.s32.totalorder %v12512_v17, %v729_v28  ;;  %17824 = vst [vmem:[#allocation7_spill] sm:$0xff] %v17823_v18 }
 0x114   : > { %vm10588_vm15 = vmpackc.low %vm796_vm13, %vm795_vm14 }
 0x115   : > { %vm3327_vm13 = vmpackc.low %vm12737_vm8, %vm12737_vm8 }
 0x116   : > { %vm3329_vm14 = vmpackc.low %vm12744_vm9, %vm12744_vm9 }
 0x117   : > { %11760 = vmatmul.mubr.msk.bf16.gmra.mrb[60].mxu0 %vm10588_vm15, %v12324_v22  ;;  %v12211_v22 = vld [vmem:[%s17484_s3 + $0x18] sm:$0xff]   ;;  %vm12781_vm15 = vcmp.eq.s16.totalorder %v10623_v25, 0  ;;  %v10627_v25 = vcombine.low %v12718_v57, %v3395_v7 }
 0x118   : > { %3765 = vmatpush1.bf16.msra.mxu1 %v12211_v22 }
 0x119   : > { %3766 = vmatprep.subr.bf16.mxu1 %v17511_v3 }
 0x11c   : > { %3767 = vmatpush1.bf16.msra.mxu1 %v12212_v32 }
 0x11d   : > { %3768 = vmatprep.subr.bf16.mxu1 %v17511_v3 }
 0x120   : > { %3769 = vmatpush1.bf16.msra.mxu1 %v12213_v33  ;;  %v10624_v33 = vcombine.low %v12718_v57, %v3389_v19  ;;  %v1362_v19 = vadd.s32 152, %v12683_v40 }
 0x121   : > { %3770 = vmatprep.subr.bf16.mxu1 %v17511_v3 }
 0x122   : > { %vm12791_vm1 = vcmp.eq.s16.totalorder %v10624_v33, 0  ;;  %v1364_v33 = vadd.s32 168, %v12683_v40 }
 0x123   : > { %v17831_v47 = vsel %vm12791_vm1, 4294967295, %v17830_v47 }
 0x124   : > { %3771 = vmatpush1.bf16.msra.mxu1 %v12214_v34  ;;  %17832 = vst [vmem:[#allocation9_spill] sm:$0xff] %v17831_v47 }
 0x125   : > { %3772 = vmatprep.subr.bf16.mxu1 %v17511_v3 }
 0x128   : > { %3773 = vmatpush1.bf16.msra.mxu1 %v12215_v35  ;;  %v3391_v35 = vsel %vm3327_vm13, 65537, %v17511_v3  ;;  %vm12879_vm13 = vcmp.eq.s16.totalorder %v10627_v25, 0 }
 0x129   : > { %3774 = vmatprep.subr.bf16.mxu1 %v17511_v3  ;;  %v10625_v50 = vcombine.low %v12718_v57, %v3391_v35 }
 0x12b   : > { %vm12828_vm4 = vcmp.eq.s16.totalorder %v10625_v50, 0 }
 0x12c   : > { %3775 = vmatpush1.bf16.msra.mxu1 %v12216_v36 }
 0x12d   : > { %3776 = vmatprep.subr.bf16.mxu1 %v17511_v3 }
 0x130   : > { %3777 = vmatpush1.bf16.msra.mxu1 %v12217_v37 }
 0x131   : > { %3778 = vmatprep.subr.bf16.mxu1 %v17511_v3 }
 0x134   : > { %3779 = vmatpush1.bf16.msra.mxu1 %v12218_v38 }
 0x135   : > { %3780 = vmatprep.subr.bf16.mxu1 %v17511_v3 }
 0x138   : > { %3781 = vmatpush1.bf16.msra.mxu1 %v12219_v39  ;;  %v3393_v39 = vsel %vm3329_vm14, 65537, %v17511_v3 }
 0x139   : > { %3782 = vmatprep.subr.bf16.mxu1 %v17511_v3  ;;  %v10626_v51 = vcombine.low %v12718_v57, %v3393_v39 }
 0x13b   : > { %vm12835_vm6 = vcmp.eq.s16.totalorder %v10626_v51, 0 }
 0x13c   : > { %3783 = vmatpush1.bf16.msra.mxu1 %v12220_v41  ;;  %v17825_v41 = vmov 0 }
 0x13d   : > { %3784 = vmatprep.subr.bf16.mxu1 %v17511_v3  ;;  %v17826_v41 = vsel %vm12781_vm15, 4294967295, %v17825_v41 }
 0x13e   : > { %17827 = vst [vmem:[#allocation8_spill] sm:$0xff] %v17826_v41 }
 0x140   : > { %3785 = vmatpush1.bf16.msra.mxu1 %v12221_v43  ;;  %v1502_v43 = vand.u32 15, %v1356_v30 }
 0x141   : > { %3786 = vmatprep.subr.bf16.mxu1 %v17511_v3 }
 0x142   : > { %vm12807_vm3 = vcmp.eq.s32.totalorder %v1502_v43, 15 }
 0x143   : > { %vm3333_vm5 = vmpackc.low %vm12807_vm3, %vm12807_vm3 }
 0x144   : > { %3787 = vmatpush1.bf16.msra.mxu1 %v12222_v45  ;;  %v3397_v30 = vsel %vm3333_vm5, 65537, %v17511_v3 }
 0x145   : > { %3788 = vmatprep.subr.bf16.mxu1 %v17511_v3 }
 0x148   : > { %3789 = vmatpush1.bf16.msra.mxu1 %v12223_v49 }
 0x172   : > { %v11701_v52 = vpop.f32.mrb[0].mxu0 }
 0x173   : > { %v1055_v54 = vpop.f32.mrb[1].mxu0 }
 0x174   : > { %v11702_v56 = vpop.f32.mrb[2].mxu0 }
 0x175   : > { %v12721_v59 = vpack.c.bf16 %v11702_v56, %v11701_v52  ;;  %v1058_v60 = vpop.f32.mrb[3].mxu0  ;;  %v1358_v52 = vadd.s32 120, %v12683_v40 }
 0x176   : > { %v1310_v63 = vpack.c.bf16 %v1058_v60, %v1055_v54 }
 0x177   : > { %v2366_v1 = vshrl.u32 %v12721_v59, 16  ;;  %v2369_v4 = vshll.u32 %v12721_v59, 16  ;;  %v1516_v8 = vand.u32 15, %v1358_v52  ;;  %v10628_v52 = vcombine.low %v12718_v57, %v3397_v30 }
 0x178   : > { %v2359_v5 = vshrl.u32 %v1310_v63, 16  ;;  %v2362_v6 = vshll.u32 %v1310_v63, 16  ;;  %3790 = vmatprep.mubr.bf16.mxu1 %v1310_v63 }
 0x179   : > { %v2368_v10 = vrot.slane %v2366_v1, 7  ;;  %v3063_v24 = vrot.slane %v2369_v4, 1  ;;  %vm12844_vm7 = vcmp.eq.s32.totalorder %v1516_v8, 15  ;;  %v1368_v8 = vadd.s32 200, %v12683_v40 }
 0x17a   : > { %v11705_v11 = vpop.f32.mrb[4].mxu0  ;;  %v12742_v12 = vrot.slane %v2362_v6, 1  ;;  %v2361_v15 = vrot.slane %v2359_v5, 7  ;;  %vm3335_vm9 = vmpackc.low %vm12844_vm7, %vm12844_vm7  ;;  %vm12895_vm2 = vcmp.eq.s16.totalorder %v10628_v52, 0 }
 0x17b   : > { %v1071_v16 = vpop.f32.mrb[5].mxu0  ;;  %v2371_v20 = vor.u32 %v2369_v4, %v2368_v10  ;;  %v3065_v45 = vor.u32 %v3063_v24, %v2366_v1 }
 0x17c   : > { %v11706_v21 = vpop.f32.mrb[6].mxu0  ;;  %v3062_v23 = vor.u32 %v12742_v12, %v2359_v5  ;;  %v12758_v26 = vor.u32 %v2362_v6, %v2361_v15 }
 0x17d   : > { %v12760_v27 = vpack.c.bf16 %v11706_v21, %v11705_v11  ;;  %v1074_v28 = vpop.f32.mrb[7].mxu0  ;;  %v12767_v31 = vsel %vm17495_vm10, %v2361_v15, %v2371_v20  ;;  %v17835_v15 = vmov 0 }
 0x17e   : > { %v12769_v22 = vpack.c.bf16 %v1074_v28, %v1071_v16  ;;  %v3064_v32 = vsel %vm17496_vm11, %v3062_v23, %v3063_v24  ;;  %v17836_v15 = vsel %vm12828_vm4, 4294967295, %v17835_v15  ;;  %v1530_v16 = vand.u32 15, %v1360_v0 }
 0x17f   : > { %v2382_v34 = vshrl.u32 %v12760_v27, 16  ;;  %11779 = vmatprep.mubr.msk.bf16.mxu0 %vm12748_vm12, %v3064_v32  ;;  %v2385_v36 = vshll.u32 %v12760_v27, 16  ;;  %17837 = vst [vmem:[#allocation10_spill] sm:$0xff] %v17836_v15 }
 0x180   : > { %v2374_v37 = vshrl.u32 %v12769_v22, 16  ;;  %v2377_v38 = vshll.u32 %v12769_v22, 16  ;;  %vm12855_vm8 = vcmp.eq.s32.totalorder %v1530_v16, 15 }
 0x181   : > { %v12789_v44 = vrot.slane %v2382_v34, 7  ;;  %v3069_v58 = vrot.slane %v2385_v36, 1  ;;  %vm3337_vm14 = vmpackc.low %vm12855_vm8, %vm12855_vm8 }
 0x182   : > { %v3066_v13 = vrot.slane %v2377_v38, 1  ;;  %v11709_v46 = vpop.f32.mrb[8].mxu0  ;;  %v2376_v48 = vrot.slane %v2374_v37, 7  ;;  %v3401_v16 = vsel %vm3337_vm14, 65537, %v17511_v3 }
 0x183   : > { %v1087_v49 = vpop.f32.mrb[9].mxu0  ;;  %v2387_v53 = vor.u32 %v2385_v36, %v12789_v44  ;;  %v3071_v23 = vor.u32 %v3069_v58, %v2382_v34 }
 0x184   : > { %v11710_v54 = vpop.f32.mrb[10].mxu0  ;;  %v3067_v55 = vsel %vm17496_vm11, %v3065_v45, %v3066_v13  ;;  %v3068_v56 = vor.u32 %v3066_v13, %v2374_v37  ;;  %v2379_v60 = vor.u32 %v2377_v38, %v2376_v48  ;;  %v1544_v45 = vand.u32 15, %v1362_v19 }
 0x185   : > { %v12803_v61 = vpack.c.bf16 %v11710_v54, %v11709_v46  ;;  %v1090_v62 = vpop.f32.mrb[11].mxu0  ;;  %11780 = vmatmul.mubr.msk.bf16.vlgmr.msra.gmra.mrb[64].mxu0 %vm12781_vm15, %v3067_v55  ;;  %v12813_v1 = vsel %vm17495_vm10, %v2376_v48, %v2387_v53  ;;  %v1558_v53 = vand.u32 15, %v1364_v33  ;;  %v1370_v13 = vadd.s32 216, %v12683_v40 }
 0x186   : > { %v12815_v2 = vpack.c.bf16 %v1090_v62, %v1087_v49  ;;  %v3070_v4 = vsel %vm17496_vm11, %v3068_v56, %v3069_v58  ;;  %v12819_v5 = vsel %vm17495_vm10, %v2368_v10, %v2379_v60  ;;  %v17838_v10 = vmov 0 }
 0x187   : > { %v2398_v6 = vshrl.u32 %v12803_v61, 16  ;;  %11783 = vmatprep.mubr.msk.bf16.mxu0 %vm12791_vm1, %v3070_v4  ;;  %v2401_v9 = vshll.u32 %v12803_v61, 16  ;;  %v17839_v10 = vsel %vm12835_vm6, 4294967295, %v17838_v10  ;;  %v17845_v58 = vmov 0 }
 0x188   : > { %v2390_v11 = vshrl.u32 %v12815_v2, 16  ;;  %v2393_v14 = vshll.u32 %v12815_v2, 16  ;;  %17840 = vst [vmem:[#allocation11_spill] sm:$0xff] %v17839_v10  ;;  %v17846_v58 = vsel %vm12879_vm13, 4294967295, %v17845_v58  ;;  %vm12887_vm0 = vcmp.eq.s32.totalorder %v1544_v45, 15 }
 0x189   : > { %v12840_v20 = vrot.slane %v2398_v6, 7  ;;  %v3075_v34 = vrot.slane %v2401_v9, 1  ;;  %17847 = vst [vmem:[#allocation12_spill] sm:$0xff] %v17846_v58  ;;  %v1366_v62 = vadd.s32 184, %v12683_v40  ;;  %vm12900_vm3 = vcmp.eq.s32.totalorder %v1558_v53, 15  ;;  %vm3339_vm5 = vmpackc.low %vm12887_vm0, %vm12887_vm0 }
 0x18a   : > { %v11713_v21 = vpop.f32.mrb[12].mxu0  ;;  %v3072_v24 = vrot.slane %v2393_v14, 1  ;;  %v2392_v28 = vrot.slane %v2390_v11, 7  ;;  %vm3341_vm7 = vmpackc.low %vm12900_vm3, %vm12900_vm3  ;;  %v3403_v53 = vsel %vm3339_vm5, 65537, %v17511_v3 }
 0x18b   : > { %v1103_v29 = vpop.f32.mrb[13].mxu0  ;;  %v2403_v35 = vor.u32 %v2401_v9, %v12840_v20  ;;  %v3077_v4 = vor.u32 %v3075_v34, %v2398_v6  ;;  %v1572_v33 = vand.u32 15, %v1366_v62 }
 0x18c   : > { %v11714_v36 = vpop.f32.mrb[14].mxu0  ;;  %v3073_v37 = vsel %vm17496_vm11, %v3071_v23, %v3072_v24  ;;  %v3074_v38 = vor.u32 %v3072_v24, %v2390_v11  ;;  %v2395_v39 = vor.u32 %v2393_v14, %v2392_v28  ;;  %v17850_v14 = vmov 0 }
 0x18d   : > { %v12851_v42 = vpack.c.bf16 %v11714_v36, %v11713_v21  ;;  %v1106_v43 = vpop.f32.mrb[15].mxu0  ;;  %11784 = vmatmul.mubr.msk.bf16.gmra.mrb[68].mxu0 %vm12828_vm4, %v3073_v37  ;;  %v12860_v46 = vsel %vm17495_vm10, %v2392_v28, %v2403_v35  ;;  %v17851_v14 = vsel %vm12895_vm2, 4294967295, %v17850_v14 }
 0x18e   : > { %v12862_v48 = vpack.c.bf16 %v1106_v43, %v1103_v29  ;;  %v3076_v49 = vsel %vm17496_vm11, %v3074_v38, %v3075_v34  ;;  %v12870_v50 = vsel %vm17495_vm10, %v12789_v44, %v2395_v39  ;;  %v3399_v44 = vsel %vm3335_vm9, 65537, %v17511_v3  ;;  %17852 = vst [vmem:[#allocation13_spill] sm:$0xff] %v17851_v14 }
 0x18f   : > { %v2414_v51 = vshrl.u32 %v12851_v42, 16  ;;  %11787 = vmatprep.mubr.msk.bf16.mxu0 %vm12835_vm6, %v3076_v49  ;;  %v2417_v54 = vshll.u32 %v12851_v42, 16  ;;  %v10629_v32 = vcombine.low %v12718_v57, %v3399_v44  ;;  %v1586_v38 = vand.u32 15, %v1368_v8 }
 0x190   : > { %v2406_v55 = vshrl.u32 %v12862_v48, 16  ;;  %v2409_v56 = vshll.u32 %v12862_v48, 16  ;;  %v10630_v43 = vcombine.low %v12718_v57, %v3401_v16  ;;  %vm12941_vm9 = vcmp.eq.s32.totalorder %v1572_v33, 15 }
 0x191   : > { %v12892_v63 = vrot.slane %v2414_v51, 7  ;;  %v3081_v25 = vrot.slane %v2417_v54, 1  ;;  %vm12936_vm8 = vcmp.eq.s16.totalorder %v10629_v32, 0  ;;  %vm12947_vm14 = vcmp.eq.s32.totalorder %v1586_v38, 15  ;;  %vm3343_vm3 = vmpackc.low %vm12941_vm9, %vm12941_vm9 }
 0x192   : > { %v11717_v0 = vpop.f32.mrb[16].mxu0  ;;  %v3078_v7 = vrot.slane %v2409_v56, 1  ;;  %v2408_v9 = vrot.slane %v2406_v55, 7  ;;  %vm12951_vm0 = vcmp.eq.s16.totalorder %v10630_v43, 0  ;;  %v17862_v8 = vmov 0  ;;  %vm3345_vm5 = vmpackc.low %vm12947_vm14, %vm12947_vm14 }
 0x193   : > { %v1119_v11 = vpop.f32.mrb[17].mxu0  ;;  %v2419_v21 = vor.u32 %v2417_v54, %v12892_v63  ;;  %v3405_v54 = vsel %vm3341_vm7, 65537, %v17511_v3  ;;  %v3083_v60 = vor.u32 %v3081_v25, %v2414_v51  ;;  %v17863_v8 = vsel %vm12951_vm0, 4294967295, %v17862_v8 }
 0x194   : > { %v11718_v23 = vpop.f32.mrb[18].mxu0  ;;  %v3079_v6 = vsel %vm17496_vm11, %v3077_v4, %v3078_v7  ;;  %v3080_v24 = vor.u32 %v3078_v7, %v2406_v55  ;;  %v2411_v28 = vor.u32 %v2409_v56, %v2408_v9  ;;  %17864 = vst [vmem:[#allocation15_spill] sm:$0xff] %v17863_v8  ;;  %v17870_v55 = vmov 0 }
 0x195   : > { %v12906_v29 = vpack.c.bf16 %v11718_v23, %v11717_v0  ;;  %v1122_v30 = vpop.f32.mrb[19].mxu0  ;;  %11788 = vmatmul.mubr.msk.bf16.gmra.mrb[72].mxu0 %vm12879_vm13, %v3079_v6  ;;  %v12915_v35 = vsel %vm17495_vm10, %v2408_v9, %v2419_v21  ;;  %v10631_v9 = vcombine.low %v12718_v57, %v3403_v53 }
 0x196   : > { %v12917_v36 = vpack.c.bf16 %v1122_v30, %v1119_v11  ;;  %v3082_v37 = vsel %vm17496_vm11, %v3080_v24, %v3081_v25  ;;  %v12925_v34 = vsel %vm17495_vm10, %v12840_v20, %v2411_v28  ;;  %v17855_v20 = vmov 0 }
 0x197   : > { %v2430_v39 = vshrl.u32 %v12906_v29, 16  ;;  %11791 = vmatprep.mubr.msk.bf16.mxu0 %vm12895_vm2, %v3082_v37  ;;  %v2433_v45 = vshll.u32 %v12906_v29, 16  ;;  %v17856_v20 = vsel %vm12936_vm8, 4294967295, %v17855_v20  ;;  %v1600_v11 = vand.u32 15, %v1370_v13 }
 0x198   : > { %v2422_v49 = vshrl.u32 %v12917_v36, 16  ;;  %v2425_v52 = vshll.u32 %v12917_v36, 16  ;;  %17857 = vst [vmem:[#allocation14_spill] sm:$0xff] %v17856_v20  ;;  %v10632_v28 = vcombine.low %v12718_v57, %v3405_v54  ;;  %v1372_v30 = vadd.s32 232, %v12683_v40 }
 0x199   : > { %v12945_v56 = vrot.slane %v2430_v39, 7  ;;  %v3087_v23 = vrot.slane %v2433_v45, 1  ;;  %v3407_v13 = vsel %vm3343_vm3, 65537, %v17511_v3  ;;  %vm12984_vm7 = vcmp.eq.s32.totalorder %v1600_v11, 15 }
 0x19a   : > { %v11721_v44 = vpop.f32.mrb[20].mxu0  ;;  %v3084_v62 = vrot.slane %v2425_v52, 1  ;;  %v2424_v4 = vrot.slane %v2422_v49, 7  ;;  %vm12992_vm9 = vcmp.eq.s16.totalorder %v10631_v9, 0  ;;  %v17867_v54 = vmov 0  ;;  %vm3347_vm3 = vmpackc.low %vm12984_vm7, %vm12984_vm7 }
 0x19b   : > { %v1135_v7 = vpop.f32.mrb[21].mxu0  ;;  %v2435_v16 = vor.u32 %v2433_v45, %v12945_v56  ;;  %v17868_v54 = vsel %vm12992_vm9, 4294967295, %v17867_v54  ;;  %vm12996_vm14 = vcmp.eq.s16.totalorder %v10632_v28, 0  ;;  %v3089_v0 = vor.u32 %v3087_v23, %v2430_v39 }
 0x19c   : > { %v11722_v19 = vpop.f32.mrb[22].mxu0  ;;  %v3085_v21 = vsel %vm17496_vm11, %v3083_v60, %v3084_v62  ;;  %v3086_v51 = vor.u32 %v3084_v62, %v2422_v49  ;;  %v2427_v6 = vor.u32 %v2425_v52, %v2424_v4  ;;  %17869 = vst [vmem:[#allocation16_spill] sm:$0xff] %v17868_v54  ;;  %v17871_v55 = vsel %vm12996_vm14, 4294967295, %v17870_v55 }
 0x19d   : > { %v12961_v24 = vpack.c.bf16 %v11722_v19, %v11721_v44  ;;  %v1138_v25 = vpop.f32.mrb[23].mxu0  ;;  %11792 = vmatmul.mubr.msk.bf16.gmra.mrb[76].mxu0 %vm12936_vm8, %v3085_v21  ;;  %v12971_v32 = vsel %vm17495_vm10, %v2424_v4, %v2435_v16  ;;  %17872 = vst [vmem:[#allocation17_spill] sm:$0xff] %v17871_v55  ;;  %v1614_v44 = vand.u32 15, %v1372_v30  ;;  %v10633_v16 = vcombine.low %v12718_v57, %v3407_v13 }
 0x19e   : > { %v12973_v33 = vpack.c.bf16 %v1138_v25, %v1135_v7  ;;  %v3088_v37 = vsel %vm17496_vm11, %v3086_v51, %v3087_v23  ;;  %v12978_v38 = vsel %vm17495_vm10, %v12892_v63, %v2427_v6  ;;  %v3409_v63 = vsel %vm3345_vm5, 65537, %v17511_v3 }
 0x19f   : > { %v2446_v43 = vshrl.u32 %v12961_v24, 16  ;;  %11795 = vmatprep.mubr.msk.bf16.mxu0 %vm12951_vm0, %v3088_v37  ;;  %v2449_v49 = vshll.u32 %v12961_v24, 16  ;;  %v1374_v7 = vadd.s32 248, %v12683_v40  ;;  %v10634_v19 = vcombine.low %v12718_v57, %v3409_v63 }
 0x1a0   : > { %v2438_v52 = vshrl.u32 %v12973_v33, 16  ;;  %v2441_v53 = vshll.u32 %v12973_v33, 16  ;;  %v1376_v21 = vadd.s32 264, %v12683_v40  ;;  %v3411_v13 = vsel %vm3347_vm3, 65537, %v17511_v3 }
 0x1a1   : > { %v13000_v60 = vrot.slane %v2446_v43, 7  ;;  %v3093_v25 = vrot.slane %v2449_v49, 1  ;;  %vm13021_vm5 = vcmp.eq.s32.totalorder %v1614_v44, 15  ;;  %vm13041_vm7 = vcmp.eq.s16.totalorder %v10633_v16, 0 }
 0x1a2   : > { %v11725_v62 = vpop.f32.mrb[24].mxu0  ;;  %v3090_v4 = vrot.slane %v2441_v53, 1  ;;  %v2440_v9 = vrot.slane %v2438_v52, 7  ;;  %v1642_v44 = vand.u32 15, %v1376_v21  ;;  %vm3349_vm3 = vmpackc.low %vm13021_vm5, %vm13021_vm5  ;;  %v1378_v21 = vadd.s32 280, %v12683_v40 }
 0x1a3   : > { %v1151_v11 = vpop.f32.mrb[25].mxu0  ;;  %v2451_v51 = vor.u32 %v2449_v49, %v13000_v60 }
 0x1a4   : > { %v11726_v6 = vpop.f32.mrb[26].mxu0  ;;  %v3091_v39 = vsel %vm17496_vm11, %v3089_v0, %v3090_v4  ;;  %v3092_v23 = vor.u32 %v3090_v4, %v2438_v52  ;;  %v2443_v28 = vor.u32 %v2441_v53, %v2440_v9  ;;  %vm13061_vm5 = vcmp.eq.s32.totalorder %v1642_v44, 15 }
 0x1a5   : > { %v13011_v30 = vpack.c.bf16 %v11726_v6, %v11725_v62  ;;  %v1154_v37 = vpop.f32.mrb[27].mxu0  ;;  %11796 = vmatmul.mubr.msk.bf16.gmra.mrb[80].mxu0 %vm12992_vm9, %v3091_v39  ;;  %v13026_v49 = vsel %vm17495_vm10, %v2440_v9, %v2451_v51  ;;  %v1628_v62 = vand.u32 15, %v1374_v7  ;;  %v17875_v51 = vmov 0  ;;  %vm3353_vm0 = vmpackc.low %vm13061_vm5, %vm13061_vm5 }
 0x1a6   : > { %v13028_v52 = vpack.c.bf16 %v1154_v37, %v1151_v11  ;;  %v3094_v53 = vsel %vm17496_vm11, %v3092_v23, %v3093_v25  ;;  %v13033_v0 = vsel %vm17495_vm10, %v12945_v56, %v2443_v28  ;;  %v17876_v51 = vsel %vm13041_vm7, 4294967295, %v17875_v51 }
 0x1a7   : > { %v2462_v45 = vshrl.u32 %v13011_v30, 16  ;;  %11799 = vmatprep.mubr.msk.bf16.mxu0 %vm12996_vm14, %v3094_v53  ;;  %v2465_v4 = vshll.u32 %v13011_v30, 16  ;;  %17877 = vst [vmem:[#allocation18_spill] sm:$0xff] %v17876_v51  ;;  %vm13048_vm10 = vcmp.eq.s16.totalorder %v10634_v19, 0  ;;  %v17878_v56 = vmov 0 }
 0x1a8   : > { %v2454_v9 = vshrl.u32 %v13028_v52, 16  ;;  %v2457_v11 = vshll.u32 %v13028_v52, 16  ;;  %v17879_v56 = vsel %vm13048_vm10, 4294967295, %v17878_v56  ;;  %v10635_v7 = vcombine.low %v12718_v57, %v3411_v13 }
 0x1a9   : > { %17880 = vst [vmem:[#allocation19_spill] sm:$0xff] %v17879_v56  ;;  %v13054_v6 = vrot.slane %v2462_v45, 7  ;;  %v3095_v23 = vor.u32 %v3093_v25, %v2446_v43  ;;  %vm13056_vm11 = vcmp.eq.s32.totalorder %v1628_v62, 15  ;;  %v3413_v19 = vsel %vm3349_vm3, 65537, %v17511_v3 }
 0x1aa   : > { %v11729_v39 = vpop.f32.mrb[28].mxu0  ;;  %v3096_v16 = vrot.slane %v2457_v11, 1  ;;  %v2456_v37 = vrot.slane %v2454_v9, 7  ;;  %v1380_v13 = vadd.s32 296, %v12683_v40  ;;  %vm17885_vm14 = vsmask.f32 7424  ;;  %vm3351_vm3 = vmpackc.low %vm13056_vm11, %vm13056_vm11 }
 0x1ab   : > { %v1167_v63 = vpop.f32.mrb[29].mxu0  ;;  %v2467_v17 = vor.u32 %v2465_v4, %v13054_v6  ;;  %v3099_v62 = vrot.slane %v2465_v4, 1  ;;  %v1656_v44 = vand.u32 15, %v1378_v21  ;;  %vm17887_vm9 = vsmask.f32 256 }
 0x1ac   : > { %v11730_v55 = vpop.f32.mrb[30].mxu0  ;;  %v3097_v43 = vsel %vm17885_vm14, %v3095_v23, %v3096_v16  ;;  %v3098_v25 = vor.u32 %v3096_v16, %v2454_v9  ;;  %v2459_v54 = vor.u32 %v2457_v11, %v2456_v37  ;;  %vm17888_vm8 = vmmov %vm17887_vm9  ;;  %v1670_v11 = vand.u32 15, %v1380_v13 }
 0x1ad   : > { %v13068_v8 = vpack.c.bf16 %v11730_v55, %v11729_v39  ;;  %v1170_v20 = vpop.f32.mrb[31].mxu0  ;;  %11800 = vmatmul.mubr.msk.bf16.gmra.mrb[84].mxu0 %vm13041_vm7, %v3097_v43  ;;  %v13076_v3 = vsel %vm17887_vm9, %v2456_v37, %v2467_v17  ;;  %v10636_v17 = vcombine.low %v12718_v57, %v3413_v19  ;;  %vm13095_vm11 = vcmp.eq.s16.totalorder %v10635_v7, 0 }
 0x1ae   : > { %v13078_v14 = vpack.c.bf16 %v1170_v20, %v1167_v63  ;;  %v3100_v9 = vsel %vm17885_vm14, %v3098_v25, %v3099_v62  ;;  %v13086_v55 = vsel %vm17888_vm8, %v13000_v60, %v2459_v54  ;;  %v17889_v23 = vmov 0 }
 0x1af   : > { %17886 = vst [vmem:[#allocation20_spill] sm:$0xff] %v13068_v8  ;;  %v2478_v4 = vshrl.u32 %v13068_v8, 16  ;;  %11803 = vmatprep.mubr.msk.bf16.mxu0 %vm13048_vm10, %v3100_v9  ;;  %v2481_v20 = vshll.u32 %v13068_v8, 16  ;;  %v17890_v23 = vsel %vm13095_vm11, 4294967295, %v17889_v23  ;;  %v17892_v54 = vmov 0  }
 0x1b0   : > { %v2470_v21 = vshrl.u32 %v13078_v14, 16  ;;  %v2473_v39 = vshll.u32 %v13078_v14, 16  ;;  %17891 = vst [vmem:[#allocation21_spill] sm:$0xff] %v17890_v23  ;;  %v3415_v60 = vsel %vm3351_vm3, 65537, %v17892_v54  ;;  %v3417_v16 = vsel %vm3353_vm0, 65537, %v17892_v54  ;;  %vm17900_vm0 = vmmov %vm17885_vm14 }
 0x1b1   : > { %vm13101_vm8 = vcmp.eq.s32.totalorder %v1656_v44, 15  ;;  %v13105_v37 = vrot.slane %v2478_v4, 7  ;;  %v3101_v19 = vor.u32 %v3099_v62, %v2462_v45  ;;  %v1382_v13 = vadd.s32 312, %v12683_v40 }
 0x1b2   : > { %v11733_v63 = vpop.f32.mrb[32].mxu0  ;;  %v3102_v53 = vrot.slane %v2473_v39, 1  ;;  %v2472_v43 = vrot.slane %v2470_v21, 7  ;;  %vm13108_vm9 = vcmp.eq.s16.totalorder %v10636_v17, 0  ;;  %v17895_v25 = vmov 0  ;;  %vm3355_vm3 = vmpackc.low %vm13101_vm8, %vm13101_vm8 }
 0x1b3   : > { %v1183_v7 = vpop.f32.mrb[33].mxu0  ;;  %v17896_v25 = vsel %vm13108_vm9, 4294967295, %v17895_v25  ;;  %vm13112_vm5 = vcmp.eq.s32.totalorder %v1670_v11, 15  ;;  %v1384_v44 = vadd.s32 328, %v12683_v40  ;;  %v2483_v56 = vor.u32 %v2481_v20, %v13105_v37 }
 0x1b4   : > { %17897 = vst [vmem:[#allocation22_spill] sm:$0xff] %v17896_v25  ;;  %v11734_v51 = vpop.f32.mrb[34].mxu0  ;;  %v3103_v45 = vsel %vm17900_vm0, %v3101_v19, %v3102_v53  ;;  %v3104_v62 = vor.u32 %v3102_v53, %v2470_v21  ;;  %v3105_v58 = vrot.slane %v2481_v20, 1  ;;  %v2475_v10 = vor.u32 %v2473_v39, %v2472_v43  ;;  %vm3357_vm10 = vmpackc.low %vm13112_vm5, %vm13112_vm5 }
 0x1b5   : > { %v13119_v15 = vpack.c.bf16 %v11734_v51, %v11733_v63  ;;  %v1186_v17 = vpop.f32.mrb[35].mxu0  ;;  %11804 = vmatmul.mubr.msk.bf16.gmra.mrb[88].mxu0 %vm13095_vm11, %v3103_v45  ;;  %v10637_v11 = vcombine.low %v12718_v57, %v3415_v60  ;;  %v10638_v47 = vcombine.low %v12718_v57, %v3417_v16  ;;  %vm17902_vm14 = vsmask.f32 256 }
 0x1b6   : > { %v13129_v41 = vsel %vm17902_vm14, %v2472_v43, %v2483_v56  ;;  %v13131_v21 = vpack.c.bf16 %v1186_v17, %v1183_v7  ;;  %v3106_v51 = vsel %vm17900_vm0, %v3104_v62, %v3105_v58  ;;  %v1684_v20 = vand.u32 15, %v1382_v13  ;;  %vm17905_vm11 = vmmov %vm17902_vm14 }
 0x1b7   : > { %17901 = vst [vmem:[#allocation23_spill] sm:$0xff] %v13119_v15  ;;  %17903 = vst [vmem:[#allocation24_spill] sm:$0xff] %v13129_v41  ;;  %v13139_v39 = vsel %vm17905_vm11, %v13054_v6, %v2475_v10  ;;  %v2494_v60 = vshrl.u32 %v13119_v15, 16  ;;  %11807 = vmatprep.mubr.msk.bf16.mxu0 %vm13108_vm9, %v3106_v51  ;;  %v1698_v56 = vand.u32 15, %v1384_v44  ;;  %v2497_v16 = vshll.u32 %v13119_v15, 16 }
 0x1b8   : > { %17904 = vst [vmem:[#allocation25_spill] sm:$0xff] %v13131_v21  ;;  %v2486_v28 = vshrl.u32 %v13131_v21, 16  ;;  %v2489_v63 = vshll.u32 %v13131_v21, 16  ;;  %v3419_v19 = vsel %vm3355_vm3, 65537, %v17892_v54  ;;  %vm13148_vm8 = vcmp.eq.s16.totalorder %v10637_v11, 0 }
 0x1b9   : > { %v17906_v53 = vmov 0  ;;  %vm13152_vm11 = vcmp.eq.s16.totalorder %v10638_v47, 0  ;;  %v17909_v10 = vmov 0  ;;  %v3421_v6 = vsel %vm3357_vm10, 65537, %v17892_v54  ;;  %vm17916_vm10 = vmmov %vm17900_vm0 }
 0x1ba   : > { %v17907_v53 = vsel %vm13148_vm8, 4294967295, %v17906_v53  ;;  %v17910_v10 = vsel %vm13152_vm11, 4294967295, %v17909_v10  ;;  %v13157_v13 = vrot.slane %v2494_v60, 7  ;;  %v11737_v43 = vpop.f32.mrb[36].mxu0  ;;  %v3107_v7 = vor.u32 %v3105_v58, %v2478_v4 }
 0x1bb   : > { %17908 = vst [vmem:[#allocation26_spill] sm:$0xff] %v17907_v53  ;;  %17911 = vst [vmem:[#allocation27_spill] sm:$0xff] %v17910_v10  ;;  %v3108_v9 = vrot.slane %v2489_v63, 1  ;;  %vm13159_vm5 = vcmp.eq.s32.totalorder %v1684_v20, 15  ;;  %v2488_v45 = vrot.slane %v2486_v28, 7  ;;  %v1199_v62 = vpop.f32.mrb[37].mxu0  ;;  %v10639_v17 = vcombine.low %v12718_v57, %v3419_v19 }
 0x1bc   : > { %vm13164_vm3 = vcmp.eq.s32.totalorder %v1698_v56, 15  ;;  %v1386_v11 = vadd.s32 344, %v12683_v40  ;;  %v2499_v51 = vor.u32 %v2497_v16, %v13157_v13  ;;  %v11738_v25 = vpop.f32.mrb[38].mxu0  ;;  %v3111_v20 = vrot.slane %v2497_v16, 1  ;;  %vm3359_vm14 = vmpackc.low %vm13159_vm5, %vm13159_vm5 }
 0x1bd   : > { %v3109_v58 = vsel %vm17916_vm10, %v3107_v7, %v3108_v9  ;;  %v3110_v4 = vor.u32 %v3108_v9, %v2486_v28  ;;  %v2491_v23 = vor.u32 %v2489_v63, %v2488_v45  ;;  %v13171_v18 = vpack.c.bf16 %v11738_v25, %v11737_v43  ;;  %v1202_v15 = vpop.f32.mrb[39].mxu0  ;;  %vm3361_vm9 = vmpackc.low %vm13164_vm3, %vm13164_vm3 }
 0x1be   : > { %11808 = vmatmul.mubr.msk.bf16.gmra.mrb[92].mxu0 %vm13148_vm8, %v3109_v58  ;;  %v10640_v56 = vcombine.low %v12718_v57, %v3421_v6  ;;  %v1388_v19 = vadd.s32 360, %v12683_v40  ;;  %vm17918_vm0 = vsmask.f32 256  ;;  %v13183_v28 = vpack.c.bf16 %v1202_v15, %v1199_v62 }
 0x1bf   : > { %17917 = vst [vmem:[#allocation28_spill] sm:$0xff] %v13171_v18  ;;  %v13181_v21 = vsel %vm17918_vm0, %v2488_v45, %v2499_v51  ;;  %v3112_v25 = vsel %vm17916_vm10, %v3110_v4, %v3111_v20  ;;  %vm17921_vm8 = vmmov %vm17918_vm0  ;;  %v2510_v63 = vshrl.u32 %v13171_v18, 16  ;;  %vm13196_vm5 = vcmp.eq.s16.totalorder %v10639_v17, 0 }
 0x1c0   : > { %17919 = vst [vmem:[#allocation29_spill] sm:$0xff] %v13181_v21  ;;  %17920 = vst [vmem:[#allocation30_spill] sm:$0xff] %v13183_v28  ;;  %v13191_v16 = vsel %vm17921_vm8, %v13105_v37, %v2491_v23  ;;  %11811 = vmatprep.mubr.msk.bf16.mxu0 %vm13152_vm11, %v3112_v25  ;;  %v17923_v6 = vmov 0  ;;  %v1712_v15 = vand.u32 15, %v1386_v11  ;;  %v2513_v43 = vshll.u32 %v13171_v18, 16 }
 0x1c1   : > { %17922 = vst [vmem:[#allocation31_spill] sm:$0xff] %v13191_v16  ;;  %v17924_v6 = vsel %vm13196_vm5, 4294967295, %v17923_v6  ;;  %v2502_v7 = vshrl.u32 %v13183_v28, 16  ;;  %v2505_v9 = vshll.u32 %v13183_v28, 16  ;;  %v3423_v44 = vsel %vm3359_vm14, 65537, %v17892_v54 }
 0x1c2   : > { %17925 = vst [vmem:[#allocation32_spill] sm:$0xff] %v17924_v6  ;;  %vm13204_vm8 = vcmp.eq.s16.totalorder %v10640_v56, 0  ;;  %v17926_v23 = vmov 0  ;;  %v3425_v37 = vsel %vm3361_vm9, 65537, %v17892_v54  ;;  %v1726_v45 = vand.u32 15, %v1388_v19  ;;  %v11741_v17 = vpop.f32.mrb[40].mxu0  ;;  %vm17931_vm9 = vmmov %vm17916_vm10 }
 0x1c3   : > { %v17927_v23 = vsel %vm13204_vm8, 4294967295, %v17926_v23  ;;  %v13209_v62 = vrot.slane %v2510_v63, 7  ;;  %v3113_v47 = vor.u32 %v3111_v20, %v2494_v60  ;;  %v3114_v11 = vrot.slane %v2505_v9, 1  ;;  %v1215_v4 = vpop.f32.mrb[41].mxu0  ;;  %vm17937_vm10 = vmmov %vm17931_vm9 }
 0x1c4   : > { %17928 = vst [vmem:[#allocation33_spill] sm:$0xff] %v17927_v23  ;;  %v1390_v51 = vadd.s32 376, %v12683_v40  ;;  %v2504_v58 = vrot.slane %v2502_v7, 7  ;;  %v10641_v25 = vcombine.low %v12718_v57, %v3423_v44  ;;  %vm13213_vm3 = vcmp.eq.s32.totalorder %v1712_v15, 15  ;;  %v11742_v19 = vpop.f32.mrb[42].mxu0 }
 0x1c5   : > { %v1392_v56 = vadd.s32 392, %v12683_v40  ;;  %v2515_v53 = vor.u32 %v2513_v43, %v13209_v62  ;;  %v3115_v18 = vsel %vm17931_vm9, %v3113_v47, %v3114_v11  ;;  %v3116_v28 = vor.u32 %v3114_v11, %v2502_v7  ;;  %v1218_v16 = vpop.f32.mrb[43].mxu0  ;;  %vm3363_vm9 = vmpackc.low %vm13213_vm3, %vm13213_vm3 }
 0x1c6   : > { %v3117_v60 = vrot.slane %v2513_v43, 1  ;;  %v2507_v20 = vor.u32 %v2505_v9, %v2504_v58  ;;  %v13220_v21 = vpack.c.bf16 %v11742_v19, %v11741_v17  ;;  %11812 = vmatmul.mubr.msk.bf16.gmra.mrb[96].mxu0 %vm13196_vm5, %v3115_v18  ;;  %v10642_v15 = vcombine.low %v12718_v57, %v3425_v37  ;;  %vm17938_vm5 = vmmov %vm17918_vm0 }
 0x1c7   : > { %vm13225_vm14 = vcmp.eq.s32.totalorder %v1726_v45, 15  ;;  %v13230_v41 = vsel %vm17918_vm0, %v2504_v58, %v2515_v53  ;;  %v13232_v8 = vpack.c.bf16 %v1218_v16, %v1215_v4  ;;  %v1740_v7 = vand.u32 15, %v1390_v51 }
 0x1c8   : > { %17932 = vst [vmem:[#allocation34_spill] sm:$0xff] %v13220_v21  ;;  %17935 = vst [vmem:[#allocation35_spill] sm:$0xff] %v13230_v41  ;;  %v3118_v43 = vsel %vm17937_vm10, %v3116_v28, %v3117_v60  ;;  %v13240_v18 = vsel %vm17938_vm5, %v13157_v13, %v2507_v20  ;;  %v2526_v9 = vshrl.u32 %v13220_v21, 16  ;;  %v1754_v53 = vand.u32 15, %v1392_v56 }
 0x1c9   : > { %17936 = vst [vmem:[#allocation36_spill] sm:$0xff] %v13232_v8  ;;  %17939 = vst [vmem:[#allocation37_spill] sm:$0xff] %v13240_v18  ;;  %11815 = vmatprep.mubr.msk.bf16.mxu0 %vm13204_vm8, %v3118_v43  ;;  %v1394_v16 = vadd.s32 408, %v12683_v40  ;;  %v2529_v37 = vshll.u32 %v13220_v21, 16  ;;  %v2518_v28 = vshrl.u32 %v13232_v8, 16  ;;  %v2521_v10 = vshll.u32 %v13232_v8, 16 }
 0x1ca   : > { %vm13249_vm3 = vcmp.eq.s16.totalorder %v10641_v25, 0  ;;  %v17940_v45 = vmov 0  ;;  %vm3365_vm5 = vmpackc.low %vm13225_vm14, %vm13225_vm14  ;;  %vm13256_vm0 = vcmp.eq.s16.totalorder %v10642_v15, 0  ;;  %v17943_v13 = vmov 0  ;;  %v11745_v51 = vpop.f32.mrb[44].mxu0 }
 0x1cb   : > { %v17941_v45 = vsel %vm13249_vm3, 4294967295, %v17940_v45  ;;  %v17944_v13 = vsel %vm13256_vm0, 4294967295, %v17943_v13  ;;  %v3427_v17 = vsel %vm3363_vm9, 65537, %v17892_v54  ;;  %v1396_v47 = vadd.s32 424, %v12683_v40  ;;  %v1231_v19 = vpop.f32.mrb[45].mxu0 }
 0x1cc   : > { %17942 = vst [vmem:[#allocation38_spill] sm:$0xff] %v17941_v45  ;;  %17945 = vst [vmem:[#allocation39_spill] sm:$0xff] %v17944_v13  ;;  %v13262_v11 = vrot.slane %v2526_v9, 7  ;;  %v3119_v58 = vor.u32 %v3117_v60, %v2510_v63  ;;  %v3120_v4 = vrot.slane %v2521_v10, 1  ;;  %vm13264_vm10 = vcmp.eq.s32.totalorder %v1740_v7, 15  ;;  %v11746_v23 = vpop.f32.mrb[46].mxu0 }
 0x1cd   : > { %v2520_v56 = vrot.slane %v2518_v28, 7  ;;  %v3429_v20 = vsel %vm3365_vm5, 65537, %v17892_v54  ;;  %vm13269_vm14 = vcmp.eq.s32.totalorder %v1754_v53, 15  ;;  %v1768_v44 = vand.u32 15, %v1394_v16  ;;  %v1234_v8 = vpop.f32.mrb[47].mxu0  ;;  %vm3367_vm5 = vmpackc.low %vm13264_vm10, %vm13264_vm10 }
 0x1ce   : > { %v2531_v43 = vor.u32 %v2529_v37, %v13262_v11  ;;  %vm17950_vm9 = vsmask.f32 7424  ;;  %v3122_v63 = vor.u32 %v3120_v4, %v2518_v28  ;;  %v3123_v60 = vrot.slane %v2529_v37, 1  ;;  %vm3369_vm11 = vmpackc.low %vm13269_vm14, %vm13269_vm14 }
 0x1cf   : > { %v3121_v6 = vsel %vm17950_vm9, %v3119_v58, %v3120_v4  ;;  %v2523_v7 = vor.u32 %v2521_v10, %v2520_v56  ;;  %v13275_v21 = vpack.c.bf16 %v11746_v23, %v11745_v51  ;;  %v10643_v53 = vcombine.low %v12718_v57, %v3427_v17 }
 0x1d0   : > { %11816 = vmatmul.mubr.msk.bf16.gmra.mrb[100].mxu0 %vm13249_vm3, %v3121_v6  ;;  %v1782_v16 = vand.u32 15, %v1396_v47  ;;  %vm17952_vm8 = vsmask.f32 256  ;;  %v13286_v58 = vpack.c.bf16 %v1234_v8, %v1231_v19  ;;  %v3124_v37 = vsel %vm17950_vm9, %v3122_v63, %v3123_v60 }
 0x1d1   : > { %17951 = vst [vmem:[#allocation40_spill] sm:$0xff] %v13275_v21  ;;  %v13284_v41 = vsel %vm17952_vm8, %v2520_v56, %v2531_v43  ;;  %v1398_v6 = vadd.s32 440, %v12683_v40  ;;  %vm17955_vm3 = vmmov %vm17952_vm8  ;;  %v2542_v28 = vshrl.u32 %v13275_v21, 16  ;;  %11819 = vmatprep.mubr.msk.bf16.mxu0 %vm13256_vm0, %v3124_v37  ;;  %v10644_v8 = vcombine.low %v12718_v57, %v3429_v20 }
 0x1d2   : > { %17953 = vst [vmem:[#allocation41_spill] sm:$0xff] %v13284_v41  ;;  %17954 = vst [vmem:[#allocation42_spill] sm:$0xff] %v13286_v58  ;;  %v13295_v23 = vsel %vm17955_vm3, %v13209_v62, %v2523_v7  ;;  %vm13301_vm8 = vcmp.eq.s32.totalorder %v1768_v44, 15  ;;  %v1400_v17 = vadd.s32 456, %v12683_v40  ;;  %v2545_v47 = vshll.u32 %v13275_v21, 16  ;;  %v11749_v44 = vpop.f32.mrb[48].mxu0 }
 0x1d3   : > { %17956 = vst [vmem:[#allocation43_spill] sm:$0xff] %v13295_v23  ;;  %v2534_v51 = vshrl.u32 %v13286_v58, 16  ;;  %v2537_v62 = vshll.u32 %v13286_v58, 16  ;;  %v3431_v4 = vsel %vm3367_vm5, 65537, %v17892_v54  ;;  %vm13315_vm3 = vcmp.eq.s16.totalorder %v10643_v53, 0  ;;  %vm3371_vm10 = vmpackc.low %vm13301_vm8, %vm13301_vm8  ;;  %v1247_v53 = vpop.f32.mrb[49].mxu0 }
 0x1d4   : > { %v17959_v56 = vmov 0  ;;  %v3433_v19 = vsel %vm3369_vm11, 65537, %v17892_v54  ;;  %vm13320_vm14 = vcmp.eq.s32.totalorder %v1782_v16, 15  ;;  %v13324_v15 = vrot.slane %v2542_v28, 7  ;;  %v11750_v21 = vpop.f32.mrb[50].mxu0  ;;  %vm17967_vm11 = vmmov %vm17950_vm9 }
 0x1d5   : > { %v17960_v56 = vsel %vm13315_vm3, 4294967295, %v17959_v56  ;;  %v3125_v43 = vor.u32 %v3123_v60, %v2526_v9  ;;  %v3126_v63 = vrot.slane %v2537_v62, 1  ;;  %v1796_v25 = vand.u32 15, %v1398_v6  ;;  %v1250_v6 = vpop.f32.mrb[51].mxu0  ;;  %vm3373_vm9 = vmpackc.low %vm13320_vm14, %vm13320_vm14 }
 0x1d6   : > { %17961 = vst [vmem:[#allocation44_spill] sm:$0xff] %v17960_v56  ;;  %v2536_v7 = vrot.slane %v2534_v51, 7  ;;  %vm13329_vm5 = vcmp.eq.s16.totalorder %v10644_v8, 0  ;;  %v17964_v37 = vmov 0  ;;  %v10645_v16 = vcombine.low %v12718_v57, %v3431_v4 }
 0x1d7   : > { %v17965_v37 = vsel %vm13329_vm5, 4294967295, %v17964_v37  ;;  %v1810_v13 = vand.u32 15, %v1400_v17  ;;  %v2547_v45 = vor.u32 %v2545_v47, %v13324_v15  ;;  %v3127_v9 = vsel %vm17967_vm11, %v3125_v43, %v3126_v63 }
 0x1d8   : > { %17966 = vst [vmem:[#allocation45_spill] sm:$0xff] %v17965_v37  ;;  %v3128_v60 = vor.u32 %v3126_v63, %v2534_v51  ;;  %v3129_v58 = vrot.slane %v2545_v47, 1  ;;  %v2539_v41 = vor.u32 %v2537_v62, %v2536_v7  ;;  %v13336_v23 = vpack.c.bf16 %v11750_v21, %v11749_v44  ;;  %11820 = vmatmul.mubr.msk.bf16.gmra.mrb[104].mxu0 %vm13315_vm3, %v3127_v9 }
 0x1d9   : > { %v10646_v8 = vcombine.low %v12718_v57, %v3433_v19  ;;  %v3435_v17 = vsel %vm3371_vm10, 65537, %v17892_v54  ;;  %vm17969_vm11 = vsmask.f32 256  ;;  %v13353_v47 = vpack.c.bf16 %v1250_v6, %v1247_v53 }
 0x1da   : > { %17968 = vst [vmem:[#allocation46_spill] sm:$0xff] %v13336_v23  ;;  %v13351_v21 = vsel %vm17969_vm11, %v2536_v7, %v2547_v45  ;;  %vm17972_vm0 = vsmask.f32 7424  ;;  %vm13356_vm3 = vcmp.eq.s32.totalorder %v1796_v25, 15  ;;  %vm17975_vm7 = vmmov %vm17969_vm11  ;;  %v2558_v4 = vshrl.u32 %v13336_v23, 16  ;;  %v11753_v25 = vpop.f32.mrb[52].mxu0 }
 0x1db   : > { %17970 = vst [vmem:[#allocation47_spill] sm:$0xff] %v13351_v21  ;;  %17971 = vst [vmem:[#allocation48_spill] sm:$0xff] %v13353_v47  ;;  %v3130_v51 = vsel %vm17972_vm0, %v3128_v60, %v3129_v58  ;;  %v13362_v10 = vsel %vm17975_vm7, %v13262_v11, %v2539_v41  ;;  %vm13367_vm8 = vcmp.eq.s32.totalorder %v1810_v13, 15  ;;  %v2561_v19 = vshll.u32 %v13336_v23, 16  ;;  %v1263_v60 = vpop.f32.mrb[53].mxu0 }
 0x1dc   : > { %17976 = vst [vmem:[#allocation49_spill] sm:$0xff] %v13362_v10  ;;  %11823 = vmatprep.mubr.msk.bf16.mxu0 %vm13329_vm5, %v3130_v51  ;;  %v2550_v20 = vshrl.u32 %v13353_v47, 16  ;;  %v2553_v44 = vshll.u32 %v13353_v47, 16  ;;  %v3437_v43 = vsel %vm3373_vm9, 65537, %v17892_v54  ;;  %vm13375_vm0 = vcmp.eq.s16.totalorder %v10645_v16, 0  ;;  %vm3375_vm14 = vmpackc.low %vm13356_vm3, %vm13356_vm3  ;;  %v11754_v37 = vpop.f32.mrb[54].mxu0 }
 0x1dd   : > { %v17979_v41 = vmov 0  ;;  %vm13379_vm7 = vcmp.eq.s16.totalorder %v10646_v8, 0  ;;  %v17982_v11 = vmov 0  ;;  %v10647_v13 = vcombine.low %v12718_v57, %v3435_v17  ;;  %vm3377_vm10 = vmpackc.low %vm13367_vm8, %vm13367_vm8  ;;  %v1266_v21 = vpop.f32.mrb[55].mxu0 }
 0x1de   : > { %v17980_v41 = vsel %vm13375_vm0, 4294967295, %v17979_v41  ;;  %v17983_v11 = vsel %vm13379_vm7, 4294967295, %v17982_v11  ;;  %v13387_v63 = vrot.slane %v2558_v4, 7  ;;  %v3131_v7 = vor.u32 %v3129_v58, %v2542_v28 }
 0x1df   : > { %17981 = vst [vmem:[#allocation50_spill] sm:$0xff] %v17980_v41  ;;  %17984 = vst [vmem:[#allocation51_spill] sm:$0xff] %v17983_v11  ;;  %v3132_v53 = vrot.slane %v2553_v44, 1  ;;  %v1402_v16 = vadd.s32 472, %v12683_v40  ;;  %v2552_v9 = vrot.slane %v2550_v20, 7  ;;  %v10648_v6 = vcombine.low %v12718_v57, %v3437_v43 }
 0x1e0   : > { %v1411_v8 = vand.u32 15, %v12683_v40  ;;  %v1404_v17 = vadd.s32 488, %v12683_v40  ;;  %v2563_v51 = vor.u32 %v2561_v19, %v13387_v63  ;;  %vm17985_vm9 = vsmask.f32 7424 }
 0x1e1   : > { %v3133_v58 = vsel %vm17985_vm9, %v3131_v7, %v3132_v53  ;;  %v3134_v28 = vor.u32 %v3132_v53, %v2550_v20  ;;  %v3135_v56 = vrot.slane %v2561_v19, 1  ;;  %v2555_v23 = vor.u32 %v2553_v44, %v2552_v9 }
 0x1e2   : > { %v13398_v47 = vpack.c.bf16 %v11754_v37, %v11753_v25  ;;  %11824 = vmatmul.mubr.msk.bf16.gmra.mrb[108].mxu0 %vm13375_vm0, %v3133_v58  ;;  %v3439_v43 = vsel %vm3375_vm14, 65537, %v17892_v54  ;;  %v3441_v19 = vsel %vm3377_vm10, 65537, %v17892_v54  ;;  %v13415_v37 = vsel %vm17969_vm11, %v2552_v9, %v2563_v51  ;;  %vm17989_vm0 = vmmov %vm17969_vm11 }
 0x1e3   : > { %17987 = vst [vmem:[#allocation53_spill] sm:$0xff] %v13415_v37  ;;  %v13417_v20 = vpack.c.bf16 %v1266_v21, %v1263_v60  ;;  %v3136_v44 = vsel %vm17985_vm9, %v3134_v28, %v3135_v56  ;;  %v1824_v25 = vand.u32 15, %v1402_v16  ;;  %v13422_v62 = vsel %vm17989_vm0, %v13324_v15, %v2555_v23 }
 0x1e4   : > { %17986 = vst [vmem:[#allocation52_spill] sm:$0xff] %v13398_v47  ;;  %17990 = vst [vmem:[#allocation55_spill] sm:$0xff] %v13422_v62  ;;  %v2574_v7 = vshrl.u32 %v13398_v47, 16  ;;  %11827 = vmatprep.mubr.msk.bf16.mxu0 %vm13379_vm7, %v3136_v44  ;;  %vm13427_vm3 = vcmp.eq.s16.totalorder %v10647_v13, 0  ;;  %v17991_v45 = vmov 0  ;;  %v1838_v53 = vand.u32 15, %v1404_v17 }
 0x1e5   : > { %17988 = vst [vmem:[#allocation54_spill] sm:$0xff] %v13417_v20  ;;  %v17992_v45 = vsel %vm13427_vm3, 4294967295, %v17991_v45  ;;  %v2577_v21 = vshll.u32 %v13398_v47, 16  ;;  %v2566_v9 = vshrl.u32 %v13417_v20, 16  ;;  %v2569_v16 = vshll.u32 %v13417_v20, 16  ;;  %v11757_v17 = vpop.f32.mrb[56].mxu0  ;;  %vm18007_vm7 = vmmov %vm17985_vm9 }
 0x1e6   : > { %17993 = vst [vmem:[#allocation56_spill] sm:$0xff] %v17992_v45  ;;  %vm13434_vm8 = vcmp.eq.s32.totalorder %v1411_v8, 0  ;;  %vm13438_vm0 = vcmp.eq.s16.totalorder %v10648_v6, 0  ;;  %v17996_v23 = vmov 0  ;;  %v10649_v15 = vcombine.low %v12718_v57, %v3439_v43  ;;  %v1279_v11 = vpop.f32.mrb[57].mxu0 }
 0x1e7   : > { %v17997_v23 = vsel %vm13438_vm0, 4294967295, %v17996_v23  ;;  %v10650_v13 = vcombine.low %v12718_v57, %v3441_v19  ;;  %v13444_v51 = vrot.slane %v2574_v7, 7  ;;  %v3137_v58 = vor.u32 %v3135_v56, %v2558_v4  ;;  %v11758_v4 = vpop.f32.mrb[58].mxu0 }
 0x1e8   : > { %17998 = vst [vmem:[#allocation57_spill] sm:$0xff] %v17997_v23  ;;  %v3138_v28 = vrot.slane %v2569_v16, 1  ;;  %vm13446_vm14 = vcmp.eq.s32.totalorder %v1824_v25, 15  ;;  %v2568_v8 = vrot.slane %v2566_v9, 7  ;;  %vm13453_vm11 = vcmp.eq.s32.totalorder %v1838_v53, 15  ;;  %v1282_v62 = vpop.f32.mrb[59].mxu0 }
 0x1e9   : > { %v1345_v43 = vadd.s32 16, %v12683_v40  ;;  %v1406_v19 = vadd.s32 504, %v12683_v40  ;;  %v2579_v56 = vor.u32 %v2577_v21, %v13444_v51  ;;  %v3141_v47 = vrot.slane %v2577_v21, 1  ;;  %vm3379_vm5 = vmpackc.low %vm13446_vm14, %vm13446_vm14 }
 0x1ea   : > { %v3139_v25 = vsel %vm17985_vm9, %v3137_v58, %v3138_v28  ;;  %v3140_v41 = vor.u32 %v3138_v28, %v2566_v9  ;;  %v2571_v20 = vor.u32 %v2569_v16, %v2568_v8  ;;  %v13461_v37 = vpack.c.bf16 %v11758_v4, %v11757_v17  ;;  %vm18008_vm9 = vmpackc.low %vm13434_vm8, %vm13434_vm8  ;;  %v11761_v28 = vpop.f32.mrb[60].mxu0 }
 0x1eb   : > { %11828 = vmatmul.mubr.msk.bf16.gmra.mrb[112].mxu0 %vm13427_vm3, %v3139_v25  ;;  %vm18004_vm10 = vsmask.f32 256  ;;  %v13468_v10 = vpack.c.bf16 %v1282_v62, %v1279_v11  ;;  %v2836_v21 = vsel %vm18008_vm9, 65537, %v17892_v54  ;;  %vm3381_vm8 = vmpackc.low %vm13453_vm11, %vm13453_vm11  ;;  %v1425_v62 = vand.u32 15, %v1345_v43 }
 0x1ec   : > { %18003 = vst [vmem:[#allocation58_spill] sm:$0xff] %v13461_v37  ;;  %v13466_v53 = vsel %vm18004_vm10, %v2568_v8, %v2579_v56  ;;  %v3142_v18 = vsel %vm18007_vm7, %v3140_v41, %v3141_v47  ;;  %vm18009_vm3 = vmmov %vm18004_vm10  ;;  %v2590_v11 = vshrl.u32 %v13461_v37, 16  ;;  %vm13487_vm7 = vcmp.eq.s16.totalorder %v10649_v15, 0 }
 0x1ed   : > { %18005 = vst [vmem:[#allocation59_spill] sm:$0xff] %v13466_v53  ;;  %18006 = vst [vmem:[#allocation60_spill] sm:$0xff] %v13468_v10  ;;  %v13482_v9 = vsel %vm18009_vm3, %v13387_v63, %v2571_v20  ;;  %11831 = vmatprep.mubr.msk.bf16.mxu0 %vm13438_vm0, %v3142_v18  ;;  %v18011_v41 = vmov 0  ;;  %v1852_v16 = vand.u32 15, %v1406_v19  ;;  %v2593_v60 = vshll.u32 %v13461_v37, 16  ;;  %v1295_v19 = vpop.f32.mrb[61].mxu0 }
 0x1ee   : > { %18010 = vst [vmem:[#allocation61_spill] sm:$0xff] %v13482_v9  ;;  %v18012_v41 = vsel %vm13487_vm7, 4294967295, %v18011_v41  ;;  %v2582_v63 = vshrl.u32 %v13468_v10, 16  ;;  %v2585_v20 = vshll.u32 %v13468_v10, 16  ;;  %vm13497_vm3 = vcmp.eq.s16.totalorder %v10650_v13, 0 }
 0x1ef   : > { %18013 = vst [vmem:[#allocation62_spill] sm:$0xff] %v18012_v41  ;;  %v18014_v17 = vmov 0  ;;  %v10590_v18 = vcombine.low %v2836_v21, %v12718_v57  ;;  %v3443_v15 = vsel %vm3379_vm5, 65537, %v17892_v54  ;;  %v2592_v58 = vrot.slane %v2590_v11, 7  ;;  %v11762_v21 = vpop.f32.mrb[62].mxu0 }
 0x1f0   : > { %v18015_v17 = vsel %vm13497_vm3, 4294967295, %v18014_v17  ;;  %v3143_v44 = vor.u32 %v3141_v47, %v2574_v7  ;;  %v3144_v8 = vrot.slane %v2585_v20, 1  ;;  %v3445_v6 = vsel %vm3381_vm8, 65537, %v17892_v54  ;;  %v1298_v10 = vpop.f32.mrb[63].mxu0 }
 0x1f1   : > { %18016 = vst [vmem:[#allocation63_spill] sm:$0xff] %v18015_v17  ;;  %v2584_v43 = vrot.slane %v2582_v63, 7  ;;  %vm13504_vm10 = vcmp.eq.s32.totalorder %v1425_v62, 0  ;;  %vm13508_vm11 = vcmp.eq.s32.totalorder %v1852_v16, 15  ;;  %v1347_v4 = vadd.s32 32, %v12683_v40 }
 0x1f2   : > { %v2595_v25 = vor.u32 %v2593_v60, %v2592_v58  ;;  %vm18021_vm5 = vsmask.f32 7424  ;;  %v3146_v47 = vor.u32 %v3144_v8, %v2582_v63  ;;  %v3147_v7 = vrot.slane %v2593_v60, 1 }
 0x1f3   : > { %v3145_v23 = vsel %vm18021_vm5, %v3143_v44, %v3144_v8  ;;  %v2587_v45 = vor.u32 %v2585_v20, %v2584_v43  ;;  %v13514_v37 = vpack.c.bf16 %v11762_v21, %v11761_v28  ;;  %v10651_v62 = vcombine.low %v12718_v57, %v3443_v15  ;;  %vm18023_vm8 = vmmov %vm18021_vm5 }
 0x1f4   : > { %11832 = vmatmul.mubr.msk.bf16.gmra.mrb[116].mxu0 %vm13487_vm7, %v3145_v23  ;;  %v10652_v16 = vcombine.low %v12718_v57, %v3445_v6  ;;  %vm18022_vm9 = vsmask.f32 256  ;;  %v13523_v9 = vpack.c.bf16 %v1298_v10, %v1295_v19  ;;  %v3148_v44 = vsel %vm18023_vm8, %v3146_v47, %v3147_v7  ;;  %vm2774_vm5 = vmpackc.low %vm13504_vm10, %vm13504_vm10 }
 0x1f5   : > { %v13521_v53 = vsel %vm18022_vm9, %v2584_v43, %v2595_v25  ;;  %vm18024_vm14 = vmmov %vm18022_vm9  ;;  %v2353_v23 = vshrl.u32 %v13514_v37, 16  ;;  %11835 = vmatprep.mubr.msk.bf16.mxu0 %vm13497_vm3, %v3148_v44  ;;  %v1439_v10 = vand.u32 15, %v1347_v4  ;;  %v2605_v63 = vshll.u32 %v13514_v37, 16 }
 0x1f6   : > { %v13531_v60 = vsel %vm18024_vm14, %v13444_v51, %v2587_v45  ;;  %vm3383_vm9 = vmpackc.low %vm13508_vm11, %vm13508_vm11  ;;  %v2598_v20 = vshrl.u32 %v13523_v9, 16  ;;  %v2601_v15 = vshll.u32 %v13523_v9, 16  ;;  %vm18026_vm8 = vcmask 1040384  }
 0x1f7   : > { %vm18025_vm10 = vmmov %vm18024_vm14  ;;  %v18027_v45 = vmov 0  ;;  %vm13548_vm7 = vcmp.eq.s16.totalorder %v10590_v18, 0  ;;  %v18030_v51 = vmov 0  ;;  %v2355_v28 = vrot.slane %v2353_v23, 7 }
 0x1f8   : > { %vm13544_vm14 = vmand %vm18026_vm8, %vm18025_vm10  ;;  %v18031_v51 = vsel %vm13548_vm7, 4294967295, %v18030_v51  ;;  %vm13552_vm3 = vcmp.eq.s16.totalorder %v10651_v62, 0  ;;  %v18033_v8 = vmov 0  ;;  %vm13556_vm11 = vcmp.eq.s16.totalorder %v10652_v16, 0 }
 0x1f9   : > { %v18028_v45 = vsel %vm13544_vm14, 4294967295, %v18027_v45  ;;  %18032 = vst [vmem:[#allocation65_spill] sm:$0xff] %v18031_v51  ;;  %v18034_v8 = vsel %vm13552_vm3, 4294967295, %v18033_v8  ;;  %v18036_v6 = vmov 0  ;;  %v2838_v43 = vsel %vm2774_vm5, 65537, %v17892_v54 }
 0x1fa   : > { %18029 = vst [vmem:[#allocation64_spill] sm:$0xff] %v18028_v45  ;;  %18035 = vst [vmem:[#allocation66_spill] sm:$0xff] %v18034_v8  ;;  %v18037_v6 = vsel %vm13556_vm11, 4294967295, %v18036_v6  ;;  %v3149_v19 = vor.u32 %v3147_v7, %v2590_v11  ;;  %v3150_v56 = vrot.slane %v2601_v15, 1  ;;  %v3447_v13 = vsel %vm3383_vm9, 65537, %v17892_v54 }
 0x1fb   : > { %18038 = vst [vmem:[#allocation67_spill] sm:$0xff] %v18037_v6  ;;  %v2600_v4 = vrot.slane %v2598_v20, 7  ;;  %v2643_v18 = vsel %vm13544_vm14, %v2355_v28, %v12758_v26  ;;  %vm13565_vm10 = vcmp.eq.s32.totalorder %v1439_v10, 0  ;;  %v1349_v21 = vadd.s32 48, %v12683_v40 }
 0x1fc   : > { %v2607_v47 = vor.u32 %v2605_v63, %v2355_v28  ;;  %10680 = vmatmul.mubr.msk.bf16.vlgmr.msra.gmra.mrb[0].mxu1 %vm13548_vm7, %v2643_v18  ;;  %vm18041_vm5 = vsmask.f32 7424  ;;  %v3152_v7 = vor.u32 %v3150_v56, %v2598_v20  ;;  %v3153_v62 = vrot.slane %v2605_v63, 1 }
 0x1fd   : > { %v3151_v11 = vsel %vm18041_vm5, %v3149_v19, %v3150_v56  ;;  %v2603_v16 = vor.u32 %v2601_v15, %v2600_v4  ;;  %3798 = vmatprep.mubr.bf16.mxu1 %v12721_v59  ;;  %v10591_v26 = vcombine.low %v2838_v43, %v12718_v57  ;;  %vm18042_vm9 = vsmask.f32 256  ;;  %vm18043_vm8 = vmmov %vm18041_vm5 }
 0x1fe   : > { %11836 = vmatmul.mubr.msk.bf16.gmra.mrb[120].mxu0 %vm13552_vm3, %v3151_v11  ;;  %v13578_v44 = vsel %vm18042_vm9, %v2600_v4, %v2607_v47  ;;  %v3154_v10 = vsel %vm18043_vm8, %v3152_v7, %v3153_v62  ;;  %vm3189_vm14 = vcmask 1047552   ;;  %v10653_v28 = vcombine.low %v12718_v57, %v3447_v13  ;;  %vm18044_vm7 = vmmov %vm18042_vm9 }
 0x1ff   : > { %v13583_v19 = vsel %vm18044_vm7, %v2592_v58, %v2603_v16  ;;  %11839 = vmatprep.mubr.msk.bf16.mxu0 %vm13556_vm11, %v3154_v10  ;;  %vm2776_vm5 = vmpackc.low %vm13565_vm10, %vm13565_vm10  ;;  %v3155_v59 = vor.u32 %v3153_v62, %v2353_v23  ;;  %v1453_v63 = vand.u32 15, %v1349_v21  ;;  %vm13590_vm3 = vcmp.eq.s16.totalorder %v10591_v26, 0 }
 0x200   : > { %v18045_v20 = vmov 0  ;;  %vm18048_vm9 = vmmov %vm18043_vm8  ;;  %v18049_v15 = vmov 0  ;;  %vm13599_vm7 = vcmp.eq.s16.totalorder %v10653_v28, 0  ;;  %v18052_v58 = vmov 0 }
 0x201   : > { %v18046_v20 = vsel %vm13590_vm3, 4294967295, %v18045_v20  ;;  %vm13595_vm8 = vmand %vm3189_vm14, %vm18048_vm9  ;;  %v18053_v58 = vsel %vm13599_vm7, 4294967295, %v18052_v58  ;;  %v2840_v43 = vsel %vm2776_vm5, 65537, %v17892_v54  ;;  %vm2181_vm10 = vcmp.eq.s32.totalorder %v1453_v63, 0 }
 0x202   : > { %18047 = vst [vmem:[#allocation68_spill] sm:$0xff] %v18046_v20  ;;  %v18050_v15 = vsel %vm13595_vm8, 4294967295, %v18049_v15  ;;  %18054 = vst [vmem:[#allocation70_spill] sm:$0xff] %v18053_v58  ;;  %v3191_v23 = vsel %vm13595_vm8, %v3155_v59, %v12742_v12  ;;  %v1351_v56 = vadd.s32 64, %v12683_v40  ;;  %v10592_v13 = vcombine.low %v2840_v43, %v12718_v57 }
 0x203   : > { %18051 = vst [vmem:[#allocation69_spill] sm:$0xff] %v18050_v15  ;;  %vm2778_vm14 = vmpackc.low %vm2181_vm10, %vm2181_vm10  ;;  %v18055_v18 = vmov 0  ;;  %v1353_v12 = vadd.s32 80, %v12683_v40  ;;  %v18058_v21 = vmov 0  ;;  %v18061_v7 = vmov 0 }
 0x204   : > { %10682 = vmatmul.mubr.msk.bf16.gmra.mrb[4].mxu1 %vm13590_vm3, %v12767_v31  ;;  %v1467_v4 = vand.u32 15, %v1351_v56  ;;  %vm13615_vm5 = vcmp.eq.s16.totalorder %v10592_v13, 0  ;;  %v2842_v31 = vsel %vm2778_vm14, 65537, %v17892_v54  ;;  %v18064_v26 = vmov 0 }
 0x205   : > { %3806 = vmatprep.mubr.bf16.mxu1 %v12769_v22  ;;  %v18056_v18 = vsel %vm13615_vm5, 4294967295, %v18055_v18  ;;  %v10593_v22 = vcombine.low %v2842_v31, %v12718_v57  ;;  %v1481_v25 = vand.u32 15, %v1353_v12  ;;  %v18067_v59 = vmov 0 }
 0x206   : > { %11840 = vmatmul.mubr.msk.bf16.gmra.mrb[124].mxu0 %vm13599_vm7, %v3191_v23  ;;  %18057 = vst [vmem:[#allocation71_spill] sm:$0xff] %v18056_v18  ;;  %vm2183_vm9 = vcmp.eq.s32.totalorder %v1467_v4, 0  ;;  %v18070_v23 = vmov 0  ;;  %v18073_v4 = vmov 0  ;;  %v18138_v20 = vmov 0 }
 0x207   : > { %vm2780_vm3 = vmpackc.low %vm2183_vm9, %vm2183_vm9  ;;  %vm13626_vm10 = vcmp.eq.s16.totalorder %v10593_v22, 0  ;;  %vm2185_vm14 = vcmp.eq.s32.totalorder %v1481_v25, 0  ;;  %v18076_v22 = vmov 0  ;;  %v18146_v51 = vmov 0 }
 0x208   : > { %v18059_v21 = vsel %vm13626_vm10, 4294967295, %v18058_v21  ;;  %v2844_v47 = vsel %vm2780_vm3, 65537, %v17892_v54  ;;  %v18155_v41 = vmov 0 }
 0x209   : > { %18060 = vst [vmem:[#allocation72_spill] sm:$0xff] %v18059_v21 }
 0x20c   : > { %10684 = vmatmul.mubr.msk.bf16.gmra.mrb[8].mxu1 %vm13615_vm5, %v12819_v5  ;;  %v1355_v5 = vadd.s32 96, %v12683_v40  ;;  %vm2782_vm5 = vmpackc.low %vm2185_vm14, %vm2185_vm14 }
 0x20d   : > { %3814 = vmatprep.mubr.bf16.mxu1 %v12760_v27  ;;  %v10594_v27 = vcombine.low %v2844_v47, %v12718_v57  ;;  %v2846_v62 = vsel %vm2782_vm5, 65537, %v17892_v54 }
 0x20e   : > { %v1495_v11 = vand.u32 15, %v1355_v5  ;;  %v18079_v5 = vmov 0 }
 0x20f   : > { %vm13637_vm9 = vcmp.eq.s16.totalorder %v10594_v27, 0 }
 0x210   : > { %v18062_v7 = vsel %vm13637_vm9, 4294967295, %v18061_v7  ;;  %vm2187_vm3 = vcmp.eq.s32.totalorder %v1495_v11, 0 }
 0x211   : > { %18063 = vst [vmem:[#allocation73_spill] sm:$0xff] %v18062_v7 }
 0x214   : > { %10686 = vmatmul.mubr.msk.bf16.gmra.mrb[12].mxu1 %vm13626_vm10, %v12813_v1  ;;  %v1357_v1 = vadd.s32 112, %v12683_v40  ;;  %vm2784_vm10 = vmpackc.low %vm2187_vm3, %vm2187_vm3 }
 0x215   : > { %3822 = vmatprep.mubr.bf16.mxu1 %v12815_v2  ;;  %v10595_v2 = vcombine.low %v2846_v62, %v12718_v57  ;;  %v2848_v10 = vsel %vm2784_vm10, 65537, %v17892_v54  ;;  %v18082_v62 = vmov 0 }
 0x216   : > { %v1509_v16 = vand.u32 15, %v1357_v1 }
 0x217   : > { %vm13648_vm14 = vcmp.eq.s16.totalorder %v10595_v2, 0 }
 0x218   : > { %v18065_v26 = vsel %vm13648_vm14, 4294967295, %v18064_v26  ;;  %vm2189_vm5 = vcmp.eq.s32.totalorder %v1509_v16, 0  ;;  %v18085_v16 = vmov 0 }
 0x219   : > { %18066 = vst [vmem:[#allocation74_spill] sm:$0xff] %v18065_v26  ;;  %v18133_v26 = vmov 0 }
 0x21c   : > { %10688 = vmatmul.mubr.msk.bf16.gmra.mrb[16].mxu1 %vm13637_vm9, %v12870_v50  ;;  %v1359_v50 = vadd.s32 128, %v12683_v40  ;;  %vm2786_vm9 = vmpackc.low %vm2189_vm5, %vm2189_vm5 }
 0x21d   : > { %3830 = vmatprep.mubr.bf16.mxu1 %v12803_v61  ;;  %v10596_v61 = vcombine.low %v2848_v10, %v12718_v57  ;;  %v2850_v63 = vsel %vm2786_vm9, 65537, %v17892_v54 }
 0x21e   : > { %v1523_v28 = vand.u32 15, %v1359_v50  ;;  %v12224_v50 = vld [vmem:[%s17486_s5 + $0x80] sm:$0xff]  }
 0x21f   : > { %vm13659_vm3 = vcmp.eq.s16.totalorder %v10596_v61, 0  ;;  %11843 = vmatprep.subr.bf16.mxu1 %v12224_v50 }
 0x220   : > { %v18068_v59 = vsel %vm13659_vm3, 4294967295, %v18067_v59  ;;  %vm2191_vm10 = vcmp.eq.s32.totalorder %v1523_v28, 0  ;;  %11844 = vmatpush3.bf16.msra.mxu1 %v12224_v50  ;;  %v12225_v28 = vld [vmem:[%s17486_s5 + $0x88] sm:$0xff]  }
 0x221   : > { %18069 = vst [vmem:[#allocation75_spill] sm:$0xff] %v18068_v59  ;;  %11845 = vmatprep.subr.bf16.mxu1 %v12225_v28 }
 0x224   : > { %10690 = vmatmul.mubr.msk.bf16.gmra.mrb[20].mxu1 %vm13648_vm14, %v12860_v46  ;;  %v1361_v46 = vadd.s32 144, %v12683_v40  ;;  %vm2788_vm14 = vmpackc.low %vm2191_vm10, %vm2191_vm10 }
 0x225   : > { %3838 = vmatprep.mubr.bf16.mxu1 %v12862_v48  ;;  %v10597_v48 = vcombine.low %v2850_v63, %v12718_v57  ;;  %v2852_v56 = vsel %vm2788_vm14, 65537, %v17892_v54  ;;  %11846 = vmatpush3.bf16.msra.mxu1 %v12225_v28 }
 0x226   : > { %v1537_v43 = vand.u32 15, %v1361_v46 }
 0x227   : > { %vm13670_vm5 = vcmp.eq.s16.totalorder %v10597_v48, 0  ;;  %v18090_v48 = vmov 0 }
 0x228   : > { %v18071_v23 = vsel %vm13670_vm5, 4294967295, %v18070_v23  ;;  %vm2193_vm9 = vcmp.eq.s32.totalorder %v1537_v43, 0 }
 0x229   : > { %18072 = vst [vmem:[#allocation76_spill] sm:$0xff] %v18071_v23 }
 0x22c   : > { %10692 = vmatmul.mubr.msk.bf16.gmra.mrb[24].mxu1 %vm13659_vm3, %v12925_v34  ;;  %v1363_v34 = vadd.s32 160, %v12683_v40  ;;  %vm2790_vm3 = vmpackc.low %vm2193_vm9, %vm2193_vm9 }
 0x22d   : > { %3846 = vmatprep.mubr.bf16.mxu1 %v12851_v42  ;;  %v10598_v42 = vcombine.low %v2852_v56, %v12718_v57  ;;  %v2854_v31 = vsel %vm2790_vm3, 65537, %v17892_v54  ;;  %v12226_v56 = vld [vmem:[%s17486_s5 + $0x90] sm:$0xff]  }
 0x22e   : > { %v1551_v13 = vand.u32 15, %v1363_v34  ;;  %11847 = vmatprep.subr.bf16.mxu1 %v12226_v56 }
 0x22f   : > { %vm13681_vm10 = vcmp.eq.s16.totalorder %v10598_v42, 0  ;;  %11848 = vmatpush3.bf16.msra.mxu1 %v12226_v56  ;;  %v12231_v42 = vld [vmem:[%s17486_s5 + $0xb8] sm:$0xff]  }
 0x230   : > { %v18074_v4 = vsel %vm13681_vm10, 4294967295, %v18073_v4  ;;  %vm2195_vm14 = vcmp.eq.s32.totalorder %v1551_v13, 0  ;;  %v1375_v13 = vadd.s32 256, %v12683_v40 }
 0x231   : > { %18075 = vst [vmem:[#allocation77_spill] sm:$0xff] %v18074_v4 }
 0x234   : > { %10694 = vmatmul.mubr.msk.bf16.gmra.mrb[28].mxu1 %vm13670_vm5, %v12915_v35  ;;  %v1365_v35 = vadd.s32 176, %v12683_v40  ;;  %vm2792_vm5 = vmpackc.low %vm2195_vm14, %vm2195_vm14 }
 0x235   : > { %3854 = vmatprep.mubr.bf16.mxu1 %v12917_v36  ;;  %v10599_v36 = vcombine.low %v2854_v31, %v12718_v57  ;;  %v2856_v25 = vsel %vm2792_vm5, 65537, %v17892_v54 }
 0x236   : > { %v1565_v12 = vand.u32 15, %v1365_v35  ;;  %v12227_v35 = vld [vmem:[%s17486_s5 + $0x98] sm:$0xff]  }
 0x237   : > { %vm13692_vm9 = vcmp.eq.s16.totalorder %v10599_v36, 0  ;;  %v1635_v36 = vand.u32 15, %v1375_v13  ;;  %11849 = vmatprep.subr.bf16.mxu1 %v12227_v35 }
 0x238   : > { %v18077_v22 = vsel %vm13692_vm9, 4294967295, %v18076_v22  ;;  %vm2197_vm3 = vcmp.eq.s32.totalorder %v1565_v12, 0  ;;  %11850 = vmatpush3.bf16.msra.mxu1 %v12227_v35 }
 0x239   : > { %18078 = vst [vmem:[#allocation78_spill] sm:$0xff] %v18077_v22  ;;  %v18128_v22 = vmov 0 }
 0x23c   : > { %10696 = vmatmul.mubr.msk.bf16.gmra.mrb[32].mxu1 %vm13681_vm10, %v12978_v38  ;;  %v1367_v38 = vadd.s32 192, %v12683_v40  ;;  %vm2794_vm10 = vmpackc.low %vm2197_vm3, %vm2197_vm3 }
 0x23d   : > { %3862 = vmatprep.mubr.bf16.mxu1 %v12906_v29  ;;  %v10600_v29 = vcombine.low %v2856_v25, %v12718_v57  ;;  %v2858_v27 = vsel %vm2794_vm10, 65537, %v17892_v54  ;;  %v18095_v25 = vmov 0 }
 0x23e   : > { %v1579_v47 = vand.u32 15, %v1367_v38 }
 0x23f   : > { %vm13703_vm14 = vcmp.eq.s16.totalorder %v10600_v29, 0  ;;  %v12228_v29 = vld [vmem:[%s17486_s5 + $0xa0] sm:$0xff]  }
 0x240   : > { %v18080_v5 = vsel %vm13703_vm14, 4294967295, %v18079_v5  ;;  %vm2199_vm5 = vcmp.eq.s32.totalorder %v1579_v47, 0  ;;  %11851 = vmatprep.subr.bf16.mxu1 %v12228_v29 }
 0x241   : > { %18081 = vst [vmem:[#allocation79_spill] sm:$0xff] %v18080_v5  ;;  %11852 = vmatpush3.bf16.msra.mxu1 %v12228_v29 }
 0x244   : > { %10698 = vmatmul.mubr.msk.bf16.gmra.mrb[36].mxu1 %vm13692_vm9, %v12971_v32  ;;  %v1369_v32 = vadd.s32 208, %v12683_v40  ;;  %vm2796_vm9 = vmpackc.low %vm2199_vm5, %vm2199_vm5 }
 0x245   : > { %3870 = vmatprep.mubr.bf16.mxu1 %v12973_v33  ;;  %v10601_v33 = vcombine.low %v2858_v27, %v12718_v57  ;;  %v2860_v1 = vsel %vm2796_vm9, 65537, %v17892_v54 }
 0x246   : > { %v1593_v11 = vand.u32 15, %v1369_v32  ;;  %v1377_v32 = vadd.s32 272, %v12683_v40 }
 0x247   : > { %vm13714_vm3 = vcmp.eq.s16.totalorder %v10601_v33, 0  ;;  %v18100_v33 = vld [vmem:[#allocation20_spill] sm:$0xff] }
 0x248   : > { %v18083_v62 = vsel %vm13714_vm3, 4294967295, %v18082_v62  ;;  %vm2201_vm10 = vcmp.eq.s32.totalorder %v1593_v11, 0 }
 0x249   : > { %18084 = vst [vmem:[#allocation80_spill] sm:$0xff] %v18083_v62 }
 0x24c   : > { %10700 = vmatmul.mubr.msk.bf16.gmra.mrb[40].mxu1 %vm13703_vm14, %v13033_v0  ;;  %v1371_v0 = vadd.s32 224, %v12683_v40  ;;  %vm2798_vm14 = vmpackc.low %vm2201_vm10, %vm2201_vm10 }
 0x24d   : > { %3878 = vmatprep.mubr.bf16.mxu1 %v12961_v24  ;;  %v10602_v24 = vcombine.low %v2860_v1, %v12718_v57  ;;  %v2862_v10 = vsel %vm2798_vm14, 65537, %v17892_v54  ;;  %v12229_v1 = vld [vmem:[%s17486_s5 + $0xa8] sm:$0xff]  }
 0x24e   : > { %v1607_v2 = vand.u32 15, %v1371_v0  ;;  %v10603_v61 = vcombine.low %v2862_v10, %v12718_v57  ;;  %v1649_v0 = vand.u32 15, %v1377_v32  ;;  %11853 = vmatprep.subr.bf16.mxu1 %v12229_v1  ;;  %v18111_v32 = vld [vmem:[#allocation31_spill] sm:$0xff] }
 0x24f   : > { %vm13725_vm5 = vcmp.eq.s16.totalorder %v10602_v24, 0  ;;  %11854 = vmatpush3.bf16.msra.mxu1 %v12229_v1 }
 0x250   : > { %v18086_v16 = vsel %vm13725_vm5, 4294967295, %v18085_v16  ;;  %vm13736_vm9 = vcmp.eq.s32.totalorder %v1607_v2, 0  ;;  %vm13753_vm10 = vcmp.eq.s16.totalorder %v10603_v61, 0  ;;  %v18101_v2 = vmov 0  ;;  %v18104_v61 = vld [vmem:[#allocation24_spill] sm:$0xff] }
 0x251   : > { %18087 = vst [vmem:[#allocation81_spill] sm:$0xff] %v18086_v16  ;;  %vm2800_vm14 = vmpackc.low %vm13736_vm9, %vm13736_vm9  ;;  %v18091_v48 = vsel %vm13753_vm10, 4294967295, %v18090_v48 }
 0x252   : > { %18092 = vst [vmem:[#allocation82_spill] sm:$0xff] %v18091_v48  ;;  %v2864_v43 = vsel %vm2800_vm14, 65537, %v17892_v54  ;;  %v18123_v48 = vmov 0 }
 0x253   : > { %v10604_v31 = vcombine.low %v2864_v43, %v12718_v57  ;;  %v18107_v43 = vld [vmem:[#allocation25_spill] sm:$0xff] }
 0x254   : > { %10702 = vmatmul.mubr.msk.bf16.gmra.mrb[44].mxu1 %vm13714_vm3, %v13026_v49  ;;  %v12230_v49 = vld [vmem:[%s17486_s5 + $0xb0] sm:$0xff]  }
 0x255   : > { %3886 = vmatprep.mubr.bf16.mxu1 %v13028_v52  ;;  %v1373_v52 = vadd.s32 240, %v12683_v40  ;;  %11855 = vmatprep.subr.bf16.mxu1 %v12230_v49 }
 0x256   : > { %11856 = vmatpush3.bf16.msra.mxu1 %v12230_v49 }
 0x257   : > { %v1621_v63 = vand.u32 15, %v1373_v52  ;;  %11857 = vmatprep.subr.bf16.mxu1 %v12231_v42 }
 0x259   : > { %vm13768_vm9 = vcmp.eq.s32.totalorder %v1621_v63, 0  ;;  %v1379_v63 = vadd.s32 288, %v12683_v40 }
 0x25a   : > { %vm2802_vm14 = vmpackc.low %vm13768_vm9, %vm13768_vm9  ;;  %vm13800_vm9 = vcmp.eq.s32.totalorder %v1635_v36, 0  ;;  %v18108_v36 = vmov 0  ;;  %11858 = vmatpush3.bf16.msra.mxu1 %v12231_v42  ;;  %v1383_v42 = vadd.s32 320, %v12683_v40 }
 0x25b   : > { %v2866_v38 = vsel %vm2802_vm14, 65537, %v17892_v54  ;;  %vm2804_vm14 = vmpackc.low %vm13800_vm9, %vm13800_vm9  ;;  %vm13832_vm9 = vcmp.eq.s32.totalorder %v1649_v0, 0  ;;  %6470 = vmatprep.subr.bf16.mxu1 %v17892_v54 }
 0x25c   : > { %10704 = vmatmul.mubr.msk.bf16.gmra.mrb[48].mxu1 %vm13725_vm5, %v13086_v55  ;;  %v13749_v55 = vpop.f32.mrb[64].mxu0  ;;  %v10605_v11 = vcombine.low %v2866_v38, %v12718_v57  ;;  %v2868_v50 = vsel %vm2804_vm14, 65537, %v17892_v54  ;;  %vm2806_vm14 = vmpackc.low %vm13832_vm9, %vm13832_vm9 }
 0x25d   : > { %3894 = vmatprep.mubr.bf16.mxu1 %v13011_v30  ;;  %v13751_v46 = vpop.f32.mrb[65].mxu0  ;;  %v10606_v56 = vcombine.low %v2868_v50, %v12718_v57  ;;  %v2870_v29 = vsel %vm2806_vm14, 65537, %v17892_v54 }
 0x25e   : > { %v13757_v30 = vpop.f32.mrb[66].mxu0  ;;  %v10607_v1 = vcombine.low %v2870_v29, %v12718_v57 }
 0x25f   : > { %v13763_v34 = vpop.f32.mrb[67].mxu0 }
 0x260   : > { %vm13869_vm14 = vcmp.eq.s16.totalorder %v10607_v1, 0  ;;  %v18118_v1 = vmov 0 }
 0x264   : > { %10706 = vmatmul.mubr.msk.bf16.gmra.mrb[52].mxu1 %vm13753_vm10, %v13076_v3  ;;  %v13781_v3 = vpop.f32.mrb[68].mxu0  ;;  %vm13785_vm10 = vcmp.eq.s16.totalorder %v10604_v31, 0  ;;  %v1663_v31 = vand.u32 15, %v1379_v63 }
 0x265   : > { %3902 = vmatprep.mubr.bf16.mxu1 %v13078_v14  ;;  %v13783_v12 = vpop.f32.mrb[69].mxu0  ;;  %v18096_v25 = vsel %vm13785_vm10, 4294967295, %v18095_v25 }
 0x266   : > { %18097 = vst [vmem:[#allocation83_spill] sm:$0xff] %v18096_v25  ;;  %v13789_v14 = vpop.f32.mrb[70].mxu0  ;;  %vm2211_vm9 = vcmp.eq.s32.totalorder %v1663_v31, 0  ;;  %v18117_v31 = vld [vmem:[#allocation30_spill] sm:$0xff] }
 0x267   : > { %v13795_v47 = vpop.f32.mrb[71].mxu0  ;;  %vm2808_vm5 = vmpackc.low %vm2211_vm9, %vm2211_vm9 }
 0x268   : > { %v2872_v63 = vsel %vm2808_vm5, 65537, %v17892_v54 }
 0x269   : > { %v10608_v29 = vcombine.low %v2872_v63, %v12718_v57  ;;  %v1385_v63 = vadd.s32 336, %v12683_v40 }
 0x26b   : > { %vm13888_vm5 = vcmp.eq.s16.totalorder %v10608_v29, 0 }
 0x26c   : > { %10708 = vmatmul.mubr.msk.bf16.gmra.mrb[56].mxu1 %vm13785_vm10, %v13139_v39  ;;  %v13813_v39 = vpop.f32.mrb[72].mxu0  ;;  %vm13817_vm10 = vcmp.eq.s16.totalorder %v10605_v11, 0  ;;  %v18112_v11 = vld [vmem:[#allocation23_spill] sm:$0xff]  ;;  %v18119_v1 = vsel %vm13888_vm5, 4294967295, %v18118_v1 }
 0x26d   : > { %3910 = vmatprep.mubr.bf16.mxu1 %v18100_v33  ;;  %v13815_v24 = vpop.f32.mrb[73].mxu0  ;;  %v18102_v2 = vsel %vm13817_vm10, 4294967295, %v18101_v2  ;;  %v1381_v33 = vadd.s32 304, %v12683_v40  ;;  %18120 = vst [vmem:[#allocation31_spill] sm:$0xff] %v18119_v1  ;;  %v18126_v1 = vld [vmem:[#allocation35_spill] sm:$0xff] }
 0x26e   : > { %18103 = vst [vmem:[#allocation20_spill] sm:$0xff] %v18102_v2  ;;  %v13821_v10 = vpop.f32.mrb[74].mxu0  ;;  %v1705_v2 = vand.u32 15, %v1385_v63  ;;  %v18127_v63 = vld [vmem:[#allocation36_spill] sm:$0xff] }
 0x26f   : > { %v13827_v52 = vpop.f32.mrb[75].mxu0  ;;  %v1677_v50 = vand.u32 15, %v1381_v33  ;;  %v1691_v33 = vand.u32 15, %v1383_v42  ;;  %v18122_v42 = vld [vmem:[#allocation28_spill] sm:$0xff] }
 0x270   : > { %v13845_v13 = vpop.f32.mrb[76].mxu0 }
 0x271   : > { %v13847_v35 = vpop.f32.mrb[77].mxu0  ;;  %vm2213_vm9 = vcmp.eq.s32.totalorder %v1677_v50, 0 }
 0x272   : > { %v13853_v38 = vpop.f32.mrb[78].mxu0 }
 0x273   : > { %v13857_v27 = vpop.f32.mrb[79].mxu0 }
 0x274   : > { %10710 = vmatmul.mubr.msk.bf16.gmra.mrb[60].mxu1 %vm13817_vm10, %v18104_v61  ;;  %vm13849_vm10 = vcmp.eq.s16.totalorder %v10606_v56, 0  ;;  %v18113_v61 = vmov 0  ;;  %v18116_v56 = vld [vmem:[#allocation29_spill] sm:$0xff] }
 0x275   : > { %3918 = vmatprep.mubr.bf16.mxu1 %v18107_v43  ;;  %v18109_v36 = vsel %vm13849_vm10, 4294967295, %v18108_v36  ;;  %v18114_v61 = vsel %vm13869_vm14, 4294967295, %v18113_v61 }
 0x276   : > { %18110 = vst [vmem:[#allocation24_spill] sm:$0xff] %v18109_v36  ;;  %18115 = vst [vmem:[#allocation25_spill] sm:$0xff] %v18114_v61  ;;  %v18121_v61 = vld [vmem:[#allocation37_spill] sm:$0xff] }
 0x278   : > { %v13865_v0 = vpop.f32.mrb[80].mxu0 }
 0x279   : > { %v13867_v49 = vpop.f32.mrb[81].mxu0 }
 0x27a   : > { %v13873_v28 = vpop.f32.mrb[82].mxu0 }
 0x27b   : > { %v13876_v43 = vpop.f32.mrb[83].mxu0 }
 0x27c   : > { %10712 = vmatmul.mubr.msk.bf16.gmra.mrb[64].mxu1 %vm13849_vm10, %v18111_v32  ;;  %vm2810_vm10 = vmpackc.low %vm2213_vm9, %vm2213_vm9  ;;  %vm2215_vm9 = vcmp.eq.s32.totalorder %v1691_v33, 0 }
 0x27d   : > { %3926 = vmatprep.mubr.bf16.mxu1 %v18112_v11  ;;  %v2874_v50 = vsel %vm2810_vm10, 65537, %v17892_v54 }
 0x280   : > { %v13884_v32 = vpop.f32.mrb[84].mxu0 }
 0x281   : > { %v13886_v11 = vpop.f32.mrb[85].mxu0 }
 0x282   : > { %v13892_v36 = vpop.f32.mrb[86].mxu0 }
 0x284   : > { %10714 = vmatmul.mubr.msk.bf16.gmra.mrb[68].mxu1 %vm13869_vm14, %v18116_v56  ;;  %v13895_v56 = vpop.f32.mrb[87].mxu0  ;;  %vm2812_vm14 = vmpackc.low %vm2215_vm9, %vm2215_vm9  ;;  %vm2217_vm9 = vcmp.eq.s32.totalorder %v1705_v2, 0 }
 0x285   : > { %3934 = vmatprep.mubr.bf16.mxu1 %v18117_v31  ;;  %v10609_v31 = vcombine.low %v2874_v50, %v12718_v57  ;;  %v1387_v50 = vadd.s32 352, %v12683_v40 }
 0x287   : > { %vm13907_vm10 = vcmp.eq.s16.totalorder %v10609_v31, 0  ;;  %v1719_v62 = vand.u32 15, %v1387_v50  ;;  %v18132_v50 = vld [vmem:[#allocation34_spill] sm:$0xff] }
 0x288   : > { %v13903_v29 = vpop.f32.mrb[88].mxu0  ;;  %v18124_v48 = vsel %vm13907_vm10, 4294967295, %v18123_v48 }
 0x289   : > { %v13905_v25 = vpop.f32.mrb[89].mxu0  ;;  %18125 = vst [vmem:[#allocation23_spill] sm:$0xff] %v18124_v48  ;;  %v18131_v48 = vld [vmem:[#allocation43_spill] sm:$0xff] }
 0x28a   : > { %v13911_v16 = vpop.f32.mrb[90].mxu0 }
 0x28b   : > { %v13914_v33 = vpop.f32.mrb[91].mxu0 }
 0x28c   : > { %10716 = vmatmul.mubr.msk.bf16.gmra.mrb[72].mxu1 %vm13888_vm5, %v18121_v61  ;;  %v2876_v61 = vsel %vm2812_vm14, 65537, %v17892_v54  ;;  %vm2814_vm5 = vmpackc.low %vm2217_vm9, %vm2217_vm9  ;;  %vm2219_vm9 = vcmp.eq.s32.totalorder %v1719_v62, 0 }
 0x28d   : > { %3942 = vmatprep.mubr.bf16.mxu1 %v18122_v42  ;;  %v10610_v42 = vcombine.low %v2876_v61, %v12718_v57  ;;  %v2878_v2 = vsel %vm2814_vm5, 65537, %v17892_v54  ;;  %v1389_v61 = vadd.s32 368, %v12683_v40 }
 0x28f   : > { %vm13926_vm14 = vcmp.eq.s16.totalorder %v10610_v42, 0  ;;  %v1733_v23 = vand.u32 15, %v1389_v61  ;;  %v18137_v61 = vld [vmem:[#allocation42_spill] sm:$0xff] }
 0x290   : > { %v18129_v22 = vsel %vm13926_vm14, 4294967295, %v18128_v22 }
 0x291   : > { %v13922_v31 = vpop.f32.mrb[92].mxu0  ;;  %18130 = vst [vmem:[#allocation29_spill] sm:$0xff] %v18129_v22  ;;  %v18136_v22 = vld [vmem:[#allocation41_spill] sm:$0xff] }
 0x292   : > { %v13924_v5 = vpop.f32.mrb[93].mxu0 }
 0x293   : > { %v13930_v4 = vpop.f32.mrb[94].mxu0 }
 0x294   : > { %10718 = vmatmul.mubr.msk.bf16.gmra.mrb[76].mxu1 %vm13907_vm10, %v18126_v1  ;;  %v13933_v1 = vpop.f32.mrb[95].mxu0  ;;  %vm2816_vm10 = vmpackc.low %vm2219_vm9, %vm2219_vm9  ;;  %vm2221_vm9 = vcmp.eq.s32.totalorder %v1733_v23, 0 }
 0x295   : > { %3950 = vmatprep.mubr.bf16.mxu1 %v18127_v63  ;;  %v10611_v63 = vcombine.low %v2878_v2, %v12718_v57  ;;  %v2880_v62 = vsel %vm2816_vm10, 65537, %v17892_v54  ;;  %v1391_v2 = vadd.s32 384, %v12683_v40 }
 0x297   : > { %vm13945_vm5 = vcmp.eq.s16.totalorder %v10611_v63, 0  ;;  %v1747_v21 = vand.u32 15, %v1391_v2  ;;  %v18143_v2 = vld [vmem:[#allocation40_spill] sm:$0xff] }
 0x298   : > { %v18134_v26 = vsel %vm13945_vm5, 4294967295, %v18133_v26 }
 0x299   : > { %v13941_v42 = vpop.f32.mrb[96].mxu0  ;;  %18135 = vst [vmem:[#allocation30_spill] sm:$0xff] %v18134_v26  ;;  %v18142_v26 = vld [vmem:[#allocation49_spill] sm:$0xff] }
 0x29a   : > { %v13943_v59 = vpop.f32.mrb[97].mxu0 }
 0x29b   : > { %v13949_v7 = vpop.f32.mrb[98].mxu0 }
 0x29c   : > { %10720 = vmatmul.mubr.msk.bf16.gmra.mrb[80].mxu1 %vm13926_vm14, %v18131_v48  ;;  %v13952_v48 = vpop.f32.mrb[99].mxu0  ;;  %vm2818_vm14 = vmpackc.low %vm2221_vm9, %vm2221_vm9  ;;  %vm2223_vm9 = vcmp.eq.s32.totalorder %v1747_v21, 0 }
 0x29d   : > { %3958 = vmatprep.mubr.bf16.mxu1 %v18132_v50  ;;  %v10612_v50 = vcombine.low %v2880_v62, %v12718_v57  ;;  %v2882_v23 = vsel %vm2818_vm14, 65537, %v17892_v54  ;;  %v1393_v62 = vadd.s32 400, %v12683_v40 }
 0x29f   : > { %vm13964_vm10 = vcmp.eq.s16.totalorder %v10612_v50, 0  ;;  %v1761_v15 = vand.u32 15, %v1393_v62  ;;  %v18152_v62 = vld [vmem:[#allocation48_spill] sm:$0xff] }
 0x2a0   : > { %v18139_v20 = vsel %vm13964_vm10, 4294967295, %v18138_v20 }
 0x2a1   : > { %18140 = vst [vmem:[#allocation37_spill] sm:$0xff] %v18139_v20  ;;  %v18151_v20 = vld [vmem:[#allocation47_spill] sm:$0xff] }
 0x2a3   : > { %v13960_v63 = vpop.f32.mrb[100].mxu0 }
 0x2a4   : > { %10722 = vmatmul.mubr.msk.bf16.gmra.mrb[84].mxu1 %vm13945_vm5, %v18136_v22  ;;  %v13962_v18 = vpop.f32.mrb[101].mxu0  ;;  %vm2820_vm5 = vmpackc.low %vm2223_vm9, %vm2223_vm9  ;;  %vm2225_vm9 = vcmp.eq.s32.totalorder %v1761_v15, 0 }
 0x2a5   : > { %3966 = vmatprep.mubr.bf16.mxu1 %v18137_v61  ;;  %v13968_v58 = vpop.f32.mrb[102].mxu0  ;;  %v10613_v61 = vcombine.low %v2882_v23, %v12718_v57  ;;  %v2884_v21 = vsel %vm2820_vm5, 65537, %v17892_v54  ;;  %v1395_v23 = vadd.s32 416, %v12683_v40 }
 0x2a6   : > { %18141 = vst [vmem:[#allocation28_spill] sm:$0xff] %v13968_v58  ;;  %v13971_v22 = vpop.f32.mrb[103].mxu0 }
 0x2a7   : > { %vm13983_vm14 = vcmp.eq.s16.totalorder %v10613_v61, 0  ;;  %v1775_v8 = vand.u32 15, %v1395_v23  ;;  %v18161_v23 = vld [vmem:[#allocation46_spill] sm:$0xff] }
 0x2a8   : > { %v18147_v51 = vsel %vm13983_vm14, 4294967295, %v18146_v51 }
 0x2a9   : > { %18148 = vst [vmem:[#allocation43_spill] sm:$0xff] %v18147_v51  ;;  %v18160_v51 = vld [vmem:[#allocation55_spill] sm:$0xff] }
 0x2ab   : > { %v13979_v50 = vpop.f32.mrb[104].mxu0 }
 0x2ac   : > { %10724 = vmatmul.mubr.msk.bf16.gmra.mrb[88].mxu1 %vm13964_vm10, %v18142_v26  ;;  %18144 = vst [vmem:[#allocation35_spill] sm:$0xff] %v13979_v50  ;;  %v13981_v6 = vpop.f32.mrb[105].mxu0  ;;  %vm2822_vm10 = vmpackc.low %vm2225_vm9, %vm2225_vm9  ;;  %vm2227_vm9 = vcmp.eq.s32.totalorder %v1775_v8, 0  ;;  %v18184_v50 = vmov 0 }
 0x2ad   : > { %3974 = vmatprep.mubr.bf16.mxu1 %v18143_v2  ;;  %18145 = vst [vmem:[#allocation36_spill] sm:$0xff] %v13981_v6  ;;  %v13987_v45 = vpop.f32.mrb[106].mxu0  ;;  %v10614_v2 = vcombine.low %v2884_v21, %v12718_v57  ;;  %v1397_v21 = vadd.s32 432, %v12683_v40 }
 0x2ae   : > { %18149 = vst [vmem:[#allocation34_spill] sm:$0xff] %v13987_v45  ;;  %v13990_v26 = vpop.f32.mrb[107].mxu0 }
 0x2af   : > { %18150 = vst [vmem:[#allocation41_spill] sm:$0xff] %v13990_v26  ;;  %vm14002_vm5 = vcmp.eq.s16.totalorder %v10614_v2, 0 }
 0x2b0   : > { %v18156_v41 = vsel %vm14002_vm5, 4294967295, %v18155_v41 }
 0x2b1   : > { %18157 = vst [vmem:[#allocation40_spill] sm:$0xff] %v18156_v41  ;;  %v18169_v41 = vld [vmem:[#allocation53_spill] sm:$0xff] }
 0x2b4   : > { %10726 = vmatmul.mubr.msk.bf16.gmra.mrb[92].mxu1 %vm13983_vm14, %v18151_v20  ;;  %v2886_v20 = vsel %vm2822_vm10, 65537, %v17892_v54  ;;  %vm2824_vm14 = vmpackc.low %vm2227_vm9, %vm2227_vm9 }
 0x2b5   : > { %3982 = vmatprep.mubr.bf16.mxu1 %v18152_v62  ;;  %v13998_v61 = vpop.f32.mrb[108].mxu0  ;;  %v10615_v62 = vcombine.low %v2886_v20, %v12718_v57  ;;  %v1399_v20 = vadd.s32 448, %v12683_v40 }
 0x2b6   : > { %18153 = vst [vmem:[#allocation42_spill] sm:$0xff] %v13998_v61  ;;  %v14000_v17 = vpop.f32.mrb[109].mxu0  ;;  %v1789_v61 = vand.u32 15, %v1397_v21  ;;  %v18170_v21 = vld [vmem:[#allocation54_spill] sm:$0xff] }
 0x2b7   : > { %18154 = vst [vmem:[#allocation49_spill] sm:$0xff] %v14000_v17  ;;  %v14006_v45 = vpop.f32.mrb[110].mxu0  ;;  %vm14021_vm10 = vcmp.eq.s16.totalorder %v10615_v62, 0  ;;  %v18164_v17 = vmov 0 }
 0x2b8   : > { %18158 = vst [vmem:[#allocation47_spill] sm:$0xff] %v14006_v45  ;;  %v14009_v15 = vpop.f32.mrb[111].mxu0  ;;  %v18165_v17 = vsel %vm14021_vm10, 4294967295, %v18164_v17  ;;  %vm2229_vm9 = vcmp.eq.s32.totalorder %v1789_v61, 0 }
 0x2b9   : > { %18159 = vst [vmem:[#allocation48_spill] sm:$0xff] %v14009_v15  ;;  %18166 = vst [vmem:[#allocation84_spill] sm:$0xff] %v18165_v17  ;;  %v18178_v17 = vld [vmem:[#allocation61_spill] sm:$0xff] }
 0x2bc   : > { %10728 = vmatmul.mubr.msk.bf16.gmra.mrb[96].mxu1 %vm14002_vm5, %v18160_v51  ;;  %v2888_v51 = vsel %vm2824_vm14, 65537, %v17892_v54  ;;  %vm2826_vm5 = vmpackc.low %vm2229_vm9, %vm2229_vm9 }
 0x2bd   : > { %3990 = vmatprep.mubr.bf16.mxu1 %v18161_v23  ;;  %v10616_v23 = vcombine.low %v2888_v51, %v12718_v57 }
 0x2be   : > { %v14017_v2 = vpop.f32.mrb[112].mxu0 }
 0x2bf   : > { %18162 = vst [vmem:[#allocation55_spill] sm:$0xff] %v14017_v2  ;;  %v14019_v45 = vpop.f32.mrb[113].mxu0  ;;  %v1803_v2 = vand.u32 15, %v1399_v20  ;;  %vm14040_vm14 = vcmp.eq.s16.totalorder %v10616_v23, 0  ;;  %v1401_v20 = vadd.s32 464, %v12683_v40 }
 0x2c0   : > { %18163 = vst [vmem:[#allocation46_spill] sm:$0xff] %v14019_v45  ;;  %v14025_v15 = vpop.f32.mrb[114].mxu0  ;;  %v18173_v45 = vmov 0  ;;  %v14061_v23 = vld [vmem:[%s17485_s4] ss:$0 sm:$0xff] }
 0x2c1   : > { %18167 = vst [vmem:[#allocation85_spill] sm:$0xff] %v14025_v15  ;;  %v14028_v8 = vpop.f32.mrb[115].mxu0  ;;  %v18174_v45 = vsel %vm14040_vm14, 4294967295, %v18173_v45  ;;  %vm14052_vm9 = vcmp.eq.s32.totalorder %v1803_v2, 0 }
 0x2c2   : > { %18168 = vst [vmem:[#allocation86_spill] sm:$0xff] %v14028_v8  ;;  %18175 = vst [vmem:[#allocation87_spill] sm:$0xff] %v18174_v45 }
 0x2c4   : > { %10730 = vmatmul.mubr.msk.bf16.gmra.mrb[100].mxu1 %vm14021_vm10, %v18169_v41  ;;  %v2890_v41 = vsel %vm2826_vm5, 65537, %v17892_v54  ;;  %vm2828_vm5 = vmpackc.low %vm14052_vm9, %vm14052_vm9 }
 0x2c5   : > { %3998 = vmatprep.mubr.bf16.mxu1 %v18170_v21  ;;  %v18181_v21 = vld [vmem:[#allocation52_spill] sm:$0xff] }
 0x2c7   : > { %v14036_v62 = vpop.f32.mrb[116].mxu0 }
 0x2c8   : > { %18171 = vst [vmem:[#allocation53_spill] sm:$0xff] %v14036_v62  ;;  %v14038_v15 = vpop.f32.mrb[117].mxu0 }
 0x2c9   : > { %18172 = vst [vmem:[#allocation54_spill] sm:$0xff] %v14038_v15  ;;  %v14044_v8 = vpop.f32.mrb[118].mxu0 }
 0x2ca   : > { %18176 = vst [vmem:[#allocation88_spill] sm:$0xff] %v14044_v8  ;;  %v14047_v61 = vpop.f32.mrb[119].mxu0  ;;  %v10617_v8 = vcombine.low %v2890_v41, %v12718_v57 }
 0x2cb   : > { %18177 = vst [vmem:[#allocation89_spill] sm:$0xff] %v14047_v61  ;;  %v1817_v61 = vand.u32 15, %v1401_v20  ;;  %v1403_v20 = vadd.s32 480, %v12683_v40 }
 0x2cc   : > { %10732 = vmatmul.mubr.msk.bf16.gmra.mrb[104].mxu1 %vm14040_vm14, %v18178_v17  ;;  %vm14072_vm14 = vcmp.eq.s16.totalorder %v10617_v8, 0 }
 0x2cd   : > { %4006 = vmatprep.mubr.bf16.mxu1 %v18181_v21  ;;  %v18185_v50 = vsel %vm14072_vm14, 4294967295, %v18184_v50  ;;  %vm14088_vm9 = vcmp.eq.s32.totalorder %v1817_v61, 0 }
 0x2ce   : > { %18186 = vst [vmem:[#allocation90_spill] sm:$0xff] %v18185_v50 }
 0x2cf   : > { %v3792_v62 = vpop.f32.mrb[0].mxu1 }
 0x2d0   : > { %v3793_v17 = vadd.f32 %v14061_v23, %v3792_v62  ;;  %v3794_v2 = vpop.f32.mrb[1].mxu1  ;;  %v2892_v62 = vsel %vm2828_vm5, 65537, %v17892_v54  ;;  %vm2830_vm5 = vmpackc.low %vm14088_vm9, %vm14088_vm9 }
 0x2d1   : > { %v14068_v45 = vpop.f32.mrb[120].mxu0  ;;  %v3795_v15 = vpop.f32.mrb[2].mxu1 }
 0x2d2   : > { %18182 = vst [vmem:[#allocation61_spill] sm:$0xff] %v14068_v45  ;;  %v14070_v21 = vpop.f32.mrb[121].mxu0  ;;  %v4082_v41 = vadd.f32 %v13751_v46, %v3793_v17  ;;  %v3796_v26 = vadd.f32 %v14061_v23, %v3795_v15  ;;  %v3797_v51 = vpop.f32.mrb[3].mxu1  ;;  %v18192_v46 = vld [vmem:[#allocation60_spill] sm:$0xff]  ;;  %v10618_v15 = vcombine.low %v2892_v62, %v12718_v57  ;;  %v18194_v62 = vmov 0 }
 0x2d3   : > { %18183 = vst [vmem:[#allocation52_spill] sm:$0xff] %v14070_v21  ;;  %v14078_v6 = vpop.f32.mrb[122].mxu0  ;;  %v18189_v21 = vld [vmem:[#allocation59_spill] sm:$0xff] }
 0x2d4   : > { %18187 = vst [vmem:[#allocation91_spill] sm:$0xff] %v14078_v6  ;;  %v14081_v2 = vpop.f32.mrb[123].mxu0  ;;  %v4085_v45 = vadd.f32 %v13763_v34, %v3796_v26  ;;  %10734 = vmatmul.mubr.msk.bf16.gmra.mrb[108].mxu1 %vm14072_vm14, %v18189_v21  ;;  %v4336_v17 = vmax.f32 %v4082_v41, 0.0  ;;  %v1831_v34 = vand.u32 15, %v1403_v20  ;;  %vm14104_vm14 = vcmp.eq.s16.totalorder %v10618_v15, 0 }
 0x2d5   : > { %18188 = vst [vmem:[#allocation92_spill] sm:$0xff] %v14081_v2  ;;  %4014 = vmatprep.mubr.bf16.mxu1 %v18192_v46  ;;  %v18195_v62 = vsel %vm14104_vm14, 4294967295, %v18194_v62 }
 0x2d6   : > { %v4337_v51 = vmax.f32 %v4085_v45, 0.0  ;;  %18196 = vst [vmem:[#allocation60_spill] sm:$0xff] %v18195_v62  ;;  %vm14117_vm9 = vcmp.eq.s32.totalorder %v1831_v34, 0  ;;  %v12232_v34 = vld [vmem:[%s17486_s5] sm:$0xff]  }
 0x2d7   : > { %v3800_v6 = vpop.f32.mrb[4].mxu1  ;;  %5114 = vmatpush1.bf16.msra.mxu0 %v12232_v34 }
 0x2d8   : > { %v3801_v26 = vadd.f32 %v14061_v23, %v3800_v6  ;;  %v3802_v50 = vpop.f32.mrb[5].mxu1  ;;  %v14100_v61 = vpack.c.bf16 %v4337_v51, %v4336_v17  ;;  %v1405_v51 = vadd.s32 496, %v12683_v40  ;;  %5115 = vmatprep.subr.bf16.mxu0 %v17892_v54 }
 0x2d9   : > { %v14098_v21 = vpop.f32.mrb[124].mxu0  ;;  %v3803_v2 = vpop.f32.mrb[6].mxu1  ;;  %v2894_v50 = vsel %vm2830_vm5, 65537, %v17892_v54  ;;  %vm2832_vm5 = vmpackc.low %vm14117_vm9, %vm14117_vm9 }
 0x2da   : > { %18193 = vst [vmem:[#allocation59_spill] sm:$0xff] %v14098_v21  ;;  %v14102_v58 = vpop.f32.mrb[125].mxu0  ;;  %v4090_v45 = vadd.f32 %v13749_v55, %v3801_v26  ;;  %v3804_v41 = vadd.f32 %v14061_v23, %v3803_v2  ;;  %v3805_v8 = vpop.f32.mrb[7].mxu1  ;;  %v17738_v6 = vshrl.u32 %v14100_v61, 16  ;;  %5145 = vmatprep.mubr.bf16.mxu0 %v14100_v61  ;;  %v4490_v2 = vshll.u32 %v14100_v61, 16  ;;  %v18200_v26 = vld [vmem:[#allocation58_spill] sm:$0xff] }
 0x2db   : > { %v14110_v20 = vpop.f32.mrb[126].mxu0  ;;  %v10619_v8 = vcombine.low %v2894_v50, %v12718_v57  ;;  %v2896_v34 = vsel %vm2832_vm5, 65537, %v17892_v54 }
 0x2dc   : > { %18197 = vst [vmem:[#allocation93_spill] sm:$0xff] %v14110_v20  ;;  %v14115_v46 = vpop.f32.mrb[127].mxu0  ;;  %v4093_v17 = vadd.f32 %v13757_v30, %v3804_v41  ;;  %v4489_v55 = vrot.slane %v17738_v6, 7  ;;  %10736 = vmatmul.mubr.msk.bf16.gmra.mrb[112].mxu1 %vm14104_vm14, %v13531_v60  ;;  %v4338_v30 = vmax.f32 %v4090_v45, 0.0  ;;  %v18202_v45 = vmov 0 }
 0x2dd   : > { %4022 = vmatprep.mubr.bf16.mxu1 %v18200_v26  ;;  %v1845_v26 = vand.u32 15, %v1405_v51  ;;  %vm14143_vm14 = vcmp.eq.s16.totalorder %v10619_v8, 0 }
 0x2de   : > { %v4339_v41 = vmax.f32 %v4093_v17, 0.0  ;;  %v14134_v20 = vor.u32 %v4490_v2, %v4489_v55  ;;  %v18203_v45 = vsel %vm14143_vm14, 4294967295, %v18202_v45 }
 0x2df   : > { %v3808_v6 = vpop.f32.mrb[8].mxu1  ;;  %18204 = vst [vmem:[#allocation94_spill] sm:$0xff] %v18203_v45  ;;  %vm14155_vm9 = vcmp.eq.s32.totalorder %v1845_v26, 0  ;;  %v18272_v45 = vld [vmem:[#allocation33_spill] sm:$0xff] }
 0x2e0   : > { %18201 = vst [vmem:[#allocation58_spill] sm:$0xff] %v14134_v20  ;;  %v14140_v60 = vpack.c.bf16 %v4339_v41, %v4338_v30  ;;  %v3809_v40 = vadd.f32 %v14061_v23, %v3808_v6  ;;  %v3810_v62 = vpop.f32.mrb[9].mxu1  ;;  %vm2834_vm5 = vmpackc.low %vm14155_vm9, %vm14155_vm9 }
 0x2e1   : > { %v3811_v21 = vpop.f32.mrb[10].mxu1 }
 0x2e2   : > { %v4098_v50 = vadd.f32 %v13783_v12, %v3809_v40  ;;  %v3812_v17 = vadd.f32 %v14061_v23, %v3811_v21  ;;  %v3813_v15 = vpop.f32.mrb[11].mxu1  ;;  %v17749_v20 = vshrl.u32 %v14140_v60, 16  ;;  %v4497_v6 = vshll.u32 %v14140_v60, 16  ;;  %v12233_v40 = vld [vmem:[%s17486_s5 + $0x8] sm:$0xff]  }
 0x2e3   : > { %5116 = vmatpush1.bf16.msra.mxu0 %v12233_v40  ;;  %v2898_v40 = vsel %vm2834_vm5, 65537, %v17892_v54  ;;  %vm18215_vm5 = vsmask.f32 7424 }
 0x2e4   : > { %v4101_v30 = vadd.f32 %v13795_v47, %v3812_v17  ;;  %10738 = vmatmul.mubr.msk.bf16.gmra.mrb[116].mxu1 %vm14143_vm14, %v13521_v53  ;;  %v4496_v12 = vrot.slane %v17749_v20, 7  ;;  %v10620_v47 = vcombine.low %v2896_v34, %v12718_v57  ;;  %v4340_v21 = vmax.f32 %v4098_v50, 0.0  ;;  %5117 = vmatprep.subr.bf16.mxu0 %v17892_v54 }
 0x2e5   : > { %4030 = vmatprep.mubr.bf16.mxu1 %v13523_v9  ;;  %vm18207_vm14 = vsmask.f32 256  ;;  %v18208_v50 = vmov 0  ;;  %v4804_v20 = vrot.slane %v4497_v6, 1 }
 0x2e6   : > { %v4341_v51 = vmax.f32 %v4101_v30, 0.0  ;;  %v4499_v53 = vor.u32 %v4497_v6, %v4496_v12  ;;  %vm14177_vm10 = vcmp.eq.s16.totalorder %v10620_v47, 0  ;;  %v10621_v47 = vcombine.low %v2898_v40, %v12718_v57 }
 0x2e7   : > { %v3816_v8 = vpop.f32.mrb[12].mxu1  ;;  %v18209_v50 = vsel %vm14177_vm10, 4294967295, %v18208_v50  ;;  %v18211_v57 = vmov 0 }
 0x2e8   : > { %v14171_v41 = vpack.c.bf16 %v4341_v51, %v4340_v21  ;;  %v3817_v26 = vadd.f32 %v14061_v23, %v3816_v8  ;;  %v3818_v17 = vpop.f32.mrb[13].mxu1  ;;  %v14175_v9 = vsel %vm18207_vm14, %v4489_v55, %v4499_v53  ;;  %18210 = vst [vmem:[#allocation95_spill] sm:$0xff] %v18209_v50  ;;  %v12234_v55 = vld [vmem:[%s17486_s5 + $0x10] sm:$0xff]   ;;  %vm14204_vm9 = vcmp.eq.s16.totalorder %v10621_v47, 0 }
 0x2e9   : > { %v3819_v15 = vpop.f32.mrb[14].mxu1  ;;  %v14195_v17 = vrot.slane %v4490_v2, 1  ;;  %5118 = vmatpush1.bf16.msra.mxu0 %v12234_v55  ;;  %v18212_v57 = vsel %vm14204_vm9, 4294967295, %v18211_v57 }
 0x2ea   : > { %v4106_v34 = vadd.f32 %v13781_v3, %v3817_v26  ;;  %v3820_v30 = vadd.f32 %v14061_v23, %v3819_v15  ;;  %v3821_v62 = vpop.f32.mrb[15].mxu1  ;;  %v4502_v21 = vshrl.u32 %v14171_v41, 16  ;;  %v4505_v51 = vshll.u32 %v14171_v41, 16  ;;  %5119 = vmatprep.subr.bf16.mxu0 %v17892_v54  ;;  %18213 = vst [vmem:[#allocation96_spill] sm:$0xff] %v18212_v57 }
 0x2ec   : > { %v4109_v8 = vadd.f32 %v13789_v14, %v3820_v30  ;;  %10740 = vmatmul.mubr.msk.bf16.gmra.mrb[120].mxu1 %vm14177_vm10, %v13583_v19  ;;  %v4504_v3 = vrot.slane %v4502_v21, 7  ;;  %v4342_v53 = vmax.f32 %v4106_v34, 0.0 }
 0x2ed   : > { %4038 = vmatprep.mubr.bf16.mxu1 %v13514_v37 }
 0x2ee   : > { %v4343_v26 = vmax.f32 %v4109_v8, 0.0  ;;  %v4507_v15 = vor.u32 %v4505_v51, %v4504_v3  ;;  %v18214_v8 = vshrl.u32 %v14100_v61, 16 }
 0x2ef   : > { %v3824_v14 = vpop.f32.mrb[16].mxu1 }
 0x2f0   : > { %v14198_v30 = vpack.c.bf16 %v4343_v26, %v4342_v53  ;;  %v3825_v19 = vadd.f32 %v14061_v23, %v3824_v14  ;;  %v3826_v62 = vpop.f32.mrb[17].mxu1  ;;  %v14202_v50 = vsel %vm18207_vm14, %v4496_v12, %v4507_v15  ;;  %v4803_v55 = vor.u32 %v14195_v17, %v18214_v8 }
 0x2f1   : > { %v3827_v37 = vpop.f32.mrb[18].mxu1 }
 0x2f2   : > { %v4114_v2 = vadd.f32 %v13815_v24, %v3825_v19  ;;  %v3828_v34 = vadd.f32 %v14061_v23, %v3827_v37  ;;  %v3829_v40 = vpop.f32.mrb[19].mxu1  ;;  %v4510_v53 = vshrl.u32 %v14198_v30, 16  ;;  %v4805_v12 = vsel %vm18215_vm5, %v4803_v55, %v4804_v20  ;;  %v12235_v24 = vld [vmem:[%s17486_s5 + $0x18] sm:$0xff]  }
 0x2f3   : > { %v4513_v47 = vshll.u32 %v14198_v30, 16  ;;  %v4807_v19 = vrot.slane %v4505_v51, 1  ;;  %5120 = vmatpush1.bf16.msra.mxu0 %v12235_v24  ;;  %v18217_v55 = vshrl.u32 %v14140_v60, 16 }
 0x2f4   : > { %v4117_v6 = vadd.f32 %v13827_v52, %v3828_v34  ;;  %10742 = vmatmul.mubr.msk.bf16.gmra.mrb[124].mxu1 %vm14204_vm9, %v13578_v44  ;;  %v4512_v26 = vrot.slane %v4510_v53, 7  ;;  %v4344_v15 = vmax.f32 %v4114_v2, 0.0  ;;  %5121 = vmatprep.subr.bf16.mxu0 %v17892_v54 }
 0x2f5   : > { %11859 = vmatprep.mubr.msk.bf16.mxu1 %vm12748_vm12, %v4805_v12  ;;  %v4810_v40 = vrot.slane %v4513_v47, 1  ;;  %v4806_v12 = vor.u32 %v4804_v20, %v18217_v55  ;;  %v4809_v61 = vor.u32 %v4807_v19, %v4502_v21 }
 0x2f6   : > { %v4345_v14 = vmax.f32 %v4117_v6, 0.0  ;;  %v4515_v52 = vor.u32 %v4513_v47, %v4512_v26 }
 0x2f7   : > { %v3832_v62 = vpop.f32.mrb[20].mxu1 }
 0x2f8   : > { %v14226_v44 = vpack.c.bf16 %v4345_v14, %v4344_v15  ;;  %v3833_v37 = vadd.f32 %v14061_v23, %v3832_v62  ;;  %v3834_v34 = vpop.f32.mrb[21].mxu1  ;;  %v14230_v8 = vsel %vm18207_vm14, %v4504_v3, %v4515_v52  ;;  %v4808_v14 = vsel %vm18215_vm5, %v4806_v12, %v4807_v19  ;;  %vm18219_vm14 = vmmov %vm18215_vm5  ;;  %v18266_v3 = vld [vmem:[#allocation32_spill] sm:$0xff] }
 0x2f9   : > { %v3835_v2 = vpop.f32.mrb[22].mxu1  ;;  %v4811_v20 = vsel %vm18219_vm14, %v4809_v61, %v4810_v40  ;;  %vm18221_vm5 = vsmask.f32 256 }
 0x2fa   : > { %v4122_v51 = vadd.f32 %v13813_v39, %v3833_v37  ;;  %v3836_v6 = vadd.f32 %v14061_v23, %v3835_v2  ;;  %v3837_v24 = vpop.f32.mrb[23].mxu1  ;;  %v4518_v15 = vshrl.u32 %v14226_v44, 16  ;;  %v4521_v62 = vshll.u32 %v14226_v44, 16  ;;  %v12236_v39 = vld [vmem:[%s17486_s5 + $0x20] sm:$0xff]  }
 0x2fb   : > { %5122 = vmatpush1.bf16.msra.mxu0 %v12236_v39 }
 0x2fc   : > { %v4125_v47 = vadd.f32 %v13821_v10, %v3836_v6  ;;  %11860 = vmatmul.mubr.msk.bf16.vlgmr.msra.gmra.mrb[128].mxu1 %vm12781_vm15, %v4808_v14  ;;  %v4520_v52 = vrot.slane %v4518_v15, 7  ;;  %v4346_v21 = vmax.f32 %v4122_v51, 0.0  ;;  %v4813_v12 = vrot.slane %v4521_v62, 1  ;;  %5123 = vmatprep.subr.bf16.mxu0 %v17892_v54 }
 0x2fd   : > { %11863 = vmatprep.mubr.msk.bf16.mxu1 %vm12791_vm1, %v4811_v20  ;;  %v4812_v14 = vor.u32 %v4810_v40, %v4510_v53 }
 0x2fe   : > { %v4347_v34 = vmax.f32 %v4125_v47, 0.0  ;;  %v4523_v19 = vor.u32 %v4521_v62, %v4520_v52 }
 0x2ff   : > { %v3840_v55 = vpop.f32.mrb[24].mxu1 }
 0x300   : > { %v14249_v10 = vpack.c.bf16 %v4347_v34, %v4346_v21  ;;  %v3841_v61 = vadd.f32 %v14061_v23, %v3840_v55  ;;  %v3842_v2 = vpop.f32.mrb[25].mxu1  ;;  %v14253_v6 = vsel %vm18221_vm5, %v4512_v26, %v4523_v19  ;;  %v4814_v21 = vsel %vm18219_vm14, %v4812_v14, %v4813_v12  ;;  %vm18223_vm5 = vmmov %vm18219_vm14 }
 0x301   : > { %v3843_v24 = vpop.f32.mrb[26].mxu1  ;;  %v4815_v26 = vor.u32 %v4813_v12, %v4518_v15  ;;  %vm18225_vm14 = vsmask.f32 256 }
 0x302   : > { %v4130_v20 = vadd.f32 %v13847_v35, %v3841_v61  ;;  %v3844_v51 = vadd.f32 %v14061_v23, %v3843_v24  ;;  %v3845_v47 = vpop.f32.mrb[27].mxu1  ;;  %v4529_v39 = vshll.u32 %v14249_v10, 16  ;;  %v4526_v62 = vshrl.u32 %v14249_v10, 16  ;;  %v12237_v35 = vld [vmem:[%s17486_s5 + $0x28] sm:$0xff]  }
 0x303   : > { %5124 = vmatpush1.bf16.msra.mxu0 %v12237_v35 }
 0x304   : > { %v4133_v34 = vadd.f32 %v13857_v27, %v3844_v51  ;;  %11864 = vmatmul.mubr.msk.bf16.gmra.mrb[132].mxu1 %vm12828_vm4, %v4814_v21  ;;  %v4816_v19 = vrot.slane %v4529_v39, 1  ;;  %v4528_v53 = vrot.slane %v4526_v62, 7  ;;  %v4348_v40 = vmax.f32 %v4130_v20, 0.0  ;;  %5125 = vmatprep.subr.bf16.mxu0 %v17892_v54 }
 0x306   : > { %v4349_v61 = vmax.f32 %v4133_v34, 0.0  ;;  %v4817_v2 = vsel %vm18223_vm5, %v4815_v26, %v4816_v19  ;;  %v4531_v24 = vor.u32 %v4529_v39, %v4528_v53 }
 0x307   : > { %v3848_v47 = vpop.f32.mrb[28].mxu1  ;;  %11867 = vmatprep.mubr.msk.bf16.mxu1 %vm12835_vm6, %v4817_v2 }
 0x308   : > { %v14270_v27 = vpack.c.bf16 %v4349_v61, %v4348_v40  ;;  %v3849_v15 = vadd.f32 %v14061_v23, %v3848_v47  ;;  %v3850_v12 = vpop.f32.mrb[29].mxu1  ;;  %v14274_v51 = vsel %vm18225_vm14, %v4520_v52, %v4531_v24  ;;  %v4818_v40 = vor.u32 %v4816_v19, %v4526_v62  ;;  %v12238_v47 = vld [vmem:[%s17486_s5 + $0x30] sm:$0xff]  }
 0x309   : > { %v3851_v20 = vpop.f32.mrb[30].mxu1  ;;  %5126 = vmatpush1.bf16.msra.mxu0 %v12238_v47 }
 0x30a   : > { %v4138_v21 = vadd.f32 %v13845_v13, %v3849_v15  ;;  %v3852_v34 = vadd.f32 %v14061_v23, %v3851_v20  ;;  %v3853_v39 = vpop.f32.mrb[31].mxu1  ;;  %v4537_v26 = vshll.u32 %v14270_v27, 16  ;;  %v4534_v35 = vshrl.u32 %v14270_v27, 16  ;;  %5127 = vmatprep.subr.bf16.mxu0 %v17892_v54 }
 0x30c   : > { %v4141_v2 = vadd.f32 %v13853_v38, %v3852_v34  ;;  %v4819_v61 = vrot.slane %v4537_v26, 1  ;;  %v4536_v52 = vrot.slane %v4534_v35, 7  ;;  %v4350_v24 = vmax.f32 %v4138_v21, 0.0 }
 0x30e   : > { %v4351_v12 = vmax.f32 %v4141_v2, 0.0  ;;  %v4820_v13 = vsel %vm18223_vm5, %v4818_v40, %v4819_v61  ;;  %v4539_v15 = vor.u32 %v4537_v26, %v4536_v52 }
 0x30f   : > { %v3856_v20 = vpop.f32.mrb[32].mxu1  ;;  %11868 = vmatmul.mubr.msk.bf16.gmra.mrb[136].mxu1 %vm12879_vm13, %v4820_v13 }
 0x310   : > { %v14288_v38 = vpack.c.bf16 %v4351_v12, %v4350_v24  ;;  %v3857_v62 = vadd.f32 %v14061_v23, %v3856_v20  ;;  %v3858_v19 = vpop.f32.mrb[33].mxu1  ;;  %v14292_v34 = vsel %vm18225_vm14, %v4528_v53, %v4539_v15  ;;  %v4821_v24 = vor.u32 %v4819_v61, %v4534_v35  ;;  %v12239_v20 = vld [vmem:[%s17486_s5 + $0x38] sm:$0xff]  }
 0x311   : > { %v3859_v21 = vpop.f32.mrb[34].mxu1  ;;  %5128 = vmatpush1.bf16.msra.mxu0 %v12239_v20 }
 0x312   : > { %v4146_v2 = vadd.f32 %v13867_v49, %v3857_v62  ;;  %v3860_v40 = vadd.f32 %v14061_v23, %v3859_v21  ;;  %v3861_v26 = vpop.f32.mrb[35].mxu1  ;;  %v4545_v47 = vshll.u32 %v14288_v38, 16  ;;  %v4542_v13 = vshrl.u32 %v14288_v38, 16  ;;  %5129 = vmatprep.subr.bf16.mxu0 %v17892_v54 }
 0x314   : > { %v4149_v39 = vadd.f32 %v13876_v43, %v3860_v40  ;;  %v4822_v12 = vrot.slane %v4545_v47, 1  ;;  %v4544_v53 = vrot.slane %v4542_v13, 7  ;;  %v4352_v15 = vmax.f32 %v4146_v2, 0.0 }
 0x316   : > { %v4353_v19 = vmax.f32 %v4149_v39, 0.0  ;;  %v4823_v49 = vsel %vm18223_vm5, %v4821_v24, %v4822_v12  ;;  %v4547_v62 = vor.u32 %v4545_v47, %v4544_v53 }
 0x317   : > { %v3864_v21 = vpop.f32.mrb[36].mxu1  ;;  %11871 = vmatprep.mubr.msk.bf16.mxu1 %vm12895_vm2, %v4823_v49  ;;  %vm18230_vm2 = vsmask.f32 256 }
 0x318   : > { %v14306_v43 = vpack.c.bf16 %v4353_v19, %v4352_v15  ;;  %v3865_v35 = vadd.f32 %v14061_v23, %v3864_v21  ;;  %v3866_v61 = vpop.f32.mrb[37].mxu1  ;;  %v14310_v40 = vsel %vm18225_vm14, %v4536_v52, %v4547_v62  ;;  %v4824_v15 = vor.u32 %v4822_v12, %v4542_v13  ;;  %v12240_v21 = vld [vmem:[%s17486_s5 + $0x40] sm:$0xff]  }
 0x319   : > { %v3867_v2 = vpop.f32.mrb[38].mxu1  ;;  %5130 = vmatpush1.bf16.msra.mxu0 %v12240_v21 }
 0x31a   : > { %v4154_v39 = vadd.f32 %v13865_v0, %v3865_v35  ;;  %v3868_v24 = vadd.f32 %v14061_v23, %v3867_v2  ;;  %v3869_v47 = vpop.f32.mrb[39].mxu1  ;;  %v4553_v20 = vshll.u32 %v14306_v43, 16  ;;  %v4550_v49 = vshrl.u32 %v14306_v43, 16  ;;  %5131 = vmatprep.subr.bf16.mxu0 %v17892_v54 }
 0x31b   : > { %v18228_v47 = vld [vmem:[#allocation14_spill] sm:$0xff] }
 0x31c   : > { %v4157_v26 = vadd.f32 %v13873_v28, %v3868_v24  ;;  %v4825_v19 = vrot.slane %v4553_v20, 1  ;;  %v4552_v52 = vrot.slane %v4550_v49, 7  ;;  %v4354_v62 = vmax.f32 %v4154_v39, 0.0 }
 0x31d   : > { %vm18229_vm14 = vnez %v18228_v47 }
 0x31e   : > { %v4355_v61 = vmax.f32 %v4157_v26, 0.0  ;;  %v4826_v0 = vsel %vm18223_vm5, %v4824_v15, %v4825_v19  ;;  %v4555_v35 = vor.u32 %v4553_v20, %v4552_v52 }
 0x31f   : > { %v3872_v2 = vpop.f32.mrb[40].mxu1  ;;  %11872 = vmatmul.mubr.msk.bf16.gmra.mrb[140].mxu1 %vm18229_vm14, %v4826_v0  ;;  %vm18234_vm14 = vsmask.f32 256 }
 0x320   : > { %v14324_v28 = vpack.c.bf16 %v4355_v61, %v4354_v62  ;;  %v3873_v13 = vadd.f32 %v14061_v23, %v3872_v2  ;;  %v3874_v12 = vpop.f32.mrb[41].mxu1  ;;  %v14328_v24 = vsel %vm18230_vm2, %v4544_v53, %v4555_v35  ;;  %v4827_v62 = vor.u32 %v4825_v19, %v4550_v49  ;;  %v12241_v2 = vld [vmem:[%s17486_s5 + $0x48] sm:$0xff]   ;;  %vm18231_vm2 = vmmov %vm18223_vm5 }
 0x321   : > { %v3875_v39 = vpop.f32.mrb[42].mxu1  ;;  %5132 = vmatpush1.bf16.msra.mxu0 %v12241_v2 }
 0x322   : > { %v4162_v26 = vadd.f32 %v13886_v11, %v3873_v13  ;;  %v3876_v15 = vadd.f32 %v14061_v23, %v3875_v39  ;;  %v3877_v20 = vpop.f32.mrb[43].mxu1  ;;  %v4561_v21 = vshll.u32 %v14324_v28, 16  ;;  %v4558_v0 = vshrl.u32 %v14324_v28, 16  ;;  %5133 = vmatprep.subr.bf16.mxu0 %v17892_v54 }
 0x323   : > { %v18232_v20 = vld [vmem:[#allocation15_spill] sm:$0xff] }
 0x324   : > { %v4165_v47 = vadd.f32 %v13895_v56, %v3876_v15  ;;  %v4828_v61 = vrot.slane %v4561_v21, 1  ;;  %v4560_v53 = vrot.slane %v4558_v0, 7  ;;  %v4356_v35 = vmax.f32 %v4162_v26, 0.0 }
 0x325   : > { %vm18233_vm5 = vnez %v18232_v20 }
 0x326   : > { %v4357_v12 = vmax.f32 %v4165_v47, 0.0  ;;  %v4829_v11 = vsel %vm18231_vm2, %v4827_v62, %v4828_v61  ;;  %v4563_v13 = vor.u32 %v4561_v21, %v4560_v53 }
 0x327   : > { %v3880_v39 = vpop.f32.mrb[44].mxu1  ;;  %11875 = vmatprep.mubr.msk.bf16.mxu1 %vm18233_vm5, %v4829_v11  ;;  %vm18238_vm5 = vsmask.f32 256 }
 0x328   : > { %v14342_v56 = vpack.c.bf16 %v4357_v12, %v4356_v35  ;;  %v3881_v49 = vadd.f32 %v14061_v23, %v3880_v39  ;;  %v3882_v19 = vpop.f32.mrb[45].mxu1  ;;  %v14346_v15 = vsel %vm18234_vm14, %v4552_v52, %v4563_v13  ;;  %v4830_v35 = vor.u32 %v4828_v61, %v4558_v0  ;;  %v12242_v39 = vld [vmem:[%s17486_s5 + $0x50] sm:$0xff]   ;;  %vm18235_vm14 = vmmov %vm18231_vm2 }
 0x329   : > { %v3883_v26 = vpop.f32.mrb[46].mxu1  ;;  %5134 = vmatpush1.bf16.msra.mxu0 %v12242_v39 }
 0x32a   : > { %v4170_v47 = vadd.f32 %v13884_v32, %v3881_v49  ;;  %v3884_v62 = vadd.f32 %v14061_v23, %v3883_v26  ;;  %v3885_v21 = vpop.f32.mrb[47].mxu1  ;;  %v4569_v2 = vshll.u32 %v14342_v56, 16  ;;  %v4566_v11 = vshrl.u32 %v14342_v56, 16  ;;  %5135 = vmatprep.subr.bf16.mxu0 %v17892_v54 }
 0x32b   : > { %v18236_v21 = vld [vmem:[#allocation16_spill] sm:$0xff] }
 0x32c   : > { %v4173_v20 = vadd.f32 %v13892_v36, %v3884_v62  ;;  %v4831_v12 = vrot.slane %v4569_v2, 1  ;;  %v4568_v52 = vrot.slane %v4566_v11, 7  ;;  %v4358_v13 = vmax.f32 %v4170_v47, 0.0 }
 0x32d   : > { %vm18237_vm2 = vnez %v18236_v21 }
 0x32e   : > { %v4359_v19 = vmax.f32 %v4173_v20, 0.0  ;;  %v4832_v32 = vsel %vm18235_vm14, %v4830_v35, %v4831_v12  ;;  %v4571_v49 = vor.u32 %v4569_v2, %v4568_v52 }
 0x32f   : > { %v3888_v26 = vpop.f32.mrb[48].mxu1  ;;  %11876 = vmatmul.mubr.msk.bf16.gmra.mrb[144].mxu1 %vm18237_vm2, %v4832_v32  ;;  %vm18242_vm2 = vsmask.f32 256 }
 0x330   : > { %v14360_v36 = vpack.c.bf16 %v4359_v19, %v4358_v13  ;;  %v3889_v0 = vadd.f32 %v14061_v23, %v3888_v26  ;;  %v3890_v61 = vpop.f32.mrb[49].mxu1  ;;  %v14364_v62 = vsel %vm18238_vm5, %v4560_v53, %v4571_v49  ;;  %v4833_v13 = vor.u32 %v4831_v12, %v4566_v11  ;;  %v12243_v26 = vld [vmem:[%s17486_s5 + $0x58] sm:$0xff]   ;;  %vm18239_vm5 = vmmov %vm18235_vm14 }
 0x331   : > { %v3891_v47 = vpop.f32.mrb[50].mxu1  ;;  %5136 = vmatpush1.bf16.msra.mxu0 %v12243_v26 }
 0x332   : > { %v4178_v20 = vadd.f32 %v13905_v25, %v3889_v0  ;;  %v3892_v35 = vadd.f32 %v14061_v23, %v3891_v47  ;;  %v3893_v2 = vpop.f32.mrb[51].mxu1  ;;  %v4577_v39 = vshll.u32 %v14360_v36, 16  ;;  %v4574_v32 = vshrl.u32 %v14360_v36, 16  ;;  %5137 = vmatprep.subr.bf16.mxu0 %v17892_v54 }
 0x333   : > { %v18240_v2 = vld [vmem:[#allocation17_spill] sm:$0xff] }
 0x334   : > { %v4181_v21 = vadd.f32 %v13914_v33, %v3892_v35  ;;  %v4834_v19 = vrot.slane %v4577_v39, 1  ;;  %v4576_v53 = vrot.slane %v4574_v32, 7  ;;  %v4360_v49 = vmax.f32 %v4178_v20, 0.0 }
 0x335   : > { %vm18241_vm14 = vnez %v18240_v2 }
 0x336   : > { %v4361_v61 = vmax.f32 %v4181_v21, 0.0  ;;  %v4835_v25 = vsel %vm18239_vm5, %v4833_v13, %v4834_v19  ;;  %v4579_v0 = vor.u32 %v4577_v39, %v4576_v53 }
 0x337   : > { %v3896_v47 = vpop.f32.mrb[52].mxu1  ;;  %11879 = vmatprep.mubr.msk.bf16.mxu1 %vm18241_vm14, %v4835_v25  ;;  %vm18246_vm14 = vsmask.f32 256 }
 0x338   : > { %v14378_v33 = vpack.c.bf16 %v4361_v61, %v4360_v49  ;;  %v3897_v11 = vadd.f32 %v14061_v23, %v3896_v47  ;;  %v3898_v12 = vpop.f32.mrb[53].mxu1  ;;  %v14382_v35 = vsel %vm18242_vm2, %v4568_v52, %v4579_v0  ;;  %v4836_v49 = vor.u32 %v4834_v19, %v4574_v32  ;;  %v12244_v47 = vld [vmem:[%s17486_s5 + $0x60] sm:$0xff]   ;;  %vm18243_vm2 = vmmov %vm18239_vm5 }
 0x339   : > { %v3899_v20 = vpop.f32.mrb[54].mxu1  ;;  %5138 = vmatpush1.bf16.msra.mxu0 %v12244_v47 }
 0x33a   : > { %v4186_v21 = vadd.f32 %v13903_v29, %v3897_v11  ;;  %v3900_v13 = vadd.f32 %v14061_v23, %v3899_v20  ;;  %v3901_v39 = vpop.f32.mrb[55].mxu1  ;;  %v4585_v26 = vshll.u32 %v14378_v33, 16  ;;  %v4582_v25 = vshrl.u32 %v14378_v33, 16  ;;  %5139 = vmatprep.subr.bf16.mxu0 %v17892_v54 }
 0x33b   : > { %v18244_v39 = vld [vmem:[#allocation18_spill] sm:$0xff] }
 0x33c   : > { %v4189_v2 = vadd.f32 %v13911_v16, %v3900_v13  ;;  %v4837_v61 = vrot.slane %v4585_v26, 1  ;;  %v4584_v52 = vrot.slane %v4582_v25, 7  ;;  %v4362_v0 = vmax.f32 %v4186_v21, 0.0 }
 0x33d   : > { %vm18245_vm5 = vnez %v18244_v39 }
 0x33e   : > { %v4363_v12 = vmax.f32 %v4189_v2, 0.0  ;;  %v4838_v29 = vsel %vm18243_vm2, %v4836_v49, %v4837_v61  ;;  %v4587_v11 = vor.u32 %v4585_v26, %v4584_v52 }
 0x33f   : > { %v3904_v20 = vpop.f32.mrb[56].mxu1  ;;  %11880 = vmatmul.mubr.msk.bf16.gmra.mrb[148].mxu1 %vm18245_vm5, %v4838_v29  ;;  %vm18250_vm5 = vsmask.f32 256 }
 0x340   : > { %v14396_v16 = vpack.c.bf16 %v4363_v12, %v4362_v0  ;;  %v3905_v32 = vadd.f32 %v14061_v23, %v3904_v20  ;;  %v3906_v19 = vpop.f32.mrb[57].mxu1  ;;  %v14400_v13 = vsel %vm18246_vm14, %v4576_v53, %v4587_v11  ;;  %v4839_v0 = vor.u32 %v4837_v61, %v4582_v25  ;;  %v12245_v20 = vld [vmem:[%s17486_s5 + $0x68] sm:$0xff]   ;;  %vm18247_vm14 = vmmov %vm18243_vm2 }
 0x341   : > { %v3907_v21 = vpop.f32.mrb[58].mxu1  ;;  %5140 = vmatpush1.bf16.msra.mxu0 %v12245_v20 }
 0x342   : > { %v4194_v2 = vadd.f32 %v13924_v5, %v3905_v32  ;;  %v3908_v49 = vadd.f32 %v14061_v23, %v3907_v21  ;;  %v3909_v26 = vpop.f32.mrb[59].mxu1  ;;  %v4593_v47 = vshll.u32 %v14396_v16, 16  ;;  %v4590_v29 = vshrl.u32 %v14396_v16, 16  ;;  %5141 = vmatprep.subr.bf16.mxu0 %v17892_v54 }
 0x343   : > { %v18248_v26 = vld [vmem:[#allocation19_spill] sm:$0xff] }
 0x344   : > { %v4197_v39 = vadd.f32 %v13933_v1, %v3908_v49  ;;  %v4840_v12 = vrot.slane %v4593_v47, 1  ;;  %v4592_v53 = vrot.slane %v4590_v29, 7  ;;  %v4364_v11 = vmax.f32 %v4194_v2, 0.0 }
 0x345   : > { %vm18249_vm2 = vnez %v18248_v26 }
 0x346   : > { %v4365_v19 = vmax.f32 %v4197_v39, 0.0  ;;  %v4841_v5 = vsel %vm18247_vm14, %v4839_v0, %v4840_v12  ;;  %v4595_v32 = vor.u32 %v4593_v47, %v4592_v53 }
 0x347   : > { %v3912_v21 = vpop.f32.mrb[60].mxu1  ;;  %11883 = vmatprep.mubr.msk.bf16.mxu1 %vm18249_vm2, %v4841_v5  ;;  %vm18254_vm2 = vsmask.f32 256 }
 0x348   : > { %v14414_v1 = vpack.c.bf16 %v4365_v19, %v4364_v11  ;;  %v3913_v25 = vadd.f32 %v14061_v23, %v3912_v21  ;;  %v3914_v61 = vpop.f32.mrb[61].mxu1  ;;  %v14418_v49 = vsel %vm18250_vm5, %v4584_v52, %v4595_v32  ;;  %v4842_v11 = vor.u32 %v4840_v12, %v4590_v29  ;;  %v12246_v21 = vld [vmem:[%s17486_s5 + $0x70] sm:$0xff]   ;;  %vm18251_vm5 = vmmov %vm18247_vm14 }
 0x349   : > { %v3915_v2 = vpop.f32.mrb[62].mxu1  ;;  %5142 = vmatpush1.bf16.msra.mxu0 %v12246_v21 }
 0x34a   : > { %v4202_v39 = vadd.f32 %v13922_v31, %v3913_v25  ;;  %v3916_v0 = vadd.f32 %v14061_v23, %v3915_v2  ;;  %v3917_v47 = vpop.f32.mrb[63].mxu1  ;;  %v4601_v20 = vshll.u32 %v14414_v1, 16  ;;  %v4598_v5 = vshrl.u32 %v14414_v1, 16  ;;  %5143 = vmatprep.subr.bf16.mxu0 %v17892_v54 }
 0x34b   : > { %v18252_v47 = vld [vmem:[#allocation21_spill] sm:$0xff] }
 0x34c   : > { %v4205_v26 = vadd.f32 %v13930_v4, %v3916_v0  ;;  %v4843_v19 = vrot.slane %v4601_v20, 1  ;;  %v4600_v52 = vrot.slane %v4598_v5, 7  ;;  %v4366_v32 = vmax.f32 %v4202_v39, 0.0 }
 0x34d   : > { %vm18253_vm14 = vnez %v18252_v47 }
 0x34e   : > { %v4367_v61 = vmax.f32 %v4205_v26, 0.0  ;;  %v4844_v31 = vsel %vm18251_vm5, %v4842_v11, %v4843_v19  ;;  %v4603_v25 = vor.u32 %v4601_v20, %v4600_v52 }
 0x34f   : > { %v3920_v2 = vpop.f32.mrb[64].mxu1  ;;  %11884 = vmatmul.mubr.msk.bf16.gmra.mrb[152].mxu1 %vm18253_vm14, %v4844_v31  ;;  %vm18258_vm14 = vsmask.f32 256 }
 0x350   : > { %v14432_v4 = vpack.c.bf16 %v4367_v61, %v4366_v32  ;;  %v3921_v29 = vadd.f32 %v14061_v23, %v3920_v2  ;;  %v3922_v12 = vpop.f32.mrb[65].mxu1  ;;  %v14436_v0 = vsel %vm18254_vm2, %v4592_v53, %v4603_v25  ;;  %v12247_v32 = vld [vmem:[%s17486_s5 + $0x78] sm:$0xff]   ;;  %v4845_v2 = vor.u32 %v4843_v19, %v4598_v5  ;;  %vm18255_vm2 = vmmov %vm18251_vm5 }
 0x351   : > { %v3923_v39 = vpop.f32.mrb[66].mxu1  ;;  %5144 = vmatpush1.bf16.msra.mxu0 %v12247_v32 }
 0x352   : > { %v4210_v26 = vadd.f32 %v13943_v59, %v3921_v29  ;;  %v3924_v11 = vadd.f32 %v14061_v23, %v3923_v39  ;;  %v3925_v20 = vpop.f32.mrb[67].mxu1  ;;  %v4609_v21 = vshll.u32 %v14432_v4, 16  ;;  %v4606_v31 = vshrl.u32 %v14432_v4, 16 }
 0x353   : > { %v18256_v20 = vld [vmem:[#allocation22_spill] sm:$0xff] }
 0x354   : > { %v4213_v61 = vadd.f32 %v13952_v48, %v3924_v11  ;;  %v4846_v12 = vrot.slane %v4609_v21, 1  ;;  %v4608_v53 = vrot.slane %v4606_v31, 7  ;;  %v4368_v25 = vmax.f32 %v4210_v26, 0.0 }
 0x355   : > { %vm18257_vm5 = vnez %v18256_v20  ;;  %v18259_v20 = vld [vmem:[#allocation26_spill] sm:$0xff] }
 0x356   : > { %v4369_v47 = vmax.f32 %v4213_v61, 0.0  ;;  %v4847_v59 = vsel %vm18255_vm2, %v4845_v2, %v4846_v12  ;;  %v4611_v29 = vor.u32 %v4609_v21, %v4608_v53 }
 0x357   : > { %v3928_v39 = vpop.f32.mrb[68].mxu1  ;;  %11887 = vmatprep.mubr.msk.bf16.mxu1 %vm18257_vm5, %v4847_v59  ;;  %vm18261_vm5 = vsmask.f32 256 }
 0x358   : > { %v14449_v14 = vpack.c.bf16 %v4369_v47, %v4368_v25  ;;  %v3929_v55 = vadd.f32 %v14061_v23, %v3928_v39  ;;  %v3930_v37 = vpop.f32.mrb[69].mxu1  ;;  %v14453_v48 = vsel %vm18258_vm14, %v4600_v52, %v4611_v29  ;;  %v4848_v47 = vor.u32 %v4846_v12, %v4606_v31 }
 0x359   : > { %v3931_v5 = vpop.f32.mrb[70].mxu1  ;;  %vm18260_vm14 = vnez %v18259_v20  ;;  %v18262_v20 = vld [vmem:[#allocation27_spill] sm:$0xff] }
 0x35a   : > { %v4218_v19 = vadd.f32 %v13941_v42, %v3929_v55  ;;  %v3932_v26 = vadd.f32 %v14061_v23, %v3931_v5  ;;  %v3933_v11 = vpop.f32.mrb[71].mxu1  ;;  %v4617_v21 = vshll.u32 %v14449_v14, 16  ;;  %v4614_v32 = vshrl.u32 %v14449_v14, 16 }
 0x35c   : > { %v4221_v61 = vadd.f32 %v13949_v7, %v3932_v26  ;;  %v4849_v2 = vrot.slane %v4617_v21, 1  ;;  %v4616_v25 = vrot.slane %v4614_v32, 7  ;;  %v4370_v59 = vmax.f32 %v4218_v19, 0.0 }
 0x35e   : > { %v4371_v37 = vmax.f32 %v4221_v61, 0.0  ;;  %v4850_v52 = vsel %vm18255_vm2, %v4848_v47, %v4849_v2  ;;  %v4619_v29 = vor.u32 %v4617_v21, %v4616_v25  ;;  %v4851_v47 = vor.u32 %v4849_v2, %v4614_v32 }
 0x35f   : > { %v3936_v39 = vpop.f32.mrb[72].mxu1  ;;  %11888 = vmatmul.mubr.msk.bf16.gmra.mrb[156].mxu1 %vm18260_vm14, %v4850_v52  ;;  %vm18264_vm14 = vsmask.f32 256 }
 0x360   : > { %v14463_v42 = vpack.c.bf16 %v4371_v37, %v4370_v59  ;;  %v3937_v55 = vadd.f32 %v14061_v23, %v3936_v39  ;;  %v3938_v5 = vpop.f32.mrb[73].mxu1  ;;  %v14467_v11 = vsel %vm18261_vm5, %v4608_v53, %v4619_v29  ;;  %vm18263_vm5 = vnez %v18262_v20 }
 0x361   : > { %v3939_v7 = vpop.f32.mrb[74].mxu1 }
 0x362   : > { %v4226_v31 = vadd.f32 %v13962_v18, %v3937_v55  ;;  %v3940_v12 = vadd.f32 %v14061_v23, %v3939_v7  ;;  %v3941_v19 = vpop.f32.mrb[75].mxu1  ;;  %v4625_v26 = vshll.u32 %v14463_v42, 16  ;;  %v4622_v21 = vshrl.u32 %v14463_v42, 16 }
 0x364   : > { %v4229_v61 = vadd.f32 %v13971_v22, %v3940_v12  ;;  %v4852_v59 = vrot.slane %v4625_v26, 1  ;;  %v4624_v37 = vrot.slane %v4622_v21, 7  ;;  %v4372_v52 = vmax.f32 %v4226_v31, 0.0 }
 0x366   : > { %v4373_v39 = vmax.f32 %v4229_v61, 0.0  ;;  %v4853_v53 = vsel %vm18255_vm2, %v4851_v47, %v4852_v59  ;;  %v4627_v29 = vor.u32 %v4625_v26, %v4624_v37  ;;  %v18265_v61 = vld [vmem:[#allocation28_spill] sm:$0xff] }
 0x367   : > { %v3944_v5 = vpop.f32.mrb[76].mxu1  ;;  %11891 = vmatprep.mubr.msk.bf16.mxu1 %vm18263_vm5, %v4853_v53  ;;  %vm18269_vm5 = vsmask.f32 256 }
 0x368   : > { %v14477_v18 = vpack.c.bf16 %v4373_v39, %v4372_v52  ;;  %v3945_v55 = vadd.f32 %v14061_v23, %v3944_v5  ;;  %v3946_v7 = vpop.f32.mrb[77].mxu1  ;;  %v14481_v19 = vsel %vm18264_vm14, %v4616_v25, %v4627_v29  ;;  %v4854_v52 = vor.u32 %v4852_v59, %v4622_v21  ;;  %v18270_v59 = vld [vmem:[#allocation36_spill] sm:$0xff] }
 0x369   : > { %v3947_v22 = vpop.f32.mrb[78].mxu1  ;;  %vm18267_vm14 = vnez %v18266_v3 }
 0x36a   : > { %v4234_v32 = vadd.f32 %v13960_v63, %v3945_v55  ;;  %v3948_v2 = vadd.f32 %v14061_v23, %v3947_v22  ;;  %v3949_v31 = vpop.f32.mrb[79].mxu1  ;;  %v4633_v12 = vshll.u32 %v14477_v18, 16  ;;  %v4630_v26 = vshrl.u32 %v14477_v18, 16 }
 0x36c   : > { %v4237_v47 = vadd.f32 %v18265_v61, %v3948_v2  ;;  %v4855_v39 = vrot.slane %v4633_v12, 1  ;;  %v4632_v53 = vrot.slane %v4630_v26, 7  ;;  %v4374_v5 = vmax.f32 %v4234_v32, 0.0 }
 0x36e   : > { %v4375_v7 = vmax.f32 %v4237_v47, 0.0  ;;  %v4856_v25 = vsel %vm18255_vm2, %v4854_v52, %v4855_v39  ;;  %v4635_v29 = vor.u32 %v4633_v12, %v4632_v53  ;;  %v18271_v52 = vld [vmem:[#allocation41_spill] sm:$0xff] }
 0x36f   : > { %v3952_v20 = vpop.f32.mrb[80].mxu1  ;;  %11892 = vmatmul.mubr.msk.bf16.gmra.mrb[160].mxu1 %vm18267_vm14, %v4856_v25  ;;  %vm18275_vm14 = vsmask.f32 256 }
 0x370   : > { %v14491_v63 = vpack.c.bf16 %v4375_v7, %v4374_v5  ;;  %v3953_v55 = vadd.f32 %v14061_v23, %v3952_v20  ;;  %v3954_v22 = vpop.f32.mrb[81].mxu1  ;;  %v14495_v31 = vsel %vm18269_vm5, %v4624_v37, %v4635_v29  ;;  %v4857_v5 = vor.u32 %v4855_v39, %v4630_v26  ;;  %v18277_v39 = vld [vmem:[#allocation35_spill] sm:$0xff] }
 0x371   : > { %v3955_v21 = vpop.f32.mrb[82].mxu1  ;;  %vm18273_vm5 = vnez %v18272_v45 }
 0x372   : > { %18268 = vst [vmem:[#allocation28_spill] sm:$0xff] %v14491_v63  ;;  %v4242_v2 = vadd.f32 %v18270_v59, %v3953_v55  ;;  %v3956_v32 = vadd.f32 %v14061_v23, %v3955_v21  ;;  %v3957_v61 = vpop.f32.mrb[83].mxu1  ;;  %v4641_v12 = vshll.u32 %v14491_v63, 16  ;;  %v4638_v47 = vshrl.u32 %v14491_v63, 16  ;;  %v18279_v63 = vld [vmem:[#allocation38_spill] sm:$0xff] }
 0x374   : > { %v4245_v25 = vadd.f32 %v18271_v52, %v3956_v32  ;;  %v4858_v7 = vrot.slane %v4641_v12, 1  ;;  %v4640_v3 = vrot.slane %v4638_v47, 7  ;;  %v4376_v20 = vmax.f32 %v4242_v2, 0.0 }
 0x376   : > { %v4377_v22 = vmax.f32 %v4245_v25, 0.0  ;;  %v4859_v37 = vsel %vm18255_vm2, %v4857_v5, %v4858_v7  ;;  %v4643_v29 = vor.u32 %v4641_v12, %v4640_v3  ;;  %v18278_v5 = vld [vmem:[#allocation34_spill] sm:$0xff] }
 0x377   : > { %v3960_v57 = vpop.f32.mrb[84].mxu1  ;;  %11895 = vmatprep.mubr.msk.bf16.mxu1 %vm18273_vm5, %v4859_v37  ;;  %vm18282_vm5 = vsmask.f32 256 }
 0x378   : > { %v14505_v55 = vpack.c.bf16 %v4377_v22, %v4376_v20  ;;  %v3961_v21 = vadd.f32 %v14061_v23, %v3960_v57  ;;  %v3962_v59 = vpop.f32.mrb[85].mxu1  ;;  %v14509_v61 = vsel %vm18275_vm14, %v4632_v53, %v4643_v29  ;;  %v4860_v20 = vor.u32 %v4858_v7, %v4638_v47 }
 0x379   : > { %18276 = vst [vmem:[#allocation41_spill] sm:$0xff] %v14509_v61  ;;  %v3963_v26 = vpop.f32.mrb[86].mxu1  ;;  %vm18280_vm14 = vnez %v18279_v63 }
 0x37a   : > { %18274 = vst [vmem:[#allocation36_spill] sm:$0xff] %v14505_v55  ;;  %v4250_v32 = vadd.f32 %v18277_v39, %v3961_v21  ;;  %v3964_v2 = vadd.f32 %v14061_v23, %v3963_v26  ;;  %v3965_v52 = vpop.f32.mrb[87].mxu1  ;;  %v4649_v12 = vshll.u32 %v14505_v55, 16  ;;  %v4646_v25 = vshrl.u32 %v14505_v55, 16  ;;  %v14524_v21 = vld [vmem:[%s17485_s4] ss:$0 sm:$0xff] }
 0x37b   : > { %v18286_v55 = vld [vmem:[#allocation39_spill] sm:$0xff] }
 0x37c   : > { %v4253_v37 = vadd.f32 %v18278_v5, %v3964_v2  ;;  %v4861_v22 = vrot.slane %v4649_v12, 1  ;;  %v4648_v45 = vrot.slane %v4646_v25, 7  ;;  %v4378_v57 = vmax.f32 %v4250_v32, 0.0  ;;  %v18284_v32 = vld [vmem:[#allocation49_spill] sm:$0xff] }
 0x37e   : > { %v4379_v59 = vmax.f32 %v4253_v37, 0.0  ;;  %v4862_v53 = vsel %vm18255_vm2, %v4860_v20, %v4861_v22  ;;  %v4651_v29 = vor.u32 %v4649_v12, %v4648_v45  ;;  %v18285_v20 = vld [vmem:[#allocation48_spill] sm:$0xff] }
 0x37f   : > { %v3968_v61 = vpop.f32.mrb[88].mxu1  ;;  %11896 = vmatmul.mubr.msk.bf16.gmra.mrb[164].mxu1 %vm18280_vm14, %v4862_v53  ;;  %vm18289_vm14 = vsmask.f32 256 }
 0x380   : > { %v14519_v23 = vpack.c.bf16 %v4379_v59, %v4378_v57  ;;  %v3969_v47 = vadd.f32 %v14524_v21, %v3968_v61  ;;  %v3970_v7 = vpop.f32.mrb[89].mxu1  ;;  %v14528_v26 = vsel %vm18282_vm5, %v4640_v3, %v4651_v29  ;;  %v4863_v59 = vor.u32 %v4861_v22, %v4646_v25  ;;  %v18291_v22 = vld [vmem:[#allocation42_spill] sm:$0xff] }
 0x381   : > { %18283 = vst [vmem:[#allocation34_spill] sm:$0xff] %v14528_v26  ;;  %v3971_v39 = vpop.f32.mrb[90].mxu1  ;;  %vm18287_vm5 = vnez %v18286_v55 }
 0x382   : > { %18281 = vst [vmem:[#allocation35_spill] sm:$0xff] %v14519_v23  ;;  %v4258_v2 = vadd.f32 %v18284_v32, %v3969_v47  ;;  %v3972_v52 = vadd.f32 %v14524_v21, %v3971_v39  ;;  %v3973_v12 = vpop.f32.mrb[91].mxu1  ;;  %v4657_v5 = vshll.u32 %v14519_v23, 16  ;;  %v4654_v37 = vshrl.u32 %v14519_v23, 16  ;;  %v18293_v23 = vld [vmem:[#allocation44_spill] sm:$0xff] }
 0x384   : > { %v4261_v57 = vadd.f32 %v18285_v20, %v3972_v52  ;;  %v4864_v53 = vrot.slane %v4657_v5, 1  ;;  %v4656_v63 = vrot.slane %v4654_v37, 7  ;;  %v4380_v61 = vmax.f32 %v4258_v2, 0.0 }
 0x386   : > { %v4381_v7 = vmax.f32 %v4261_v57, 0.0  ;;  %v4865_v3 = vsel %vm18255_vm2, %v4863_v59, %v4864_v53  ;;  %v4659_v29 = vor.u32 %v4657_v5, %v4656_v63  ;;  %v18292_v59 = vld [vmem:[#allocation47_spill] sm:$0xff] }
 0x387   : > { %v3976_v26 = vpop.f32.mrb[92].mxu1  ;;  %11899 = vmatprep.mubr.msk.bf16.mxu1 %vm18287_vm5, %v4865_v3  ;;  %vm18296_vm5 = vsmask.f32 256 }
 0x388   : > { %v14538_v47 = vpack.c.bf16 %v4381_v7, %v4380_v61  ;;  %v3977_v39 = vadd.f32 %v14524_v21, %v3976_v26  ;;  %v3978_v32 = vpop.f32.mrb[93].mxu1  ;;  %v14542_v12 = vsel %vm18289_vm14, %v4648_v45, %v4659_v29  ;;  %v4866_v61 = vor.u32 %v4864_v53, %v4654_v37  ;;  %v18298_v53 = vld [vmem:[#allocation46_spill] sm:$0xff] }
 0x389   : > { %18290 = vst [vmem:[#allocation48_spill] sm:$0xff] %v14542_v12  ;;  %v3979_v25 = vpop.f32.mrb[94].mxu1  ;;  %vm18294_vm14 = vnez %v18293_v23 }
 0x38a   : > { %18288 = vst [vmem:[#allocation49_spill] sm:$0xff] %v14538_v47  ;;  %v4266_v52 = vadd.f32 %v18291_v22, %v3977_v39  ;;  %v3980_v2 = vadd.f32 %v14524_v21, %v3979_v25  ;;  %v3981_v20 = vpop.f32.mrb[95].mxu1  ;;  %v4665_v5 = vshll.u32 %v14538_v47, 16  ;;  %v4662_v57 = vshrl.u32 %v14538_v47, 16  ;;  %v18300_v47 = vld [vmem:[#allocation45_spill] sm:$0xff] }
 0x38c   : > { %v4269_v3 = vadd.f32 %v18292_v59, %v3980_v2  ;;  %v4867_v7 = vrot.slane %v4665_v5, 1  ;;  %v4664_v55 = vrot.slane %v4662_v57, 7  ;;  %v4382_v26 = vmax.f32 %v4266_v52, 0.0 }
 0x38e   : > { %v4383_v32 = vmax.f32 %v4269_v3, 0.0  ;;  %v4868_v45 = vsel %vm18255_vm2, %v4866_v61, %v4867_v7  ;;  %v4667_v29 = vor.u32 %v4665_v5, %v4664_v55  ;;  %v18299_v61 = vld [vmem:[#allocation86_spill] sm:$0xff] }
 0x38f   : > { %v3984_v12 = vpop.f32.mrb[96].mxu1  ;;  %11900 = vmatmul.mubr.msk.bf16.gmra.mrb[168].mxu1 %vm18294_vm14, %v4868_v45  ;;  %vm18303_vm14 = vsmask.f32 256 }
 0x390   : > { %v14552_v39 = vpack.c.bf16 %v4383_v32, %v4382_v26  ;;  %v3985_v25 = vadd.f32 %v14524_v21, %v3984_v12  ;;  %v3986_v22 = vpop.f32.mrb[97].mxu1  ;;  %v14556_v20 = vsel %vm18296_vm5, %v4656_v63, %v4667_v29  ;;  %v4869_v26 = vor.u32 %v4867_v7, %v4662_v57  ;;  %v18305_v7 = vld [vmem:[#allocation55_spill] sm:$0xff] }
 0x391   : > { %18297 = vst [vmem:[#allocation47_spill] sm:$0xff] %v14556_v20  ;;  %v3987_v37 = vpop.f32.mrb[98].mxu1  ;;  %vm18301_vm5 = vnez %v18300_v47 }
 0x392   : > { %18295 = vst [vmem:[#allocation42_spill] sm:$0xff] %v14552_v39  ;;  %v4274_v2 = vadd.f32 %v18298_v53, %v3985_v25  ;;  %v3988_v52 = vadd.f32 %v14524_v21, %v3987_v37  ;;  %v3989_v59 = vpop.f32.mrb[99].mxu1  ;;  %v4673_v5 = vshll.u32 %v14552_v39, 16  ;;  %v4670_v3 = vshrl.u32 %v14552_v39, 16  ;;  %v18307_v39 = vld [vmem:[#allocation50_spill] sm:$0xff] }
 0x394   : > { %v4277_v45 = vadd.f32 %v18299_v61, %v3988_v52  ;;  %v4870_v32 = vrot.slane %v4673_v5, 1  ;;  %v4672_v23 = vrot.slane %v4670_v3, 7  ;;  %v4384_v12 = vmax.f32 %v4274_v2, 0.0 }
 0x396   : > { %v4385_v22 = vmax.f32 %v4277_v45, 0.0  ;;  %v4871_v63 = vsel %vm18255_vm2, %v4869_v26, %v4870_v32  ;;  %v4675_v29 = vor.u32 %v4673_v5, %v4672_v23  ;;  %v18306_v26 = vld [vmem:[#allocation85_spill] sm:$0xff] }
 0x397   : > { %v3992_v20 = vpop.f32.mrb[100].mxu1  ;;  %11903 = vmatprep.mubr.msk.bf16.mxu1 %vm18301_vm5, %v4871_v63  ;;  %vm18310_vm5 = vsmask.f32 256 }
 0x398   : > { %v14566_v25 = vpack.c.bf16 %v4385_v22, %v4384_v12  ;;  %v3993_v37 = vadd.f32 %v14524_v21, %v3992_v20  ;;  %v3994_v53 = vpop.f32.mrb[101].mxu1  ;;  %v14570_v59 = vsel %vm18303_vm14, %v4664_v55, %v4675_v29  ;;  %v4872_v12 = vor.u32 %v4870_v32, %v4670_v3  ;;  %v18312_v32 = vld [vmem:[#allocation54_spill] sm:$0xff] }
 0x399   : > { %18304 = vst [vmem:[#allocation86_spill] sm:$0xff] %v14570_v59  ;;  %v3995_v57 = vpop.f32.mrb[102].mxu1  ;;  %vm18308_vm14 = vnez %v18307_v39 }
 0x39a   : > { %18302 = vst [vmem:[#allocation46_spill] sm:$0xff] %v14566_v25  ;;  %v4282_v52 = vadd.f32 %v18305_v7, %v3993_v37  ;;  %v3996_v2 = vadd.f32 %v14524_v21, %v3995_v57  ;;  %v3997_v61 = vpop.f32.mrb[103].mxu1  ;;  %v4681_v5 = vshll.u32 %v14566_v25, 16  ;;  %v4678_v45 = vshrl.u32 %v14566_v25, 16  ;;  %v18314_v25 = vld [vmem:[#allocation51_spill] sm:$0xff] }
 0x39c   : > { %v4285_v63 = vadd.f32 %v18306_v26, %v3996_v2  ;;  %v4873_v22 = vrot.slane %v4681_v5, 1  ;;  %v4680_v47 = vrot.slane %v4678_v45, 7  ;;  %v4386_v20 = vmax.f32 %v4282_v52, 0.0 }
 0x39e   : > { %v4387_v53 = vmax.f32 %v4285_v63, 0.0  ;;  %v4874_v55 = vsel %vm18255_vm2, %v4872_v12, %v4873_v22  ;;  %v4683_v29 = vor.u32 %v4681_v5, %v4680_v47  ;;  %v18313_v12 = vld [vmem:[#allocation89_spill] sm:$0xff] }
 0x39f   : > { %v4000_v59 = vpop.f32.mrb[104].mxu1  ;;  %11904 = vmatmul.mubr.msk.bf16.gmra.mrb[172].mxu1 %vm18308_vm14, %v4874_v55  ;;  %vm18317_vm14 = vsmask.f32 256 }
 0x3a0   : > { %v14580_v37 = vpack.c.bf16 %v4387_v53, %v4386_v20  ;;  %v4001_v57 = vadd.f32 %v14524_v21, %v4000_v59  ;;  %v4002_v7 = vpop.f32.mrb[105].mxu1  ;;  %v14584_v61 = vsel %vm18310_vm5, %v4672_v23, %v4683_v29  ;;  %v4875_v20 = vor.u32 %v4873_v22, %v4678_v45  ;;  %v18319_v22 = vld [vmem:[#allocation53_spill] sm:$0xff] }
 0x3a1   : > { %18311 = vst [vmem:[#allocation85_spill] sm:$0xff] %v14584_v61  ;;  %v4003_v3 = vpop.f32.mrb[106].mxu1  ;;  %vm18315_vm5 = vnez %v18314_v25 }
 0x3a2   : > { %18309 = vst [vmem:[#allocation55_spill] sm:$0xff] %v14580_v37  ;;  %v4290_v2 = vadd.f32 %v18312_v32, %v4001_v57  ;;  %v4004_v52 = vadd.f32 %v14524_v21, %v4003_v3  ;;  %v4005_v26 = vpop.f32.mrb[107].mxu1  ;;  %v4689_v5 = vshll.u32 %v14580_v37, 16  ;;  %v4686_v63 = vshrl.u32 %v14580_v37, 16  ;;  %v18321_v37 = vld [vmem:[#allocation56_spill] sm:$0xff] }
 0x3a4   : > { %v4293_v55 = vadd.f32 %v18313_v12, %v4004_v52  ;;  %v4876_v53 = vrot.slane %v4689_v5, 1  ;;  %v4688_v39 = vrot.slane %v4686_v63, 7  ;;  %v4388_v59 = vmax.f32 %v4290_v2, 0.0 }
 0x3a6   : > { %v4389_v7 = vmax.f32 %v4293_v55, 0.0  ;;  %v4877_v23 = vsel %vm18255_vm2, %v4875_v20, %v4876_v53  ;;  %v4691_v29 = vor.u32 %v4689_v5, %v4688_v39  ;;  %v18320_v20 = vld [vmem:[#allocation88_spill] sm:$0xff] }
 0x3a7   : > { %v4008_v61 = vpop.f32.mrb[108].mxu1  ;;  %11907 = vmatprep.mubr.msk.bf16.mxu1 %vm18315_vm5, %v4877_v23  ;;  %vm18324_vm5 = vsmask.f32 256 }
 0x3a8   : > { %v14594_v57 = vpack.c.bf16 %v4389_v7, %v4388_v59  ;;  %v4009_v3 = vadd.f32 %v14524_v21, %v4008_v61  ;;  %v4010_v32 = vpop.f32.mrb[109].mxu1  ;;  %v14598_v26 = vsel %vm18317_vm14, %v4680_v47, %v4691_v29  ;;  %v4878_v59 = vor.u32 %v4876_v53, %v4686_v63  ;;  %v18326_v53 = vld [vmem:[#allocation52_spill] sm:$0xff] }
 0x3a9   : > { %18318 = vst [vmem:[#allocation89_spill] sm:$0xff] %v14598_v26  ;;  %v4011_v45 = vpop.f32.mrb[110].mxu1  ;;  %vm18322_vm14 = vnez %v18321_v37 }
 0x3aa   : > { %18316 = vst [vmem:[#allocation54_spill] sm:$0xff] %v14594_v57  ;;  %v4298_v52 = vadd.f32 %v18319_v22, %v4009_v3  ;;  %v4012_v2 = vadd.f32 %v14524_v21, %v4011_v45  ;;  %v4013_v12 = vpop.f32.mrb[111].mxu1  ;;  %v4697_v5 = vshll.u32 %v14594_v57, 16  ;;  %v4694_v55 = vshrl.u32 %v14594_v57, 16 }
 0x3ac   : > { %v4301_v23 = vadd.f32 %v18320_v20, %v4012_v2  ;;  %v4879_v7 = vrot.slane %v4697_v5, 1  ;;  %v4696_v25 = vrot.slane %v4694_v55, 7  ;;  %v4390_v61 = vmax.f32 %v4298_v52, 0.0 }
 0x3ae   : > { %v4391_v32 = vmax.f32 %v4301_v23, 0.0  ;;  %v4880_v47 = vsel %vm18255_vm2, %v4878_v59, %v4879_v7  ;;  %v4699_v29 = vor.u32 %v4697_v5, %v4696_v25  ;;  %v18327_v59 = vld [vmem:[#allocation92_spill] sm:$0xff] }
 0x3af   : > { %v4016_v26 = vpop.f32.mrb[112].mxu1  ;;  %11908 = vmatmul.mubr.msk.bf16.gmra.mrb[176].mxu1 %vm18322_vm14, %v4880_v47 }
 0x3b0   : > { %v14608_v3 = vpack.c.bf16 %v4391_v32, %v4390_v61  ;;  %v4017_v45 = vadd.f32 %v14524_v21, %v4016_v26  ;;  %v4018_v22 = vpop.f32.mrb[113].mxu1  ;;  %v14612_v12 = vsel %vm18324_vm5, %v4688_v39, %v4699_v29  ;;  %v4881_v61 = vor.u32 %v4879_v7, %v4694_v55  ;;  %v18330_v7 = vld [vmem:[#allocation61_spill] sm:$0xff] }
 0x3b1   : > { %18325 = vst [vmem:[#allocation88_spill] sm:$0xff] %v14612_v12  ;;  %v4019_v63 = vpop.f32.mrb[114].mxu1 }
 0x3b2   : > { %18323 = vst [vmem:[#allocation53_spill] sm:$0xff] %v14608_v3  ;;  %v4306_v2 = vadd.f32 %v18326_v53, %v4017_v45  ;;  %v4020_v52 = vadd.f32 %v14524_v21, %v4019_v63  ;;  %v4021_v20 = vpop.f32.mrb[115].mxu1  ;;  %v4705_v5 = vshll.u32 %v14608_v3, 16  ;;  %v4702_v23 = vshrl.u32 %v14608_v3, 16  ;;  %v18332_v3 = vld [vmem:[#allocation62_spill] sm:$0xff] }
 0x3b4   : > { %v4309_v47 = vadd.f32 %v18327_v59, %v4020_v52  ;;  %v4882_v32 = vrot.slane %v4705_v5, 1  ;;  %v4704_v37 = vrot.slane %v4702_v23, 7  ;;  %v4392_v26 = vmax.f32 %v4306_v2, 0.0 }
 0x3b6   : > { %v4393_v22 = vmax.f32 %v4309_v47, 0.0  ;;  %v4883_v39 = vsel %vm18255_vm2, %v4881_v61, %v4882_v32  ;;  %v4707_v29 = vor.u32 %v4705_v5, %v4704_v37  ;;  %v18331_v61 = vld [vmem:[#allocation91_spill] sm:$0xff] }
 0x3b7   : > { %v4024_v12 = vpop.f32.mrb[116].mxu1  ;;  %11911 = vmatprep.mubr.msk.bf16.mxu1 %vm13438_vm0, %v4883_v39  ;;  %vm18334_vm0 = vsmask.f32 256 }
 0x3b8   : > { %v14622_v45 = vpack.c.bf16 %v4393_v22, %v4392_v26  ;;  %v4025_v63 = vadd.f32 %v14524_v21, %v4024_v12  ;;  %v4026_v53 = vpop.f32.mrb[117].mxu1  ;;  %v14626_v20 = vsel %vm18324_vm5, %v4696_v25, %v4707_v29  ;;  %v4884_v26 = vor.u32 %v4882_v32, %v4702_v23 }
 0x3b9   : > { %18329 = vst [vmem:[#allocation52_spill] sm:$0xff] %v14626_v20  ;;  %v4027_v55 = vpop.f32.mrb[118].mxu1  ;;  %vm18333_vm5 = vnez %v18332_v3  ;;  %v18335_v3 = vld [vmem:[#allocation63_spill] sm:$0xff] }
 0x3ba   : > { %v4314_v52 = vadd.f32 %v18330_v7, %v4025_v63  ;;  %v4028_v2 = vadd.f32 %v14524_v21, %v4027_v55  ;;  %v4029_v59 = vpop.f32.mrb[119].mxu1  ;;  %v4713_v5 = vshll.u32 %v14622_v45, 16  ;;  %v4710_v47 = vshrl.u32 %v14622_v45, 16 }
 0x3bc   : > { %v4317_v39 = vadd.f32 %v18331_v61, %v4028_v2  ;;  %v4885_v22 = vrot.slane %v4713_v5, 1  ;;  %v4712_v57 = vrot.slane %v4710_v47, 7  ;;  %v4394_v12 = vmax.f32 %v4314_v52, 0.0 }
 0x3be   : > { %v4395_v53 = vmax.f32 %v4317_v39, 0.0  ;;  %v4886_v25 = vsel %vm18255_vm2, %v4884_v26, %v4885_v22  ;;  %v4715_v29 = vor.u32 %v4713_v5, %v4712_v57  ;;  %v4887_v26 = vor.u32 %v4885_v22, %v4710_v47  ;;  %v18339_v47 = vld [vmem:[#allocation59_spill] sm:$0xff] }
 0x3bf   : > { %v4032_v20 = vpop.f32.mrb[120].mxu1  ;;  %11912 = vmatmul.mubr.msk.bf16.gmra.mrb[180].mxu1 %vm18333_vm5, %v4886_v25  ;;  %vm18337_vm5 = vsmask.f32 256 }
 0x3c0   : > { %v14636_v63 = vpack.c.bf16 %v4395_v53, %v4394_v12  ;;  %v4033_v55 = vadd.f32 %v14524_v21, %v4032_v20  ;;  %v4034_v7 = vpop.f32.mrb[121].mxu1  ;;  %v14640_v59 = vsel %vm18334_vm0, %v4704_v37, %v4715_v29  ;;  %vm18336_vm0 = vnez %v18335_v3 }
 0x3c1   : > { %v4035_v23 = vpop.f32.mrb[122].mxu1 }
 0x3c2   : > { %v4322_v32 = vadd.f32 %v14102_v58, %v4033_v55  ;;  %v4036_v52 = vadd.f32 %v14524_v21, %v4035_v23  ;;  %v4037_v2 = vpop.f32.mrb[123].mxu1  ;;  %v4721_v5 = vshll.u32 %v14636_v63, 16  ;;  %v4718_v61 = vshrl.u32 %v14636_v63, 16 }
 0x3c4   : > { %v4325_v39 = vadd.f32 %v14115_v46, %v4036_v52  ;;  %v4888_v12 = vrot.slane %v4721_v5, 1  ;;  %v4720_v53 = vrot.slane %v4718_v61, 7  ;;  %v4396_v20 = vmax.f32 %v4322_v32, 0.0 }
 0x3c6   : > { %v4397_v25 = vmax.f32 %v4325_v39, 0.0  ;;  %v4889_v37 = vsel %vm18255_vm2, %v4887_v26, %v4888_v12  ;;  %v4723_v29 = vor.u32 %v4721_v5, %v4720_v53  ;;  %v18340_v26 = vld [vmem:[#allocation93_spill] sm:$0xff] }
 0x3c7   : > { %v4040_v7 = vpop.f32.mrb[124].mxu1  ;;  %11915 = vmatprep.mubr.msk.bf16.mxu1 %vm18336_vm0, %v4889_v37  ;;  %vm18343_vm0 = vsmask.f32 256 }
 0x3c8   : > { %v14650_v58 = vpack.c.bf16 %v4397_v25, %v4396_v20  ;;  %v4041_v55 = vadd.f32 %v14524_v21, %v4040_v7  ;;  %v4042_v23 = vpop.f32.mrb[125].mxu1  ;;  %v14654_v2 = vsel %vm18337_vm5, %v4712_v57, %v4723_v29  ;;  %v4890_v20 = vor.u32 %v4888_v12, %v4718_v61 }
 0x3c9   : > { %18338 = vst [vmem:[#allocation92_spill] sm:$0xff] %v14654_v2  ;;  %v4043_v46 = vpop.f32.mrb[126].mxu1 }
 0x3ca   : > { %v4330_v22 = vadd.f32 %v18339_v47, %v4041_v55  ;;  %v4044_v32 = vadd.f32 %v14524_v21, %v4043_v46  ;;  %v4045_v52 = vpop.f32.mrb[127].mxu1  ;;  %v4729_v5 = vshll.u32 %v14650_v58, 16  ;;  %v4726_v39 = vshrl.u32 %v14650_v58, 16  ;;  %v18341_v55 = vld [vmem:[#allocation66_spill] sm:$0xff] }
 0x3cb   : > { %vm18342_vm5 = vnez %v18341_v55 }
 0x3cc   : > { %v4333_v37 = vadd.f32 %v18340_v26, %v4044_v32  ;;  %v4891_v25 = vrot.slane %v4729_v5, 1  ;;  %v4728_v3 = vrot.slane %v4726_v39, 7  ;;  %v4398_v7 = vmax.f32 %v4330_v22, 0.0 }
 0x3ce   : > { %v4399_v23 = vmax.f32 %v4333_v37, 0.0  ;;  %v4892_v57 = vsel %vm18255_vm2, %v4890_v20, %v4891_v25  ;;  %v4731_v29 = vor.u32 %v4729_v5, %v4728_v3  ;;  %v4893_v5 = vor.u32 %v4891_v25, %v4726_v39  ;;  %v18345_v37 = vld [vmem:[#allocation58_spill] sm:$0xff]  ;;  %v18346_v20 = vld [vmem:[#allocation64_spill] sm:$0xff] }
 0x3cf   : > { %v14662_v2 = vpop.f32.mrb[128].mxu1  ;;  %11916 = vmatmul.mubr.msk.bf16.gmra.mrb[184].mxu1 %vm18342_vm5, %v4892_v57  ;;  %vm18347_vm2 = vnez %v18346_v20  ;;  %vm18348_vm5 = vsmask.f32 7424 }
 0x3d0   : > { %v14666_v21 = vpack.c.bf16 %v4399_v23, %v4398_v7  ;;  %v14668_v46 = vpop.f32.mrb[129].mxu1  ;;  %v14671_v47 = vsel %vm18343_vm0, %v4720_v53, %v4731_v29  ;;  %v18349_v29 = vld [vmem:[#allocation65_spill] sm:$0xff] }
 0x3d1   : > { %18344 = vst [vmem:[#allocation61_spill] sm:$0xff] %v14671_v47  ;;  %v14673_v61 = vpop.f32.mrb[130].mxu1  ;;  %vm18350_vm0 = vnez %v18349_v29  ;;  %v18400_v47 = vld [vmem:[#allocation34_spill] sm:$0xff]  ;;  %v18401_v29 = vld [vmem:[#allocation29_spill] sm:$0xff] }
 0x3d2   : > { %v4482_v12 = vshrl.u32 %v14666_v21, 16  ;;  %v14676_v22 = vpop.f32.mrb[131].mxu1  ;;  %v4733_v32 = vshll.u32 %v14666_v21, 16 }
 0x3d4   : > { %v4484_v52 = vrot.slane %v4482_v12, 7  ;;  %v4894_v26 = vrot.slane %v4733_v32, 1 }
 0x3d6   : > { %v4769_v7 = vsel %vm18347_vm2, %v4484_v52, %v18345_v37  ;;  %v4895_v23 = vsel %vm18348_vm5, %v4893_v5, %v4894_v26  ;;  %v4896_v57 = vor.u32 %v4894_v26, %v4482_v12  ;;  %v4735_v53 = vor.u32 %v4733_v32, %v4484_v52  ;;  %v18355_v26 = vld [vmem:[#allocation68_spill] sm:$0xff] }
 0x3d7   : > { %10833 = vmatmul.mubr.msk.bf16.vlgmr.msra.gmra.mrb[128].mxu0 %vm18350_vm0, %v4769_v7  ;;  %v14685_v55 = vpop.f32.mrb[132].mxu1  ;;  %11919 = vmatprep.mubr.msk.bf16.mxu1 %vm13556_vm11, %v4895_v23  ;;  %vm18353_vm2 = vsmask.f32 256  ;;  %vm18356_vm5 = vnez %v18355_v26  ;;  %v18357_v23 = vld [vmem:[#allocation71_spill] sm:$0xff]  ;;  %v18361_v26 = vld [vmem:[#allocation73_spill] sm:$0xff] }
 0x3d8   : > { %5153 = vmatprep.mubr.bf16.mxu0 %v14140_v60  ;;  %v14690_v39 = vpop.f32.mrb[133].mxu1  ;;  %v4930_v37 = vsel %vm13595_vm8, %v4896_v57, %v14195_v17  ;;  %v14696_v5 = vsel %vm18353_vm2, %v4728_v3, %v4735_v53  ;;  %vm18358_vm2 = vnez %v18357_v23  ;;  %v18359_v57 = vld [vmem:[#allocation72_spill] sm:$0xff]  ;;  %v18365_v23 = vld [vmem:[#allocation75_spill] sm:$0xff] }
 0x3d9   : > { %v14698_v12 = vpop.f32.mrb[134].mxu1  ;;  %11920 = vmatmul.mubr.msk.bf16.gmra.mrb[188].mxu1 %vm13599_vm7, %v4930_v37  ;;  %vm18360_vm7 = vnez %v18359_v57 }
 0x3da   : > { %v14702_v52 = vpop.f32.mrb[135].mxu1 }
 0x3df   : > { %10835 = vmatmul.mubr.msk.bf16.gmra.mrb[132].mxu0 %vm18356_vm5, %v14175_v9  ;;  %vm18362_vm5 = vnez %v18361_v26  ;;  %v18369_v26 = vld [vmem:[#allocation77_spill] sm:$0xff] }
 0x3e0   : > { %5161 = vmatprep.mubr.bf16.mxu0 %v14171_v41 }
 0x3e2   : > { %v14708_v60 = vpop.f32.mrb[136].mxu1 }
 0x3e3   : > { %v14710_v7 = vpop.f32.mrb[137].mxu1 }
 0x3e4   : > { %v14712_v17 = vpop.f32.mrb[138].mxu1 }
 0x3e5   : > { %v14714_v3 = vpop.f32.mrb[139].mxu1 }
 0x3e7   : > { %10837 = vmatmul.mubr.msk.bf16.gmra.mrb[136].mxu0 %vm18358_vm2, %v14202_v50  ;;  %v18363_v50 = vld [vmem:[#allocation74_spill] sm:$0xff] }
 0x3e8   : > { %5169 = vmatprep.mubr.bf16.mxu0 %v14198_v30  ;;  %vm18364_vm2 = vnez %v18363_v50 }
 0x3ef   : > { %10839 = vmatmul.mubr.msk.bf16.gmra.mrb[140].mxu0 %vm18360_vm7, %v14230_v8  ;;  %vm18366_vm7 = vnez %v18365_v23  ;;  %v18373_v23 = vld [vmem:[#allocation79_spill] sm:$0xff] }
 0x3f0   : > { %5177 = vmatprep.mubr.bf16.mxu0 %v14226_v44 }
 0x3f2   : > { %v14724_v41 = vpop.f32.mrb[140].mxu1 }
 0x3f3   : > { %v14726_v9 = vpop.f32.mrb[141].mxu1 }
 0x3f4   : > { %v14728_v53 = vpop.f32.mrb[142].mxu1 }
 0x3f5   : > { %v14730_v37 = vpop.f32.mrb[143].mxu1 }
 0x3f7   : > { %10841 = vmatmul.mubr.msk.bf16.gmra.mrb[144].mxu0 %vm18362_vm5, %v14253_v6 }
 0x3f8   : > { %5185 = vmatprep.mubr.bf16.mxu0 %v14249_v10  ;;  %v18367_v10 = vld [vmem:[#allocation76_spill] sm:$0xff] }
 0x3f9   : > { %vm18368_vm5 = vnez %v18367_v10 }
 0x3ff   : > { %10843 = vmatmul.mubr.msk.bf16.gmra.mrb[148].mxu0 %vm18364_vm2, %v14274_v51  ;;  %vm18370_vm2 = vnez %v18369_v26  ;;  %v18389_v26 = vld [vmem:[#allocation31_spill] sm:$0xff] }
 0x400   : > { %5193 = vmatprep.mubr.bf16.mxu0 %v14270_v27 }
 0x402   : > { %v14740_v30 = vpop.f32.mrb[144].mxu1 }
 0x403   : > { %v14742_v44 = vpop.f32.mrb[145].mxu1 }
 0x404   : > { %v14744_v8 = vpop.f32.mrb[146].mxu1 }
 0x405   : > { %v14746_v57 = vpop.f32.mrb[147].mxu1 }
 0x407   : > { %10845 = vmatmul.mubr.msk.bf16.gmra.mrb[152].mxu0 %vm18366_vm7, %v14292_v34 }
 0x408   : > { %5201 = vmatprep.mubr.bf16.mxu0 %v14288_v38  ;;  %v18371_v38 = vld [vmem:[#allocation78_spill] sm:$0xff] }
 0x409   : > { %vm18372_vm7 = vnez %v18371_v38 }
 0x40f   : > { %10847 = vmatmul.mubr.msk.bf16.gmra.mrb[156].mxu0 %vm18368_vm5, %v14310_v40  ;;  %vm18374_vm5 = vnez %v18373_v23 }
 0x410   : > { %5209 = vmatprep.mubr.bf16.mxu0 %v14306_v43 }
 0x412   : > { %v14756_v6 = vpop.f32.mrb[148].mxu1 }
 0x413   : > { %v14758_v27 = vpop.f32.mrb[149].mxu1 }
 0x414   : > { %v14760_v51 = vpop.f32.mrb[150].mxu1 }
 0x415   : > { %v14762_v50 = vpop.f32.mrb[151].mxu1 }
 0x417   : > { %10849 = vmatmul.mubr.msk.bf16.gmra.mrb[160].mxu0 %vm18370_vm2, %v14328_v24 }
 0x418   : > { %5217 = vmatprep.mubr.bf16.mxu0 %v14324_v28  ;;  %v18378_v28 = vld [vmem:[#allocation82_spill] sm:$0xff] }
 0x41f   : > { %10851 = vmatmul.mubr.msk.bf16.gmra.mrb[164].mxu0 %vm18372_vm7, %v14346_v15  ;;  %vm18390_vm7 = vnez %v18389_v26  ;;  %v18405_v26 = vld [vmem:[#allocation30_spill] sm:$0xff] }
 0x420   : > { %5225 = vmatprep.mubr.bf16.mxu0 %v14342_v56 }
 0x422   : > { %v14772_v34 = vpop.f32.mrb[152].mxu1 }
 0x423   : > { %v14774_v43 = vpop.f32.mrb[153].mxu1 }
 0x424   : > { %v14776_v40 = vpop.f32.mrb[154].mxu1 }
 0x425   : > { %v14778_v10 = vpop.f32.mrb[155].mxu1 }
 0x427   : > { %10853 = vmatmul.mubr.msk.bf16.gmra.mrb[168].mxu0 %vm18374_vm5, %v14364_v62  ;;  %v12248_v62 = vld [vmem:[%s17486_s5 + $0x140] sm:$0xff]  }
 0x428   : > { %5233 = vmatprep.mubr.bf16.mxu0 %v14360_v36  ;;  %v18376_v36 = vld [vmem:[#allocation81_spill] sm:$0xff]  ;;  %11923 = vmatprep.subr.bf16.mxu0 %v12248_v62 }
 0x429   : > { %vm18377_vm5 = vnez %v18376_v36  ;;  %11924 = vmatpush3.bf16.msra.mxu0 %v12248_v62 }
 0x42f   : > { %10855 = vmatmul.mubr.msk.bf16.gmra.mrb[172].mxu0 %vm13714_vm3, %v14382_v35  ;;  %v12250_v35 = vld [vmem:[%s17486_s5 + $0x150] sm:$0xff]   ;;  %vm18379_vm3 = vnez %v18378_v28  ;;  %v18382_v28 = vld [vmem:[#allocation20_spill] sm:$0xff] }
 0x430   : > { %5241 = vmatprep.mubr.bf16.mxu0 %v14378_v33  ;;  %v12249_v33 = vld [vmem:[%s17486_s5 + $0x148] sm:$0xff]  }
 0x431   : > { %11925 = vmatprep.subr.bf16.mxu0 %v12249_v33 }
 0x432   : > { %v14788_v24 = vpop.f32.mrb[156].mxu1  ;;  %11926 = vmatpush3.bf16.msra.mxu0 %v12249_v33 }
 0x433   : > { %v14790_v56 = vpop.f32.mrb[157].mxu1  ;;  %11927 = vmatprep.subr.bf16.mxu0 %v12250_v35 }
 0x434   : > { %v14792_v15 = vpop.f32.mrb[158].mxu1 }
 0x435   : > { %v14794_v38 = vpop.f32.mrb[159].mxu1 }
 0x436   : > { %11928 = vmatpush3.bf16.msra.mxu0 %v12250_v35  ;;  %v12253_v35 = vld [vmem:[%s17486_s5 + $0x168] sm:$0xff]  }
 0x437   : > { %10857 = vmatmul.mubr.msk.bf16.gmra.mrb[176].mxu0 %vm18377_vm5, %v14400_v13  ;;  %vm18383_vm5 = vnez %v18382_v28 }
 0x438   : > { %5249 = vmatprep.mubr.bf16.mxu0 %v14396_v16  ;;  %v12251_v16 = vld [vmem:[%s17486_s5 + $0x158] sm:$0xff]  }
 0x439   : > { %11929 = vmatprep.subr.bf16.mxu0 %v12251_v16 }
 0x43a   : > { %11930 = vmatpush3.bf16.msra.mxu0 %v12251_v16  ;;  %v12254_v16 = vld [vmem:[%s17486_s5 + $0x170] sm:$0xff]  }
 0x43f   : > { %10859 = vmatmul.mubr.msk.bf16.gmra.mrb[180].mxu0 %vm18379_vm3, %v14418_v49  ;;  %v12252_v49 = vld [vmem:[%s17486_s5 + $0x160] sm:$0xff]  }
 0x440   : > { %5257 = vmatprep.mubr.bf16.mxu0 %v14414_v1  ;;  %v18380_v1 = vld [vmem:[#allocation83_spill] sm:$0xff]  ;;  %11931 = vmatprep.subr.bf16.mxu0 %v12252_v49 }
 0x441   : > { %vm18381_vm3 = vnez %v18380_v1  ;;  %11932 = vmatpush3.bf16.msra.mxu0 %v12252_v49 }
 0x442   : > { %v14816_v13 = vpop.f32.mrb[160].mxu1  ;;  %11933 = vmatprep.subr.bf16.mxu0 %v12253_v35 }
 0x443   : > { %v14818_v62 = vpop.f32.mrb[161].mxu1 }
 0x444   : > { %v14820_v33 = vpop.f32.mrb[162].mxu1 }
 0x445   : > { %v14822_v36 = vpop.f32.mrb[163].mxu1  ;;  %11934 = vmatpush3.bf16.msra.mxu0 %v12253_v35 }
 0x446   : > { %11935 = vmatprep.subr.bf16.mxu0 %v12254_v16 }
 0x447   : > { %10861 = vmatmul.mubr.msk.bf16.gmra.mrb[184].mxu0 %vm18381_vm3, %v14436_v0 }
 0x448   : > { %5265 = vmatprep.mubr.bf16.mxu0 %v14432_v4  ;;  %v12255_v4 = vld [vmem:[%s17486_s5 + $0x178] sm:$0xff]  }
 0x449   : > { %11936 = vmatpush3.bf16.msra.mxu0 %v12254_v16 }
 0x44a   : > { %11937 = vmatprep.subr.bf16.mxu0 %v12255_v4 }
 0x44d   : > { %11938 = vmatpush3.bf16.msra.mxu0 %v12255_v4 }
 0x44e   : > { %7827 = vmatprep.subr.bf16.mxu0 %v17892_v54 }
 0x44f   : > { %10863 = vmatmul.mubr.msk.bf16.gmra.mrb[188].mxu0 %vm18383_vm5, %v14453_v48  ;;  %v18384_v48 = vld [vmem:[#allocation24_spill] sm:$0xff] }
 0x450   : > { %5273 = vmatprep.mubr.bf16.mxu0 %v14449_v14  ;;  %vm18385_vm5 = vnez %v18384_v48  ;;  %v18386_v14 = vld [vmem:[#allocation25_spill] sm:$0xff]  ;;  %v18393_v48 = vld [vmem:[#allocation23_spill] sm:$0xff] }
 0x451   : > { %vm18387_vm3 = vnez %v18386_v14 }
 0x452   : > { %v14844_v0 = vpop.f32.mrb[164].mxu1 }
 0x453   : > { %v14846_v49 = vpop.f32.mrb[165].mxu1 }
 0x454   : > { %v14848_v35 = vpop.f32.mrb[166].mxu1 }
 0x455   : > { %v14850_v1 = vpop.f32.mrb[167].mxu1 }
 0x457   : > { %10865 = vmatmul.mubr.msk.bf16.gmra.mrb[192].mxu0 %vm18385_vm5, %v14467_v11  ;;  %v18391_v11 = vld [vmem:[#allocation28_spill] sm:$0xff]  ;;  %vm18394_vm5 = vnez %v18393_v48 }
 0x458   : > { %5281 = vmatprep.mubr.bf16.mxu0 %v14463_v42  ;;  %v18392_v42 = vld [vmem:[#allocation41_spill] sm:$0xff] }
 0x45f   : > { %10867 = vmatmul.mubr.msk.bf16.gmra.mrb[196].mxu0 %vm18387_vm3, %v14481_v19  ;;  %v18395_v19 = vld [vmem:[#allocation36_spill] sm:$0xff]  ;;  %vm18402_vm3 = vnez %v18401_v29  ;;  %v18417_v29 = vld [vmem:[#allocation43_spill] sm:$0xff] }
 0x460   : > { %5289 = vmatprep.mubr.bf16.mxu0 %v14477_v18 }
 0x462   : > { %v14861_v16 = vpop.f32.mrb[168].mxu1 }
 0x463   : > { %v14863_v28 = vpop.f32.mrb[169].mxu1 }
 0x464   : > { %v14865_v4 = vpop.f32.mrb[170].mxu1 }
 0x465   : > { %18388 = vst [vmem:[#allocation91_spill] sm:$0xff] %v14865_v4  ;;  %v14867_v23 = vpop.f32.mrb[171].mxu1  ;;  %v18444_v4 = vld [vmem:[#allocation90_spill] sm:$0xff] }
 0x467   : > { %10869 = vmatmul.mubr.msk.bf16.gmra.mrb[200].mxu0 %vm18390_vm7, %v14495_v31  ;;  %v18403_v31 = vld [vmem:[#allocation35_spill] sm:$0xff]  ;;  %vm18406_vm7 = vnez %v18405_v26 }
 0x468   : > { %5297 = vmatprep.mubr.bf16.mxu0 %v18391_v11  ;;  %v18404_v11 = vld [vmem:[#allocation48_spill] sm:$0xff] }
 0x46f   : > { %10871 = vmatmul.mubr.msk.bf16.gmra.mrb[204].mxu0 %vm18394_vm5, %v18392_v42  ;;  %v18407_v42 = vld [vmem:[#allocation49_spill] sm:$0xff] }
 0x470   : > { %5305 = vmatprep.mubr.bf16.mxu0 %v18395_v19 }
 0x472   : > { %v14877_v18 = vpop.f32.mrb[172].mxu1 }
 0x473   : > { %18396 = vst [vmem:[#allocation59_spill] sm:$0xff] %v14877_v18  ;;  %v14879_v14 = vpop.f32.mrb[173].mxu1  ;;  %v18412_v18 = vld [vmem:[#allocation47_spill] sm:$0xff] }
 0x474   : > { %18397 = vst [vmem:[#allocation93_spill] sm:$0xff] %v14879_v14  ;;  %v14881_v32 = vpop.f32.mrb[174].mxu1  ;;  %v18443_v14 = vld [vmem:[#allocation52_spill] sm:$0xff] }
 0x475   : > { %18398 = vst [vmem:[#allocation58_spill] sm:$0xff] %v14881_v32  ;;  %v14883_v25 = vpop.f32.mrb[175].mxu1 }
 0x476   : > { %18399 = vst [vmem:[#allocation28_spill] sm:$0xff] %v14883_v25  ;;  %v18413_v25 = vld [vmem:[#allocation37_spill] sm:$0xff] }
 0x477   : > { %10873 = vmatmul.mubr.msk.bf16.gmra.mrb[208].mxu0 %vm18402_vm3, %v18400_v47  ;;  %vm18414_vm5 = vnez %v18413_v25  ;;  %v18415_v47 = vld [vmem:[#allocation42_spill] sm:$0xff]  ;;  %vm18418_vm3 = vnez %v18417_v29  ;;  %v18429_v25 = vld [vmem:[#allocation84_spill] sm:$0xff] }
 0x478   : > { %5313 = vmatprep.mubr.bf16.mxu0 %v18403_v31  ;;  %v18416_v31 = vld [vmem:[#allocation86_spill] sm:$0xff] }
 0x47f   : > { %10875 = vmatmul.mubr.msk.bf16.gmra.mrb[212].mxu0 %vm18406_vm7, %v18404_v11  ;;  %v18419_v11 = vld [vmem:[#allocation46_spill] sm:$0xff] }
 0x480   : > { %5321 = vmatprep.mubr.bf16.mxu0 %v18407_v42 }
 0x482   : > { %v14893_v19 = vpop.f32.mrb[176].mxu1 }
 0x483   : > { %18408 = vst [vmem:[#allocation41_spill] sm:$0xff] %v14893_v19  ;;  %v14895_v48 = vpop.f32.mrb[177].mxu1 }
 0x484   : > { %18409 = vst [vmem:[#allocation36_spill] sm:$0xff] %v14895_v48  ;;  %v14897_v20 = vpop.f32.mrb[178].mxu1  ;;  %v18425_v48 = vld [vmem:[#allocation40_spill] sm:$0xff] }
 0x485   : > { %18410 = vst [vmem:[#allocation34_spill] sm:$0xff] %v14897_v20  ;;  %v14899_v32 = vpop.f32.mrb[179].mxu1  ;;  %vm18426_vm7 = vnez %v18425_v48 }
 0x486   : > { %18411 = vst [vmem:[#allocation35_spill] sm:$0xff] %v14899_v32  ;;  %v18424_v32 = vld [vmem:[#allocation85_spill] sm:$0xff] }
 0x487   : > { %10877 = vmatmul.mubr.msk.bf16.gmra.mrb[216].mxu0 %vm18414_vm5, %v18412_v18  ;;  %v18427_v18 = vld [vmem:[#allocation55_spill] sm:$0xff]  ;;  %vm18430_vm5 = vnez %v18429_v25 }
 0x488   : > { %5329 = vmatprep.mubr.bf16.mxu0 %v18415_v47  ;;  %v18428_v47 = vld [vmem:[#allocation89_spill] sm:$0xff] }
 0x48f   : > { %10879 = vmatmul.mubr.msk.bf16.gmra.mrb[220].mxu0 %vm18418_vm3, %v18416_v31  ;;  %v18431_v31 = vld [vmem:[#allocation54_spill] sm:$0xff] }
 0x490   : > { %5337 = vmatprep.mubr.bf16.mxu0 %v18419_v11 }
 0x492   : > { %v14909_v42 = vpop.f32.mrb[180].mxu1 }
 0x493   : > { %18420 = vst [vmem:[#allocation48_spill] sm:$0xff] %v14909_v42  ;;  %v14911_v26 = vpop.f32.mrb[181].mxu1 }
 0x494   : > { %18421 = vst [vmem:[#allocation49_spill] sm:$0xff] %v14911_v26  ;;  %v14913_v19 = vpop.f32.mrb[182].mxu1  ;;  %v18437_v26 = vld [vmem:[#allocation87_spill] sm:$0xff] }
 0x495   : > { %18422 = vst [vmem:[#allocation47_spill] sm:$0xff] %v14913_v19  ;;  %v14915_v20 = vpop.f32.mrb[183].mxu1  ;;  %vm18438_vm3 = vnez %v18437_v26 }
 0x496   : > { %18423 = vst [vmem:[#allocation42_spill] sm:$0xff] %v14915_v20  ;;  %v18436_v20 = vld [vmem:[#allocation88_spill] sm:$0xff] }
 0x497   : > { %10881 = vmatmul.mubr.msk.bf16.gmra.mrb[224].mxu0 %vm18426_vm7, %v18424_v32  ;;  %v18439_v32 = vld [vmem:[#allocation53_spill] sm:$0xff] }
 0x498   : > { %5345 = vmatprep.mubr.bf16.mxu0 %v18427_v18  ;;  %v14940_v18 = vld [vmem:[%s17487_s6] ss:$0 sm:$0xff] }
 0x49f   : > { %10883 = vmatmul.mubr.msk.bf16.gmra.mrb[228].mxu0 %vm18430_vm5, %v18428_v47 }
 0x4a0   : > { %5353 = vmatprep.mubr.bf16.mxu0 %v18431_v31 }
 0x4a2   : > { %v14925_v11 = vpop.f32.mrb[184].mxu1 }
 0x4a3   : > { %18432 = vst [vmem:[#allocation86_spill] sm:$0xff] %v14925_v11  ;;  %v14927_v29 = vpop.f32.mrb[185].mxu1 }
 0x4a4   : > { %18433 = vst [vmem:[#allocation46_spill] sm:$0xff] %v14927_v29  ;;  %v14929_v42 = vpop.f32.mrb[186].mxu1 }
 0x4a5   : > { %18434 = vst [vmem:[#allocation85_spill] sm:$0xff] %v14929_v42  ;;  %v14931_v19 = vpop.f32.mrb[187].mxu1 }
 0x4a6   : > { %18435 = vst [vmem:[#allocation55_spill] sm:$0xff] %v14931_v19 }
 0x4a7   : > { %10885 = vmatmul.mubr.msk.bf16.gmra.mrb[232].mxu0 %vm18438_vm3, %v18436_v20  ;;  %vm18445_vm3 = vnez %v18444_v4 }
 0x4a8   : > { %5361 = vmatprep.mubr.bf16.mxu0 %v18439_v32 }
 0x4aa   : > { %v5147_v47 = vpop.f32.mrb[128].mxu0 }
 0x4ab   : > { %v5148_v31 = vadd.f32 %v14940_v18, %v5147_v47  ;;  %v5149_v25 = vpop.f32.mrb[129].mxu0 }
 0x4ac   : > { %v5150_v48 = vpop.f32.mrb[130].mxu0  ;;  %v14943_v11 = vpop.f32.mrb[188].mxu1 }
 0x4ad   : > { %18440 = vst [vmem:[#allocation89_spill] sm:$0xff] %v14943_v11  ;;  %v5437_v42 = vadd.f32 %v14668_v46, %v5148_v31  ;;  %v5151_v19 = vadd.f32 %v14940_v18, %v5150_v48  ;;  %v5152_v26 = vpop.f32.mrb[131].mxu0  ;;  %v14947_v20 = vpop.f32.mrb[189].mxu1 }
 0x4ae   : > { %18441 = vst [vmem:[#allocation54_spill] sm:$0xff] %v14947_v20  ;;  %v14949_v32 = vpop.f32.mrb[190].mxu1 }
 0x4af   : > { %18442 = vst [vmem:[#allocation88_spill] sm:$0xff] %v14949_v32  ;;  %v5440_v29 = vadd.f32 %v14676_v22, %v5151_v19  ;;  %10887 = vmatmul.mubr.msk.bf16.gmra.mrb[236].mxu0 %vm18445_vm3, %v18443_v14  ;;  %v14955_v47 = vpop.f32.mrb[191].mxu1  ;;  %v5691_v25 = vmax.f32 %v5437_v42, 0.0 }
 0x4b0   : > { %5369 = vmatprep.mubr.bf16.mxu0 %v14622_v45 }
 0x4b1   : > { %v5692_v11 = vmax.f32 %v5440_v29, 0.0 }
 0x4b2   : > { %v5155_v46 = vpop.f32.mrb[132].mxu0 }
 0x4b3   : > { %v5156_v48 = vadd.f32 %v14940_v18, %v5155_v46  ;;  %v5157_v26 = vpop.f32.mrb[133].mxu0  ;;  %v14959_v31 = vpack.c.bf16 %v5692_v11, %v5691_v25  ;;  %v18446_v11 = vld [vmem:[#allocation60_spill] sm:$0xff] }
 0x4b4   : > { %v5158_v20 = vpop.f32.mrb[134].mxu0  ;;  %vm18447_vm3 = vnez %v18446_v11 }
 0x4b5   : > { %v5445_v32 = vadd.f32 %v14662_v2, %v5156_v48  ;;  %v5159_v22 = vadd.f32 %v14940_v18, %v5158_v20  ;;  %v5160_v19 = vpop.f32.mrb[135].mxu0  ;;  %v17773_v14 = vshrl.u32 %v14959_v31, 16  ;;  %6502 = vmatprep.mubr.bf16.mxu1 %v14959_v31  ;;  %v5847_v42 = vshll.u32 %v14959_v31, 16  ;;  %v12256_v2 = vld [vmem:[%s17486_s5 + $0xc0] sm:$0xff]  }
 0x4b6   : > { %6471 = vmatpush1.bf16.msra.mxu1 %v12256_v2  ;;  %v18449_v2 = vld [vmem:[#allocation94_spill] sm:$0xff] }
 0x4b7   : > { %v5448_v45 = vadd.f32 %v14673_v61, %v5159_v22  ;;  %v5846_v29 = vrot.slane %v17773_v14, 7  ;;  %10889 = vmatmul.mubr.msk.bf16.gmra.mrb[240].mxu0 %vm18447_vm3, %v14640_v59  ;;  %v5693_v20 = vmax.f32 %v5445_v32, 0.0  ;;  %6472 = vmatprep.subr.bf16.mxu1 %v17892_v54  ;;  %vm18450_vm3 = vnez %v18449_v2 }
 0x4b8   : > { %5377 = vmatprep.mubr.bf16.mxu0 %v14636_v63 }
 0x4b9   : > { %v5694_v25 = vmax.f32 %v5448_v45, 0.0  ;;  %v14976_v46 = vor.u32 %v5847_v42, %v5846_v29  ;;  %v18448_v45 = vld [vmem:[#allocation92_spill] sm:$0xff] }
 0x4ba   : > { %v5163_v61 = vpop.f32.mrb[136].mxu0 }
 0x4bb   : > { %v14979_v48 = vpack.c.bf16 %v5694_v25, %v5693_v20  ;;  %v5164_v26 = vadd.f32 %v14940_v18, %v5163_v61  ;;  %v5165_v22 = vpop.f32.mrb[137].mxu0  ;;  %v12257_v25 = vld [vmem:[%s17486_s5 + $0xc8] sm:$0xff]  }
 0x4bc   : > { %v5166_v59 = vpop.f32.mrb[138].mxu0  ;;  %6473 = vmatpush1.bf16.msra.mxu1 %v12257_v25 }
 0x4bd   : > { %v5453_v19 = vadd.f32 %v14690_v39, %v5164_v26  ;;  %v5167_v14 = vadd.f32 %v14940_v18, %v5166_v59  ;;  %v5168_v11 = vpop.f32.mrb[139].mxu0  ;;  %v17774_v63 = vshrl.u32 %v14979_v48, 16  ;;  %v5854_v20 = vshll.u32 %v14979_v48, 16  ;;  %6474 = vmatprep.subr.bf16.mxu1 %v17892_v54 }
 0x4bf   : > { %v5456_v32 = vadd.f32 %v14702_v52, %v5167_v14  ;;  %10891 = vmatmul.mubr.msk.bf16.gmra.mrb[244].mxu0 %vm18450_vm3, %v18448_v45  ;;  %v5853_v39 = vrot.slane %v17774_v63, 7  ;;  %v5695_v11 = vmax.f32 %v5453_v19, 0.0  ;;  %vm18452_vm3 = vsmask.f32 256 }
 0x4c0   : > { %5385 = vmatprep.mubr.bf16.mxu0 %v14650_v58 }
 0x4c1   : > { %v5696_v61 = vmax.f32 %v5456_v32, 0.0  ;;  %v5856_v26 = vor.u32 %v5854_v20, %v5853_v39 }
 0x4c2   : > { %v5171_v52 = vpop.f32.mrb[140].mxu0 }
 0x4c3   : > { %v14997_v14 = vpack.c.bf16 %v5696_v61, %v5695_v11  ;;  %v5172_v22 = vadd.f32 %v14940_v18, %v5171_v52  ;;  %v5173_v59 = vpop.f32.mrb[141].mxu0  ;;  %v15001_v45 = vsel %vm18452_vm3, %v5846_v29, %v5856_v26  ;;  %v18453_v11 = vld [vmem:[#allocation61_spill] sm:$0xff]  ;;  %v6161_v61 = vrot.slane %v5854_v20, 1 }
 0x4c4   : > { %v5174_v2 = vpop.f32.mrb[142].mxu0  ;;  %v15012_v59 = vrot.slane %v5847_v42, 1 }
 0x4c5   : > { %18451 = vst [vmem:[#allocation53_spill] sm:$0xff] %v14997_v14  ;;  %v5461_v63 = vadd.f32 %v14685_v55, %v5172_v22  ;;  %v5175_v58 = vadd.f32 %v14940_v18, %v5174_v2  ;;  %v5176_v19 = vpop.f32.mrb[143].mxu0  ;;  %v5859_v32 = vshrl.u32 %v14997_v14, 16  ;;  %v5862_v25 = vshll.u32 %v14997_v14, 16  ;;  %v12258_v55 = vld [vmem:[%s17486_s5 + $0xd0] sm:$0xff]  }
 0x4c6   : > { %6475 = vmatpush1.bf16.msra.mxu1 %v12258_v55  ;;  %v18455_v14 = vshrl.u32 %v14959_v31, 16 }
 0x4c7   : > { %v5464_v4 = vadd.f32 %v14698_v12, %v5175_v58  ;;  %10893 = vmatmul.mubr.msk.bf16.gmra.mrb[248].mxu0 %vm14177_vm10, %v18453_v11  ;;  %v5861_v52 = vrot.slane %v5859_v32, 7  ;;  %v5697_v29 = vmax.f32 %v5461_v63, 0.0  ;;  %6476 = vmatprep.subr.bf16.mxu1 %v17892_v54 }
 0x4c8   : > { %5393 = vmatprep.mubr.bf16.mxu0 %v14666_v21 }
 0x4c9   : > { %v5698_v26 = vmax.f32 %v5464_v4, 0.0  ;;  %v5864_v2 = vor.u32 %v5862_v25, %v5861_v52 }
 0x4ca   : > { %v5179_v22 = vpop.f32.mrb[144].mxu0 }
 0x4cb   : > { %v15017_v19 = vpack.c.bf16 %v5698_v26, %v5697_v29  ;;  %v5180_v12 = vadd.f32 %v14940_v18, %v5179_v22  ;;  %v5181_v58 = vpop.f32.mrb[145].mxu0  ;;  %v15021_v11 = vsel %vm18452_vm3, %v5853_v39, %v5864_v2  ;;  %v6160_v29 = vor.u32 %v15012_v59, %v18455_v14  ;;  %v12259_v14 = vld [vmem:[%s17486_s5 + $0xd8] sm:$0xff]  }
 0x4cc   : > { %v5182_v21 = vpop.f32.mrb[146].mxu0  ;;  %vm18457_vm3 = vsmask.f32 7424  ;;  %6477 = vmatpush1.bf16.msra.mxu1 %v12259_v14 }
 0x4cd   : > { %v5469_v4 = vadd.f32 %v14710_v7, %v5180_v12  ;;  %v5183_v42 = vadd.f32 %v14940_v18, %v5182_v21  ;;  %v5184_v63 = vpop.f32.mrb[147].mxu0  ;;  %v5867_v26 = vshrl.u32 %v15017_v19, 16  ;;  %v6162_v39 = vsel %vm18457_vm3, %v6160_v29, %v6161_v61  ;;  %6478 = vmatprep.subr.bf16.mxu1 %v17892_v54 }
 0x4ce   : > { %v5870_v2 = vshll.u32 %v15017_v19, 16  ;;  %v6164_v12 = vrot.slane %v5862_v25, 1  ;;  %vm18459_vm3 = vsmask.f32 256  ;;  %v18460_v25 = vshrl.u32 %v14979_v48, 16 }
 0x4cf   : > { %v5472_v20 = vadd.f32 %v14714_v3, %v5183_v42  ;;  %10895 = vmatmul.mubr.msk.bf16.gmra.mrb[252].mxu0 %vm14204_vm9, %v14696_v5  ;;  %v5869_v7 = vrot.slane %v5867_v26, 7  ;;  %v5699_v31 = vmax.f32 %v5469_v4, 0.0 }
 0x4d0   : > { %11939 = vmatprep.mubr.msk.bf16.mxu0 %vm12748_vm12, %v6162_v39  ;;  %v6167_v29 = vrot.slane %v5870_v2, 1  ;;  %v6163_v4 = vor.u32 %v6161_v61, %v18460_v25  ;;  %vm18461_vm12 = vsmask.f32 7424 }
 0x4d1   : > { %v5700_v58 = vmax.f32 %v5472_v20, 0.0  ;;  %v5872_v3 = vor.u32 %v5870_v2, %v5869_v7 }
 0x4d2   : > { %v5187_v21 = vpop.f32.mrb[148].mxu0  ;;  %v6165_v14 = vsel %vm18461_vm12, %v6163_v4, %v6164_v12 }
 0x4d3   : > { %v15041_v42 = vpack.c.bf16 %v5700_v58, %v5699_v31  ;;  %v5188_v5 = vadd.f32 %v14940_v18, %v5187_v21  ;;  %v5189_v63 = vpop.f32.mrb[149].mxu0  ;;  %v15045_v55 = vsel %vm18459_vm3, %v5861_v52, %v5872_v3  ;;  %v6166_v58 = vor.u32 %v6164_v12, %v5859_v32  ;;  %vm18463_vm3 = vmmov %vm18461_vm12  ;;  %v12260_v32 = vld [vmem:[%s17486_s5 + $0xe0] sm:$0xff]  }
 0x4d4   : > { %v5190_v20 = vpop.f32.mrb[150].mxu0  ;;  %6479 = vmatpush1.bf16.msra.mxu1 %v12260_v32  ;;  %vm18465_vm12 = vsmask.f32 256 }
 0x4d5   : > { %v5477_v39 = vadd.f32 %v14708_v60, %v5188_v5  ;;  %v5191_v22 = vadd.f32 %v14940_v18, %v5190_v20  ;;  %v5192_v31 = vpop.f32.mrb[151].mxu0  ;;  %v5875_v21 = vshrl.u32 %v15041_v42, 16  ;;  %v5878_v2 = vshll.u32 %v15041_v42, 16  ;;  %6480 = vmatprep.subr.bf16.mxu1 %v17892_v54 }
 0x4d6   : > { %v6168_v61 = vsel %vm18463_vm3, %v6166_v58, %v6167_v29 }
 0x4d7   : > { %v5480_v52 = vadd.f32 %v14712_v17, %v5191_v22  ;;  %11940 = vmatmul.mubr.msk.bf16.vlgmr.msra.gmra.mrb[0].mxu0 %vm12781_vm15, %v6165_v14  ;;  %v5877_v63 = vrot.slane %v5875_v21, 7  ;;  %v5701_v60 = vmax.f32 %v5477_v39, 0.0  ;;  %v6170_v31 = vrot.slane %v5878_v2, 1 }
 0x4d8   : > { %11943 = vmatprep.mubr.msk.bf16.mxu0 %vm12791_vm1, %v6168_v61  ;;  %v6169_v14 = vor.u32 %v6167_v29, %v5867_v26  ;;  %vm18477_vm1 = vsmask.f32 256  ;;  %vm18481_vm15 = vsmask.f32 256 }
 0x4d9   : > { %v5702_v5 = vmax.f32 %v5480_v52, 0.0  ;;  %v5880_v20 = vor.u32 %v5878_v2, %v5877_v63  ;;  %v6172_v26 = vor.u32 %v6170_v31, %v5875_v21 }
 0x4da   : > { %v5195_v12 = vpop.f32.mrb[152].mxu0 }
 0x4db   : > { %v15064_v4 = vpack.c.bf16 %v5702_v5, %v5701_v60  ;;  %v5196_v17 = vadd.f32 %v14940_v18, %v5195_v12  ;;  %v5197_v22 = vpop.f32.mrb[153].mxu0  ;;  %v15068_v58 = vsel %vm18465_vm12, %v5869_v7, %v5880_v20  ;;  %v6171_v5 = vsel %vm18463_vm3, %v6169_v14, %v6170_v31  ;;  %vm18467_vm12 = vmmov %vm18463_vm3 }
 0x4dc   : > { %v5198_v61 = vpop.f32.mrb[154].mxu0  ;;  %vm18469_vm3 = vsmask.f32 256 }
 0x4dd   : > { %v5485_v39 = vadd.f32 %v14726_v9, %v5196_v17  ;;  %v5199_v52 = vadd.f32 %v14940_v18, %v5198_v61  ;;  %v5200_v25 = vpop.f32.mrb[155].mxu0  ;;  %v5883_v2 = vshrl.u32 %v15064_v4, 16  ;;  %v5886_v60 = vshll.u32 %v15064_v4, 16 }
 0x4de   : > { %v12261_v25 = vld [vmem:[%s17486_s5 + $0xe8] sm:$0xff]  }
 0x4df   : > { %v5488_v32 = vadd.f32 %v14730_v37, %v5199_v52  ;;  %11944 = vmatmul.mubr.msk.bf16.gmra.mrb[4].mxu0 %vm12828_vm4, %v6171_v5  ;;  %v6173_v7 = vrot.slane %v5886_v60, 1  ;;  %v5885_v29 = vrot.slane %v5883_v2, 7  ;;  %v5703_v20 = vmax.f32 %v5485_v39, 0.0  ;;  %6481 = vmatpush1.bf16.msra.mxu1 %v12261_v25 }
 0x4e0   : > { %6482 = vmatprep.subr.bf16.mxu1 %v17892_v54  ;;  %vm18473_vm4 = vsmask.f32 256 }
 0x4e1   : > { %v5704_v22 = vmax.f32 %v5488_v32, 0.0  ;;  %v6174_v9 = vsel %vm18467_vm12, %v6172_v26, %v6173_v7  ;;  %v5888_v17 = vor.u32 %v5886_v60, %v5885_v29 }
 0x4e2   : > { %v5203_v61 = vpop.f32.mrb[156].mxu0  ;;  %11947 = vmatprep.mubr.msk.bf16.mxu0 %vm12835_vm6, %v6174_v9 }
 0x4e3   : > { %v15085_v37 = vpack.c.bf16 %v5704_v22, %v5703_v20  ;;  %v5204_v14 = vadd.f32 %v14940_v18, %v5203_v61  ;;  %v5205_v21 = vpop.f32.mrb[157].mxu0  ;;  %v15089_v31 = vsel %vm18469_vm3, %v5877_v63, %v5888_v17  ;;  %v6175_v22 = vor.u32 %v6173_v7, %v5883_v2 }
 0x4e4   : > { %v5206_v39 = vpop.f32.mrb[158].mxu0  ;;  %v12262_v21 = vld [vmem:[%s17486_s5 + $0xf0] sm:$0xff]  }
 0x4e5   : > { %v5894_v52 = vshll.u32 %v15085_v37, 16  ;;  %v5493_v60 = vadd.f32 %v14724_v41, %v5204_v14  ;;  %v5207_v5 = vadd.f32 %v14940_v18, %v5206_v39  ;;  %v5208_v32 = vpop.f32.mrb[159].mxu0  ;;  %v5891_v26 = vshrl.u32 %v15085_v37, 16  ;;  %6483 = vmatpush1.bf16.msra.mxu1 %v12262_v21 }
 0x4e6   : > { %6484 = vmatprep.subr.bf16.mxu1 %v17892_v54 }
 0x4e7   : > { %v6176_v20 = vrot.slane %v5894_v52, 1  ;;  %v5496_v9 = vadd.f32 %v14728_v53, %v5207_v5  ;;  %v5893_v25 = vrot.slane %v5891_v26, 7  ;;  %v5705_v61 = vmax.f32 %v5493_v60, 0.0 }
 0x4e9   : > { %v6177_v63 = vsel %vm18467_vm12, %v6175_v22, %v6176_v20  ;;  %v5706_v17 = vmax.f32 %v5496_v9, 0.0  ;;  %v5896_v12 = vor.u32 %v5894_v52, %v5893_v25 }
 0x4ea   : > { %v5211_v41 = vpop.f32.mrb[160].mxu0  ;;  %11948 = vmatmul.mubr.msk.bf16.gmra.mrb[8].mxu0 %vm12879_vm13, %v6177_v63  ;;  %v6178_v63 = vor.u32 %v6176_v20, %v5891_v26 }
 0x4eb   : > { %v15103_v39 = vpack.c.bf16 %v5706_v17, %v5705_v61  ;;  %v5212_v2 = vadd.f32 %v14940_v18, %v5211_v41  ;;  %v5213_v7 = vpop.f32.mrb[161].mxu0  ;;  %v15107_v53 = vsel %vm18469_vm3, %v5885_v29, %v5896_v12 }
 0x4ec   : > { %v5214_v60 = vpop.f32.mrb[162].mxu0 }
 0x4ed   : > { %v5501_v5 = vadd.f32 %v14742_v44, %v5212_v2  ;;  %v5215_v52 = vadd.f32 %v14940_v18, %v5214_v60  ;;  %v5216_v32 = vpop.f32.mrb[163].mxu0  ;;  %v5899_v22 = vshrl.u32 %v15103_v39, 16  ;;  %v5902_v9 = vshll.u32 %v15103_v39, 16  ;;  %v12263_v44 = vld [vmem:[%s17486_s5 + $0xf8] sm:$0xff]   ;;  %v18471_v60 = vld [vmem:[#allocation13_spill] sm:$0xff] }
 0x4ee   : > { %vm18472_vm3 = vnez %v18471_v60  ;;  %6485 = vmatpush1.bf16.msra.mxu1 %v12263_v44  ;;  %v12264_v60 = vld [vmem:[%s17486_s5 + $0x100] sm:$0xff]  }
 0x4ef   : > { %v5504_v61 = vadd.f32 %v14746_v57, %v5215_v52  ;;  %v6179_v17 = vrot.slane %v5902_v9, 1  ;;  %v5901_v21 = vrot.slane %v5899_v22, 7  ;;  %v5707_v41 = vmax.f32 %v5501_v5, 0.0  ;;  %6486 = vmatprep.subr.bf16.mxu1 %v17892_v54 }
 0x4f1   : > { %v5708_v12 = vmax.f32 %v5504_v61, 0.0  ;;  %v6180_v29 = vsel %vm18467_vm12, %v6178_v63, %v6179_v17  ;;  %v5904_v2 = vor.u32 %v5902_v9, %v5901_v21 }
 0x4f2   : > { %v5219_v7 = vpop.f32.mrb[164].mxu0  ;;  %11951 = vmatprep.mubr.msk.bf16.mxu0 %vm18472_vm3, %v6180_v29  ;;  %v6181_v29 = vor.u32 %v6179_v17, %v5899_v22  ;;  %6487 = vmatpush1.bf16.msra.mxu1 %v12264_v60 }
 0x4f3   : > { %v15121_v32 = vpack.c.bf16 %v5708_v12, %v5707_v41  ;;  %v5220_v57 = vadd.f32 %v14940_v18, %v5219_v7  ;;  %v5221_v26 = vpop.f32.mrb[165].mxu0  ;;  %v15125_v20 = vsel %vm18473_vm4, %v5893_v25, %v5904_v2  ;;  %vm18474_vm4 = vmmov %vm18467_vm12  ;;  %6488 = vmatprep.subr.bf16.mxu1 %v17892_v54 }
 0x4f4   : > { %v5222_v5 = vpop.f32.mrb[166].mxu0 }
 0x4f5   : > { %v5910_v52 = vshll.u32 %v15121_v32, 16  ;;  %v5509_v9 = vadd.f32 %v14740_v30, %v5220_v57  ;;  %v5223_v61 = vadd.f32 %v14940_v18, %v5222_v5  ;;  %v5224_v63 = vpop.f32.mrb[167].mxu0  ;;  %v5907_v41 = vshrl.u32 %v15121_v32, 16  ;;  %v18475_v57 = vld [vmem:[#allocation14_spill] sm:$0xff] }
 0x4f6   : > { %vm18476_vm12 = vnez %v18475_v57 }
 0x4f7   : > { %v6182_v12 = vrot.slane %v5910_v52, 1  ;;  %v5512_v7 = vadd.f32 %v14744_v8, %v5223_v61  ;;  %v5909_v44 = vrot.slane %v5907_v41, 7  ;;  %v5709_v26 = vmax.f32 %v5509_v9, 0.0 }
 0x4f9   : > { %v6183_v25 = vsel %vm18474_vm4, %v6181_v29, %v6182_v12  ;;  %v5710_v2 = vmax.f32 %v5512_v7, 0.0  ;;  %v5912_v14 = vor.u32 %v5910_v52, %v5909_v44 }
 0x4fa   : > { %v5227_v30 = vpop.f32.mrb[168].mxu0  ;;  %11952 = vmatmul.mubr.msk.bf16.gmra.mrb[12].mxu0 %vm18476_vm12, %v6183_v25  ;;  %v6184_v25 = vor.u32 %v6182_v12, %v5907_v41 }
 0x4fb   : > { %v15139_v5 = vpack.c.bf16 %v5710_v2, %v5709_v26  ;;  %v5228_v22 = vadd.f32 %v14940_v18, %v5227_v30  ;;  %v5229_v17 = vpop.f32.mrb[169].mxu0  ;;  %v15143_v8 = vsel %vm18477_vm1, %v5901_v21, %v5912_v14  ;;  %vm18478_vm1 = vmmov %vm18474_vm4 }
 0x4fc   : > { %v5230_v9 = vpop.f32.mrb[170].mxu0 }
 0x4fd   : > { %v5517_v61 = vadd.f32 %v14758_v27, %v5228_v22  ;;  %v5231_v52 = vadd.f32 %v14940_v18, %v5230_v9  ;;  %v5232_v63 = vpop.f32.mrb[171].mxu0  ;;  %v5915_v29 = vshrl.u32 %v15139_v5, 16  ;;  %v5918_v7 = vshll.u32 %v15139_v5, 16  ;;  %v12265_v27 = vld [vmem:[%s17486_s5 + $0x108] sm:$0xff]   ;;  %v18479_v9 = vld [vmem:[#allocation15_spill] sm:$0xff] }
 0x4fe   : > { %vm18480_vm4 = vnez %v18479_v9  ;;  %6489 = vmatpush1.bf16.msra.mxu1 %v12265_v27  ;;  %v12266_v9 = vld [vmem:[%s17486_s5 + $0x110] sm:$0xff]  }
 0x4ff   : > { %v5520_v26 = vadd.f32 %v14762_v50, %v5231_v52  ;;  %v6185_v2 = vrot.slane %v5918_v7, 1  ;;  %v5917_v60 = vrot.slane %v5915_v29, 7  ;;  %v5711_v30 = vmax.f32 %v5517_v61, 0.0  ;;  %6490 = vmatprep.subr.bf16.mxu1 %v17892_v54 }
 0x501   : > { %v5712_v14 = vmax.f32 %v5520_v26, 0.0  ;;  %v6186_v21 = vsel %vm18478_vm1, %v6184_v25, %v6185_v2  ;;  %v5920_v22 = vor.u32 %v5918_v7, %v5917_v60 }
 0x502   : > { %v5235_v17 = vpop.f32.mrb[172].mxu0  ;;  %11955 = vmatprep.mubr.msk.bf16.mxu0 %vm18480_vm4, %v6186_v21  ;;  %v6187_v21 = vor.u32 %v6185_v2, %v5915_v29  ;;  %6491 = vmatpush1.bf16.msra.mxu1 %v12266_v9  ;;  %vm18485_vm4 = vsmask.f32 256 }
 0x503   : > { %v15157_v63 = vpack.c.bf16 %v5712_v14, %v5711_v30  ;;  %v5236_v50 = vadd.f32 %v14940_v18, %v5235_v17  ;;  %v5237_v41 = vpop.f32.mrb[173].mxu0  ;;  %v15161_v12 = vsel %vm18481_vm15, %v5909_v44, %v5920_v22  ;;  %vm18482_vm15 = vmmov %vm18478_vm1  ;;  %6492 = vmatprep.subr.bf16.mxu1 %v17892_v54 }
 0x504   : > { %v5238_v61 = vpop.f32.mrb[174].mxu0 }
 0x505   : > { %v5926_v52 = vshll.u32 %v15157_v63, 16  ;;  %v5525_v7 = vadd.f32 %v14756_v6, %v5236_v50  ;;  %v5239_v26 = vadd.f32 %v14940_v18, %v5238_v61  ;;  %v5240_v25 = vpop.f32.mrb[175].mxu0  ;;  %v5923_v30 = vshrl.u32 %v15157_v63, 16  ;;  %v18483_v50 = vld [vmem:[#allocation16_spill] sm:$0xff] }
 0x506   : > { %vm18484_vm1 = vnez %v18483_v50 }
 0x507   : > { %v6188_v14 = vrot.slane %v5926_v52, 1  ;;  %v5528_v17 = vadd.f32 %v14760_v51, %v5239_v26  ;;  %v5925_v27 = vrot.slane %v5923_v30, 7  ;;  %v5713_v41 = vmax.f32 %v5525_v7, 0.0 }
 0x509   : > { %v6189_v44 = vsel %vm18482_vm15, %v6187_v21, %v6188_v14  ;;  %v5714_v22 = vmax.f32 %v5528_v17, 0.0  ;;  %v5928_v57 = vor.u32 %v5926_v52, %v5925_v27 }
 0x50a   : > { %v5243_v6 = vpop.f32.mrb[176].mxu0  ;;  %11956 = vmatmul.mubr.msk.bf16.gmra.mrb[16].mxu0 %vm18484_vm1, %v6189_v44  ;;  %v6190_v44 = vor.u32 %v6188_v14, %v5923_v30  ;;  %vm18489_vm1 = vsmask.f32 256 }
 0x50b   : > { %v15175_v61 = vpack.c.bf16 %v5714_v22, %v5713_v41  ;;  %v5244_v29 = vadd.f32 %v14940_v18, %v5243_v6  ;;  %v5245_v2 = vpop.f32.mrb[177].mxu0  ;;  %v15179_v51 = vsel %vm18485_vm4, %v5917_v60, %v5928_v57  ;;  %vm18486_vm4 = vmmov %vm18482_vm15 }
 0x50c   : > { %v5246_v7 = vpop.f32.mrb[178].mxu0 }
 0x50d   : > { %v5533_v26 = vadd.f32 %v14774_v43, %v5244_v29  ;;  %v5247_v52 = vadd.f32 %v14940_v18, %v5246_v7  ;;  %v5248_v25 = vpop.f32.mrb[179].mxu0  ;;  %v5931_v21 = vshrl.u32 %v15175_v61, 16  ;;  %v5934_v17 = vshll.u32 %v15175_v61, 16  ;;  %v12267_v43 = vld [vmem:[%s17486_s5 + $0x118] sm:$0xff]   ;;  %v18487_v7 = vld [vmem:[#allocation17_spill] sm:$0xff] }
 0x50e   : > { %vm18488_vm15 = vnez %v18487_v7  ;;  %6493 = vmatpush1.bf16.msra.mxu1 %v12267_v43  ;;  %v12268_v7 = vld [vmem:[%s17486_s5 + $0x120] sm:$0xff]  }
 0x50f   : > { %v5536_v41 = vadd.f32 %v14778_v10, %v5247_v52  ;;  %v6191_v22 = vrot.slane %v5934_v17, 1  ;;  %v5933_v9 = vrot.slane %v5931_v21, 7  ;;  %v5715_v6 = vmax.f32 %v5533_v26, 0.0  ;;  %6494 = vmatprep.subr.bf16.mxu1 %v17892_v54 }
 0x511   : > { %v5716_v57 = vmax.f32 %v5536_v41, 0.0  ;;  %v6192_v60 = vsel %vm18486_vm4, %v6190_v44, %v6191_v22  ;;  %v5936_v29 = vor.u32 %v5934_v17, %v5933_v9 }
 0x512   : > { %v5251_v2 = vpop.f32.mrb[180].mxu0  ;;  %11959 = vmatprep.mubr.msk.bf16.mxu0 %vm18488_vm15, %v6192_v60  ;;  %v6193_v60 = vor.u32 %v6191_v22, %v5931_v21  ;;  %6495 = vmatpush1.bf16.msra.mxu1 %v12268_v7  ;;  %vm18493_vm15 = vsmask.f32 256 }
 0x513   : > { %v15193_v25 = vpack.c.bf16 %v5716_v57, %v5715_v6  ;;  %v5252_v10 = vadd.f32 %v14940_v18, %v5251_v2  ;;  %v5253_v30 = vpop.f32.mrb[181].mxu0  ;;  %v15197_v14 = vsel %vm18489_vm1, %v5925_v27, %v5936_v29  ;;  %vm18490_vm1 = vmmov %vm18486_vm4  ;;  %6496 = vmatprep.subr.bf16.mxu1 %v17892_v54 }
 0x514   : > { %v5254_v26 = vpop.f32.mrb[182].mxu0 }
 0x515   : > { %v5942_v52 = vshll.u32 %v15193_v25, 16  ;;  %v5541_v17 = vadd.f32 %v14772_v34, %v5252_v10  ;;  %v5255_v41 = vadd.f32 %v14940_v18, %v5254_v26  ;;  %v5256_v44 = vpop.f32.mrb[183].mxu0  ;;  %v5939_v6 = vshrl.u32 %v15193_v25, 16  ;;  %v18491_v10 = vld [vmem:[#allocation18_spill] sm:$0xff] }
 0x516   : > { %vm18492_vm4 = vnez %v18491_v10 }
 0x517   : > { %v6194_v57 = vrot.slane %v5942_v52, 1  ;;  %v5544_v2 = vadd.f32 %v14776_v40, %v5255_v41  ;;  %v5941_v43 = vrot.slane %v5939_v6, 7  ;;  %v5717_v30 = vmax.f32 %v5541_v17, 0.0 }
 0x519   : > { %v6195_v27 = vsel %vm18490_vm1, %v6193_v60, %v6194_v57  ;;  %v5718_v29 = vmax.f32 %v5544_v2, 0.0  ;;  %v5944_v50 = vor.u32 %v5942_v52, %v5941_v43 }
 0x51a   : > { %v5259_v34 = vpop.f32.mrb[184].mxu0  ;;  %11960 = vmatmul.mubr.msk.bf16.gmra.mrb[20].mxu0 %vm18492_vm4, %v6195_v27  ;;  %v6196_v27 = vor.u32 %v6194_v57, %v5939_v6  ;;  %vm18497_vm4 = vsmask.f32 256 }
 0x51b   : > { %v15211_v26 = vpack.c.bf16 %v5718_v29, %v5717_v30  ;;  %v5260_v21 = vadd.f32 %v14940_v18, %v5259_v34  ;;  %v5261_v22 = vpop.f32.mrb[185].mxu0  ;;  %v15215_v40 = vsel %vm18493_vm15, %v5933_v9, %v5944_v50  ;;  %vm18494_vm15 = vmmov %vm18490_vm1 }
 0x51c   : > { %v5262_v17 = vpop.f32.mrb[186].mxu0 }
 0x51d   : > { %v5549_v41 = vadd.f32 %v14790_v56, %v5260_v21  ;;  %v5263_v52 = vadd.f32 %v14940_v18, %v5262_v17  ;;  %v5264_v44 = vpop.f32.mrb[187].mxu0  ;;  %v5947_v60 = vshrl.u32 %v15211_v26, 16  ;;  %v5950_v2 = vshll.u32 %v15211_v26, 16  ;;  %v12269_v56 = vld [vmem:[%s17486_s5 + $0x128] sm:$0xff]   ;;  %v18495_v17 = vld [vmem:[#allocation19_spill] sm:$0xff] }
 0x51e   : > { %vm18496_vm1 = vnez %v18495_v17  ;;  %6497 = vmatpush1.bf16.msra.mxu1 %v12269_v56  ;;  %v12270_v17 = vld [vmem:[%s17486_s5 + $0x130] sm:$0xff]  }
 0x51f   : > { %v5552_v30 = vadd.f32 %v14794_v38, %v5263_v52  ;;  %v6197_v29 = vrot.slane %v5950_v2, 1  ;;  %v5949_v7 = vrot.slane %v5947_v60, 7  ;;  %v5719_v34 = vmax.f32 %v5549_v41, 0.0  ;;  %6498 = vmatprep.subr.bf16.mxu1 %v17892_v54 }
 0x521   : > { %v5720_v50 = vmax.f32 %v5552_v30, 0.0  ;;  %v6198_v9 = vsel %vm18494_vm15, %v6196_v27, %v6197_v29  ;;  %v5952_v21 = vor.u32 %v5950_v2, %v5949_v7 }
 0x522   : > { %v5267_v22 = vpop.f32.mrb[188].mxu0  ;;  %11963 = vmatprep.mubr.msk.bf16.mxu0 %vm18496_vm1, %v6198_v9  ;;  %v6199_v9 = vor.u32 %v6197_v29, %v5947_v60  ;;  %6499 = vmatpush1.bf16.msra.mxu1 %v12270_v17  ;;  %vm18501_vm1 = vsmask.f32 256 }
 0x523   : > { %v15229_v44 = vpack.c.bf16 %v5720_v50, %v5719_v34  ;;  %v5268_v38 = vadd.f32 %v14940_v18, %v5267_v22  ;;  %v5269_v6 = vpop.f32.mrb[189].mxu0  ;;  %v15233_v57 = vsel %vm18497_vm4, %v5941_v43, %v5952_v21  ;;  %vm18498_vm4 = vmmov %vm18494_vm15  ;;  %6500 = vmatprep.subr.bf16.mxu1 %v17892_v54 }
 0x524   : > { %v5270_v41 = vpop.f32.mrb[190].mxu0 }
 0x525   : > { %v5958_v52 = vshll.u32 %v15229_v44, 16  ;;  %v5557_v2 = vadd.f32 %v14788_v24, %v5268_v38  ;;  %v5271_v30 = vadd.f32 %v14940_v18, %v5270_v41  ;;  %v5272_v27 = vpop.f32.mrb[191].mxu0  ;;  %v5955_v34 = vshrl.u32 %v15229_v44, 16  ;;  %v18499_v38 = vld [vmem:[#allocation21_spill] sm:$0xff] }
 0x526   : > { %vm18500_vm15 = vnez %v18499_v38 }
 0x527   : > { %v6200_v50 = vrot.slane %v5958_v52, 1  ;;  %v5560_v22 = vadd.f32 %v14792_v15, %v5271_v30  ;;  %v5957_v56 = vrot.slane %v5955_v34, 7  ;;  %v5721_v6 = vmax.f32 %v5557_v2, 0.0 }
 0x529   : > { %v6201_v43 = vsel %vm18498_vm4, %v6199_v9, %v6200_v50  ;;  %v5722_v21 = vmax.f32 %v5560_v22, 0.0  ;;  %v5960_v10 = vor.u32 %v5958_v52, %v5957_v56 }
 0x52a   : > { %v5275_v24 = vpop.f32.mrb[192].mxu0  ;;  %11964 = vmatmul.mubr.msk.bf16.gmra.mrb[24].mxu0 %vm18500_vm15, %v6201_v43  ;;  %vm18505_vm15 = vsmask.f32 256 }
 0x52b   : > { %v15247_v41 = vpack.c.bf16 %v5722_v21, %v5721_v6  ;;  %v5276_v60 = vadd.f32 %v14940_v18, %v5275_v24  ;;  %v5277_v29 = vpop.f32.mrb[193].mxu0  ;;  %v15251_v15 = vsel %vm18501_vm1, %v5949_v7, %v5960_v10  ;;  %v12271_v6 = vld [vmem:[%s17486_s5 + $0x138] sm:$0xff]   ;;  %v6202_v10 = vor.u32 %v6200_v50, %v5955_v34  ;;  %vm18502_vm1 = vmmov %vm18498_vm4 }
 0x52c   : > { %v5278_v2 = vpop.f32.mrb[194].mxu0  ;;  %6501 = vmatpush1.bf16.msra.mxu1 %v12271_v6 }
 0x52d   : > { %v5565_v30 = vadd.f32 %v14818_v62, %v5276_v60  ;;  %v5279_v52 = vadd.f32 %v14940_v18, %v5278_v2  ;;  %v5280_v27 = vpop.f32.mrb[195].mxu0  ;;  %v5963_v9 = vshrl.u32 %v15247_v41, 16  ;;  %v5966_v22 = vshll.u32 %v15247_v41, 16  ;;  %v18503_v2 = vld [vmem:[#allocation22_spill] sm:$0xff] }
 0x52e   : > { %vm18504_vm4 = vnez %v18503_v2  ;;  %v18506_v2 = vld [vmem:[#allocation26_spill] sm:$0xff] }
 0x52f   : > { %v5568_v17 = vadd.f32 %v14822_v36, %v5279_v52  ;;  %v6203_v7 = vrot.slane %v5966_v22, 1  ;;  %v5965_v43 = vrot.slane %v5963_v9, 7  ;;  %v5723_v21 = vmax.f32 %v5565_v30, 0.0 }
 0x531   : > { %v5724_v24 = vmax.f32 %v5568_v17, 0.0  ;;  %v6204_v62 = vsel %vm18502_vm1, %v6202_v10, %v6203_v7  ;;  %v5968_v60 = vor.u32 %v5966_v22, %v5965_v43  ;;  %v6205_v10 = vor.u32 %v6203_v7, %v5963_v9 }
 0x532   : > { %v5283_v29 = vpop.f32.mrb[196].mxu0  ;;  %11967 = vmatprep.mubr.msk.bf16.mxu0 %vm18504_vm4, %v6204_v62  ;;  %vm18508_vm4 = vsmask.f32 256 }
 0x533   : > { %v15265_v27 = vpack.c.bf16 %v5724_v24, %v5723_v21  ;;  %v5284_v38 = vadd.f32 %v14940_v18, %v5283_v29  ;;  %v5285_v3 = vpop.f32.mrb[197].mxu0  ;;  %v15269_v36 = vsel %vm18505_vm15, %v5957_v56, %v5968_v60  ;;  %vm18507_vm15 = vnez %v18506_v2  ;;  %v18510_v2 = vld [vmem:[#allocation27_spill] sm:$0xff] }
 0x534   : > { %v5286_v34 = vpop.f32.mrb[198].mxu0 }
 0x535   : > { %v5974_v50 = vshll.u32 %v15265_v27, 16  ;;  %v5573_v30 = vadd.f32 %v14816_v13, %v5284_v38  ;;  %v5287_v52 = vadd.f32 %v14940_v18, %v5286_v34  ;;  %v5288_v22 = vpop.f32.mrb[199].mxu0  ;;  %v5971_v6 = vshrl.u32 %v15265_v27, 16 }
 0x537   : > { %v6206_v17 = vrot.slane %v5974_v50, 1  ;;  %v5576_v21 = vadd.f32 %v14820_v33, %v5287_v52  ;;  %v5973_v24 = vrot.slane %v5971_v6, 7  ;;  %v5725_v62 = vmax.f32 %v5573_v30, 0.0 }
 0x539   : > { %v6207_v3 = vsel %vm18502_vm1, %v6205_v10, %v6206_v17  ;;  %v5726_v56 = vmax.f32 %v5576_v21, 0.0  ;;  %v5976_v60 = vor.u32 %v5974_v50, %v5973_v24 }
 0x53a   : > { %v5291_v29 = vpop.f32.mrb[200].mxu0  ;;  %11968 = vmatmul.mubr.msk.bf16.gmra.mrb[28].mxu0 %vm18507_vm15, %v6207_v3  ;;  %vm18512_vm15 = vsmask.f32 256 }
 0x53b   : > { %v15279_v13 = vpack.c.bf16 %v5726_v56, %v5725_v62  ;;  %v5292_v38 = vadd.f32 %v14940_v18, %v5291_v29  ;;  %v5293_v34 = vpop.f32.mrb[201].mxu0  ;;  %v15283_v22 = vsel %vm18508_vm4, %v5965_v43, %v5976_v60  ;;  %v6208_v62 = vor.u32 %v6206_v17, %v5971_v6  ;;  %vm18509_vm4 = vmmov %vm18502_vm1 }
 0x53c   : > { %v5294_v9 = vpop.f32.mrb[202].mxu0  ;;  %vm18511_vm1 = vnez %v18510_v2  ;;  %v18513_v2 = vld [vmem:[#allocation32_spill] sm:$0xff] }
 0x53d   : > { %v5581_v33 = vadd.f32 %v14846_v49, %v5292_v38  ;;  %v5295_v7 = vadd.f32 %v14940_v18, %v5294_v9  ;;  %v5296_v30 = vpop.f32.mrb[203].mxu0  ;;  %v5979_v50 = vshrl.u32 %v15279_v13, 16  ;;  %v5982_v52 = vshll.u32 %v15279_v13, 16 }
 0x53f   : > { %v5584_v10 = vadd.f32 %v14850_v1, %v5295_v7  ;;  %v5981_v21 = vrot.slane %v5979_v50, 7  ;;  %v6209_v3 = vrot.slane %v5982_v52, 1  ;;  %v5727_v56 = vmax.f32 %v5581_v33, 0.0 }
 0x541   : > { %v5728_v29 = vmax.f32 %v5584_v10, 0.0  ;;  %v5984_v34 = vor.u32 %v5982_v52, %v5981_v21  ;;  %v6210_v43 = vsel %vm18509_vm4, %v6208_v62, %v6209_v3 }
 0x542   : > { %v5299_v60 = vpop.f32.mrb[204].mxu0  ;;  %11971 = vmatprep.mubr.msk.bf16.mxu0 %vm18511_vm1, %v6210_v43  ;;  %vm18515_vm1 = vsmask.f32 256 }
 0x543   : > { %v15293_v49 = vpack.c.bf16 %v5728_v29, %v5727_v56  ;;  %v5300_v38 = vadd.f32 %v14940_v18, %v5299_v60  ;;  %v5301_v9 = vpop.f32.mrb[205].mxu0  ;;  %v15297_v30 = vsel %vm18512_vm15, %v5973_v24, %v5984_v34  ;;  %v6211_v56 = vor.u32 %v6209_v3, %v5979_v50 }
 0x544   : > { %v5302_v1 = vpop.f32.mrb[206].mxu0  ;;  %vm18514_vm15 = vnez %v18513_v2 }
 0x545   : > { %v5987_v6 = vshrl.u32 %v15293_v49, 16  ;;  %v5990_v17 = vshll.u32 %v15293_v49, 16  ;;  %v5589_v33 = vadd.f32 %v14844_v0, %v5300_v38  ;;  %v5303_v7 = vadd.f32 %v14940_v18, %v5302_v1  ;;  %v5304_v52 = vpop.f32.mrb[207].mxu0 }
 0x547   : > { %v5989_v10 = vrot.slane %v5987_v6, 7  ;;  %v6212_v62 = vrot.slane %v5990_v17, 1  ;;  %v5592_v29 = vadd.f32 %v14848_v35, %v5303_v7  ;;  %v5729_v60 = vmax.f32 %v5589_v33, 0.0 }
 0x549   : > { %v5992_v43 = vor.u32 %v5990_v17, %v5989_v10  ;;  %v6213_v24 = vsel %vm18509_vm4, %v6211_v56, %v6212_v62  ;;  %v5730_v34 = vmax.f32 %v5592_v29, 0.0  ;;  %v6214_v29 = vor.u32 %v6212_v62, %v5987_v6 }
 0x54a   : > { %v5307_v9 = vpop.f32.mrb[208].mxu0  ;;  %11972 = vmatmul.mubr.msk.bf16.gmra.mrb[32].mxu0 %vm18514_vm15, %v6213_v24  ;;  %vm18520_vm15 = vsmask.f32 256 }
 0x54b   : > { %v15307_v54 = vpack.c.bf16 %v5730_v34, %v5729_v60  ;;  %v5308_v0 = vadd.f32 %v14940_v18, %v5307_v9  ;;  %v5309_v38 = vpop.f32.mrb[209].mxu0  ;;  %v15311_v1 = vsel %vm18515_vm1, %v5981_v21, %v5992_v43  ;;  %vm18516_vm1 = vmmov %vm18509_vm4 }
 0x54c   : > { %v5310_v50 = vpop.f32.mrb[210].mxu0  ;;  %v18517_v38 = vld [vmem:[#allocation33_spill] sm:$0xff] }
 0x54d   : > { %v5995_v35 = vshrl.u32 %v15307_v54, 16  ;;  %v5998_v3 = vshll.u32 %v15307_v54, 16  ;;  %v5597_v17 = vadd.f32 %v14863_v28, %v5308_v0  ;;  %v5311_v33 = vadd.f32 %v14940_v18, %v5310_v50  ;;  %v5312_v7 = vpop.f32.mrb[211].mxu0 }
 0x54e   : > { %vm18518_vm4 = vnez %v18517_v38  ;;  %v18522_v38 = vld [vmem:[#allocation38_spill] sm:$0xff] }
 0x54f   : > { %v5997_v52 = vrot.slane %v5995_v35, 7  ;;  %v5600_v56 = vadd.f32 %v14867_v23, %v5311_v33  ;;  %v6215_v60 = vrot.slane %v5998_v3, 1  ;;  %v5731_v34 = vmax.f32 %v5597_v17, 0.0 }
 0x551   : > { %v6000_v24 = vor.u32 %v5998_v3, %v5997_v52  ;;  %v5732_v9 = vmax.f32 %v5600_v56, 0.0  ;;  %v6216_v21 = vsel %vm18516_vm1, %v6214_v29, %v6215_v60  ;;  %v6217_v29 = vor.u32 %v6215_v60, %v5995_v35 }
 0x552   : > { %v5315_v43 = vpop.f32.mrb[212].mxu0  ;;  %11975 = vmatprep.mubr.msk.bf16.mxu0 %vm18518_vm4, %v6216_v21  ;;  %vm18525_vm4 = vsmask.f32 256 }
 0x553   : > { %v15321_v2 = vpack.c.bf16 %v5732_v9, %v5731_v34  ;;  %v5316_v28 = vadd.f32 %v14940_v18, %v5315_v43  ;;  %v5317_v0 = vpop.f32.mrb[213].mxu0  ;;  %v15325_v50 = vsel %vm18520_vm15, %v5989_v10, %v6000_v24  ;;  %v18521_v34 = vld [vmem:[#allocation91_spill] sm:$0xff]  ;;  %vm18523_vm15 = vnez %v18522_v38 }
 0x554   : > { %v5318_v23 = vpop.f32.mrb[214].mxu0 }
 0x555   : > { %18519 = vst [vmem:[#allocation52_spill] sm:$0xff] %v15321_v2  ;;  %v6003_v6 = vshrl.u32 %v15321_v2, 16  ;;  %v6006_v62 = vshll.u32 %v15321_v2, 16  ;;  %v5605_v3 = vadd.f32 %v14861_v16, %v5316_v28  ;;  %v5319_v17 = vadd.f32 %v14940_v18, %v5318_v23  ;;  %v5320_v33 = vpop.f32.mrb[215].mxu0 }
 0x557   : > { %v6005_v7 = vrot.slane %v6003_v6, 7  ;;  %v6218_v56 = vrot.slane %v6006_v62, 1  ;;  %v5608_v9 = vadd.f32 %v18521_v34, %v5319_v17  ;;  %v5733_v43 = vmax.f32 %v5605_v3, 0.0  ;;  %v18527_v3 = vld [vmem:[#allocation93_spill] sm:$0xff] }
 0x559   : > { %v6008_v21 = vor.u32 %v6006_v62, %v6005_v7  ;;  %v6219_v10 = vsel %vm18516_vm1, %v6217_v29, %v6218_v56  ;;  %v5734_v24 = vmax.f32 %v5608_v9, 0.0  ;;  %v18528_v9 = vld [vmem:[#allocation28_spill] sm:$0xff] }
 0x55a   : > { %v5323_v0 = vpop.f32.mrb[216].mxu0  ;;  %11976 = vmatmul.mubr.msk.bf16.gmra.mrb[36].mxu0 %vm18523_vm15, %v6219_v10  ;;  %v6220_v10 = vor.u32 %v6218_v56, %v6003_v6  ;;  %vm18533_vm15 = vsmask.f32 256 }
 0x55b   : > { %v15335_v2 = vpack.c.bf16 %v5734_v24, %v5733_v43  ;;  %v5324_v16 = vadd.f32 %v14940_v18, %v5323_v0  ;;  %v5325_v28 = vpop.f32.mrb[217].mxu0  ;;  %v15339_v23 = vsel %vm18525_vm4, %v5997_v52, %v6008_v21  ;;  %vm18529_vm4 = vmmov %vm18516_vm1 }
 0x55c   : > { %18526 = vst [vmem:[#allocation61_spill] sm:$0xff] %v15339_v23  ;;  %v5326_v35 = vpop.f32.mrb[218].mxu0  ;;  %v18530_v23 = vld [vmem:[#allocation39_spill] sm:$0xff] }
 0x55d   : > { %18524 = vst [vmem:[#allocation92_spill] sm:$0xff] %v15335_v2  ;;  %v6011_v60 = vshrl.u32 %v15335_v2, 16  ;;  %v6014_v62 = vshll.u32 %v15335_v2, 16  ;;  %v5613_v17 = vadd.f32 %v18527_v3, %v5324_v16  ;;  %v5327_v33 = vadd.f32 %v14940_v18, %v5326_v35  ;;  %v5328_v29 = vpop.f32.mrb[219].mxu0 }
 0x55e   : > { %vm18531_vm1 = vnez %v18530_v23  ;;  %v15361_v29 = vld [vmem:[%s17487_s6] ss:$0 sm:$0xff] }
 0x55f   : > { %v6013_v34 = vrot.slane %v6011_v60, 7  ;;  %v5616_v43 = vadd.f32 %v18528_v9, %v5327_v33  ;;  %v6221_v24 = vrot.slane %v6014_v62, 1  ;;  %v5735_v28 = vmax.f32 %v5613_v17, 0.0 }
 0x561   : > { %v6016_v0 = vor.u32 %v6014_v62, %v6013_v34  ;;  %v5736_v38 = vmax.f32 %v5616_v43, 0.0  ;;  %v6222_v52 = vsel %vm18529_vm4, %v6220_v10, %v6221_v24  ;;  %v18535_v62 = vld [vmem:[#allocation59_spill] sm:$0xff]  ;;  %v6223_v10 = vor.u32 %v6221_v24, %v6011_v60 }
 0x562   : > { %v5331_v21 = vpop.f32.mrb[220].mxu0  ;;  %11979 = vmatprep.mubr.msk.bf16.mxu0 %vm18531_vm1, %v6222_v52  ;;  %vm18541_vm1 = vsmask.f32 256 }
 0x563   : > { %v15349_v2 = vpack.c.bf16 %v5736_v38, %v5735_v28  ;;  %v5332_v16 = vadd.f32 %v14940_v18, %v5331_v21  ;;  %v5333_v35 = vpop.f32.mrb[221].mxu0  ;;  %v15353_v3 = vsel %vm18533_vm15, %v6005_v7, %v6016_v0  ;;  %v18536_v7 = vld [vmem:[#allocation58_spill] sm:$0xff]  ;;  %vm18537_vm15 = vmmov %vm18529_vm4 }
 0x564   : > { %18534 = vst [vmem:[#allocation93_spill] sm:$0xff] %v15353_v3  ;;  %v5334_v33 = vpop.f32.mrb[222].mxu0 }
 0x565   : > { %18532 = vst [vmem:[#allocation91_spill] sm:$0xff] %v15349_v2  ;;  %v6019_v6 = vshrl.u32 %v15349_v2, 16  ;;  %v6022_v56 = vshll.u32 %v15349_v2, 16  ;;  %v5621_v17 = vadd.f32 %v18535_v62, %v5332_v16  ;;  %v5335_v38 = vadd.f32 %v15361_v29, %v5334_v33  ;;  %v5336_v9 = vpop.f32.mrb[223].mxu0  ;;  %v18538_v16 = vld [vmem:[#allocation44_spill] sm:$0xff] }
 0x566   : > { %vm18539_vm4 = vnez %v18538_v16 }
 0x567   : > { %v6021_v18 = vrot.slane %v6019_v6, 7  ;;  %v6224_v43 = vrot.slane %v6022_v56, 1  ;;  %v5624_v0 = vadd.f32 %v18536_v7, %v5335_v38  ;;  %v5737_v52 = vmax.f32 %v5621_v17, 0.0  ;;  %v18543_v17 = vld [vmem:[#allocation36_spill] sm:$0xff] }
 0x569   : > { %v6024_v28 = vor.u32 %v6022_v56, %v6021_v18  ;;  %v6225_v21 = vsel %vm18537_vm15, %v6223_v10, %v6224_v43  ;;  %v5738_v35 = vmax.f32 %v5624_v0, 0.0 }
 0x56a   : > { %v5339_v23 = vpop.f32.mrb[224].mxu0  ;;  %11980 = vmatmul.mubr.msk.bf16.gmra.mrb[40].mxu0 %vm18539_vm4, %v6225_v21  ;;  %v18544_v21 = vld [vmem:[#allocation35_spill] sm:$0xff]  ;;  %vm18549_vm4 = vsmask.f32 256 }
 0x56b   : > { %v15368_v62 = vpack.c.bf16 %v5738_v35, %v5737_v52  ;;  %v5340_v2 = vadd.f32 %v15361_v29, %v5339_v23  ;;  %v5341_v33 = vpop.f32.mrb[225].mxu0  ;;  %v15372_v9 = vsel %vm18541_vm1, %v6013_v34, %v6024_v28  ;;  %v6226_v35 = vor.u32 %v6224_v43, %v6019_v6  ;;  %vm18545_vm1 = vmmov %vm18537_vm15 }
 0x56c   : > { %18542 = vst [vmem:[#allocation59_spill] sm:$0xff] %v15372_v9  ;;  %v5342_v60 = vpop.f32.mrb[226].mxu0  ;;  %v18546_v9 = vld [vmem:[#allocation45_spill] sm:$0xff] }
 0x56d   : > { %18540 = vst [vmem:[#allocation28_spill] sm:$0xff] %v15368_v62  ;;  %v6027_v24 = vshrl.u32 %v15368_v62, 16  ;;  %v6030_v56 = vshll.u32 %v15368_v62, 16  ;;  %v5629_v38 = vadd.f32 %v18543_v17, %v5340_v2  ;;  %v5343_v10 = vadd.f32 %v15361_v29, %v5342_v60  ;;  %v5344_v7 = vpop.f32.mrb[227].mxu0 }
 0x56e   : > { %vm18547_vm15 = vnez %v18546_v9 }
 0x56f   : > { %v6029_v0 = vrot.slane %v6027_v24, 7  ;;  %v5632_v52 = vadd.f32 %v18544_v21, %v5343_v10  ;;  %v6227_v16 = vrot.slane %v6030_v56, 1  ;;  %v5739_v33 = vmax.f32 %v5629_v38, 0.0 }
 0x571   : > { %v6032_v23 = vor.u32 %v6030_v56, %v6029_v0  ;;  %v5740_v3 = vmax.f32 %v5632_v52, 0.0  ;;  %v6228_v34 = vsel %vm18545_vm1, %v6226_v35, %v6227_v16  ;;  %v18551_v56 = vld [vmem:[#allocation41_spill] sm:$0xff] }
 0x572   : > { %v5347_v28 = vpop.f32.mrb[228].mxu0  ;;  %11983 = vmatprep.mubr.msk.bf16.mxu0 %vm18547_vm15, %v6228_v34  ;;  %vm18556_vm15 = vsmask.f32 256 }
 0x573   : > { %v15382_v62 = vpack.c.bf16 %v5740_v3, %v5739_v33  ;;  %v5348_v2 = vadd.f32 %v15361_v29, %v5347_v28  ;;  %v5349_v60 = vpop.f32.mrb[229].mxu0  ;;  %v15386_v17 = vsel %vm18549_vm4, %v6021_v18, %v6032_v23  ;;  %v6229_v3 = vor.u32 %v6227_v16, %v6027_v24  ;;  %v18552_v33 = vld [vmem:[#allocation34_spill] sm:$0xff] }
 0x574   : > { %18550 = vst [vmem:[#allocation36_spill] sm:$0xff] %v15386_v17  ;;  %v5350_v10 = vpop.f32.mrb[230].mxu0  ;;  %v18553_v17 = vld [vmem:[#allocation50_spill] sm:$0xff] }
 0x575   : > { %18548 = vst [vmem:[#allocation58_spill] sm:$0xff] %v15382_v62  ;;  %v6035_v6 = vshrl.u32 %v15382_v62, 16  ;;  %v6038_v43 = vshll.u32 %v15382_v62, 16  ;;  %v5637_v38 = vadd.f32 %v18551_v56, %v5348_v2  ;;  %v5351_v7 = vadd.f32 %v15361_v29, %v5350_v10  ;;  %v5352_v21 = vpop.f32.mrb[231].mxu0 }
 0x576   : > { %vm18554_vm4 = vnez %v18553_v17 }
 0x577   : > { %v6037_v52 = vrot.slane %v6035_v6, 7  ;;  %v6230_v35 = vrot.slane %v6038_v43, 1  ;;  %v5640_v34 = vadd.f32 %v18552_v33, %v5351_v7  ;;  %v5741_v60 = vmax.f32 %v5637_v38, 0.0  ;;  %v18558_v38 = vld [vmem:[#allocation49_spill] sm:$0xff] }
 0x579   : > { %v6040_v28 = vor.u32 %v6038_v43, %v6037_v52  ;;  %v6231_v18 = vsel %vm18545_vm1, %v6229_v3, %v6230_v35  ;;  %v5742_v23 = vmax.f32 %v5640_v34, 0.0  ;;  %v18559_v34 = vld [vmem:[#allocation42_spill] sm:$0xff] }
 0x57a   : > { %v5355_v9 = vpop.f32.mrb[232].mxu0  ;;  %11984 = vmatmul.mubr.msk.bf16.gmra.mrb[44].mxu0 %vm18554_vm4, %v6231_v18  ;;  %v6232_v18 = vor.u32 %v6230_v35, %v6035_v6  ;;  %vm18564_vm4 = vsmask.f32 256 }
 0x57b   : > { %v15396_v62 = vpack.c.bf16 %v5742_v23, %v5741_v60  ;;  %v5356_v2 = vadd.f32 %v15361_v29, %v5355_v9  ;;  %v5357_v10 = vpop.f32.mrb[233].mxu0  ;;  %v15400_v56 = vsel %vm18556_vm15, %v6029_v0, %v6040_v28  ;;  %vm18560_vm15 = vmmov %vm18545_vm1 }
 0x57c   : > { %18557 = vst [vmem:[#allocation41_spill] sm:$0xff] %v15400_v56  ;;  %v5358_v16 = vpop.f32.mrb[234].mxu0  ;;  %v18561_v56 = vld [vmem:[#allocation51_spill] sm:$0xff] }
 0x57d   : > { %18555 = vst [vmem:[#allocation35_spill] sm:$0xff] %v15396_v62  ;;  %v6043_v24 = vshrl.u32 %v15396_v62, 16  ;;  %v6046_v43 = vshll.u32 %v15396_v62, 16  ;;  %v5645_v7 = vadd.f32 %v18558_v38, %v5356_v2  ;;  %v5359_v21 = vadd.f32 %v15361_v29, %v5358_v16  ;;  %v5360_v3 = vpop.f32.mrb[235].mxu0 }
 0x57e   : > { %vm18562_vm1 = vnez %v18561_v56 }
 0x57f   : > { %v6045_v33 = vrot.slane %v6043_v24, 7  ;;  %v5648_v60 = vadd.f32 %v18559_v34, %v5359_v21  ;;  %v6233_v23 = vrot.slane %v6046_v43, 1  ;;  %v5743_v10 = vmax.f32 %v5645_v7, 0.0 }
 0x581   : > { %v6048_v9 = vor.u32 %v6046_v43, %v6045_v33  ;;  %v5744_v17 = vmax.f32 %v5648_v60, 0.0  ;;  %v6234_v0 = vsel %vm18560_vm15, %v6232_v18, %v6233_v23  ;;  %v18566_v43 = vld [vmem:[#allocation48_spill] sm:$0xff] }
 0x582   : > { %v5363_v28 = vpop.f32.mrb[236].mxu0  ;;  %11987 = vmatprep.mubr.msk.bf16.mxu0 %vm18562_vm1, %v6234_v0 }
 0x583   : > { %v15410_v62 = vpack.c.bf16 %v5744_v17, %v5743_v10  ;;  %v5364_v2 = vadd.f32 %v15361_v29, %v5363_v28  ;;  %v5365_v16 = vpop.f32.mrb[237].mxu0  ;;  %v15414_v38 = vsel %vm18564_vm4, %v6037_v52, %v6048_v9  ;;  %v6235_v17 = vor.u32 %v6233_v23, %v6043_v24  ;;  %v18567_v10 = vld [vmem:[#allocation47_spill] sm:$0xff] }
 0x584   : > { %18565 = vst [vmem:[#allocation49_spill] sm:$0xff] %v15414_v38  ;;  %v5366_v21 = vpop.f32.mrb[238].mxu0 }
 0x585   : > { %18563 = vst [vmem:[#allocation34_spill] sm:$0xff] %v15410_v62  ;;  %v6051_v6 = vshrl.u32 %v15410_v62, 16  ;;  %v6054_v35 = vshll.u32 %v15410_v62, 16  ;;  %v5653_v7 = vadd.f32 %v18566_v43, %v5364_v2  ;;  %v5367_v3 = vadd.f32 %v15361_v29, %v5366_v21  ;;  %v5368_v34 = vpop.f32.mrb[239].mxu0 }
 0x587   : > { %v6053_v60 = vrot.slane %v6051_v6, 7  ;;  %v6236_v18 = vrot.slane %v6054_v35, 1  ;;  %v5656_v0 = vadd.f32 %v18567_v10, %v5367_v3  ;;  %v5745_v16 = vmax.f32 %v5653_v7, 0.0  ;;  %v18571_v7 = vld [vmem:[#allocation46_spill] sm:$0xff] }
 0x589   : > { %v6056_v28 = vor.u32 %v6054_v35, %v6053_v60  ;;  %v6237_v52 = vsel %vm18560_vm15, %v6235_v17, %v6236_v18  ;;  %v5746_v9 = vmax.f32 %v5656_v0, 0.0  ;;  %v18572_v0 = vld [vmem:[#allocation55_spill] sm:$0xff] }
 0x58a   : > { %v5371_v56 = vpop.f32.mrb[240].mxu0  ;;  %11988 = vmatmul.mubr.msk.bf16.gmra.mrb[48].mxu0 %vm18322_vm14, %v6237_v52  ;;  %v6238_v52 = vor.u32 %v6236_v18, %v6051_v6  ;;  %vm18576_vm14 = vsmask.f32 256 }
 0x58b   : > { %v15424_v62 = vpack.c.bf16 %v5746_v9, %v5745_v16  ;;  %v5372_v2 = vadd.f32 %v15361_v29, %v5371_v56  ;;  %v5373_v21 = vpop.f32.mrb[241].mxu0  ;;  %v15428_v43 = vsel %vm18564_vm4, %v6045_v33, %v6056_v28 }
 0x58c   : > { %18570 = vst [vmem:[#allocation48_spill] sm:$0xff] %v15428_v43  ;;  %v5374_v24 = vpop.f32.mrb[242].mxu0  ;;  %v18573_v43 = vld [vmem:[#allocation57_spill] sm:$0xff] }
 0x58d   : > { %18569 = vst [vmem:[#allocation42_spill] sm:$0xff] %v15424_v62  ;;  %v6059_v23 = vshrl.u32 %v15424_v62, 16  ;;  %v6062_v35 = vshll.u32 %v15424_v62, 16  ;;  %v5661_v3 = vadd.f32 %v18571_v7, %v5372_v2  ;;  %v5375_v34 = vadd.f32 %v15361_v29, %v5374_v24  ;;  %v5376_v17 = vpop.f32.mrb[243].mxu0 }
 0x58e   : > { %vm18574_vm4 = vnez %v18573_v43 }
 0x58f   : > { %v6061_v10 = vrot.slane %v6059_v23, 7  ;;  %v5664_v16 = vadd.f32 %v18572_v0, %v5375_v34  ;;  %v6239_v9 = vrot.slane %v6062_v35, 1  ;;  %v5747_v21 = vmax.f32 %v5661_v3, 0.0 }
 0x591   : > { %v6064_v56 = vor.u32 %v6062_v35, %v6061_v10  ;;  %v5748_v38 = vmax.f32 %v5664_v16, 0.0  ;;  %v6240_v33 = vsel %vm18560_vm15, %v6238_v52, %v6239_v9  ;;  %v18578_v35 = vld [vmem:[#allocation86_spill] sm:$0xff] }
 0x592   : > { %v5379_v28 = vpop.f32.mrb[244].mxu0  ;;  %11991 = vmatprep.mubr.msk.bf16.mxu0 %vm18574_vm4, %v6240_v33  ;;  %vm18583_vm4 = vsmask.f32 256 }
 0x593   : > { %v15438_v62 = vpack.c.bf16 %v5748_v38, %v5747_v21  ;;  %v5380_v2 = vadd.f32 %v15361_v29, %v5379_v28  ;;  %v5381_v24 = vpop.f32.mrb[245].mxu0  ;;  %v15442_v7 = vsel %vm18576_vm14, %v6053_v60, %v6064_v56  ;;  %v6241_v38 = vor.u32 %v6239_v9, %v6059_v23  ;;  %v18579_v21 = vld [vmem:[#allocation85_spill] sm:$0xff] }
 0x594   : > { %18577 = vst [vmem:[#allocation46_spill] sm:$0xff] %v15442_v7  ;;  %v5382_v34 = vpop.f32.mrb[246].mxu0  ;;  %v18580_v7 = vld [vmem:[#allocation62_spill] sm:$0xff] }
 0x595   : > { %18575 = vst [vmem:[#allocation47_spill] sm:$0xff] %v15438_v62  ;;  %v6067_v6 = vshrl.u32 %v15438_v62, 16  ;;  %v6070_v18 = vshll.u32 %v15438_v62, 16  ;;  %v5669_v3 = vadd.f32 %v18578_v35, %v5380_v2  ;;  %v5383_v17 = vadd.f32 %v15361_v29, %v5382_v34  ;;  %v5384_v0 = vpop.f32.mrb[247].mxu0 }
 0x596   : > { %vm18581_vm14 = vnez %v18580_v7  ;;  %v18586_v7 = vld [vmem:[#allocation63_spill] sm:$0xff] }
 0x597   : > { %v6069_v16 = vrot.slane %v6067_v6, 7  ;;  %v6242_v52 = vrot.slane %v6070_v18, 1  ;;  %v5672_v33 = vadd.f32 %v18579_v21, %v5383_v17  ;;  %v5749_v24 = vmax.f32 %v5669_v3, 0.0  ;;  %v18584_v3 = vld [vmem:[#allocation54_spill] sm:$0xff] }
 0x599   : > { %v6072_v28 = vor.u32 %v6070_v18, %v6069_v16  ;;  %v6243_v60 = vsel %vm18560_vm15, %v6241_v38, %v6242_v52  ;;  %v5750_v56 = vmax.f32 %v5672_v33, 0.0 }
 0x59a   : > { %v5387_v43 = vpop.f32.mrb[248].mxu0  ;;  %11992 = vmatmul.mubr.msk.bf16.gmra.mrb[52].mxu0 %vm18581_vm14, %v6243_v60  ;;  %vm18589_vm14 = vsmask.f32 256 }
 0x59b   : > { %v15452_v62 = vpack.c.bf16 %v5750_v56, %v5749_v24  ;;  %v5388_v2 = vadd.f32 %v15361_v29, %v5387_v43  ;;  %v5389_v34 = vpop.f32.mrb[249].mxu0  ;;  %v15456_v35 = vsel %vm18583_vm4, %v6061_v10, %v6072_v28  ;;  %v6244_v24 = vor.u32 %v6242_v52, %v6067_v6  ;;  %vm18585_vm4 = vmmov %vm18560_vm15 }
 0x59c   : > { %v5390_v23 = vpop.f32.mrb[250].mxu0  ;;  %vm18587_vm15 = vnez %v18586_v7 }
 0x59d   : > { %18582 = vst [vmem:[#allocation55_spill] sm:$0xff] %v15452_v62  ;;  %v6075_v9 = vshrl.u32 %v15452_v62, 16  ;;  %v6078_v18 = vshll.u32 %v15452_v62, 16  ;;  %v5677_v17 = vadd.f32 %v18584_v3, %v5388_v2  ;;  %v5391_v0 = vadd.f32 %v15361_v29, %v5390_v23  ;;  %v5392_v38 = vpop.f32.mrb[251].mxu0 }
 0x59f   : > { %v6077_v21 = vrot.slane %v6075_v9, 7  ;;  %v5680_v33 = vadd.f32 %v14955_v47, %v5391_v0  ;;  %v6245_v60 = vrot.slane %v6078_v18, 1  ;;  %v5751_v56 = vmax.f32 %v5677_v17, 0.0 }
 0x5a1   : > { %v6080_v43 = vor.u32 %v6078_v18, %v6077_v21  ;;  %v5752_v34 = vmax.f32 %v5680_v33, 0.0  ;;  %v6246_v10 = vsel %vm18585_vm4, %v6244_v24, %v6245_v60  ;;  %v18591_v18 = vld [vmem:[#allocation89_spill] sm:$0xff] }
 0x5a2   : > { %v5395_v28 = vpop.f32.mrb[252].mxu0  ;;  %11995 = vmatprep.mubr.msk.bf16.mxu0 %vm18587_vm15, %v6246_v10  ;;  %vm18595_vm15 = vsmask.f32 256 }
 0x5a3   : > { %v15466_v62 = vpack.c.bf16 %v5752_v34, %v5751_v56  ;;  %v5396_v2 = vadd.f32 %v15361_v29, %v5395_v28  ;;  %v5397_v23 = vpop.f32.mrb[253].mxu0  ;;  %v15470_v3 = vsel %vm18589_vm14, %v6069_v16, %v6080_v43  ;;  %v6247_v56 = vor.u32 %v6245_v60, %v6075_v9  ;;  %v18592_v34 = vld [vmem:[#allocation88_spill] sm:$0xff] }
 0x5a4   : > { %18590 = vst [vmem:[#allocation85_spill] sm:$0xff] %v15470_v3  ;;  %v5398_v47 = vpop.f32.mrb[254].mxu0  ;;  %v18593_v3 = vld [vmem:[#allocation66_spill] sm:$0xff] }
 0x5a5   : > { %18588 = vst [vmem:[#allocation86_spill] sm:$0xff] %v15466_v62  ;;  %v6083_v6 = vshrl.u32 %v15466_v62, 16  ;;  %v6086_v52 = vshll.u32 %v15466_v62, 16  ;;  %v5685_v17 = vadd.f32 %v18591_v18, %v5396_v2  ;;  %v5399_v0 = vadd.f32 %v15361_v29, %v5398_v47  ;;  %v5400_v38 = vpop.f32.mrb[255].mxu0 }
 0x5a6   : > { %vm18594_vm14 = vnez %v18593_v3  ;;  %v18659_v3 = vld [vmem:[#allocation59_spill] sm:$0xff] }
 0x5a7   : > { %v6085_v33 = vrot.slane %v6083_v6, 7  ;;  %v6248_v24 = vrot.slane %v6086_v52, 1  ;;  %v5688_v10 = vadd.f32 %v18592_v34, %v5399_v0  ;;  %v5753_v23 = vmax.f32 %v5685_v17, 0.0 }
 0x5a9   : > { %v6088_v28 = vor.u32 %v6086_v52, %v6085_v33  ;;  %v6249_v16 = vsel %vm18585_vm4, %v6247_v56, %v6248_v24  ;;  %v5754_v43 = vmax.f32 %v5688_v10, 0.0  ;;  %v6250_v17 = vor.u32 %v6248_v24, %v6083_v6  ;;  %v18596_v56 = vld [vmem:[#allocation64_spill] sm:$0xff] }
 0x5aa   : > { %v15478_v7 = vpop.f32.mrb[0].mxu0  ;;  %11996 = vmatmul.mubr.msk.bf16.gmra.mrb[56].mxu0 %vm18594_vm14, %v6249_v16  ;;  %vm18597_vm4 = vnez %v18596_v56  ;;  %vm18598_vm14 = vsmask.f32 7424  ;;  %v18647_v16 = vld [vmem:[#allocation61_spill] sm:$0xff] }
 0x5ab   : > { %v15482_v62 = vpack.c.bf16 %v5754_v43, %v5753_v23  ;;  %v15484_v2 = vpop.f32.mrb[1].mxu0  ;;  %v15487_v29 = vsel %vm18595_vm15, %v6077_v21, %v6088_v28 }
 0x5ac   : > { %v15489_v9 = vpop.f32.mrb[2].mxu0 }
 0x5ad   : > { %v5839_v60 = vshrl.u32 %v15482_v62, 16  ;;  %v6090_v47 = vshll.u32 %v15482_v62, 16  ;;  %v15493_v52 = vpop.f32.mrb[3].mxu0 }
 0x5af   : > { %v5841_v18 = vrot.slane %v5839_v60, 7  ;;  %v6251_v0 = vrot.slane %v6090_v47, 1 }
 0x5b1   : > { %v6092_v38 = vor.u32 %v6090_v47, %v5841_v18  ;;  %v6126_v34 = vsel %vm18597_vm4, %v5841_v18, %v14976_v46  ;;  %v6252_v10 = vsel %vm18598_vm14, %v6250_v17, %v6251_v0  ;;  %v6253_v21 = vor.u32 %v6251_v0, %v5839_v60  ;;  %v18602_v47 = vld [vmem:[#allocation70_spill] sm:$0xff]  ;;  %v18604_v17 = vld [vmem:[#allocation68_spill] sm:$0xff]  ;;  %v18606_v0 = vld [vmem:[#allocation53_spill] sm:$0xff] }
 0x5b2   : > { %11035 = vmatmul.mubr.msk.bf16.vlgmr.msra.gmra.mrb[192].mxu1 %vm18350_vm0, %v6126_v34  ;;  %v15501_v23 = vpop.f32.mrb[4].mxu0  ;;  %11999 = vmatprep.mubr.msk.bf16.mxu0 %vm13556_vm11, %v6252_v10  ;;  %vm18603_vm14 = vnez %v18602_v47  ;;  %vm18605_vm11 = vnez %v18604_v17  ;;  %v18609_v10 = vld [vmem:[#allocation72_spill] sm:$0xff]  ;;  %v18611_v17 = vld [vmem:[#allocation73_spill] sm:$0xff] }
 0x5b3   : > { %v6287_v6 = vsel %vm13595_vm8, %v6253_v21, %v15012_v59  ;;  %6510 = vmatprep.mubr.bf16.mxu1 %v14979_v48  ;;  %v15509_v24 = vpop.f32.mrb[5].mxu0  ;;  %v15512_v46 = vsel %vm18595_vm15, %v6085_v33, %v6092_v38  ;;  %v18607_v38 = vld [vmem:[#allocation71_spill] sm:$0xff] }
 0x5b4   : > { %v15514_v60 = vpop.f32.mrb[6].mxu0  ;;  %12000 = vmatmul.mubr.msk.bf16.gmra.mrb[60].mxu0 %vm18603_vm14, %v6287_v6  ;;  %vm18608_vm15 = vnez %v18607_v38  ;;  %vm18610_vm14 = vnez %v18609_v10  ;;  %v18615_v38 = vld [vmem:[#allocation75_spill] sm:$0xff] }
 0x5b5   : > { %v15518_v18 = vpop.f32.mrb[7].mxu0 }
 0x5ba   : > { %11037 = vmatmul.mubr.msk.bf16.gmra.mrb[196].mxu1 %vm18605_vm11, %v15001_v45  ;;  %vm18612_vm11 = vnez %v18611_v17  ;;  %v18626_v17 = vld [vmem:[#allocation81_spill] sm:$0xff] }
 0x5bb   : > { %6518 = vmatprep.mubr.bf16.mxu1 %v18606_v0 }
 0x5bd   : > { %v15524_v59 = vpop.f32.mrb[8].mxu0 }
 0x5be   : > { %v15526_v48 = vpop.f32.mrb[9].mxu0 }
 0x5bf   : > { %v15528_v34 = vpop.f32.mrb[10].mxu0 }
 0x5c0   : > { %v15530_v33 = vpop.f32.mrb[11].mxu0 }
 0x5c2   : > { %11039 = vmatmul.mubr.msk.bf16.gmra.mrb[200].mxu1 %vm18608_vm15, %v15021_v11 }
 0x5c3   : > { %6526 = vmatprep.mubr.bf16.mxu1 %v15017_v19  ;;  %v18613_v19 = vld [vmem:[#allocation74_spill] sm:$0xff] }
 0x5c4   : > { %vm18614_vm15 = vnez %v18613_v19 }
 0x5ca   : > { %11041 = vmatmul.mubr.msk.bf16.gmra.mrb[204].mxu1 %vm18610_vm14, %v15045_v55  ;;  %vm18616_vm14 = vnez %v18615_v38  ;;  %v18622_v38 = vld [vmem:[#allocation79_spill] sm:$0xff] }
 0x5cb   : > { %6534 = vmatprep.mubr.bf16.mxu1 %v15041_v42 }
 0x5cd   : > { %v15540_v45 = vpop.f32.mrb[12].mxu0 }
 0x5ce   : > { %v15542_v21 = vpop.f32.mrb[13].mxu0 }
 0x5cf   : > { %v15544_v6 = vpop.f32.mrb[14].mxu0 }
 0x5d0   : > { %v15546_v0 = vpop.f32.mrb[15].mxu0 }
 0x5d2   : > { %11043 = vmatmul.mubr.msk.bf16.gmra.mrb[208].mxu1 %vm18612_vm11, %v15068_v58 }
 0x5d3   : > { %6542 = vmatprep.mubr.bf16.mxu1 %v15064_v4  ;;  %v18617_v4 = vld [vmem:[#allocation76_spill] sm:$0xff] }
 0x5d4   : > { %vm18618_vm11 = vnez %v18617_v4 }
 0x5da   : > { %11045 = vmatmul.mubr.msk.bf16.gmra.mrb[212].mxu1 %vm18614_vm15, %v15089_v31 }
 0x5db   : > { %6550 = vmatprep.mubr.bf16.mxu1 %v15085_v37 }
 0x5dd   : > { %v15556_v11 = vpop.f32.mrb[16].mxu0 }
 0x5de   : > { %v15558_v55 = vpop.f32.mrb[17].mxu0 }
 0x5df   : > { %v15560_v42 = vpop.f32.mrb[18].mxu0 }
 0x5e0   : > { %v15562_v10 = vpop.f32.mrb[19].mxu0 }
 0x5e2   : > { %11047 = vmatmul.mubr.msk.bf16.gmra.mrb[216].mxu1 %vm18616_vm14, %v15107_v53 }
 0x5e3   : > { %6558 = vmatprep.mubr.bf16.mxu1 %v15103_v39  ;;  %v18620_v39 = vld [vmem:[#allocation78_spill] sm:$0xff] }
 0x5e4   : > { %vm18621_vm14 = vnez %v18620_v39 }
 0x5ea   : > { %11049 = vmatmul.mubr.msk.bf16.gmra.mrb[220].mxu1 %vm18618_vm11, %v15125_v20  ;;  %vm18623_vm11 = vnez %v18622_v38  ;;  %v18630_v38 = vld [vmem:[#allocation83_spill] sm:$0xff] }
 0x5eb   : > { %6566 = vmatprep.mubr.bf16.mxu1 %v15121_v32 }
 0x5ed   : > { %v15572_v58 = vpop.f32.mrb[20].mxu0 }
 0x5ee   : > { %v15574_v37 = vpop.f32.mrb[21].mxu0 }
 0x5ef   : > { %v15576_v31 = vpop.f32.mrb[22].mxu0 }
 0x5f0   : > { %v15578_v19 = vpop.f32.mrb[23].mxu0 }
 0x5f2   : > { %11051 = vmatmul.mubr.msk.bf16.gmra.mrb[224].mxu1 %vm18370_vm2, %v15143_v8 }
 0x5f3   : > { %6574 = vmatprep.mubr.bf16.mxu1 %v15139_v5  ;;  %v18624_v5 = vld [vmem:[#allocation80_spill] sm:$0xff] }
 0x5f4   : > { %vm18625_vm2 = vnez %v18624_v5 }
 0x5fa   : > { %11053 = vmatmul.mubr.msk.bf16.gmra.mrb[228].mxu1 %vm18621_vm14, %v15161_v12  ;;  %vm18627_vm14 = vnez %v18626_v17 }
 0x5fb   : > { %6582 = vmatprep.mubr.bf16.mxu1 %v15157_v63 }
 0x5fd   : > { %v15588_v53 = vpop.f32.mrb[24].mxu0 }
 0x5fe   : > { %v15590_v32 = vpop.f32.mrb[25].mxu0 }
 0x5ff   : > { %v15592_v20 = vpop.f32.mrb[26].mxu0 }
 0x600   : > { %v15594_v4 = vpop.f32.mrb[27].mxu0 }
 0x602   : > { %11055 = vmatmul.mubr.msk.bf16.gmra.mrb[232].mxu1 %vm18623_vm11, %v15179_v51 }
 0x603   : > { %6590 = vmatprep.mubr.bf16.mxu1 %v15175_v61  ;;  %v18628_v61 = vld [vmem:[#allocation82_spill] sm:$0xff] }
 0x604   : > { %vm18629_vm11 = vnez %v18628_v61  ;;  %v18636_v61 = vld [vmem:[#allocation25_spill] sm:$0xff] }
 0x60a   : > { %11057 = vmatmul.mubr.msk.bf16.gmra.mrb[236].mxu1 %vm18625_vm2, %v15197_v14  ;;  %vm18631_vm2 = vnez %v18630_v38 }
 0x60b   : > { %6598 = vmatprep.mubr.bf16.mxu1 %v15193_v25 }
 0x60d   : > { %v15604_v8 = vpop.f32.mrb[28].mxu0 }
 0x60e   : > { %v15606_v63 = vpop.f32.mrb[29].mxu0 }
 0x60f   : > { %v15608_v12 = vpop.f32.mrb[30].mxu0 }
 0x610   : > { %v15610_v39 = vpop.f32.mrb[31].mxu0 }
 0x612   : > { %11059 = vmatmul.mubr.msk.bf16.gmra.mrb[240].mxu1 %vm18627_vm14, %v15215_v40  ;;  %v12273_v40 = vld [vmem:[%s17486_s5 + $0x208] sm:$0xff]  }
 0x613   : > { %6606 = vmatprep.mubr.bf16.mxu1 %v15211_v26  ;;  %v15635_v26 = vld [vmem:[%s17486_s5 + $0x200] sm:$0xff]  }
 0x614   : > { %12163 = vmatprep.subr.bf16.mxu1 %v15635_v26 }
 0x615   : > { %12171 = vmatpush3.bf16.msra.mxu1 %v15635_v26 }
 0x616   : > { %12164 = vmatprep.subr.bf16.mxu1 %v12273_v40 }
 0x619   : > { %12172 = vmatpush3.bf16.msra.mxu1 %v12273_v40  ;;  %v12276_v40 = vld [vmem:[%s17486_s5 + $0x220] sm:$0xff]  }
 0x61a   : > { %11061 = vmatmul.mubr.msk.bf16.gmra.mrb[244].mxu1 %vm18629_vm11, %v15233_v57  ;;  %v12274_v57 = vld [vmem:[%s17486_s5 + $0x210] sm:$0xff]  }
 0x61b   : > { %6614 = vmatprep.mubr.bf16.mxu1 %v15229_v44  ;;  %v18632_v44 = vld [vmem:[#allocation20_spill] sm:$0xff]  ;;  %12165 = vmatprep.subr.bf16.mxu1 %v12274_v57 }
 0x61c   : > { %vm18633_vm11 = vnez %v18632_v44  ;;  %v12275_v44 = vld [vmem:[%s17486_s5 + $0x218] sm:$0xff]  }
 0x61d   : > { %v15620_v51 = vpop.f32.mrb[32].mxu0  ;;  %12173 = vmatpush3.bf16.msra.mxu1 %v12274_v57  ;;  %v12277_v57 = vld [vmem:[%s17486_s5 + $0x228] sm:$0xff]  }
 0x61e   : > { %v15622_v25 = vpop.f32.mrb[33].mxu0  ;;  %12166 = vmatprep.subr.bf16.mxu1 %v12275_v44 }
 0x61f   : > { %v15624_v14 = vpop.f32.mrb[34].mxu0 }
 0x620   : > { %v15626_v5 = vpop.f32.mrb[35].mxu0 }
 0x621   : > { %12174 = vmatpush3.bf16.msra.mxu1 %v12275_v44 }
 0x622   : > { %11063 = vmatmul.mubr.msk.bf16.gmra.mrb[248].mxu1 %vm18631_vm2, %v15251_v15  ;;  %12167 = vmatprep.subr.bf16.mxu1 %v12276_v40  ;;  %vm18637_vm2 = vnez %v18636_v61  ;;  %v12279_v61 = vld [vmem:[%s17486_s5 + $0x238] sm:$0xff]  }
 0x623   : > { %6622 = vmatprep.mubr.bf16.mxu1 %v15247_v41 }
 0x625   : > { %12175 = vmatpush3.bf16.msra.mxu1 %v12276_v40 }
 0x626   : > { %12168 = vmatprep.subr.bf16.mxu1 %v12277_v57 }
 0x629   : > { %12176 = vmatpush3.bf16.msra.mxu1 %v12277_v57  ;;  %v18640_v57 = vld [vmem:[#allocation23_spill] sm:$0xff] }
 0x62a   : > { %11065 = vmatmul.mubr.msk.bf16.gmra.mrb[252].mxu1 %vm18633_vm11, %v15269_v36 }
 0x62b   : > { %6630 = vmatprep.mubr.bf16.mxu1 %v15265_v27  ;;  %v18634_v27 = vld [vmem:[#allocation24_spill] sm:$0xff] }
 0x62c   : > { %vm18635_vm11 = vnez %v18634_v27  ;;  %v18642_v27 = vld [vmem:[#allocation52_spill] sm:$0xff] }
 0x62d   : > { %v15649_v41 = vpop.f32.mrb[36].mxu0 }
 0x62e   : > { %v15651_v15 = vpop.f32.mrb[37].mxu0 }
 0x62f   : > { %v15653_v38 = vpop.f32.mrb[38].mxu0 }
 0x630   : > { %v15658_v36 = vpop.f32.mrb[39].mxu0 }
 0x632   : > { %11067 = vmatmul.mubr.msk.bf16.gmra.mrb[0].mxu1 %vm18635_vm11, %v15283_v22  ;;  %vm18641_vm11 = vnez %v18640_v57 }
 0x633   : > { %6638 = vmatprep.mubr.bf16.mxu1 %v15279_v13  ;;  %v12278_v13 = vld [vmem:[%s17486_s5 + $0x230] sm:$0xff]  }
 0x634   : > { %12169 = vmatprep.subr.bf16.mxu1 %v12278_v13 }
 0x635   : > { %12177 = vmatpush3.bf16.msra.mxu1 %v12278_v13 }
 0x636   : > { %12170 = vmatprep.subr.bf16.mxu1 %v12279_v61 }
 0x639   : > { %12178 = vmatpush3.bf16.msra.mxu1 %v12279_v61  ;;  %v18652_v61 = vld [vmem:[#allocation30_spill] sm:$0xff] }
 0x63a   : > { %11069 = vmatmul.mubr.msk.bf16.gmra.mrb[4].mxu1 %vm18637_vm2, %v15297_v30  ;;  %vm18653_vm14 = vnez %v18652_v61 }
 0x63b   : > { %6646 = vmatprep.mubr.bf16.mxu1 %v15293_v49  ;;  %v18638_v49 = vld [vmem:[#allocation31_spill] sm:$0xff] }
 0x63c   : > { %vm18639_vm2 = vnez %v18638_v49  ;;  %v18648_v49 = vld [vmem:[#allocation29_spill] sm:$0xff] }
 0x63d   : > { %v15677_v22 = vpop.f32.mrb[40].mxu0 }
 0x63e   : > { %v15679_v44 = vpop.f32.mrb[41].mxu0 }
 0x63f   : > { %v15681_v40 = vpop.f32.mrb[42].mxu0 }
 0x640   : > { %v15686_v30 = vpop.f32.mrb[43].mxu0 }
 0x642   : > { %11071 = vmatmul.mubr.msk.bf16.gmra.mrb[8].mxu1 %vm18639_vm2, %v15311_v1  ;;  %vm18649_vm2 = vnez %v18648_v49  ;;  %v18651_v1 = vld [vmem:[#allocation93_spill] sm:$0xff]  ;;  %v18664_v49 = vld [vmem:[#allocation43_spill] sm:$0xff] }
 0x643   : > { %6654 = vmatprep.mubr.bf16.mxu1 %v15307_v54  ;;  %v18650_v54 = vld [vmem:[#allocation92_spill] sm:$0xff] }
 0x64a   : > { %11073 = vmatmul.mubr.msk.bf16.gmra.mrb[12].mxu1 %vm18641_vm11, %v15325_v50  ;;  %v18654_v50 = vld [vmem:[#allocation91_spill] sm:$0xff] }
 0x64b   : > { %6662 = vmatprep.mubr.bf16.mxu1 %v18642_v27 }
 0x64d   : > { %v15696_v13 = vpop.f32.mrb[44].mxu0 }
 0x64e   : > { %18643 = vst [vmem:[#allocation54_spill] sm:$0xff] %v15696_v13  ;;  %v15698_v17 = vpop.f32.mrb[45].mxu0  ;;  %v18688_v13 = vld [vmem:[#allocation46_spill] sm:$0xff] }
 0x64f   : > { %18644 = vst [vmem:[#allocation89_spill] sm:$0xff] %v15698_v17  ;;  %v15700_v47 = vpop.f32.mrb[46].mxu0 }
 0x650   : > { %18645 = vst [vmem:[#allocation88_spill] sm:$0xff] %v15700_v47  ;;  %v15702_v43 = vpop.f32.mrb[47].mxu0  ;;  %v18660_v47 = vld [vmem:[#allocation37_spill] sm:$0xff] }
 0x651   : > { %18646 = vst [vmem:[#allocation53_spill] sm:$0xff] %v15702_v43  ;;  %vm18661_vm11 = vnez %v18660_v47  ;;  %v18689_v43 = vld [vmem:[#allocation90_spill] sm:$0xff] }
 0x652   : > { %11075 = vmatmul.mubr.msk.bf16.gmra.mrb[16].mxu1 %vm18649_vm2, %v18647_v16  ;;  %v18662_v16 = vld [vmem:[#allocation28_spill] sm:$0xff]  ;;  %vm18665_vm2 = vnez %v18664_v49 }
 0x653   : > { %6670 = vmatprep.mubr.bf16.mxu1 %v18650_v54  ;;  %v18663_v54 = vld [vmem:[#allocation36_spill] sm:$0xff] }
 0x65a   : > { %11077 = vmatmul.mubr.msk.bf16.gmra.mrb[20].mxu1 %vm18653_vm14, %v18651_v1  ;;  %v18666_v1 = vld [vmem:[#allocation58_spill] sm:$0xff] }
 0x65b   : > { %6678 = vmatprep.mubr.bf16.mxu1 %v18654_v50 }
 0x65d   : > { %v15712_v27 = vpop.f32.mrb[48].mxu0 }
 0x65e   : > { %18655 = vst [vmem:[#allocation52_spill] sm:$0xff] %v15712_v27  ;;  %v15714_v57 = vpop.f32.mrb[49].mxu0 }
 0x65f   : > { %18656 = vst [vmem:[#allocation61_spill] sm:$0xff] %v15714_v57  ;;  %v15716_v28 = vpop.f32.mrb[50].mxu0 }
 0x660   : > { %18657 = vst [vmem:[#allocation92_spill] sm:$0xff] %v15716_v28  ;;  %v15718_v56 = vpop.f32.mrb[51].mxu0 }
 0x661   : > { %18658 = vst [vmem:[#allocation93_spill] sm:$0xff] %v15718_v56  ;;  %v18671_v56 = vld [vmem:[#allocation41_spill] sm:$0xff] }
 0x662   : > { %11079 = vmatmul.mubr.msk.bf16.gmra.mrb[24].mxu1 %vm18661_vm11, %v18659_v3  ;;  %v18673_v3 = vld [vmem:[#allocation35_spill] sm:$0xff] }
 0x663   : > { %6686 = vmatprep.mubr.bf16.mxu1 %v18662_v16  ;;  %v18674_v16 = vld [vmem:[#allocation49_spill] sm:$0xff] }
 0x66a   : > { %11081 = vmatmul.mubr.msk.bf16.gmra.mrb[28].mxu1 %vm18665_vm2, %v18663_v54  ;;  %v18676_v54 = vld [vmem:[#allocation34_spill] sm:$0xff] }
 0x66b   : > { %6694 = vmatprep.mubr.bf16.mxu1 %v18666_v1 }
 0x66d   : > { %v15728_v50 = vpop.f32.mrb[52].mxu0 }
 0x66e   : > { %18667 = vst [vmem:[#allocation91_spill] sm:$0xff] %v15728_v50  ;;  %v15730_v61 = vpop.f32.mrb[53].mxu0 }
 0x66f   : > { %18668 = vst [vmem:[#allocation59_spill] sm:$0xff] %v15730_v61  ;;  %v15732_v27 = vpop.f32.mrb[54].mxu0  ;;  %v18682_v61 = vld [vmem:[#allocation87_spill] sm:$0xff] }
 0x670   : > { %18669 = vst [vmem:[#allocation28_spill] sm:$0xff] %v15732_v27  ;;  %v15734_v28 = vpop.f32.mrb[55].mxu0  ;;  %vm18683_vm2 = vnez %v18682_v61 }
 0x671   : > { %18670 = vst [vmem:[#allocation36_spill] sm:$0xff] %v15734_v28  ;;  %v18681_v28 = vld [vmem:[#allocation48_spill] sm:$0xff] }
 0x672   : > { %11083 = vmatmul.mubr.msk.bf16.gmra.mrb[32].mxu1 %vm18426_vm7, %v18671_v56  ;;  %v18684_v56 = vld [vmem:[#allocation42_spill] sm:$0xff] }
 0x673   : > { %6702 = vmatprep.mubr.bf16.mxu1 %v18673_v3  ;;  %v15759_v3 = vld [vmem:[%s17487_s6 + $0x1] ss:$0 sm:$0xff] }
 0x67a   : > { %11085 = vmatmul.mubr.msk.bf16.gmra.mrb[36].mxu1 %vm18430_vm5, %v18674_v16  ;;  %vm18703_vm5 = vsmask.f32 7424 }
 0x67b   : > { %6710 = vmatprep.mubr.bf16.mxu1 %v18676_v54 }
 0x67d   : > { %v15744_v1 = vpop.f32.mrb[56].mxu0 }
 0x67e   : > { %18677 = vst [vmem:[#allocation58_spill] sm:$0xff] %v15744_v1  ;;  %v15746_v49 = vpop.f32.mrb[57].mxu0 }
 0x67f   : > { %18678 = vst [vmem:[#allocation41_spill] sm:$0xff] %v15746_v49  ;;  %v15748_v50 = vpop.f32.mrb[58].mxu0 }
 0x680   : > { %18679 = vst [vmem:[#allocation35_spill] sm:$0xff] %v15748_v50  ;;  %v15750_v27 = vpop.f32.mrb[59].mxu0 }
 0x681   : > { %18680 = vst [vmem:[#allocation49_spill] sm:$0xff] %v15750_v27 }
 0x682   : > { %11087 = vmatmul.mubr.msk.bf16.gmra.mrb[40].mxu1 %vm18683_vm2, %v18681_v28  ;;  %vm18690_vm2 = vnez %v18689_v43 }
 0x683   : > { %6718 = vmatprep.mubr.bf16.mxu1 %v18684_v56 }
 0x685   : > { %v6504_v16 = vpop.f32.mrb[192].mxu1 }
 0x686   : > { %v6505_v54 = vadd.f32 %v15759_v3, %v6504_v16  ;;  %v6506_v47 = vpop.f32.mrb[193].mxu1 }
 0x687   : > { %v6507_v57 = vpop.f32.mrb[194].mxu1  ;;  %v15762_v1 = vpop.f32.mrb[60].mxu0  ;;  %v18691_v47 = vld [vmem:[#allocation47_spill] sm:$0xff] }
 0x688   : > { %18685 = vst [vmem:[#allocation34_spill] sm:$0xff] %v15762_v1  ;;  %v6794_v50 = vadd.f32 %v15484_v2, %v6505_v54  ;;  %v6508_v27 = vadd.f32 %v15759_v3, %v6507_v57  ;;  %v6509_v61 = vpop.f32.mrb[195].mxu1  ;;  %v15766_v28 = vpop.f32.mrb[61].mxu0 }
 0x689   : > { %18686 = vst [vmem:[#allocation48_spill] sm:$0xff] %v15766_v28  ;;  %v15768_v56 = vpop.f32.mrb[62].mxu0 }
 0x68a   : > { %18687 = vst [vmem:[#allocation42_spill] sm:$0xff] %v15768_v56  ;;  %v6797_v49 = vadd.f32 %v15493_v52, %v6508_v27  ;;  %11089 = vmatmul.mubr.msk.bf16.gmra.mrb[44].mxu1 %vm18690_vm2, %v18688_v13  ;;  %v15774_v16 = vpop.f32.mrb[63].mxu0  ;;  %v7048_v1 = vmax.f32 %v6794_v50, 0.0  ;;  %v18695_v50 = vld [vmem:[#allocation55_spill] sm:$0xff] }
 0x68b   : > { %6726 = vmatprep.mubr.bf16.mxu1 %v18691_v47 }
 0x68c   : > { %v7049_v17 = vmax.f32 %v6797_v49, 0.0  ;;  %v18693_v49 = vld [vmem:[#allocation60_spill] sm:$0xff] }
 0x68d   : > { %v6512_v2 = vpop.f32.mrb[196].mxu1  ;;  %vm18694_vm2 = vnez %v18693_v49 }
 0x68e   : > { %v6513_v57 = vadd.f32 %v15759_v3, %v6512_v2  ;;  %v6514_v61 = vpop.f32.mrb[197].mxu1  ;;  %v15778_v54 = vpack.c.bf16 %v7049_v17, %v7048_v1 }
 0x68f   : > { %v6515_v28 = vpop.f32.mrb[198].mxu1 }
 0x690   : > { %18692 = vst [vmem:[#allocation46_spill] sm:$0xff] %v15778_v54  ;;  %v6802_v56 = vadd.f32 %v15478_v7, %v6513_v57  ;;  %v6516_v52 = vadd.f32 %v15759_v3, %v6515_v28  ;;  %v6517_v27 = vpop.f32.mrb[199].mxu1  ;;  %7859 = vmatprep.mubr.bf16.mxu0 %v15778_v54  ;;  %v17795_v47 = vshll.u32 %v15778_v54, 16  ;;  %v12280_v7 = vld [vmem:[%s17486_s5 + $0x180] sm:$0xff]  }
 0x691   : > { %7828 = vmatpush1.bf16.msra.mxu0 %v12280_v7  ;;  %v18700_v7 = vld [vmem:[#allocation94_spill] sm:$0xff] }
 0x692   : > { %v6805_v13 = vadd.f32 %v15489_v9, %v6516_v52  ;;  %11091 = vmatmul.mubr.msk.bf16.gmra.mrb[48].mxu1 %vm18694_vm2, %v15456_v35  ;;  %v7050_v17 = vmax.f32 %v6802_v56, 0.0  ;;  %v15794_v2 = vrot.slane %v17795_v47, 1  ;;  %v7201_v35 = vshrl.u32 %v15778_v54, 16 }
 0x693   : > { %6734 = vmatprep.mubr.bf16.mxu1 %v18695_v50  ;;  %v18698_v56 = vmov 0   ;;  %vm18701_vm2 = vnez %v18700_v7 }
 0x694   : > { %v7051_v1 = vmax.f32 %v6805_v13, 0.0  ;;  %18696 = vst [vmem:[#allocation47_spill] sm:$0xff] %v15794_v2  ;;  %7829 = vmatprep.subr.bf16.mxu0 %v18698_v56  ;;  %v15810_v54 = vrot.slane %v7201_v35, 7 }
 0x695   : > { %v6520_v28 = vpop.f32.mrb[200].mxu1 }
 0x696   : > { %v6521_v9 = vadd.f32 %v15759_v3, %v6520_v28  ;;  %v6522_v57 = vpop.f32.mrb[201].mxu1  ;;  %v15797_v61 = vpack.c.bf16 %v7051_v1, %v7050_v17  ;;  %v7517_v1 = vor.u32 %v15794_v2, %v7201_v35 }
 0x697   : > { %v6523_v52 = vpop.f32.mrb[202].mxu1  ;;  %v18699_v57 = vld [vmem:[#allocation85_spill] sm:$0xff] }
 0x698   : > { %18697 = vst [vmem:[#allocation55_spill] sm:$0xff] %v15797_v61  ;;  %v6810_v27 = vadd.f32 %v15509_v24, %v6521_v9  ;;  %v6524_v13 = vadd.f32 %v15759_v3, %v6523_v52  ;;  %v6525_v50 = vpop.f32.mrb[203].mxu1  ;;  %v7208_v49 = vshrl.u32 %v15797_v61, 16  ;;  %v7211_v47 = vshll.u32 %v15797_v61, 16  ;;  %v18702_v9 = vld [vmem:[#allocation86_spill] sm:$0xff] }
 0x699   : > { %v12281_v50 = vld [vmem:[%s17486_s5 + $0x188] sm:$0xff]  }
 0x69a   : > { %v6813_v28 = vadd.f32 %v15518_v18, %v6524_v13  ;;  %11093 = vmatmul.mubr.msk.bf16.gmra.mrb[52].mxu1 %vm18701_vm2, %v18699_v57  ;;  %v7210_v17 = vrot.slane %v7208_v49, 7  ;;  %v7518_v43 = vrot.slane %v7211_v47, 1  ;;  %v7052_v24 = vmax.f32 %v6810_v27, 0.0  ;;  %7830 = vmatpush1.bf16.msra.mxu0 %v12281_v50 }
 0x69b   : > { %6742 = vmatprep.mubr.bf16.mxu1 %v18702_v9  ;;  %vm18705_vm2 = vsmask.f32 256  ;;  %7831 = vmatprep.subr.bf16.mxu0 %v18698_v56 }
 0x69c   : > { %v7053_v52 = vmax.f32 %v6813_v28, 0.0  ;;  %v7213_v61 = vor.u32 %v7211_v47, %v7210_v17  ;;  %v15817_v18 = vsel %vm18703_vm5, %v7517_v1, %v7518_v43  ;;  %v7520_v13 = vor.u32 %v7518_v43, %v7208_v49 }
 0x69d   : > { %18704 = vst [vmem:[#allocation85_spill] sm:$0xff] %v15817_v18  ;;  %v6528_v57 = vpop.f32.mrb[204].mxu1 }
 0x69e   : > { %v6529_v7 = vadd.f32 %v15759_v3, %v6528_v57  ;;  %v6530_v2 = vpop.f32.mrb[205].mxu1  ;;  %v15822_v35 = vsel %vm18705_vm2, %v15810_v54, %v7213_v61  ;;  %v15824_v27 = vpack.c.bf16 %v7053_v52, %v7052_v24 }
 0x69f   : > { %v6531_v28 = vpop.f32.mrb[206].mxu1 }
 0x6a0   : > { %v6818_v47 = vadd.f32 %v15501_v23, %v6529_v7  ;;  %v6532_v1 = vadd.f32 %v15759_v3, %v6531_v28  ;;  %v6533_v9 = vpop.f32.mrb[207].mxu1  ;;  %v7216_v43 = vshrl.u32 %v15824_v27, 16  ;;  %v7219_v49 = vshll.u32 %v15824_v27, 16  ;;  %v12282_v23 = vld [vmem:[%s17486_s5 + $0x190] sm:$0xff]  }
 0x6a1   : > { %7832 = vmatpush1.bf16.msra.mxu0 %v12282_v23 }
 0x6a2   : > { %v6821_v2 = vadd.f32 %v15514_v60, %v6532_v1  ;;  %11095 = vmatmul.mubr.msk.bf16.gmra.mrb[56].mxu1 %vm14177_vm10, %v15487_v29  ;;  %v7218_v61 = vrot.slane %v7216_v43, 7  ;;  %v7521_v24 = vrot.slane %v7219_v49, 1  ;;  %v7054_v52 = vmax.f32 %v6818_v47, 0.0  ;;  %7833 = vmatprep.subr.bf16.mxu0 %v18698_v56 }
 0x6a3   : > { %6750 = vmatprep.mubr.bf16.mxu1 %v15482_v62 }
 0x6a4   : > { %v7055_v57 = vmax.f32 %v6821_v2, 0.0  ;;  %v7221_v7 = vor.u32 %v7219_v49, %v7218_v61  ;;  %v15840_v28 = vsel %vm18703_vm5, %v7520_v13, %v7521_v24  ;;  %v7523_v9 = vor.u32 %v7521_v24, %v7216_v43 }
 0x6a5   : > { %18707 = vst [vmem:[#allocation86_spill] sm:$0xff] %v15840_v28  ;;  %v6536_v60 = vpop.f32.mrb[208].mxu1 }
 0x6a6   : > { %v6537_v1 = vadd.f32 %v15759_v3, %v6536_v60  ;;  %v6538_v18 = vpop.f32.mrb[209].mxu1  ;;  %v15844_v29 = vsel %vm18705_vm2, %v7210_v17, %v7221_v7  ;;  %v15846_v47 = vpack.c.bf16 %v7055_v57, %v7054_v52 }
 0x6a7   : > { %v6539_v62 = vpop.f32.mrb[210].mxu1 }
 0x6a8   : > { %v6826_v2 = vadd.f32 %v15526_v48, %v6537_v1  ;;  %v6540_v49 = vadd.f32 %v15759_v3, %v6539_v62  ;;  %v6541_v13 = vpop.f32.mrb[211].mxu1  ;;  %v7224_v43 = vshrl.u32 %v15846_v47, 16  ;;  %v7227_v24 = vshll.u32 %v15846_v47, 16  ;;  %v12283_v48 = vld [vmem:[%s17486_s5 + $0x198] sm:$0xff]  }
 0x6a9   : > { %7834 = vmatpush1.bf16.msra.mxu0 %v12283_v48 }
 0x6aa   : > { %v6829_v18 = vadd.f32 %v15530_v33, %v6540_v49  ;;  %11097 = vmatmul.mubr.msk.bf16.gmra.mrb[60].mxu1 %vm14204_vm9, %v15512_v46  ;;  %v7226_v17 = vrot.slane %v7224_v43, 7  ;;  %v7524_v52 = vrot.slane %v7227_v24, 1  ;;  %v7056_v57 = vmax.f32 %v6826_v2, 0.0  ;;  %7835 = vmatprep.subr.bf16.mxu0 %v18698_v56 }
 0x6ac   : > { %v7057_v7 = vmax.f32 %v6829_v18, 0.0  ;;  %v7229_v60 = vor.u32 %v7227_v24, %v7226_v17  ;;  %v15861_v1 = vsel %vm18703_vm5, %v7523_v9, %v7524_v52  ;;  %v7526_v62 = vor.u32 %v7524_v52, %v7224_v43 }
 0x6ad   : > { %18709 = vst [vmem:[#allocation97_spill] sm:$0xff] %v15861_v1  ;;  %v6544_v13 = vpop.f32.mrb[212].mxu1 }
 0x6ae   : > { %v15863_v28 = vpack.c.bf16 %v7057_v7, %v7056_v57  ;;  %v6545_v33 = vadd.f32 %v15759_v3, %v6544_v13  ;;  %v6546_v49 = vpop.f32.mrb[213].mxu1  ;;  %v15867_v46 = vsel %vm18705_vm2, %v7218_v61, %v7229_v60  ;;  %v12284_v60 = vld [vmem:[%s17486_s5 + $0x1a0] sm:$0xff]  }
 0x6af   : > { %v6547_v2 = vpop.f32.mrb[214].mxu1  ;;  %7836 = vmatpush1.bf16.msra.mxu0 %v12284_v60 }
 0x6b0   : > { %v7232_v18 = vshrl.u32 %v15863_v28, 16  ;;  %v7235_v24 = vshll.u32 %v15863_v28, 16  ;;  %v6834_v9 = vadd.f32 %v15524_v59, %v6545_v33  ;;  %v6548_v43 = vadd.f32 %v15759_v3, %v6547_v2  ;;  %v6549_v52 = vpop.f32.mrb[215].mxu1  ;;  %7837 = vmatprep.subr.bf16.mxu0 %v18698_v56 }
 0x6b2   : > { %v7234_v57 = vrot.slane %v7232_v18, 7  ;;  %v6837_v7 = vadd.f32 %v15528_v34, %v6548_v43  ;;  %v7527_v13 = vrot.slane %v7235_v24, 1  ;;  %v7058_v49 = vmax.f32 %v6834_v9, 0.0 }
 0x6b4   : > { %v7237_v48 = vor.u32 %v7235_v24, %v7234_v57  ;;  %v7059_v61 = vmax.f32 %v6837_v7, 0.0  ;;  %v15879_v1 = vsel %vm18703_vm5, %v7526_v62, %v7527_v13 }
 0x6b5   : > { %18710 = vst [vmem:[#allocation98_spill] sm:$0xff] %v15879_v1  ;;  %v6552_v23 = vpop.f32.mrb[216].mxu1  ;;  %v12285_v1 = vld [vmem:[%s17486_s5 + $0x1a8] sm:$0xff]  }
 0x6b6   : > { %v15881_v50 = vpack.c.bf16 %v7059_v61, %v7058_v49  ;;  %v6553_v59 = vadd.f32 %v15759_v3, %v6552_v23  ;;  %v6554_v33 = vpop.f32.mrb[217].mxu1  ;;  %v15885_v34 = vsel %vm18705_vm2, %v7226_v17, %v7237_v48  ;;  %v7529_v49 = vor.u32 %v7527_v13, %v7232_v18  ;;  %7838 = vmatpush1.bf16.msra.mxu0 %v12285_v1 }
 0x6b7   : > { %18712 = vst [vmem:[#allocation100_spill] sm:$0xff] %v15885_v34  ;;  %v6555_v2 = vpop.f32.mrb[218].mxu1  ;;  %7839 = vmatprep.subr.bf16.mxu0 %v18698_v56 }
 0x6b8   : > { %18711 = vst [vmem:[#allocation99_spill] sm:$0xff] %v15881_v50  ;;  %v7240_v24 = vshrl.u32 %v15881_v50, 16  ;;  %v7243_v9 = vshll.u32 %v15881_v50, 16  ;;  %v6842_v62 = vadd.f32 %v15542_v21, %v6553_v59  ;;  %v6556_v43 = vadd.f32 %v15759_v3, %v6555_v2  ;;  %v6557_v52 = vpop.f32.mrb[219].mxu1 }
 0x6ba   : > { %v7242_v7 = vrot.slane %v7240_v24, 7  ;;  %v6845_v23 = vadd.f32 %v15546_v0, %v6556_v43  ;;  %v7530_v61 = vrot.slane %v7243_v9, 1  ;;  %v7060_v17 = vmax.f32 %v6842_v62, 0.0 }
 0x6bc   : > { %v7245_v60 = vor.u32 %v7243_v9, %v7242_v7  ;;  %v7061_v48 = vmax.f32 %v6845_v23, 0.0  ;;  %v7531_v33 = vsel %vm18703_vm5, %v7529_v49, %v7530_v61 }
 0x6bd   : > { %v6560_v50 = vpop.f32.mrb[220].mxu1  ;;  %12027 = vmatprep.mubr.msk.bf16.mxu1 %vm12835_vm6, %v7531_v33  ;;  %vm18714_vm6 = vmmov %vm18703_vm5 }
 0x6be   : > { %v15899_v21 = vpack.c.bf16 %v7061_v48, %v7060_v17  ;;  %v6561_v59 = vadd.f32 %v15759_v3, %v6560_v50  ;;  %v6562_v0 = vpop.f32.mrb[221].mxu1  ;;  %v15903_v18 = vsel %vm18705_vm2, %v7234_v57, %v7245_v60  ;;  %v7532_v50 = vor.u32 %v7530_v61, %v7240_v24  ;;  %v12286_v48 = vld [vmem:[%s17486_s5 + $0x1b0] sm:$0xff]   ;;  %vm18716_vm5 = vmmov %vm18705_vm2 }
 0x6bf   : > { %v6563_v13 = vpop.f32.mrb[222].mxu1  ;;  %7840 = vmatpush1.bf16.msra.mxu0 %v12286_v48 }
 0x6c0   : > { %v7248_v2 = vshrl.u32 %v15899_v21, 16  ;;  %v7251_v9 = vshll.u32 %v15899_v21, 16  ;;  %v6850_v62 = vadd.f32 %v15540_v45, %v6561_v59  ;;  %v6564_v34 = vadd.f32 %v15759_v3, %v6563_v13  ;;  %v6565_v43 = vpop.f32.mrb[223].mxu1  ;;  %7841 = vmatprep.subr.bf16.mxu0 %v18698_v56 }
 0x6c2   : > { %v7250_v52 = vrot.slane %v7248_v2, 7  ;;  %v7533_v23 = vrot.slane %v7251_v9, 1  ;;  %v6853_v1 = vadd.f32 %v15544_v6, %v6564_v34  ;;  %v7062_v57 = vmax.f32 %v6850_v62, 0.0 }
 0x6c4   : > { %v7253_v49 = vor.u32 %v7251_v9, %v7250_v52  ;;  %v7534_v60 = vsel %vm18714_vm6, %v7532_v50, %v7533_v23  ;;  %v7063_v17 = vmax.f32 %v6853_v1, 0.0 }
 0x6c5   : > { %v6568_v33 = vpop.f32.mrb[224].mxu1  ;;  %12028 = vmatmul.mubr.msk.bf16.vlgmr.msra.gmra.mrb[64].mxu1 %vm12879_vm13, %v7534_v60  ;;  %vm18717_vm13 = vmmov %vm18714_vm6 }
 0x6c6   : > { %v15917_v45 = vpack.c.bf16 %v7063_v17, %v7062_v57  ;;  %v6569_v59 = vadd.f32 %v15759_v3, %v6568_v33  ;;  %v6570_v24 = vpop.f32.mrb[225].mxu1  ;;  %v15921_v6 = vsel %vm18716_vm5, %v7242_v7, %v7253_v49  ;;  %v7535_v57 = vor.u32 %v7533_v23, %v7248_v2  ;;  %v12287_v33 = vld [vmem:[%s17486_s5 + $0x1b8] sm:$0xff]  }
 0x6c7   : > { %v6571_v61 = vpop.f32.mrb[226].mxu1  ;;  %7842 = vmatpush1.bf16.msra.mxu0 %v12287_v33 }
 0x6c8   : > { %v7256_v13 = vshrl.u32 %v15917_v45, 16  ;;  %v7259_v9 = vshll.u32 %v15917_v45, 16  ;;  %v6858_v62 = vadd.f32 %v15558_v55, %v6569_v59  ;;  %v6572_v34 = vadd.f32 %v15759_v3, %v6571_v61  ;;  %v6573_v43 = vpop.f32.mrb[227].mxu1  ;;  %7843 = vmatprep.subr.bf16.mxu0 %v18698_v56 }
 0x6ca   : > { %v7258_v50 = vrot.slane %v7256_v13, 7  ;;  %v6861_v1 = vadd.f32 %v15562_v10, %v6572_v34  ;;  %v7536_v60 = vrot.slane %v7259_v9, 1  ;;  %v7064_v7 = vmax.f32 %v6858_v62, 0.0 }
 0x6cc   : > { %v7261_v17 = vor.u32 %v7259_v9, %v7258_v50  ;;  %v7065_v49 = vmax.f32 %v6861_v1, 0.0  ;;  %v7537_v48 = vsel %vm18717_vm13, %v7535_v57, %v7536_v60  ;;  %vm18725_vm13 = vmmov %vm18705_vm2 }
 0x6cd   : > { %v6576_v0 = vpop.f32.mrb[228].mxu1  ;;  %12031 = vmatprep.mubr.msk.bf16.mxu1 %vm18472_vm3, %v7537_v48  ;;  %vm18719_vm3 = vmmov %vm18714_vm6 }
 0x6ce   : > { %v15935_v55 = vpack.c.bf16 %v7065_v49, %v7064_v7  ;;  %v6577_v59 = vadd.f32 %v15759_v3, %v6576_v0  ;;  %v6578_v10 = vpop.f32.mrb[229].mxu1  ;;  %v15939_v2 = vsel %vm18705_vm2, %v7250_v52, %v7261_v17  ;;  %v7538_v7 = vor.u32 %v7536_v60, %v7256_v13  ;;  %v12288_v0 = vld [vmem:[%s17486_s5 + $0x1c0] sm:$0xff]   ;;  %vm18721_vm6 = vmmov %vm18705_vm2 }
 0x6cf   : > { %v6579_v23 = vpop.f32.mrb[230].mxu1  ;;  %7844 = vmatpush1.bf16.msra.mxu0 %v12288_v0  ;;  %vm18726_vm2 = vmmov %vm18719_vm3 }
 0x6d0   : > { %v7264_v61 = vshrl.u32 %v15935_v55, 16  ;;  %v7267_v9 = vshll.u32 %v15935_v55, 16  ;;  %v6866_v62 = vadd.f32 %v15556_v11, %v6577_v59  ;;  %v6580_v34 = vadd.f32 %v15759_v3, %v6579_v23  ;;  %v6581_v43 = vpop.f32.mrb[231].mxu1  ;;  %7845 = vmatprep.subr.bf16.mxu0 %v18698_v56 }
 0x6d2   : > { %v7266_v1 = vrot.slane %v7264_v61, 7  ;;  %v7539_v57 = vrot.slane %v7267_v9, 1  ;;  %v6869_v49 = vadd.f32 %v15560_v42, %v6580_v34  ;;  %v7066_v52 = vmax.f32 %v6866_v62, 0.0 }
 0x6d4   : > { %v7269_v48 = vor.u32 %v7267_v9, %v7266_v1  ;;  %v7540_v17 = vsel %vm18719_vm3, %v7538_v7, %v7539_v57  ;;  %v7067_v33 = vmax.f32 %v6869_v49, 0.0 }
 0x6d5   : > { %v6584_v24 = vpop.f32.mrb[232].mxu1  ;;  %12032 = vmatmul.mubr.msk.bf16.gmra.mrb[68].mxu1 %vm18476_vm12, %v7540_v17  ;;  %vm18722_vm12 = vmmov %vm18719_vm3 }
 0x6d6   : > { %v15953_v11 = vpack.c.bf16 %v7067_v33, %v7066_v52  ;;  %v6585_v59 = vadd.f32 %v15759_v3, %v6584_v24  ;;  %v6586_v13 = vpop.f32.mrb[233].mxu1  ;;  %v15957_v42 = vsel %vm18721_vm6, %v7258_v50, %v7269_v48  ;;  %v7541_v52 = vor.u32 %v7539_v57, %v7264_v61  ;;  %v12289_v24 = vld [vmem:[%s17486_s5 + $0x1c8] sm:$0xff]  }
 0x6d7   : > { %v6587_v60 = vpop.f32.mrb[234].mxu1  ;;  %v18723_v13 = vld [vmem:[#allocation15_spill] sm:$0xff]  ;;  %7846 = vmatpush1.bf16.msra.mxu0 %v12289_v24 }
 0x6d8   : > { %v7272_v23 = vshrl.u32 %v15953_v11, 16  ;;  %v7275_v9 = vshll.u32 %v15953_v11, 16  ;;  %v6874_v62 = vadd.f32 %v15574_v37, %v6585_v59  ;;  %v6588_v34 = vadd.f32 %v15759_v3, %v6587_v60  ;;  %v6589_v43 = vpop.f32.mrb[235].mxu1  ;;  %7847 = vmatprep.subr.bf16.mxu0 %v18698_v56 }
 0x6d9   : > { %vm18724_vm5 = vnez %v18723_v13 }
 0x6da   : > { %v7274_v7 = vrot.slane %v7272_v23, 7  ;;  %v6877_v49 = vadd.f32 %v15578_v19, %v6588_v34  ;;  %v7542_v17 = vrot.slane %v7275_v9, 1  ;;  %v7068_v50 = vmax.f32 %v6874_v62, 0.0 }
 0x6dc   : > { %v7277_v33 = vor.u32 %v7275_v9, %v7274_v7  ;;  %v7069_v48 = vmax.f32 %v6877_v49, 0.0  ;;  %v7543_v0 = vsel %vm18722_vm12, %v7541_v52, %v7542_v17  ;;  %vm18729_vm12 = vmmov %vm18726_vm2 }
 0x6dd   : > { %v6592_v10 = vpop.f32.mrb[236].mxu1  ;;  %12035 = vmatprep.mubr.msk.bf16.mxu1 %vm18724_vm5, %v7543_v0 }
 0x6de   : > { %v15971_v37 = vpack.c.bf16 %v7069_v48, %v7068_v50  ;;  %v6593_v59 = vadd.f32 %v15759_v3, %v6592_v10  ;;  %v6594_v19 = vpop.f32.mrb[237].mxu1  ;;  %v15975_v61 = vsel %vm18725_vm13, %v7266_v1, %v7277_v33  ;;  %v7544_v50 = vor.u32 %v7542_v17, %v7272_v23  ;;  %v12290_v10 = vld [vmem:[%s17486_s5 + $0x1d0] sm:$0xff]   ;;  %vm18732_vm13 = vmmov %vm18721_vm6 }
 0x6df   : > { %v6595_v57 = vpop.f32.mrb[238].mxu1  ;;  %v18727_v19 = vld [vmem:[#allocation16_spill] sm:$0xff]  ;;  %7848 = vmatpush1.bf16.msra.mxu0 %v12290_v10 }
 0x6e0   : > { %v7280_v60 = vshrl.u32 %v15971_v37, 16  ;;  %v7283_v9 = vshll.u32 %v15971_v37, 16  ;;  %v6882_v62 = vadd.f32 %v15572_v58, %v6593_v59  ;;  %v6596_v34 = vadd.f32 %v15759_v3, %v6595_v57  ;;  %v6597_v43 = vpop.f32.mrb[239].mxu1  ;;  %7849 = vmatprep.subr.bf16.mxu0 %v18698_v56 }
 0x6e1   : > { %vm18728_vm3 = vnez %v18727_v19 }
 0x6e2   : > { %v7282_v49 = vrot.slane %v7280_v60, 7  ;;  %v7545_v52 = vrot.slane %v7283_v9, 1  ;;  %v6885_v48 = vadd.f32 %v15576_v31, %v6596_v34  ;;  %v7070_v1 = vmax.f32 %v6882_v62, 0.0 }
 0x6e4   : > { %v7285_v0 = vor.u32 %v7283_v9, %v7282_v49  ;;  %v7546_v33 = vsel %vm18726_vm2, %v7544_v50, %v7545_v52  ;;  %v7071_v24 = vmax.f32 %v6885_v48, 0.0 }
 0x6e5   : > { %v6600_v13 = vpop.f32.mrb[240].mxu1  ;;  %12036 = vmatmul.mubr.msk.bf16.gmra.mrb[72].mxu1 %vm18728_vm3, %v7546_v33 }
 0x6e6   : > { %v15989_v58 = vpack.c.bf16 %v7071_v24, %v7070_v1  ;;  %v6601_v59 = vadd.f32 %v15759_v3, %v6600_v13  ;;  %v6602_v23 = vpop.f32.mrb[241].mxu1  ;;  %v15993_v31 = vsel %vm18721_vm6, %v7274_v7, %v7285_v0  ;;  %v7547_v1 = vor.u32 %v7545_v52, %v7280_v60  ;;  %v12291_v13 = vld [vmem:[%s17486_s5 + $0x1d8] sm:$0xff]  }
 0x6e7   : > { %v6603_v17 = vpop.f32.mrb[242].mxu1  ;;  %v18730_v23 = vld [vmem:[#allocation17_spill] sm:$0xff]  ;;  %7850 = vmatpush1.bf16.msra.mxu0 %v12291_v13 }
 0x6e8   : > { %v7288_v57 = vshrl.u32 %v15989_v58, 16  ;;  %v7291_v9 = vshll.u32 %v15989_v58, 16  ;;  %v6890_v62 = vadd.f32 %v15590_v32, %v6601_v59  ;;  %v6604_v34 = vadd.f32 %v15759_v3, %v6603_v17  ;;  %v6605_v43 = vpop.f32.mrb[243].mxu1  ;;  %7851 = vmatprep.subr.bf16.mxu0 %v18698_v56 }
 0x6e9   : > { %vm18731_vm5 = vnez %v18730_v23 }
 0x6ea   : > { %v7290_v50 = vrot.slane %v7288_v57, 7  ;;  %v6893_v48 = vadd.f32 %v15594_v4, %v6604_v34  ;;  %v7548_v33 = vrot.slane %v7291_v9, 1  ;;  %v7072_v7 = vmax.f32 %v6890_v62, 0.0 }
 0x6ec   : > { %v7293_v24 = vor.u32 %v7291_v9, %v7290_v50  ;;  %v7073_v0 = vmax.f32 %v6893_v48, 0.0  ;;  %v7549_v10 = vsel %vm18729_vm12, %v7547_v1, %v7548_v33  ;;  %vm18735_vm12 = vmmov %vm18726_vm2 }
 0x6ed   : > { %v6608_v19 = vpop.f32.mrb[244].mxu1  ;;  %12039 = vmatprep.mubr.msk.bf16.mxu1 %vm18731_vm5, %v7549_v10 }
 0x6ee   : > { %v16007_v32 = vpack.c.bf16 %v7073_v0, %v7072_v7  ;;  %v6609_v59 = vadd.f32 %v15759_v3, %v6608_v19  ;;  %v6610_v4 = vpop.f32.mrb[245].mxu1  ;;  %v16011_v60 = vsel %vm18732_vm13, %v7282_v49, %v7293_v24  ;;  %v7550_v7 = vor.u32 %v7548_v33, %v7288_v57  ;;  %v12292_v19 = vld [vmem:[%s17486_s5 + $0x1e0] sm:$0xff]   ;;  %vm18738_vm13 = vmmov %vm18721_vm6 }
 0x6ef   : > { %v6611_v52 = vpop.f32.mrb[246].mxu1  ;;  %v18733_v4 = vld [vmem:[#allocation18_spill] sm:$0xff]  ;;  %7852 = vmatpush1.bf16.msra.mxu0 %v12292_v19 }
 0x6f0   : > { %v7296_v17 = vshrl.u32 %v16007_v32, 16  ;;  %v7299_v9 = vshll.u32 %v16007_v32, 16  ;;  %v6898_v62 = vadd.f32 %v15588_v53, %v6609_v59  ;;  %v6612_v34 = vadd.f32 %v15759_v3, %v6611_v52  ;;  %v6613_v43 = vpop.f32.mrb[247].mxu1  ;;  %7853 = vmatprep.subr.bf16.mxu0 %v18698_v56 }
 0x6f1   : > { %vm18734_vm3 = vnez %v18733_v4 }
 0x6f2   : > { %v7298_v48 = vrot.slane %v7296_v17, 7  ;;  %v7551_v1 = vrot.slane %v7299_v9, 1  ;;  %v6901_v0 = vadd.f32 %v15592_v20, %v6612_v34  ;;  %v7074_v49 = vmax.f32 %v6898_v62, 0.0 }
 0x6f4   : > { %v7301_v10 = vor.u32 %v7299_v9, %v7298_v48  ;;  %v7552_v24 = vsel %vm18726_vm2, %v7550_v7, %v7551_v1  ;;  %v7075_v13 = vmax.f32 %v6901_v0, 0.0 }
 0x6f5   : > { %v6616_v23 = vpop.f32.mrb[248].mxu1  ;;  %12040 = vmatmul.mubr.msk.bf16.gmra.mrb[76].mxu1 %vm18734_vm3, %v7552_v24 }
 0x6f6   : > { %v16025_v53 = vpack.c.bf16 %v7075_v13, %v7074_v49  ;;  %v6617_v59 = vadd.f32 %v15759_v3, %v6616_v23  ;;  %v6618_v57 = vpop.f32.mrb[249].mxu1  ;;  %v16029_v20 = vsel %vm18721_vm6, %v7290_v50, %v7301_v10  ;;  %v7553_v49 = vor.u32 %v7551_v1, %v7296_v17  ;;  %v12293_v23 = vld [vmem:[%s17486_s5 + $0x1e8] sm:$0xff]  }
 0x6f7   : > { %v6619_v33 = vpop.f32.mrb[250].mxu1  ;;  %v18736_v57 = vld [vmem:[#allocation19_spill] sm:$0xff]  ;;  %7854 = vmatpush1.bf16.msra.mxu0 %v12293_v23 }
 0x6f8   : > { %v7304_v52 = vshrl.u32 %v16025_v53, 16  ;;  %v7307_v9 = vshll.u32 %v16025_v53, 16  ;;  %v6906_v62 = vadd.f32 %v15606_v63, %v6617_v59  ;;  %v6620_v34 = vadd.f32 %v15759_v3, %v6619_v33  ;;  %v6621_v43 = vpop.f32.mrb[251].mxu1  ;;  %7855 = vmatprep.subr.bf16.mxu0 %v18698_v56 }
 0x6f9   : > { %vm18737_vm5 = vnez %v18736_v57 }
 0x6fa   : > { %v7306_v7 = vrot.slane %v7304_v52, 7  ;;  %v6909_v0 = vadd.f32 %v15610_v39, %v6620_v34  ;;  %v7554_v24 = vrot.slane %v7307_v9, 1  ;;  %v7076_v50 = vmax.f32 %v6906_v62, 0.0 }
 0x6fc   : > { %v7309_v13 = vor.u32 %v7307_v9, %v7306_v7  ;;  %v7077_v10 = vmax.f32 %v6909_v0, 0.0  ;;  %v7555_v19 = vsel %vm18735_vm12, %v7553_v49, %v7554_v24  ;;  %vm18741_vm12 = vmmov %vm18726_vm2 }
 0x6fd   : > { %v6624_v4 = vpop.f32.mrb[252].mxu1  ;;  %12043 = vmatprep.mubr.msk.bf16.mxu1 %vm18737_vm5, %v7555_v19 }
 0x6fe   : > { %v16043_v63 = vpack.c.bf16 %v7077_v10, %v7076_v50  ;;  %v6625_v59 = vadd.f32 %v15759_v3, %v6624_v4  ;;  %v6626_v39 = vpop.f32.mrb[253].mxu1  ;;  %v16047_v17 = vsel %vm18738_vm13, %v7298_v48, %v7309_v13  ;;  %v7556_v50 = vor.u32 %v7554_v24, %v7304_v52  ;;  %v12294_v4 = vld [vmem:[%s17486_s5 + $0x1f0] sm:$0xff]   ;;  %vm18744_vm13 = vmmov %vm18721_vm6 }
 0x6ff   : > { %v6627_v1 = vpop.f32.mrb[254].mxu1  ;;  %v18739_v39 = vld [vmem:[#allocation21_spill] sm:$0xff]  ;;  %7856 = vmatpush1.bf16.msra.mxu0 %v12294_v4 }
 0x700   : > { %v7312_v33 = vshrl.u32 %v16043_v63, 16  ;;  %v7315_v9 = vshll.u32 %v16043_v63, 16  ;;  %v6914_v62 = vadd.f32 %v15604_v8, %v6625_v59  ;;  %v6628_v34 = vadd.f32 %v15759_v3, %v6627_v1  ;;  %v6629_v43 = vpop.f32.mrb[255].mxu1  ;;  %7857 = vmatprep.subr.bf16.mxu0 %v18698_v56 }
 0x701   : > { %vm18740_vm3 = vnez %v18739_v39 }
 0x702   : > { %v7314_v0 = vrot.slane %v7312_v33, 7  ;;  %v7557_v49 = vrot.slane %v7315_v9, 1  ;;  %v6917_v10 = vadd.f32 %v15608_v12, %v6628_v34  ;;  %v7078_v48 = vmax.f32 %v6914_v62, 0.0 }
 0x704   : > { %v7317_v19 = vor.u32 %v7315_v9, %v7314_v0  ;;  %v7558_v13 = vsel %vm18726_vm2, %v7556_v50, %v7557_v49  ;;  %v7079_v23 = vmax.f32 %v6917_v10, 0.0  ;;  %v12295_v50 = vld [vmem:[%s17486_s5 + $0x1f8] sm:$0xff]  }
 0x705   : > { %v6632_v57 = vpop.f32.mrb[0].mxu1  ;;  %12044 = vmatmul.mubr.msk.bf16.gmra.mrb[80].mxu1 %vm18740_vm3, %v7558_v13  ;;  %7858 = vmatpush1.bf16.msra.mxu0 %v12295_v50 }
 0x706   : > { %v16061_v8 = vpack.c.bf16 %v7079_v23, %v7078_v48  ;;  %v6633_v59 = vadd.f32 %v15759_v3, %v6632_v57  ;;  %v6634_v52 = vpop.f32.mrb[1].mxu1  ;;  %v16065_v12 = vsel %vm18721_vm6, %v7306_v7, %v7317_v19  ;;  %v7559_v19 = vor.u32 %v7557_v49, %v7312_v33  ;;  %12003 = vmatprep.subr.bf16.mxu0 %v15635_v26  ;;  %v18742_v57 = vld [vmem:[#allocation22_spill] sm:$0xff] }
 0x707   : > { %v6635_v24 = vpop.f32.mrb[2].mxu1  ;;  %vm18743_vm5 = vnez %v18742_v57 }
 0x708   : > { %v7320_v1 = vshrl.u32 %v16061_v8, 16  ;;  %v7323_v9 = vshll.u32 %v16061_v8, 16  ;;  %v6922_v62 = vadd.f32 %v15622_v25, %v6633_v59  ;;  %v6636_v34 = vadd.f32 %v15759_v3, %v6635_v24  ;;  %v6637_v43 = vpop.f32.mrb[3].mxu1 }
 0x70a   : > { %v7322_v10 = vrot.slane %v7320_v1, 7  ;;  %v6925_v7 = vadd.f32 %v15626_v5, %v6636_v34  ;;  %v7560_v48 = vrot.slane %v7323_v9, 1  ;;  %v7080_v13 = vmax.f32 %v6922_v62, 0.0 }
 0x70c   : > { %v7325_v56 = vor.u32 %v7323_v9, %v7322_v10  ;;  %v7081_v23 = vmax.f32 %v6925_v7, 0.0  ;;  %v7561_v25 = vsel %vm18741_vm12, %v7559_v19, %v7560_v48  ;;  %v7562_v50 = vor.u32 %v7560_v48, %v7320_v1  ;;  %vm18747_vm12 = vmmov %vm18726_vm2 }
 0x70d   : > { %v6640_v4 = vpop.f32.mrb[4].mxu1  ;;  %12047 = vmatprep.mubr.msk.bf16.mxu1 %vm18743_vm5, %v7561_v25  ;;  %v18745_v25 = vld [vmem:[#allocation26_spill] sm:$0xff] }
 0x70e   : > { %v16080_v39 = vpack.c.bf16 %v7081_v23, %v7080_v13  ;;  %v6641_v59 = vadd.f32 %v15759_v3, %v6640_v4  ;;  %v6642_v52 = vpop.f32.mrb[5].mxu1  ;;  %v16084_v5 = vsel %vm18744_vm13, %v7314_v0, %v7325_v56  ;;  %vm18746_vm3 = vnez %v18745_v25  ;;  %vm18750_vm13 = vmmov %vm18721_vm6 }
 0x70f   : > { %v6643_v33 = vpop.f32.mrb[6].mxu1 }
 0x710   : > { %v7328_v26 = vshrl.u32 %v16080_v39, 16  ;;  %v7331_v49 = vshll.u32 %v16080_v39, 16  ;;  %v6930_v24 = vadd.f32 %v15620_v51, %v6641_v59  ;;  %v6644_v9 = vadd.f32 %v15759_v3, %v6643_v33  ;;  %v6645_v62 = vpop.f32.mrb[7].mxu1 }
 0x712   : > { %v7330_v34 = vrot.slane %v7328_v26, 7  ;;  %v7563_v43 = vrot.slane %v7331_v49, 1  ;;  %v6933_v7 = vadd.f32 %v15624_v14, %v6644_v9  ;;  %v7082_v13 = vmax.f32 %v6930_v24, 0.0 }
 0x714   : > { %v7333_v19 = vor.u32 %v7331_v49, %v7330_v34  ;;  %v7564_v0 = vsel %vm18726_vm2, %v7562_v50, %v7563_v43  ;;  %v7083_v56 = vmax.f32 %v6933_v7, 0.0  ;;  %v7565_v62 = vor.u32 %v7563_v43, %v7328_v26 }
 0x715   : > { %v6648_v23 = vpop.f32.mrb[8].mxu1  ;;  %12048 = vmatmul.mubr.msk.bf16.gmra.mrb[84].mxu1 %vm18746_vm3, %v7564_v0 }
 0x716   : > { %v16094_v4 = vpack.c.bf16 %v7083_v56, %v7082_v13  ;;  %v6649_v51 = vadd.f32 %v15759_v3, %v6648_v23  ;;  %v6650_v57 = vpop.f32.mrb[9].mxu1  ;;  %v16098_v59 = vsel %vm18721_vm6, %v7322_v10, %v7333_v19  ;;  %v18748_v56 = vld [vmem:[#allocation27_spill] sm:$0xff] }
 0x717   : > { %v6651_v1 = vpop.f32.mrb[10].mxu1  ;;  %vm18749_vm5 = vnez %v18748_v56 }
 0x718   : > { %v7336_v14 = vshrl.u32 %v16094_v4, 16  ;;  %v7339_v48 = vshll.u32 %v16094_v4, 16  ;;  %v6938_v52 = vadd.f32 %v15651_v15, %v6649_v51  ;;  %v6652_v33 = vadd.f32 %v15759_v3, %v6651_v1  ;;  %v6653_v49 = vpop.f32.mrb[11].mxu1 }
 0x71a   : > { %v7338_v24 = vrot.slane %v7336_v14, 7  ;;  %v6941_v9 = vadd.f32 %v15658_v36, %v6652_v33  ;;  %v7566_v50 = vrot.slane %v7339_v48, 1  ;;  %v7084_v13 = vmax.f32 %v6938_v52, 0.0 }
 0x71c   : > { %v7341_v7 = vor.u32 %v7339_v48, %v7338_v24  ;;  %v7085_v0 = vmax.f32 %v6941_v9, 0.0  ;;  %v7567_v10 = vsel %vm18747_vm12, %v7565_v62, %v7566_v50  ;;  %v7568_v49 = vor.u32 %v7566_v50, %v7336_v14  ;;  %vm18753_vm12 = vmmov %vm18726_vm2 }
 0x71d   : > { %v6656_v19 = vpop.f32.mrb[12].mxu1  ;;  %12051 = vmatprep.mubr.msk.bf16.mxu1 %vm18749_vm5, %v7567_v10  ;;  %v18751_v10 = vld [vmem:[#allocation32_spill] sm:$0xff] }
 0x71e   : > { %v16108_v23 = vpack.c.bf16 %v7085_v0, %v7084_v13  ;;  %v6657_v15 = vadd.f32 %v15759_v3, %v6656_v19  ;;  %v6658_v25 = vpop.f32.mrb[13].mxu1  ;;  %v16112_v51 = vsel %vm18750_vm13, %v7330_v34, %v7341_v7  ;;  %vm18752_vm3 = vnez %v18751_v10  ;;  %vm18756_vm13 = vmmov %vm18721_vm6 }
 0x71f   : > { %v6659_v36 = vpop.f32.mrb[14].mxu1 }
 0x720   : > { %v7344_v26 = vshrl.u32 %v16108_v23, 16  ;;  %v7347_v43 = vshll.u32 %v16108_v23, 16  ;;  %v6946_v57 = vadd.f32 %v15649_v41, %v6657_v15  ;;  %v6660_v1 = vadd.f32 %v15759_v3, %v6659_v36  ;;  %v6661_v48 = vpop.f32.mrb[15].mxu1 }
 0x722   : > { %v7346_v52 = vrot.slane %v7344_v26, 7  ;;  %v7569_v33 = vrot.slane %v7347_v43, 1  ;;  %v6949_v9 = vadd.f32 %v15653_v38, %v6660_v1  ;;  %v7086_v13 = vmax.f32 %v6946_v57, 0.0 }
 0x724   : > { %v7349_v62 = vor.u32 %v7347_v43, %v7346_v52  ;;  %v7570_v34 = vsel %vm18726_vm2, %v7568_v49, %v7569_v33  ;;  %v7087_v7 = vmax.f32 %v6949_v9, 0.0  ;;  %v7571_v48 = vor.u32 %v7569_v33, %v7344_v26 }
 0x725   : > { %v6664_v0 = vpop.f32.mrb[16].mxu1  ;;  %12052 = vmatmul.mubr.msk.bf16.gmra.mrb[88].mxu1 %vm18752_vm3, %v7570_v34 }
 0x726   : > { %v16122_v19 = vpack.c.bf16 %v7087_v7, %v7086_v13  ;;  %v6665_v41 = vadd.f32 %v15759_v3, %v6664_v0  ;;  %v6666_v56 = vpop.f32.mrb[17].mxu1  ;;  %v16126_v15 = vsel %vm18721_vm6, %v7338_v24, %v7349_v62  ;;  %v18754_v7 = vld [vmem:[#allocation33_spill] sm:$0xff] }
 0x727   : > { %v6667_v14 = vpop.f32.mrb[18].mxu1  ;;  %vm18755_vm5 = vnez %v18754_v7 }
 0x728   : > { %v7352_v38 = vshrl.u32 %v16122_v19, 16  ;;  %v7355_v50 = vshll.u32 %v16122_v19, 16  ;;  %v6954_v25 = vadd.f32 %v15679_v44, %v6665_v41  ;;  %v6668_v36 = vadd.f32 %v15759_v3, %v6667_v14  ;;  %v6669_v43 = vpop.f32.mrb[19].mxu1 }
 0x72a   : > { %v7354_v57 = vrot.slane %v7352_v38, 7  ;;  %v6957_v1 = vadd.f32 %v15686_v30, %v6668_v36  ;;  %v7572_v49 = vrot.slane %v7355_v50, 1  ;;  %v7088_v13 = vmax.f32 %v6954_v25, 0.0 }
 0x72c   : > { %v7357_v9 = vor.u32 %v7355_v50, %v7354_v57  ;;  %v7089_v34 = vmax.f32 %v6957_v1, 0.0  ;;  %v7573_v24 = vsel %vm18753_vm12, %v7571_v48, %v7572_v49  ;;  %v7574_v43 = vor.u32 %v7572_v49, %v7352_v38  ;;  %vm18761_vm12 = vmmov %vm18726_vm2 }
 0x72d   : > { %v6672_v62 = vpop.f32.mrb[20].mxu1  ;;  %12055 = vmatprep.mubr.msk.bf16.mxu1 %vm18755_vm5, %v7573_v24  ;;  %v18757_v24 = vld [vmem:[#allocation38_spill] sm:$0xff] }
 0x72e   : > { %v16136_v0 = vpack.c.bf16 %v7089_v34, %v7088_v13  ;;  %v6673_v44 = vadd.f32 %v15759_v3, %v6672_v62  ;;  %v6674_v10 = vpop.f32.mrb[21].mxu1  ;;  %v16140_v41 = vsel %vm18756_vm13, %v7346_v52, %v7357_v9  ;;  %vm18758_vm3 = vnez %v18757_v24  ;;  %v18762_v24 = vld [vmem:[#allocation39_spill] sm:$0xff]  ;;  %vm18765_vm13 = vmmov %vm18721_vm6 }
 0x72f   : > { %v6675_v30 = vpop.f32.mrb[22].mxu1  ;;  %v18759_v10 = vld [vmem:[#allocation89_spill] sm:$0xff]  ;;  %vm18763_vm5 = vnez %v18762_v24 }
 0x730   : > { %v7360_v26 = vshrl.u32 %v16136_v0, 16  ;;  %v7363_v33 = vshll.u32 %v16136_v0, 16  ;;  %v6962_v56 = vadd.f32 %v15677_v22, %v6673_v44  ;;  %v6676_v14 = vadd.f32 %v15759_v3, %v6675_v30  ;;  %v6677_v50 = vpop.f32.mrb[23].mxu1 }
 0x731   : > { %v18760_v50 = vld [vmem:[#allocation53_spill] sm:$0xff] }
 0x732   : > { %v7362_v25 = vrot.slane %v7360_v26, 7  ;;  %v7575_v36 = vrot.slane %v7363_v33, 1  ;;  %v6965_v1 = vadd.f32 %v15681_v40, %v6676_v14  ;;  %v7090_v13 = vmax.f32 %v6962_v56, 0.0 }
 0x734   : > { %v7365_v48 = vor.u32 %v7363_v33, %v7362_v25  ;;  %v7576_v52 = vsel %vm18726_vm2, %v7574_v43, %v7575_v36  ;;  %v7091_v9 = vmax.f32 %v6965_v1, 0.0  ;;  %v7577_v1 = vor.u32 %v7575_v36, %v7360_v26 }
 0x735   : > { %v6680_v34 = vpop.f32.mrb[24].mxu1  ;;  %12056 = vmatmul.mubr.msk.bf16.gmra.mrb[92].mxu1 %vm18758_vm3, %v7576_v52 }
 0x736   : > { %v16150_v62 = vpack.c.bf16 %v7091_v9, %v7090_v13  ;;  %v6681_v22 = vadd.f32 %v15759_v3, %v6680_v34  ;;  %v6682_v7 = vpop.f32.mrb[25].mxu1  ;;  %v16154_v44 = vsel %vm18721_vm6, %v7354_v57, %v7365_v48 }
 0x737   : > { %v6683_v38 = vpop.f32.mrb[26].mxu1 }
 0x738   : > { %v7368_v40 = vshrl.u32 %v16150_v62, 16  ;;  %v7371_v49 = vshll.u32 %v16150_v62, 16  ;;  %v6970_v30 = vadd.f32 %v18759_v10, %v6681_v22  ;;  %v6684_v33 = vadd.f32 %v15759_v3, %v6683_v38  ;;  %v6685_v56 = vpop.f32.mrb[27].mxu1 }
 0x739   : > { %v16176_v56 = vld [vmem:[%s17487_s6 + $0x1] ss:$0 sm:$0xff] }
 0x73a   : > { %v7370_v14 = vrot.slane %v7368_v40, 7  ;;  %v6973_v43 = vadd.f32 %v18760_v50, %v6684_v33  ;;  %v7578_v13 = vrot.slane %v7371_v49, 1  ;;  %v7092_v9 = vmax.f32 %v6970_v30, 0.0 }
 0x73c   : > { %v7373_v52 = vor.u32 %v7371_v49, %v7370_v14  ;;  %v7093_v34 = vmax.f32 %v6973_v43, 0.0  ;;  %v7579_v57 = vsel %vm18761_vm12, %v7577_v1, %v7578_v13  ;;  %v18767_v49 = vld [vmem:[#allocation54_spill] sm:$0xff]  ;;  %vm18775_vm12 = vmmov %vm18726_vm2 }
 0x73d   : > { %v6688_v48 = vpop.f32.mrb[28].mxu1  ;;  %12059 = vmatprep.mubr.msk.bf16.mxu1 %vm18763_vm5, %v7579_v57 }
 0x73e   : > { %v16164_v7 = vpack.c.bf16 %v7093_v34, %v7092_v9  ;;  %v6689_v22 = vadd.f32 %v15759_v3, %v6688_v48  ;;  %v6690_v38 = vpop.f32.mrb[29].mxu1  ;;  %v16168_v10 = vsel %vm18765_vm13, %v7362_v25, %v7373_v52  ;;  %v7580_v9 = vor.u32 %v7578_v13, %v7368_v40  ;;  %v18768_v25 = vld [vmem:[#allocation88_spill] sm:$0xff]  ;;  %vm18779_vm13 = vmmov %vm18721_vm6 }
 0x73f   : > { %18766 = vst [vmem:[#allocation12_spill] sm:$0xff] %v16168_v10  ;;  %v6691_v33 = vpop.f32.mrb[30].mxu1 }
 0x740   : > { %18764 = vst [vmem:[#allocation11_spill] sm:$0xff] %v16164_v7  ;;  %v7376_v26 = vshrl.u32 %v16164_v7, 16  ;;  %v7379_v36 = vshll.u32 %v16164_v7, 16  ;;  %v6978_v30 = vadd.f32 %v18767_v49, %v6689_v22  ;;  %v6692_v50 = vadd.f32 %v16176_v56, %v6691_v33  ;;  %v6693_v43 = vpop.f32.mrb[31].mxu1  ;;  %v18769_v22 = vld [vmem:[#allocation44_spill] sm:$0xff] }
 0x741   : > { %vm18770_vm3 = vnez %v18769_v22 }
 0x742   : > { %v7378_v3 = vrot.slane %v7376_v26, 7  ;;  %v7581_v1 = vrot.slane %v7379_v36, 1  ;;  %v6981_v52 = vadd.f32 %v18768_v25, %v6692_v50  ;;  %v7094_v57 = vmax.f32 %v6978_v30, 0.0  ;;  %v18773_v30 = vld [vmem:[#allocation61_spill] sm:$0xff] }
 0x744   : > { %v7381_v34 = vor.u32 %v7379_v36, %v7378_v3  ;;  %v7582_v48 = vsel %vm18726_vm2, %v7580_v9, %v7581_v1  ;;  %v7095_v24 = vmax.f32 %v6981_v52, 0.0 }
 0x745   : > { %v6696_v38 = vpop.f32.mrb[32].mxu1  ;;  %12060 = vmatmul.mubr.msk.bf16.gmra.mrb[96].mxu1 %vm18770_vm3, %v7582_v48  ;;  %v18774_v48 = vld [vmem:[#allocation93_spill] sm:$0xff] }
 0x746   : > { %v16183_v49 = vpack.c.bf16 %v7095_v24, %v7094_v57  ;;  %v6697_v7 = vadd.f32 %v16176_v56, %v6696_v38  ;;  %v6698_v33 = vpop.f32.mrb[33].mxu1  ;;  %v16187_v43 = vsel %vm18721_vm6, %v7370_v14, %v7381_v34  ;;  %v7583_v24 = vor.u32 %v7581_v1, %v7376_v26 }
 0x747   : > { %18772 = vst [vmem:[#allocation14_spill] sm:$0xff] %v16187_v43  ;;  %v6699_v40 = vpop.f32.mrb[34].mxu1  ;;  %v18776_v43 = vld [vmem:[#allocation45_spill] sm:$0xff] }
 0x748   : > { %18771 = vst [vmem:[#allocation13_spill] sm:$0xff] %v16183_v49  ;;  %v7384_v13 = vshrl.u32 %v16183_v49, 16  ;;  %v7387_v36 = vshll.u32 %v16183_v49, 16  ;;  %v6986_v50 = vadd.f32 %v18773_v30, %v6697_v7  ;;  %v6700_v9 = vadd.f32 %v16176_v56, %v6699_v40  ;;  %v6701_v25 = vpop.f32.mrb[35].mxu1 }
 0x749   : > { %vm18777_vm5 = vnez %v18776_v43 }
 0x74a   : > { %v7386_v52 = vrot.slane %v7384_v13, 7  ;;  %v6989_v57 = vadd.f32 %v18774_v48, %v6700_v9  ;;  %v7584_v22 = vrot.slane %v7387_v36, 1  ;;  %v7096_v33 = vmax.f32 %v6986_v50, 0.0 }
 0x74c   : > { %v7389_v38 = vor.u32 %v7387_v36, %v7386_v52  ;;  %v7097_v10 = vmax.f32 %v6989_v57, 0.0  ;;  %v7585_v14 = vsel %vm18775_vm12, %v7583_v24, %v7584_v22  ;;  %v18781_v36 = vld [vmem:[#allocation52_spill] sm:$0xff]  ;;  %vm18789_vm12 = vmmov %vm18726_vm2 }
 0x74d   : > { %v6704_v34 = vpop.f32.mrb[36].mxu1  ;;  %12063 = vmatprep.mubr.msk.bf16.mxu1 %vm18777_vm5, %v7585_v14  ;;  %v18782_v24 = vld [vmem:[#allocation92_spill] sm:$0xff]  ;;  %vm18792_vm5 = vmmov %vm18721_vm6 }
 0x74e   : > { %v16197_v49 = vpack.c.bf16 %v7097_v10, %v7096_v33  ;;  %v6705_v7 = vadd.f32 %v16176_v56, %v6704_v34  ;;  %v6706_v40 = vpop.f32.mrb[37].mxu1  ;;  %v16201_v30 = vsel %vm18779_vm13, %v7378_v3, %v7389_v38  ;;  %v7586_v10 = vor.u32 %v7584_v22, %v7384_v13 }
 0x74f   : > { %18780 = vst [vmem:[#allocation16_spill] sm:$0xff] %v16201_v30  ;;  %v6707_v9 = vpop.f32.mrb[38].mxu1  ;;  %v18783_v30 = vld [vmem:[#allocation50_spill] sm:$0xff] }
 0x750   : > { %18778 = vst [vmem:[#allocation15_spill] sm:$0xff] %v16197_v49  ;;  %v7392_v26 = vshrl.u32 %v16197_v49, 16  ;;  %v7395_v1 = vshll.u32 %v16197_v49, 16  ;;  %v6994_v50 = vadd.f32 %v18781_v36, %v6705_v7  ;;  %v6708_v25 = vadd.f32 %v16176_v56, %v6707_v9  ;;  %v6709_v48 = vpop.f32.mrb[39].mxu1 }
 0x751   : > { %vm18784_vm3 = vnez %v18783_v30 }
 0x752   : > { %v7394_v43 = vrot.slane %v7392_v26, 7  ;;  %v7587_v57 = vrot.slane %v7395_v1, 1  ;;  %v6997_v33 = vadd.f32 %v18782_v24, %v6708_v25  ;;  %v7098_v34 = vmax.f32 %v6994_v50, 0.0  ;;  %v18787_v50 = vld [vmem:[#allocation59_spill] sm:$0xff]  ;;  %v18788_v24 = vld [vmem:[#allocation36_spill] sm:$0xff] }
 0x754   : > { %v7397_v14 = vor.u32 %v7395_v1, %v7394_v43  ;;  %v7588_v3 = vsel %vm18726_vm2, %v7586_v10, %v7587_v57  ;;  %v7099_v38 = vmax.f32 %v6997_v33, 0.0 }
 0x755   : > { %v6712_v40 = vpop.f32.mrb[40].mxu1  ;;  %12064 = vmatmul.mubr.msk.bf16.gmra.mrb[100].mxu1 %vm18784_vm3, %v7588_v3 }
 0x756   : > { %v16211_v49 = vpack.c.bf16 %v7099_v38, %v7098_v34  ;;  %v6713_v7 = vadd.f32 %v16176_v56, %v6712_v40  ;;  %v6714_v9 = vpop.f32.mrb[41].mxu1  ;;  %v16215_v36 = vsel %vm18721_vm6, %v7386_v52, %v7397_v14  ;;  %v7589_v34 = vor.u32 %v7587_v57, %v7392_v26 }
 0x757   : > { %18786 = vst [vmem:[#allocation18_spill] sm:$0xff] %v16215_v36  ;;  %v6715_v13 = vpop.f32.mrb[42].mxu1 }
 0x758   : > { %18785 = vst [vmem:[#allocation17_spill] sm:$0xff] %v16211_v49  ;;  %v7400_v22 = vshrl.u32 %v16211_v49, 16  ;;  %v7403_v1 = vshll.u32 %v16211_v49, 16  ;;  %v7002_v25 = vadd.f32 %v18787_v50, %v6713_v7  ;;  %v6716_v48 = vadd.f32 %v16176_v56, %v6715_v13  ;;  %v6717_v10 = vpop.f32.mrb[43].mxu1 }
 0x75a   : > { %v7402_v30 = vrot.slane %v7400_v22, 7  ;;  %v7005_v33 = vadd.f32 %v18788_v24, %v6716_v48  ;;  %v7590_v3 = vrot.slane %v7403_v1, 1  ;;  %v7100_v40 = vmax.f32 %v7002_v25, 0.0 }
 0x75c   : > { %v7405_v38 = vor.u32 %v7403_v1, %v7402_v30  ;;  %v7101_v9 = vmax.f32 %v7005_v33, 0.0  ;;  %v7591_v52 = vsel %vm18789_vm12, %v7589_v34, %v7590_v3  ;;  %v18794_v1 = vld [vmem:[#allocation91_spill] sm:$0xff]  ;;  %v7592_v34 = vor.u32 %v7590_v3, %v7400_v22 }
 0x75d   : > { %v6720_v14 = vpop.f32.mrb[44].mxu1  ;;  %12067 = vmatprep.mubr.msk.bf16.mxu1 %vm18562_vm1, %v7591_v52  ;;  %vm18796_vm1 = vmmov %vm18726_vm2 }
 0x75e   : > { %v16225_v49 = vpack.c.bf16 %v7101_v9, %v7100_v40  ;;  %v6721_v7 = vadd.f32 %v16176_v56, %v6720_v14  ;;  %v6722_v13 = vpop.f32.mrb[45].mxu1  ;;  %v16229_v50 = vsel %vm18792_vm5, %v7394_v43, %v7405_v38  ;;  %v18795_v40 = vld [vmem:[#allocation28_spill] sm:$0xff]  ;;  %vm18800_vm2 = vmmov %vm18792_vm5 }
 0x75f   : > { %18793 = vst [vmem:[#allocation21_spill] sm:$0xff] %v16229_v50  ;;  %v6723_v48 = vpop.f32.mrb[46].mxu1  ;;  %v18797_v50 = vld [vmem:[#allocation56_spill] sm:$0xff]  ;;  %vm18804_vm3 = vmmov %vm18796_vm1 }
 0x760   : > { %18791 = vst [vmem:[#allocation19_spill] sm:$0xff] %v16225_v49  ;;  %v7408_v26 = vshrl.u32 %v16225_v49, 16  ;;  %v7411_v57 = vshll.u32 %v16225_v49, 16  ;;  %v7010_v25 = vadd.f32 %v18794_v1, %v6721_v7  ;;  %v6724_v10 = vadd.f32 %v16176_v56, %v6723_v48  ;;  %v6725_v24 = vpop.f32.mrb[47].mxu1  ;;  %vm18808_vm12 = vmmov %vm18800_vm2 }
 0x761   : > { %vm18798_vm13 = vnez %v18797_v50  ;;  %vm18812_vm5 = vmmov %vm18796_vm1 }
 0x762   : > { %v7410_v36 = vrot.slane %v7408_v26, 7  ;;  %v7593_v33 = vrot.slane %v7411_v57, 1  ;;  %v7013_v9 = vadd.f32 %v18795_v40, %v6724_v10  ;;  %v7102_v14 = vmax.f32 %v7010_v25, 0.0  ;;  %v18802_v25 = vld [vmem:[#allocation41_spill] sm:$0xff] }
 0x763   : > { %v18803_v40 = vld [vmem:[#allocation49_spill] sm:$0xff] }
 0x764   : > { %v7413_v52 = vor.u32 %v7411_v57, %v7410_v36  ;;  %v7594_v43 = vsel %vm18796_vm1, %v7592_v34, %v7593_v33  ;;  %v7103_v38 = vmax.f32 %v7013_v9, 0.0 }
 0x765   : > { %v6728_v13 = vpop.f32.mrb[48].mxu1  ;;  %12068 = vmatmul.mubr.msk.bf16.gmra.mrb[104].mxu1 %vm18798_vm13, %v7594_v43  ;;  %vm18816_vm13 = vmmov %vm18800_vm2 }
 0x766   : > { %v16239_v49 = vpack.c.bf16 %v7103_v38, %v7102_v14  ;;  %v6729_v7 = vadd.f32 %v16176_v56, %v6728_v13  ;;  %v6730_v48 = vpop.f32.mrb[49].mxu1  ;;  %v16243_v1 = vsel %vm18800_vm2, %v7402_v30, %v7413_v52  ;;  %v7595_v14 = vor.u32 %v7593_v33, %v7408_v26  ;;  %vm18818_vm2 = vmmov %vm18804_vm3 }
 0x767   : > { %18801 = vst [vmem:[#allocation26_spill] sm:$0xff] %v16243_v1  ;;  %v6731_v22 = vpop.f32.mrb[50].mxu1  ;;  %v18805_v1 = vld [vmem:[#allocation57_spill] sm:$0xff] }
 0x768   : > { %18799 = vst [vmem:[#allocation22_spill] sm:$0xff] %v16239_v49  ;;  %v7416_v3 = vshrl.u32 %v16239_v49, 16  ;;  %v7419_v57 = vshll.u32 %v16239_v49, 16  ;;  %v7018_v10 = vadd.f32 %v18802_v25, %v6729_v7  ;;  %v6732_v24 = vadd.f32 %v16176_v56, %v6731_v22  ;;  %v6733_v34 = vpop.f32.mrb[51].mxu1 }
 0x769   : > { %vm18806_vm6 = vnez %v18805_v1 }
 0x76a   : > { %v7418_v50 = vrot.slane %v7416_v3, 7  ;;  %v7021_v9 = vadd.f32 %v18803_v40, %v6732_v24  ;;  %v7596_v43 = vrot.slane %v7419_v57, 1  ;;  %v7104_v13 = vmax.f32 %v7018_v10, 0.0 }
 0x76c   : > { %v7421_v38 = vor.u32 %v7419_v57, %v7418_v50  ;;  %v7105_v48 = vmax.f32 %v7021_v9, 0.0  ;;  %v7597_v30 = vsel %vm18804_vm3, %v7595_v14, %v7596_v43  ;;  %v18810_v57 = vld [vmem:[#allocation58_spill] sm:$0xff]  ;;  %v7598_v14 = vor.u32 %v7596_v43, %v7416_v3 }
 0x76d   : > { %v6736_v52 = vpop.f32.mrb[52].mxu1  ;;  %12071 = vmatprep.mubr.msk.bf16.mxu1 %vm18806_vm6, %v7597_v30  ;;  %vm18821_vm6 = vmmov %vm18808_vm12 }
 0x76e   : > { %v16253_v49 = vpack.c.bf16 %v7105_v48, %v7104_v13  ;;  %v6737_v7 = vadd.f32 %v16176_v56, %v6736_v52  ;;  %v6738_v22 = vpop.f32.mrb[53].mxu1  ;;  %v16257_v25 = vsel %vm18808_vm12, %v7410_v36, %v7421_v38  ;;  %v18811_v13 = vld [vmem:[#allocation35_spill] sm:$0xff]  ;;  %vm18825_vm12 = vmmov %vm18818_vm2 }
 0x76f   : > { %18809 = vst [vmem:[#allocation32_spill] sm:$0xff] %v16257_v25  ;;  %v6739_v24 = vpop.f32.mrb[54].mxu1  ;;  %v18813_v25 = vld [vmem:[#allocation62_spill] sm:$0xff] }
 0x770   : > { %18807 = vst [vmem:[#allocation27_spill] sm:$0xff] %v16253_v49  ;;  %v7424_v26 = vshrl.u32 %v16253_v49, 16  ;;  %v7427_v33 = vshll.u32 %v16253_v49, 16  ;;  %v7026_v10 = vadd.f32 %v18810_v57, %v6737_v7  ;;  %v6740_v34 = vadd.f32 %v16176_v56, %v6739_v24  ;;  %v6741_v40 = vpop.f32.mrb[55].mxu1 }
 0x771   : > { %vm18814_vm1 = vnez %v18813_v25 }
 0x772   : > { %v7426_v1 = vrot.slane %v7424_v26, 7  ;;  %v7599_v9 = vrot.slane %v7427_v33, 1  ;;  %v7029_v48 = vadd.f32 %v18811_v13, %v6740_v34  ;;  %v7106_v52 = vmax.f32 %v7026_v10, 0.0  ;;  %v18817_v10 = vld [vmem:[#allocation48_spill] sm:$0xff] }
 0x774   : > { %v7429_v30 = vor.u32 %v7427_v33, %v7426_v1  ;;  %v7600_v36 = vsel %vm18812_vm5, %v7598_v14, %v7599_v9  ;;  %v7107_v38 = vmax.f32 %v7029_v48, 0.0  ;;  %v7601_v48 = vor.u32 %v7599_v9, %v7424_v26 }
 0x775   : > { %v6744_v22 = vpop.f32.mrb[56].mxu1  ;;  %12072 = vmatmul.mubr.msk.bf16.gmra.mrb[108].mxu1 %vm18814_vm1, %v7600_v36  ;;  %vm18828_vm1 = vmmov %vm18821_vm6 }
 0x776   : > { %v16267_v49 = vpack.c.bf16 %v7107_v38, %v7106_v52  ;;  %v6745_v7 = vadd.f32 %v16176_v56, %v6744_v22  ;;  %v6746_v24 = vpop.f32.mrb[57].mxu1  ;;  %v16271_v57 = vsel %vm18816_vm13, %v7418_v50, %v7429_v30  ;;  %vm18832_vm13 = vmmov %vm18818_vm2 }
 0x777   : > { %v6747_v3 = vpop.f32.mrb[58].mxu1  ;;  %v18819_v24 = vld [vmem:[#allocation63_spill] sm:$0xff] }
 0x778   : > { %18815 = vst [vmem:[#allocation33_spill] sm:$0xff] %v16267_v49  ;;  %v7432_v43 = vshrl.u32 %v16267_v49, 16  ;;  %v7435_v33 = vshll.u32 %v16267_v49, 16  ;;  %v7034_v34 = vadd.f32 %v18817_v10, %v6745_v7  ;;  %v6748_v40 = vadd.f32 %v16176_v56, %v6747_v3  ;;  %v6749_v14 = vpop.f32.mrb[59].mxu1 }
 0x779   : > { %vm18820_vm3 = vnez %v18819_v24 }
 0x77a   : > { %v7434_v25 = vrot.slane %v7432_v43, 7  ;;  %v7037_v13 = vadd.f32 %v15774_v16, %v6748_v40  ;;  %v7602_v52 = vrot.slane %v7435_v33, 1  ;;  %v7108_v38 = vmax.f32 %v7034_v34, 0.0 }
 0x77c   : > { %v7437_v36 = vor.u32 %v7435_v33, %v7434_v25  ;;  %v7109_v22 = vmax.f32 %v7037_v13, 0.0  ;;  %v7603_v50 = vsel %vm18818_vm2, %v7601_v48, %v7602_v52  ;;  %v18823_v33 = vld [vmem:[#allocation34_spill] sm:$0xff] }
 0x77d   : > { %v6752_v30 = vpop.f32.mrb[60].mxu1  ;;  %12075 = vmatprep.mubr.msk.bf16.mxu1 %vm18820_vm3, %v7603_v50 }
 0x77e   : > { %v16281_v49 = vpack.c.bf16 %v7109_v22, %v7108_v38  ;;  %v6753_v7 = vadd.f32 %v16176_v56, %v6752_v30  ;;  %v6754_v3 = vpop.f32.mrb[61].mxu1  ;;  %v16285_v10 = vsel %vm18821_vm6, %v7426_v1, %v7437_v36  ;;  %v7604_v38 = vor.u32 %v7602_v52, %v7432_v43  ;;  %v18824_v22 = vld [vmem:[#allocation42_spill] sm:$0xff] }
 0x77f   : > { %18822 = vst [vmem:[#allocation38_spill] sm:$0xff] %v16285_v10  ;;  %v6755_v16 = vpop.f32.mrb[62].mxu1  ;;  %v18826_v3 = vld [vmem:[#allocation66_spill] sm:$0xff] }
 0x780   : > { %v7440_v26 = vshrl.u32 %v16281_v49, 16  ;;  %v7443_v9 = vshll.u32 %v16281_v49, 16  ;;  %v7042_v34 = vadd.f32 %v18823_v33, %v6753_v7  ;;  %v6756_v40 = vadd.f32 %v16176_v56, %v6755_v16  ;;  %v6757_v14 = vpop.f32.mrb[63].mxu1  ;;  %v18829_v43 = vld [vmem:[#allocation46_spill] sm:$0xff] }
 0x781   : > { %vm18827_vm5 = vnez %v18826_v3  ;;  %v18830_v52 = vshll.u32 %v18829_v43, 16  ;;  %v12309_v43 = vld [vmem:[%s17486_s5 + $0x210] sm:$0xff]  }
 0x782   : > { %v7442_v13 = vrot.slane %v7440_v26, 7  ;;  %v7605_v48 = vrot.slane %v7443_v9, 1  ;;  %v7045_v50 = vadd.f32 %v18824_v22, %v6756_v40  ;;  %v7110_v24 = vmax.f32 %v7042_v34, 0.0 }
 0x784   : > { %v7445_v30 = vor.u32 %v7443_v9, %v7442_v13  ;;  %v7606_v1 = vsel %vm18825_vm12, %v7604_v38, %v7605_v48  ;;  %v7111_v36 = vmax.f32 %v7045_v50, 0.0  ;;  %v7206_v9 = vor.u32 %v18830_v52, %v15810_v54  ;;  %v12307_v54 = vld [vmem:[%s17486_s5 + $0x200] sm:$0xff]   ;;  %v12313_v38 = vld [vmem:[%s17486_s5 + $0x230] sm:$0xff]  }
 0x785   : > { %12076 = vmatmul.mubr.msk.bf16.gmra.mrb[112].mxu1 %vm18827_vm5, %v7606_v1  ;;  %v7607_v34 = vor.u32 %v7605_v48, %v7440_v26  ;;  %v18836_v26 = vld [vmem:[#allocation47_spill] sm:$0xff]  ;;  %v18842_v52 = vld [vmem:[#allocation68_spill] sm:$0xff] }
 0x786   : > { %v16295_v10 = vpack.c.bf16 %v7111_v36, %v7110_v24  ;;  %v16298_v7 = vsel %vm18828_vm1, %v7434_v25, %v7445_v30  ;;  %v18834_v30 = vld [vmem:[#allocation67_spill] sm:$0xff] }
 0x787   : > { %vm18835_vm2 = vnez %v18834_v30  ;;  %v18838_v36 = vld [vmem:[#allocation55_spill] sm:$0xff]  ;;  %v18848_v30 = vld [vmem:[#allocation100_spill] sm:$0xff] }
 0x788   : > { %v7196_v56 = vshrl.u32 %v16295_v10, 16  ;;  %v7447_v16 = vshll.u32 %v16295_v10, 16 }
 0x78a   : > { %v7198_v33 = vrot.slane %v7196_v56, 7  ;;  %v7608_v40 = vrot.slane %v7447_v16, 1 }
 0x78c   : > { %v7449_v14 = vor.u32 %v7447_v16, %v7198_v33  ;;  %v7483_v22 = vsel %vm18597_vm4, %v7198_v33, %v7206_v9  ;;  %v7609_v50 = vsel %vm18832_vm13, %v7607_v34, %v7608_v40  ;;  %v7610_v24 = vor.u32 %v7608_v40, %v7196_v56  ;;  %vm18839_vm4 = vmmov %vm18828_vm1  ;;  %v18840_v56 = vld [vmem:[#allocation70_spill] sm:$0xff] }
 0x78d   : > { %11237 = vmatmul.mubr.msk.bf16.vlgmr.msra.gmra.mrb[64].mxu0 %vm18350_vm0, %v7483_v22  ;;  %12079 = vmatprep.mubr.msk.bf16.mxu1 %vm18835_vm2, %v7609_v50  ;;  %vm18841_vm3 = vnez %v18840_v56  ;;  %v12308_v16 = vld [vmem:[%s17486_s5 + $0x208] sm:$0xff]   ;;  %v18846_v22 = vld [vmem:[#allocation72_spill] sm:$0xff]  ;;  %v18853_v56 = vld [vmem:[#allocation75_spill] sm:$0xff] }
 0x78e   : > { %12004 = vmatpush3.bf16.msra.mxu0 %v12307_v54  ;;  %v7644_v1 = vsel %vm13595_vm8, %v7610_v24, %v18836_v26  ;;  %7867 = vmatprep.mubr.bf16.mxu0 %v18838_v36  ;;  %v16320_v3 = vsel %vm18839_vm4, %v7442_v13, %v7449_v14  ;;  %vm18843_vm8 = vnez %v18842_v52  ;;  %v12310_v13 = vld [vmem:[%s17486_s5 + $0x218] sm:$0xff]   ;;  %v12312_v14 = vld [vmem:[%s17486_s5 + $0x228] sm:$0xff]   ;;  %vm18847_vm6 = vnez %v18846_v22 }
 0x78f   : > { %12080 = vmatmul.mubr.msk.bf16.gmra.mrb[116].mxu1 %vm18841_vm3, %v7644_v1  ;;  %12005 = vmatprep.subr.bf16.mxu0 %v12308_v16  ;;  %v18849_v54 = vld [vmem:[#allocation73_spill] sm:$0xff]  ;;  %vm18854_vm5 = vnez %v18853_v56 }
 0x790   : > { %vm18850_vm12 = vnez %v18849_v54  ;;  %v18873_v54 = vld [vmem:[#allocation24_spill] sm:$0xff] }
 0x792   : > { %12006 = vmatpush3.bf16.msra.mxu0 %v12308_v16  ;;  %v18855_v16 = vld [vmem:[#allocation76_spill] sm:$0xff] }
 0x793   : > { %12007 = vmatprep.subr.bf16.mxu0 %v12309_v43  ;;  %vm18856_vm1 = vnez %v18855_v16  ;;  %v18881_v16 = vld [vmem:[#allocation29_spill] sm:$0xff] }
 0x795   : > { %11239 = vmatmul.mubr.msk.bf16.gmra.mrb[68].mxu0 %vm18843_vm8, %v15822_v35  ;;  %v12311_v35 = vld [vmem:[%s17486_s5 + $0x220] sm:$0xff]  }
 0x796   : > { %7875 = vmatprep.mubr.bf16.mxu0 %v15824_v27  ;;  %12008 = vmatpush3.bf16.msra.mxu0 %v12309_v43  ;;  %v18844_v27 = vld [vmem:[#allocation71_spill] sm:$0xff] }
 0x797   : > { %12009 = vmatprep.subr.bf16.mxu0 %v12310_v13  ;;  %vm18845_vm0 = vnez %v18844_v27  ;;  %v18861_v27 = vld [vmem:[#allocation79_spill] sm:$0xff] }
 0x798   : > { %v16337_v9 = vpop.f32.mrb[64].mxu1  ;;  %vm18862_vm2 = vnez %v18861_v27 }
 0x799   : > { %v16339_v33 = vpop.f32.mrb[65].mxu1 }
 0x79a   : > { %v16341_v34 = vpop.f32.mrb[66].mxu1  ;;  %12010 = vmatpush3.bf16.msra.mxu0 %v12310_v13  ;;  %v18857_v13 = vld [vmem:[#allocation77_spill] sm:$0xff] }
 0x79b   : > { %v16343_v40 = vpop.f32.mrb[67].mxu1  ;;  %12011 = vmatprep.subr.bf16.mxu0 %v12311_v35 }
 0x79d   : > { %11241 = vmatmul.mubr.msk.bf16.gmra.mrb[72].mxu0 %vm18845_vm0, %v15844_v29  ;;  %v12314_v29 = vld [vmem:[%s17486_s5 + $0x238] sm:$0xff]  }
 0x79e   : > { %7883 = vmatprep.mubr.bf16.mxu0 %v15846_v47  ;;  %12012 = vmatpush3.bf16.msra.mxu0 %v12311_v35 }
 0x79f   : > { %12013 = vmatprep.subr.bf16.mxu0 %v12312_v14 }
 0x7a2   : > { %12014 = vmatpush3.bf16.msra.mxu0 %v12312_v14 }
 0x7a3   : > { %12015 = vmatprep.subr.bf16.mxu0 %v12313_v38 }
 0x7a5   : > { %11243 = vmatmul.mubr.msk.bf16.gmra.mrb[76].mxu0 %vm18847_vm6, %v15867_v46  ;;  %v18877_v46 = vld [vmem:[#allocation31_spill] sm:$0xff] }
 0x7a6   : > { %7891 = vmatprep.mubr.bf16.mxu0 %v15863_v28  ;;  %12016 = vmatpush3.bf16.msra.mxu0 %v12313_v38  ;;  %v18851_v28 = vld [vmem:[#allocation99_spill] sm:$0xff]  ;;  %v18865_v38 = vld [vmem:[#allocation81_spill] sm:$0xff] }
 0x7a7   : > { %12017 = vmatprep.subr.bf16.mxu0 %v12314_v29  ;;  %vm18866_vm3 = vnez %v18865_v38 }
 0x7a8   : > { %v16365_v47 = vpop.f32.mrb[68].mxu1 }
 0x7a9   : > { %v16367_v50 = vpop.f32.mrb[69].mxu1 }
 0x7aa   : > { %v16369_v24 = vpop.f32.mrb[70].mxu1  ;;  %12018 = vmatpush3.bf16.msra.mxu0 %v12314_v29  ;;  %v18869_v29 = vld [vmem:[#allocation83_spill] sm:$0xff] }
 0x7ab   : > { %v16371_v25 = vpop.f32.mrb[71].mxu1  ;;  %vm18870_vm0 = vnez %v18869_v29  ;;  %v18892_v29 = vld [vmem:[#allocation15_spill] sm:$0xff] }
 0x7ad   : > { %11245 = vmatmul.mubr.msk.bf16.gmra.mrb[80].mxu0 %vm18850_vm12, %v18848_v30  ;;  %vm18874_vm12 = vnez %v18873_v54 }
 0x7ae   : > { %7899 = vmatprep.mubr.bf16.mxu0 %v18851_v28 }
 0x7b5   : > { %11247 = vmatmul.mubr.msk.bf16.gmra.mrb[84].mxu0 %vm18614_vm15, %v15903_v18  ;;  %vm18858_vm15 = vnez %v18857_v13 }
 0x7b6   : > { %7907 = vmatprep.mubr.bf16.mxu0 %v15899_v21 }
 0x7b8   : > { %v16381_v26 = vpop.f32.mrb[72].mxu1 }
 0x7b9   : > { %v16383_v48 = vpop.f32.mrb[73].mxu1 }
 0x7ba   : > { %v16385_v1 = vpop.f32.mrb[74].mxu1 }
 0x7bb   : > { %v16387_v36 = vpop.f32.mrb[75].mxu1 }
 0x7bd   : > { %11249 = vmatmul.mubr.msk.bf16.gmra.mrb[88].mxu0 %vm18854_vm5, %v15921_v6 }
 0x7be   : > { %7915 = vmatprep.mubr.bf16.mxu0 %v15917_v45  ;;  %v18859_v45 = vld [vmem:[#allocation78_spill] sm:$0xff] }
 0x7bf   : > { %vm18860_vm13 = vnez %v18859_v45 }
 0x7c5   : > { %11251 = vmatmul.mubr.msk.bf16.gmra.mrb[92].mxu0 %vm18856_vm1, %v15939_v2  ;;  %vm18878_vm1 = vnez %v18877_v46 }
 0x7c6   : > { %7923 = vmatprep.mubr.bf16.mxu0 %v15935_v55 }
 0x7c8   : > { %v16397_v21 = vpop.f32.mrb[76].mxu1 }
 0x7c9   : > { %v16399_v18 = vpop.f32.mrb[77].mxu1 }
 0x7ca   : > { %v16401_v43 = vpop.f32.mrb[78].mxu1 }
 0x7cb   : > { %v16403_v52 = vpop.f32.mrb[79].mxu1 }
 0x7cd   : > { %11253 = vmatmul.mubr.msk.bf16.gmra.mrb[96].mxu0 %vm18858_vm15, %v15957_v42 }
 0x7ce   : > { %7931 = vmatprep.mubr.bf16.mxu0 %v15953_v11  ;;  %v18863_v11 = vld [vmem:[#allocation80_spill] sm:$0xff] }
 0x7cf   : > { %vm18864_vm4 = vnez %v18863_v11  ;;  %v18886_v11 = vld [vmem:[#allocation14_spill] sm:$0xff] }
 0x7d5   : > { %11255 = vmatmul.mubr.msk.bf16.gmra.mrb[100].mxu0 %vm18860_vm13, %v15975_v61  ;;  %vm18882_vm13 = vnez %v18881_v16 }
 0x7d6   : > { %7939 = vmatprep.mubr.bf16.mxu0 %v15971_v37 }
 0x7d8   : > { %v16413_v6 = vpop.f32.mrb[80].mxu1 }
 0x7d9   : > { %v16415_v55 = vpop.f32.mrb[81].mxu1 }
 0x7da   : > { %v16417_v2 = vpop.f32.mrb[82].mxu1 }
 0x7db   : > { %v16419_v35 = vpop.f32.mrb[83].mxu1 }
 0x7dd   : > { %11257 = vmatmul.mubr.msk.bf16.gmra.mrb[104].mxu0 %vm18862_vm2, %v15993_v31 }
 0x7de   : > { %7947 = vmatprep.mubr.bf16.mxu0 %v15989_v58  ;;  %v18867_v58 = vld [vmem:[#allocation82_spill] sm:$0xff] }
 0x7df   : > { %vm18868_vm8 = vnez %v18867_v58  ;;  %v18890_v58 = vld [vmem:[#allocation43_spill] sm:$0xff] }
 0x7e0   : > { %vm18891_vm2 = vnez %v18890_v58 }
 0x7e5   : > { %11259 = vmatmul.mubr.msk.bf16.gmra.mrb[108].mxu0 %vm18864_vm4, %v16011_v60 }
 0x7e6   : > { %7955 = vmatprep.mubr.bf16.mxu0 %v16007_v32 }
 0x7e8   : > { %v16429_v42 = vpop.f32.mrb[84].mxu1 }
 0x7e9   : > { %v16431_v37 = vpop.f32.mrb[85].mxu1 }
 0x7ea   : > { %v16433_v61 = vpop.f32.mrb[86].mxu1 }
 0x7eb   : > { %v16435_v14 = vpop.f32.mrb[87].mxu1 }
 0x7ed   : > { %11261 = vmatmul.mubr.msk.bf16.gmra.mrb[112].mxu0 %vm18866_vm3, %v16029_v20 }
 0x7ee   : > { %7963 = vmatprep.mubr.bf16.mxu0 %v16025_v53  ;;  %v18871_v53 = vld [vmem:[#allocation20_spill] sm:$0xff] }
 0x7ef   : > { %vm18872_vm6 = vnez %v18871_v53 }
 0x7f5   : > { %11263 = vmatmul.mubr.msk.bf16.gmra.mrb[116].mxu0 %vm18868_vm8, %v16047_v17 }
 0x7f6   : > { %7971 = vmatprep.mubr.bf16.mxu0 %v16043_v63 }
 0x7f8   : > { %v16445_v31 = vpop.f32.mrb[88].mxu1 }
 0x7f9   : > { %v16447_v32 = vpop.f32.mrb[89].mxu1 }
 0x7fa   : > { %v16449_v60 = vpop.f32.mrb[90].mxu1 }
 0x7fb   : > { %v16451_v22 = vpop.f32.mrb[91].mxu1 }
 0x7fd   : > { %11265 = vmatmul.mubr.msk.bf16.gmra.mrb[120].mxu0 %vm18870_vm0, %v16065_v12 }
 0x7fe   : > { %7979 = vmatprep.mubr.bf16.mxu0 %v16061_v8  ;;  %v18875_v8 = vld [vmem:[#allocation25_spill] sm:$0xff] }
 0x7ff   : > { %vm18876_vm5 = vnez %v18875_v8 }
 0x805   : > { %11267 = vmatmul.mubr.msk.bf16.gmra.mrb[124].mxu0 %vm18872_vm6, %v16084_v5  ;;  %vm10015_vm6 = vcmask 130112  }
 0x806   : > { %7987 = vmatprep.mubr.bf16.mxu0 %v16080_v39 }
 0x808   : > { %v16461_v20 = vpop.f32.mrb[92].mxu1 }
 0x809   : > { %v16463_v63 = vpop.f32.mrb[93].mxu1 }
 0x80a   : > { %v16465_v17 = vpop.f32.mrb[94].mxu1 }
 0x80b   : > { %v16467_v30 = vpop.f32.mrb[95].mxu1 }
 0x80d   : > { %11269 = vmatmul.mubr.msk.bf16.gmra.mrb[128].mxu0 %vm18874_vm12, %v16098_v59  ;;  %vm10296_vm12 = vcmask 1041409  }
 0x80e   : > { %7995 = vmatprep.mubr.bf16.mxu0 %v16094_v4  ;;  %v18879_v4 = vld [vmem:[#allocation23_spill] sm:$0xff] }
 0x80f   : > { %vm18880_vm15 = vnez %v18879_v4  ;;  %v18894_v4 = vld [vmem:[#allocation18_spill] sm:$0xff] }
 0x815   : > { %11271 = vmatmul.mubr.msk.bf16.gmra.mrb[132].mxu0 %vm18876_vm5, %v16112_v51  ;;  %vm10298_vm5 = vcmask 1042434  }
 0x816   : > { %8003 = vmatprep.mubr.bf16.mxu0 %v16108_v23 }
 0x818   : > { %v16477_v12 = vpop.f32.mrb[96].mxu1 }
 0x819   : > { %v16479_v39 = vpop.f32.mrb[97].mxu1 }
 0x81a   : > { %v16481_v5 = vpop.f32.mrb[98].mxu1 }
 0x81b   : > { %v16483_v28 = vpop.f32.mrb[99].mxu1 }
 0x81d   : > { %11273 = vmatmul.mubr.msk.bf16.gmra.mrb[136].mxu0 %vm18878_vm1, %v16126_v15  ;;  %v18897_v15 = vld [vmem:[#allocation21_spill] sm:$0xff]  ;;  %vm10300_vm1 = vcmask 1043459  }
 0x81e   : > { %8011 = vmatprep.mubr.bf16.mxu0 %v16122_v19  ;;  %v18883_v19 = vld [vmem:[#allocation12_spill] sm:$0xff] }
 0x825   : > { %11275 = vmatmul.mubr.msk.bf16.gmra.mrb[140].mxu0 %vm18880_vm15, %v16140_v41  ;;  %v18885_v41 = vld [vmem:[#allocation11_spill] sm:$0xff]  ;;  %vm10302_vm15 = vcmask 1044484  }
 0x826   : > { %8019 = vmatprep.mubr.bf16.mxu0 %v16136_v0 }
 0x828   : > { %v16493_v59 = vpop.f32.mrb[100].mxu1 }
 0x829   : > { %v16495_v23 = vpop.f32.mrb[101].mxu1 }
 0x82a   : > { %v16497_v51 = vpop.f32.mrb[102].mxu1 }
 0x82b   : > { %v16499_v56 = vpop.f32.mrb[103].mxu1 }
 0x82d   : > { %11277 = vmatmul.mubr.msk.bf16.gmra.mrb[144].mxu0 %vm18882_vm13, %v16154_v44  ;;  %v18888_v44 = vld [vmem:[#allocation13_spill] sm:$0xff]  ;;  %vm10304_vm13 = vcmask 1045509  }
 0x82e   : > { %8027 = vmatprep.mubr.bf16.mxu0 %v16150_v62  ;;  %v18889_v62 = vld [vmem:[#allocation16_spill] sm:$0xff] }
 0x835   : > { %11279 = vmatmul.mubr.msk.bf16.gmra.mrb[148].mxu0 %vm18653_vm14, %v18883_v19  ;;  %v18896_v19 = vld [vmem:[#allocation17_spill] sm:$0xff] }
 0x836   : > { %8035 = vmatprep.mubr.bf16.mxu0 %v18885_v41  ;;  %v18898_v41 = vld [vmem:[#allocation84_spill] sm:$0xff] }
 0x838   : > { %v16509_v0 = vpop.f32.mrb[104].mxu1 }
 0x839   : > { %v16511_v13 = vpop.f32.mrb[105].mxu1 }
 0x83a   : > { %v16513_v45 = vpop.f32.mrb[106].mxu1 }
 0x83b   : > { %v16515_v27 = vpop.f32.mrb[107].mxu1 }
 0x83d   : > { %11281 = vmatmul.mubr.msk.bf16.gmra.mrb[152].mxu0 %vm18661_vm11, %v18886_v11  ;;  %vm18899_vm11 = vnez %v18898_v41  ;;  %v18900_v11 = vld [vmem:[#allocation19_spill] sm:$0xff] }
 0x83e   : > { %8043 = vmatprep.mubr.bf16.mxu0 %v18888_v44 }
 0x845   : > { %11283 = vmatmul.mubr.msk.bf16.gmra.mrb[156].mxu0 %vm18891_vm2, %v18889_v62  ;;  %vm10306_vm2 = vcmask 1046534  }
 0x846   : > { %8051 = vmatprep.mubr.bf16.mxu0 %v18892_v29  ;;  %v18905_v29 = vld [vmem:[#allocation26_spill] sm:$0xff] }
 0x848   : > { %v16525_v53 = vpop.f32.mrb[108].mxu1 }
 0x849   : > { %v16527_v54 = vpop.f32.mrb[109].mxu1 }
 0x84a   : > { %v16529_v8 = vpop.f32.mrb[110].mxu1 }
 0x84b   : > { %18893 = vst [vmem:[#allocation89_spill] sm:$0xff] %v16529_v8  ;;  %v16531_v46 = vpop.f32.mrb[111].mxu1  ;;  %v18906_v8 = vld [vmem:[#allocation87_spill] sm:$0xff] }
 0x84c   : > { %vm18907_vm14 = vnez %v18906_v8 }
 0x84d   : > { %11285 = vmatmul.mubr.msk.bf16.gmra.mrb[160].mxu0 %vm18426_vm7, %v18894_v4  ;;  %v18908_v4 = vld [vmem:[#allocation22_spill] sm:$0xff] }
 0x84e   : > { %8059 = vmatprep.mubr.bf16.mxu0 %v18896_v19 }
 0x855   : > { %11287 = vmatmul.mubr.msk.bf16.gmra.mrb[164].mxu0 %vm18899_vm11, %v18897_v15  ;;  %vm10308_vm11 = vcmask 1047559  }
 0x856   : > { %8067 = vmatprep.mubr.bf16.mxu0 %v18900_v11 }
 0x858   : > { %v16541_v38 = vpop.f32.mrb[112].mxu1 }
 0x859   : > { %18901 = vst [vmem:[#allocation53_spill] sm:$0xff] %v16541_v38  ;;  %v16543_v44 = vpop.f32.mrb[113].mxu1 }
 0x85a   : > { %18902 = vst [vmem:[#allocation39_spill] sm:$0xff] %v16543_v44  ;;  %v16545_v62 = vpop.f32.mrb[114].mxu1 }
 0x85b   : > { %18903 = vst [vmem:[#allocation54_spill] sm:$0xff] %v16545_v62  ;;  %v16547_v58 = vpop.f32.mrb[115].mxu1  ;;  %v18914_v62 = vld [vmem:[#allocation32_spill] sm:$0xff] }
 0x85c   : > { %18904 = vst [vmem:[#allocation88_spill] sm:$0xff] %v16547_v58  ;;  %v18915_v58 = vld [vmem:[#allocation90_spill] sm:$0xff] }
 0x85d   : > { %11289 = vmatmul.mubr.msk.bf16.gmra.mrb[168].mxu0 %vm18907_vm14, %v18905_v29  ;;  %vm18916_vm7 = vnez %v18915_v58  ;;  %v18918_v29 = vld [vmem:[#allocation27_spill] sm:$0xff]  ;;  %vm10335_vm14 = vcmask 130048  }
 0x85e   : > { %8075 = vmatprep.mubr.bf16.mxu0 %v18908_v4 }
 0x860   : > { %v16553_v16 = vpop.f32.mrb[64].mxu0 }
 0x861   : > { %18909 = vst [vmem:[#allocation44_spill] sm:$0xff] %v16553_v16  ;;  %v7863_v19 = vpop.f32.mrb[65].mxu0 }
 0x862   : > { %v16555_v15 = vpop.f32.mrb[66].mxu0  ;;  %v16557_v41 = vpop.f32.mrb[116].mxu1 }
 0x863   : > { %18910 = vst [vmem:[#allocation61_spill] sm:$0xff] %v16555_v15  ;;  %18911 = vst [vmem:[#allocation93_spill] sm:$0xff] %v16557_v41  ;;  %v7866_v11 = vpop.f32.mrb[67].mxu0  ;;  %v16559_v38 = vpop.f32.mrb[117].mxu1  ;;  %v18922_v41 = vld [vmem:[#allocation33_spill] sm:$0xff] }
 0x864   : > { %18912 = vst [vmem:[#allocation45_spill] sm:$0xff] %v16559_v38  ;;  %v16561_v44 = vpop.f32.mrb[118].mxu1  ;;  %v18920_v11 = vld [vmem:[#allocation60_spill] sm:$0xff]  ;;  %v18925_v38 = vld [vmem:[#allocation38_spill] sm:$0xff] }
 0x865   : > { %18913 = vst [vmem:[#allocation52_spill] sm:$0xff] %v16561_v44  ;;  %11291 = vmatmul.mubr.msk.bf16.gmra.mrb[172].mxu0 %vm18916_vm7, %v18914_v62  ;;  %v16566_v8 = vpop.f32.mrb[119].mxu1  ;;  %vm18921_vm4 = vnez %v18920_v11  ;;  %vm10370_vm7 = vcmask 7168  }
 0x866   : > { %18917 = vst [vmem:[#allocation92_spill] sm:$0xff] %v16566_v8  ;;  %8083 = vmatprep.mubr.bf16.mxu0 %v18918_v29  ;;  %v18926_v29 = vld [vmem:[#allocation94_spill] sm:$0xff] }
 0x867   : > { %vm18927_vm3 = vnez %v18926_v29 }
 0x868   : > { %v16569_v4 = vpop.f32.mrb[68].mxu0 }
 0x869   : > { %v7871_v19 = vpop.f32.mrb[69].mxu0 }
 0x86a   : > { %v16571_v16 = vpop.f32.mrb[70].mxu0 }
 0x86b   : > { %18919 = vst [vmem:[#allocation50_spill] sm:$0xff] %v16571_v16  ;;  %v7874_v15 = vpop.f32.mrb[71].mxu0 }
 0x86d   : > { %11293 = vmatmul.mubr.msk.bf16.gmra.mrb[176].mxu0 %vm18921_vm4, %v16271_v57 }
 0x86e   : > { %8091 = vmatprep.mubr.bf16.mxu0 %v18922_v41  ;;  %v18935_v41 = vld [vmem:[#allocation86_spill] sm:$0xff] }
 0x870   : > { %v16577_v44 = vpop.f32.mrb[72].mxu0 }
 0x871   : > { %18923 = vst [vmem:[#allocation59_spill] sm:$0xff] %v16577_v44  ;;  %v7879_v58 = vpop.f32.mrb[73].mxu0  ;;  %v18936_v44 = vld [vmem:[#allocation8_spill] sm:$0xff] }
 0x872   : > { %v16579_v62 = vpop.f32.mrb[74].mxu0  ;;  %v12296_v58 = vld [vmem:[%s17488_s7] sm:$0xff]  }
 0x873   : > { %18924 = vst [vmem:[#allocation36_spill] sm:$0xff] %v16579_v62  ;;  %v7882_v8 = vpop.f32.mrb[75].mxu0  ;;  %12083 = vmatprep.subr.bf16.mxu1 %v12296_v58 }
 0x874   : > { %v16596_v8 = vld [vmem:[%s17487_s6 + $0x2] ss:$0 sm:$0xff]  ;;  %12084 = vmatpush3.bf16.msra.mxu1 %v12296_v58 }
 0x875   : > { %11295 = vmatmul.mubr.msk.bf16.gmra.mrb[180].mxu0 %vm18927_vm3, %v18925_v38 }
 0x876   : > { %8099 = vmatprep.mubr.bf16.mxu0 %v16281_v49 }
 0x878   : > { %v16585_v19 = vpop.f32.mrb[76].mxu0 }
 0x879   : > { %18928 = vst [vmem:[#allocation51_spill] sm:$0xff] %v16585_v19  ;;  %v7887_v15 = vpop.f32.mrb[77].mxu0 }
 0x87a   : > { %v16587_v16 = vpop.f32.mrb[78].mxu0 }
 0x87b   : > { %18929 = vst [vmem:[#allocation91_spill] sm:$0xff] %v16587_v16  ;;  %v7890_v57 = vpop.f32.mrb[79].mxu0 }
 0x87d   : > { %11297 = vmatmul.mubr.msk.bf16.gmra.mrb[184].mxu0 %vm14177_vm10, %v16298_v7 }
 0x87e   : > { %8107 = vmatprep.mubr.bf16.mxu0 %v16295_v10 }
 0x880   : > { %v7893_v38 = vpop.f32.mrb[80].mxu0 }
 0x881   : > { %v7894_v49 = vadd.f32 %v16596_v8, %v7893_v38  ;;  %v7895_v11 = vpop.f32.mrb[81].mxu0  ;;  %v18932_v38 = vld [vmem:[#allocation85_spill] sm:$0xff] }
 0x882   : > { %v7896_v29 = vpop.f32.mrb[82].mxu0  ;;  %v18933_v11 = vld [vmem:[#allocation7_spill] sm:$0xff] }
 0x883   : > { %v8183_v15 = vadd.f32 %v16339_v33, %v7894_v49  ;;  %v7897_v7 = vadd.f32 %v16596_v8, %v7896_v29  ;;  %v7898_v57 = vpop.f32.mrb[83].mxu0  ;;  %vm18934_vm10 = vnez %v18933_v11 }
 0x885   : > { %v8186_v10 = vadd.f32 %v16343_v40, %v7897_v7  ;;  %11299 = vmatmul.mubr.msk.bf16.gmra.mrb[188].mxu0 %vm14204_vm9, %v16320_v3  ;;  %v8413_v62 = vmax.f32 %v8183_v15, 0.0  ;;  %vm18937_vm9 = vnez %v18936_v44  ;;  %v12297_v15 = vld [vmem:[%s17488_s7 + $0x8] sm:$0xff]  }
 0x886   : > { %12019 = vmatprep.mubr.msk.bf16.mxu0 %vm18934_vm10, %v18932_v38  ;;  %12085 = vmatprep.subr.bf16.mxu1 %v12297_v15 }
 0x887   : > { %v8414_v16 = vmax.f32 %v8186_v10, 0.0  ;;  %v18939_v10 = vld [vmem:[#allocation9_spill] sm:$0xff]  ;;  %12086 = vmatpush3.bf16.msra.mxu1 %v12297_v15  ;;  %v12298_v15 = vld [vmem:[%s17488_s7 + $0x10] sm:$0xff]  }
 0x888   : > { %v7901_v19 = vpop.f32.mrb[84].mxu0  ;;  %vm18940_vm8 = vnez %v18939_v10  ;;  %12087 = vmatprep.subr.bf16.mxu1 %v12298_v15 }
 0x889   : > { %v7902_v33 = vadd.f32 %v16596_v8, %v7901_v19  ;;  %v7903_v49 = vpop.f32.mrb[85].mxu0  ;;  %v16612_v29 = vpack.c.bf16 %v8414_v16, %v8413_v62  ;;  %v18938_v19 = vld [vmem:[#allocation97_spill] sm:$0xff] }
 0x88a   : > { %v7904_v57 = vpop.f32.mrb[86].mxu0 }
 0x88b   : > { %v8191_v58 = vadd.f32 %v16337_v9, %v7902_v33  ;;  %v7905_v40 = vadd.f32 %v16596_v8, %v7904_v57  ;;  %v7906_v7 = vpop.f32.mrb[87].mxu0  ;;  %12088 = vmatpush3.bf16.msra.mxu1 %v12298_v15 }
 0x88c   : > { %v18941_v7 = vld [vmem:[#allocation98_spill] sm:$0xff] }
 0x88d   : > { %v8194_v3 = vadd.f32 %v16341_v34, %v7905_v40  ;;  %12020 = vmatmul.mubr.msk.bf16.vlgmr.msra.gmra.mrb[192].mxu0 %vm18937_vm9, %v18935_v41  ;;  %v8415_v16 = vmax.f32 %v8191_v58, 0.0  ;;  %v18942_v41 = vld [vmem:[#allocation10_spill] sm:$0xff] }
 0x88e   : > { %12023 = vmatprep.mubr.msk.bf16.mxu0 %vm18940_vm8, %v18938_v19  ;;  %vm18943_vm0 = vnez %v18942_v41 }
 0x88f   : > { %v8416_v62 = vmax.f32 %v8194_v3, 0.0 }
 0x890   : > { %v7909_v9 = vpop.f32.mrb[88].mxu0 }
 0x891   : > { %v16626_v38 = vpack.c.bf16 %v8416_v62, %v8415_v16  ;;  %v7910_v34 = vadd.f32 %v16596_v8, %v7909_v9  ;;  %v7911_v11 = vpop.f32.mrb[89].mxu0 }
 0x892   : > { %v7912_v44 = vpop.f32.mrb[90].mxu0 }
 0x893   : > { %v8199_v33 = vadd.f32 %v16367_v50, %v7910_v34  ;;  %v7913_v49 = vadd.f32 %v16596_v8, %v7912_v44  ;;  %v7914_v57 = vpop.f32.mrb[91].mxu0 }
 0x895   : > { %v8202_v40 = vadd.f32 %v16371_v25, %v7913_v49  ;;  %12024 = vmatmul.mubr.msk.bf16.gmra.mrb[196].mxu0 %vm18943_vm0, %v18941_v7  ;;  %v8417_v58 = vmax.f32 %v8199_v33, 0.0 }
 0x897   : > { %v8418_v3 = vmax.f32 %v8202_v40, 0.0 }
 0x898   : > { %v7917_v19 = vpop.f32.mrb[92].mxu0 }
 0x899   : > { %v7918_v10 = vadd.f32 %v16596_v8, %v7917_v19  ;;  %v7919_v16 = vpop.f32.mrb[93].mxu0  ;;  %v16639_v50 = vpack.c.bf16 %v8418_v3, %v8417_v58 }
 0x89a   : > { %v7920_v62 = vpop.f32.mrb[94].mxu0 }
 0x89b   : > { %v8207_v25 = vadd.f32 %v16365_v47, %v7918_v10  ;;  %v7921_v9 = vadd.f32 %v16596_v8, %v7920_v62  ;;  %v7922_v34 = vpop.f32.mrb[95].mxu0 }
 0x89d   : > { %v8210_v11 = vadd.f32 %v16369_v24, %v7921_v9  ;;  %v8419_v44 = vmax.f32 %v8207_v25, 0.0  ;;  %v12299_v24 = vld [vmem:[%s17488_s7 + $0x18] sm:$0xff]  }
 0x89e   : > { %12089 = vmatprep.subr.bf16.mxu1 %v12299_v24 }
 0x89f   : > { %v8420_v33 = vmax.f32 %v8210_v11, 0.0  ;;  %12090 = vmatpush3.bf16.msra.mxu1 %v12299_v24 }
 0x8a0   : > { %v7925_v49 = vpop.f32.mrb[96].mxu0 }
 0x8a1   : > { %v16644_v57 = vpack.c.bf16 %v8420_v33, %v8419_v44  ;;  %v7926_v40 = vadd.f32 %v16596_v8, %v7925_v49  ;;  %v7927_v7 = vpop.f32.mrb[97].mxu0 }
 0x8a2   : > { %v7928_v41 = vpop.f32.mrb[98].mxu0 }
 0x8a3   : > { %v8215_v58 = vadd.f32 %v16383_v48, %v7926_v40  ;;  %v7929_v3 = vadd.f32 %v16596_v8, %v7928_v41  ;;  %v7930_v15 = vpop.f32.mrb[99].mxu0 }
 0x8a5   : > { %v8218_v47 = vadd.f32 %v16387_v36, %v7929_v3  ;;  %v8421_v19 = vmax.f32 %v8215_v58, 0.0 }
 0x8a7   : > { %v8422_v10 = vmax.f32 %v8218_v47, 0.0 }
 0x8a8   : > { %v7933_v16 = vpop.f32.mrb[100].mxu0 }
 0x8a9   : > { %v7934_v62 = vadd.f32 %v16596_v8, %v7933_v16  ;;  %v7935_v25 = vpop.f32.mrb[101].mxu0  ;;  %v16654_v9 = vpack.c.bf16 %v8422_v10, %v8421_v19 }
 0x8aa   : > { %v7936_v34 = vpop.f32.mrb[102].mxu0 }
 0x8ab   : > { %v8223_v48 = vadd.f32 %v16381_v26, %v7934_v62  ;;  %v7937_v11 = vadd.f32 %v16596_v8, %v7936_v34  ;;  %v7938_v36 = vpop.f32.mrb[103].mxu0 }
 0x8ad   : > { %v8226_v44 = vadd.f32 %v16385_v1, %v7937_v11  ;;  %v8423_v33 = vmax.f32 %v8223_v48, 0.0  ;;  %v12300_v1 = vld [vmem:[%s17488_s7 + $0x20] sm:$0xff]  }
 0x8ae   : > { %12091 = vmatprep.subr.bf16.mxu1 %v12300_v1 }
 0x8af   : > { %v8424_v49 = vmax.f32 %v8226_v44, 0.0  ;;  %12092 = vmatpush3.bf16.msra.mxu1 %v12300_v1 }
 0x8b0   : > { %v7941_v40 = vpop.f32.mrb[104].mxu0 }
 0x8b1   : > { %v16659_v7 = vpack.c.bf16 %v8424_v49, %v8423_v33  ;;  %v7942_v41 = vadd.f32 %v16596_v8, %v7941_v40  ;;  %v7943_v58 = vpop.f32.mrb[105].mxu0 }
 0x8b2   : > { %v7944_v3 = vpop.f32.mrb[106].mxu0 }
 0x8b3   : > { %v8231_v15 = vadd.f32 %v16399_v18, %v7942_v41  ;;  %v7945_v47 = vadd.f32 %v16596_v8, %v7944_v3  ;;  %v7946_v19 = vpop.f32.mrb[107].mxu0 }
 0x8b5   : > { %v8234_v26 = vadd.f32 %v16403_v52, %v7945_v47  ;;  %v8425_v10 = vmax.f32 %v8231_v15, 0.0 }
 0x8b7   : > { %v8426_v24 = vmax.f32 %v8234_v26, 0.0 }
 0x8b8   : > { %v7949_v16 = vpop.f32.mrb[108].mxu0 }
 0x8b9   : > { %v7950_v62 = vadd.f32 %v16596_v8, %v7949_v16  ;;  %v7951_v25 = vpop.f32.mrb[109].mxu0  ;;  %v16669_v34 = vpack.c.bf16 %v8426_v24, %v8425_v10 }
 0x8ba   : > { %v7952_v48 = vpop.f32.mrb[110].mxu0 }
 0x8bb   : > { %v8239_v18 = vadd.f32 %v16397_v21, %v7950_v62  ;;  %v7953_v11 = vadd.f32 %v16596_v8, %v7952_v48  ;;  %v7954_v52 = vpop.f32.mrb[111].mxu0 }
 0x8bd   : > { %v8242_v36 = vadd.f32 %v16401_v43, %v7953_v11  ;;  %v8427_v44 = vmax.f32 %v8239_v18, 0.0  ;;  %v12301_v43 = vld [vmem:[%s17488_s7 + $0x28] sm:$0xff]  }
 0x8be   : > { %12093 = vmatprep.subr.bf16.mxu1 %v12301_v43 }
 0x8bf   : > { %v8428_v33 = vmax.f32 %v8242_v36, 0.0  ;;  %12094 = vmatpush3.bf16.msra.mxu1 %v12301_v43 }
 0x8c0   : > { %v7957_v49 = vpop.f32.mrb[112].mxu0 }
 0x8c1   : > { %v16674_v40 = vpack.c.bf16 %v8428_v33, %v8427_v44  ;;  %v7958_v41 = vadd.f32 %v16596_v8, %v7957_v49  ;;  %v7959_v58 = vpop.f32.mrb[113].mxu0 }
 0x8c2   : > { %v7960_v3 = vpop.f32.mrb[114].mxu0 }
 0x8c3   : > { %v8247_v15 = vadd.f32 %v16415_v55, %v7958_v41  ;;  %v7961_v47 = vadd.f32 %v16596_v8, %v7960_v3  ;;  %v7962_v19 = vpop.f32.mrb[115].mxu0  ;;  %v12302_v41 = vld [vmem:[%s17488_s7 + $0x30] sm:$0xff]  }
 0x8c4   : > { %12095 = vmatprep.subr.bf16.mxu1 %v12302_v41 }
 0x8c5   : > { %v8250_v21 = vadd.f32 %v16419_v35, %v7961_v47  ;;  %v8429_v26 = vmax.f32 %v8247_v15, 0.0  ;;  %12096 = vmatpush3.bf16.msra.mxu1 %v12302_v41 }
 0x8c7   : > { %v8430_v10 = vmax.f32 %v8250_v21, 0.0 }
 0x8c8   : > { %v7965_v24 = vpop.f32.mrb[116].mxu0 }
 0x8c9   : > { %v7966_v1 = vadd.f32 %v16596_v8, %v7965_v24  ;;  %v7967_v16 = vpop.f32.mrb[117].mxu0  ;;  %v16684_v62 = vpack.c.bf16 %v8430_v10, %v8429_v26 }
 0x8ca   : > { %v7968_v55 = vpop.f32.mrb[118].mxu0 }
 0x8cb   : > { %v8255_v25 = vadd.f32 %v16413_v6, %v7966_v1  ;;  %v7969_v48 = vadd.f32 %v16596_v8, %v7968_v55  ;;  %v7970_v35 = vpop.f32.mrb[119].mxu0 }
 0x8cd   : > { %v8258_v18 = vadd.f32 %v16417_v2, %v7969_v48  ;;  %v8431_v11 = vmax.f32 %v8255_v25, 0.0 }
 0x8cf   : > { %v8432_v52 = vmax.f32 %v8258_v18, 0.0 }
 0x8d0   : > { %v7973_v36 = vpop.f32.mrb[120].mxu0 }
 0x8d1   : > { %v16689_v44 = vpack.c.bf16 %v8432_v52, %v8431_v11  ;;  %v7974_v33 = vadd.f32 %v16596_v8, %v7973_v36  ;;  %v7975_v49 = vpop.f32.mrb[121].mxu0  ;;  %v12303_v52 = vld [vmem:[%s17488_s7 + $0x38] sm:$0xff]  }
 0x8d2   : > { %v7976_v58 = vpop.f32.mrb[122].mxu0  ;;  %12097 = vmatprep.subr.bf16.mxu1 %v12303_v52 }
 0x8d3   : > { %v8263_v6 = vadd.f32 %v16431_v37, %v7974_v33  ;;  %v7977_v3 = vadd.f32 %v16596_v8, %v7976_v58  ;;  %v7978_v15 = vpop.f32.mrb[123].mxu0  ;;  %12098 = vmatpush3.bf16.msra.mxu1 %v12303_v52 }
 0x8d5   : > { %v8266_v2 = vadd.f32 %v16435_v14, %v7977_v3  ;;  %v8433_v47 = vmax.f32 %v8263_v6, 0.0 }
 0x8d7   : > { %v8434_v19 = vmax.f32 %v8266_v2, 0.0 }
 0x8d8   : > { %v7981_v21 = vpop.f32.mrb[124].mxu0 }
 0x8d9   : > { %v7982_v43 = vadd.f32 %v16596_v8, %v7981_v21  ;;  %v7983_v26 = vpop.f32.mrb[125].mxu0  ;;  %v16699_v10 = vpack.c.bf16 %v8434_v19, %v8433_v47 }
 0x8da   : > { %v7984_v24 = vpop.f32.mrb[126].mxu0 }
 0x8db   : > { %v8271_v1 = vadd.f32 %v16429_v42, %v7982_v43  ;;  %v7985_v37 = vadd.f32 %v16596_v8, %v7984_v24  ;;  %v7986_v16 = vpop.f32.mrb[127].mxu0 }
 0x8dd   : > { %v8274_v55 = vadd.f32 %v16433_v61, %v7985_v37  ;;  %v8435_v25 = vmax.f32 %v8271_v1, 0.0 }
 0x8df   : > { %v8436_v48 = vmax.f32 %v8274_v55, 0.0 }
 0x8e0   : > { %v7989_v35 = vpop.f32.mrb[128].mxu0 }
 0x8e1   : > { %v16704_v14 = vpack.c.bf16 %v8436_v48, %v8435_v25  ;;  %v7990_v18 = vadd.f32 %v16596_v8, %v7989_v35  ;;  %v7991_v11 = vpop.f32.mrb[129].mxu0 }
 0x8e2   : > { %v7992_v36 = vpop.f32.mrb[130].mxu0 }
 0x8e3   : > { %v8279_v42 = vadd.f32 %v16447_v32, %v7990_v18  ;;  %v7993_v33 = vadd.f32 %v16596_v8, %v7992_v36  ;;  %v7994_v49 = vpop.f32.mrb[131].mxu0 }
 0x8e5   : > { %v8282_v61 = vadd.f32 %v16451_v22, %v7993_v33  ;;  %v8437_v41 = vmax.f32 %v8279_v42, 0.0 }
 0x8e7   : > { %v8438_v58 = vmax.f32 %v8282_v61, 0.0 }
 0x8e8   : > { %v7997_v6 = vpop.f32.mrb[132].mxu0 }
 0x8e9   : > { %v7998_v3 = vadd.f32 %v16596_v8, %v7997_v6  ;;  %v7999_v15 = vpop.f32.mrb[133].mxu0  ;;  %v16714_v2 = vpack.c.bf16 %v8438_v58, %v8437_v41 }
 0x8ea   : > { %v8000_v47 = vpop.f32.mrb[134].mxu0 }
 0x8eb   : > { %v8287_v19 = vadd.f32 %v16445_v31, %v7998_v3  ;;  %v8001_v32 = vadd.f32 %v16596_v8, %v8000_v47  ;;  %v8002_v21 = vpop.f32.mrb[135].mxu0 }
 0x8ed   : > { %v8290_v43 = vadd.f32 %v16449_v60, %v8001_v32  ;;  %v8439_v26 = vmax.f32 %v8287_v19, 0.0 }
 0x8ef   : > { %v8440_v24 = vmax.f32 %v8290_v43, 0.0 }
 0x8f0   : > { %v8005_v1 = vpop.f32.mrb[136].mxu0 }
 0x8f1   : > { %v16719_v22 = vpack.c.bf16 %v8440_v24, %v8439_v26  ;;  %v8006_v37 = vadd.f32 %v16596_v8, %v8005_v1  ;;  %v8007_v16 = vpop.f32.mrb[137].mxu0 }
 0x8f2   : > { %v8008_v55 = vpop.f32.mrb[138].mxu0 }
 0x8f3   : > { %v8295_v25 = vadd.f32 %v16463_v63, %v8006_v37  ;;  %v8009_v48 = vadd.f32 %v16596_v8, %v8008_v55  ;;  %v8010_v35 = vpop.f32.mrb[139].mxu0 }
 0x8f5   : > { %v8298_v31 = vadd.f32 %v16467_v30, %v8009_v48  ;;  %v8441_v18 = vmax.f32 %v8295_v25, 0.0 }
 0x8f7   : > { %v8442_v11 = vmax.f32 %v8298_v31, 0.0 }
 0x8f8   : > { %v8013_v52 = vpop.f32.mrb[140].mxu0 }
 0x8f9   : > { %v8014_v60 = vadd.f32 %v16596_v8, %v8013_v52  ;;  %v8015_v36 = vpop.f32.mrb[141].mxu0  ;;  %v16726_v42 = vpack.c.bf16 %v8442_v11, %v8441_v18 }
 0x8fa   : > { %v8016_v33 = vpop.f32.mrb[142].mxu0 }
 0x8fb   : > { %v8303_v49 = vadd.f32 %v16461_v20, %v8014_v60  ;;  %v8017_v61 = vadd.f32 %v16596_v8, %v8016_v33  ;;  %v8018_v41 = vpop.f32.mrb[143].mxu0 }
 0x8fd   : > { %v8306_v63 = vadd.f32 %v16465_v17, %v8017_v61  ;;  %v8443_v58 = vmax.f32 %v8303_v49, 0.0 }
 0x8ff   : > { %v8444_v6 = vmax.f32 %v8306_v63, 0.0 }
 0x900   : > { %v8021_v3 = vpop.f32.mrb[144].mxu0 }
 0x901   : > { %v16731_v30 = vpack.c.bf16 %v8444_v6, %v8443_v58  ;;  %v8022_v15 = vadd.f32 %v16596_v8, %v8021_v3  ;;  %v8023_v47 = vpop.f32.mrb[145].mxu0 }
 0x902   : > { %v8024_v19 = vpop.f32.mrb[146].mxu0 }
 0x903   : > { %v8311_v32 = vadd.f32 %v16479_v39, %v8022_v15  ;;  %v8025_v21 = vadd.f32 %v16596_v8, %v8024_v19  ;;  %v8026_v43 = vpop.f32.mrb[147].mxu0 }
 0x905   : > { %v8314_v20 = vadd.f32 %v16483_v28, %v8025_v21  ;;  %v8445_v26 = vmax.f32 %v8311_v32, 0.0 }
 0x907   : > { %v8446_v24 = vmax.f32 %v8314_v20, 0.0 }
 0x908   : > { %v8029_v1 = vpop.f32.mrb[148].mxu0 }
 0x909   : > { %v8030_v17 = vadd.f32 %v16596_v8, %v8029_v1  ;;  %v8031_v37 = vpop.f32.mrb[149].mxu0  ;;  %v16738_v16 = vpack.c.bf16 %v8446_v24, %v8445_v26 }
 0x90a   : > { %v8032_v55 = vpop.f32.mrb[150].mxu0  ;;  %v18944_v37 = vld [vmem:[#allocation6_spill] sm:$0xff] }
 0x90b   : > { %v8319_v25 = vadd.f32 %v16477_v12, %v8030_v17  ;;  %v8033_v48 = vadd.f32 %v16596_v8, %v8032_v55  ;;  %v8034_v35 = vpop.f32.mrb[151].mxu0  ;;  %v16773_v55 = vsub.s32 0, %v18944_v37 }
 0x90d   : > { %v8322_v39 = vadd.f32 %v16481_v5, %v8033_v48  ;;  %v8447_v31 = vmax.f32 %v8319_v25, 0.0  ;;  %v16777_v48 = vld [vmem:[%s16770_s23] sm:$0xff] }
 0x90f   : > { %v8448_v18 = vmax.f32 %v8322_v39, 0.0 }
 0x910   : > { %v8037_v11 = vpop.f32.mrb[152].mxu0 }
 0x911   : > { %v16743_v28 = vpack.c.bf16 %v8448_v18, %v8447_v31  ;;  %v8038_v52 = vadd.f32 %v16596_v8, %v8037_v11  ;;  %v8039_v60 = vpop.f32.mrb[153].mxu0  ;;  %v16782_v18 = vsub.s32 1, %v18944_v37 }
 0x912   : > { %v8040_v36 = vpop.f32.mrb[154].mxu0 }
 0x913   : > { %v8327_v33 = vadd.f32 %v16495_v23, %v8038_v52  ;;  %v8041_v49 = vadd.f32 %v16596_v8, %v8040_v36  ;;  %v8042_v12 = vpop.f32.mrb[155].mxu0 }
 0x915   : > { %v8330_v61 = vadd.f32 %v16499_v56, %v8041_v49  ;;  %v8449_v41 = vmax.f32 %v8327_v33, 0.0 }
 0x917   : > { %v8450_v63 = vmax.f32 %v8330_v61, 0.0  ;;  %v16792_v61 = vsub.s32 2, %v18944_v37 }
 0x918   : > { %v8045_v5 = vpop.f32.mrb[156].mxu0 }
 0x919   : > { %v8046_v58 = vadd.f32 %v16596_v8, %v8045_v5  ;;  %v8047_v6 = vpop.f32.mrb[157].mxu0  ;;  %v16750_v3 = vpack.c.bf16 %v8450_v63, %v8449_v41  ;;  %v9295_v63 = vrot.slane %v16777_v48, %v16792_v61 }
 0x91a   : > { %v8048_v15 = vpop.f32.mrb[158].mxu0 }
 0x91b   : > { %v8335_v47 = vadd.f32 %v16493_v59, %v8046_v58  ;;  %v8049_v19 = vadd.f32 %v16596_v8, %v8048_v15  ;;  %v8050_v32 = vpop.f32.mrb[159].mxu0 }
 0x91d   : > { %v8338_v23 = vadd.f32 %v16497_v51, %v8049_v19  ;;  %v8451_v21 = vmax.f32 %v8335_v47, 0.0 }
 0x91f   : > { %v8452_v56 = vmax.f32 %v8338_v23, 0.0 }
 0x920   : > { %v8053_v43 = vpop.f32.mrb[160].mxu0 }
 0x921   : > { %v16757_v20 = vpack.c.bf16 %v8452_v56, %v8451_v21  ;;  %v8054_v26 = vadd.f32 %v16596_v8, %v8053_v43  ;;  %v8055_v24 = vpop.f32.mrb[161].mxu0  ;;  %v16808_v43 = vsub.s32 4, %v18944_v37 }
 0x922   : > { %v8056_v59 = vpop.f32.mrb[162].mxu0 }
 0x923   : > { %v8343_v1 = vadd.f32 %v16511_v13, %v8054_v26  ;;  %v8057_v51 = vadd.f32 %v16596_v8, %v8056_v59  ;;  %v8058_v17 = vpop.f32.mrb[163].mxu0  ;;  %v9273_v13 = vrot.slane %v16777_v48, %v16773_v55  ;;  %v9317_v24 = vrot.slane %v16777_v48, %v16808_v43 }
 0x925   : > { %v8346_v25 = vadd.f32 %v16515_v27, %v8057_v51  ;;  %v8453_v35 = vmax.f32 %v8343_v1, 0.0  ;;  %9279 = vbcast.lane.b32.xlu1 %v9273_v13, 264  ;;  %9275 = vbcast.lane.b32.xlu0 %v9273_v13, 256  ;;  %v9284_v27 = vrot.slane %v16777_v48, %v16782_v18 }
 0x927   : > { %v8454_v39 = vmax.f32 %v8346_v25, 0.0 }
 0x928   : > { %v8061_v31 = vpop.f32.mrb[164].mxu0 }
 0x929   : > { %v8062_v11 = vadd.f32 %v16596_v8, %v8061_v31  ;;  %v8063_v52 = vpop.f32.mrb[165].mxu0  ;;  %v16785_v60 = vpack.c.bf16 %v8454_v39, %v8453_v35  ;;  %9286 = vbcast.lane.b32.xlu1 %v9284_v27, 256  ;;  %9290 = vbcast.lane.b32.xlu0 %v9284_v27, 264 }
 0x92a   : > { %v8064_v36 = vpop.f32.mrb[166].mxu0  ;;  %v16824_v52 = vsub.s32 6, %v18944_v37 }
 0x92b   : > { %v8351_v33 = vadd.f32 %v16509_v0, %v8062_v11  ;;  %v8065_v49 = vadd.f32 %v16596_v8, %v8064_v36  ;;  %v8066_v12 = vpop.f32.mrb[167].mxu0  ;;  %v16798_v0 = vsub.s32 3, %v18944_v37  ;;  %v18945_v36 = vld [vmem:[#allocation89_spill] sm:$0xff] }
 0x92d   : > { %v8354_v41 = vadd.f32 %v16513_v45, %v8065_v49  ;;  %v8455_v5 = vmax.f32 %v8351_v33, 0.0  ;;  %9297 = vbcast.lane.b32.xlu1 %v9295_v63, 256  ;;  %9301 = vbcast.lane.b32.xlu0 %v9295_v63, 264  ;;  %v9306_v45 = vrot.slane %v16777_v48, %v16798_v0  ;;  %v9339_v33 = vrot.slane %v16777_v48, %v16824_v52 }
 0x92f   : > { %v8456_v58 = vmax.f32 %v8354_v41, 0.0 }
 0x930   : > { %v8069_v6 = vpop.f32.mrb[168].mxu0 }
 0x931   : > { %v16800_v15 = vpack.c.bf16 %v8456_v58, %v8455_v5  ;;  %v8070_v47 = vadd.f32 %v16596_v8, %v8069_v6  ;;  %v8071_v19 = vpop.f32.mrb[169].mxu0  ;;  %9308 = vbcast.lane.b32.xlu1 %v9306_v45, 256  ;;  %9312 = vbcast.lane.b32.xlu0 %v9306_v45, 264 }
 0x932   : > { %v8072_v32 = vpop.f32.mrb[170].mxu0  ;;  %v18946_v19 = vld [vmem:[#allocation39_spill] sm:$0xff] }
 0x933   : > { %v8359_v23 = vadd.f32 %v16527_v54, %v8070_v47  ;;  %v8073_v21 = vadd.f32 %v16596_v8, %v8072_v32  ;;  %v8074_v56 = vpop.f32.mrb[171].mxu0  ;;  %v16814_v54 = vsub.s32 5, %v18944_v37 }
 0x934   : > { %v18947_v56 = vld [vmem:[#allocation88_spill] sm:$0xff] }
 0x935   : > { %v8362_v26 = vadd.f32 %v16531_v46, %v8073_v21  ;;  %v8457_v59 = vmax.f32 %v8359_v23, 0.0  ;;  %9319 = vbcast.lane.b32.xlu1 %v9317_v24, 256  ;;  %9323 = vbcast.lane.b32.xlu0 %v9317_v24, 264  ;;  %v9328_v46 = vrot.slane %v16777_v48, %v16814_v54  ;;  %v16840_v21 = vld [vmem:[%s16770_s23 + $0x8] sm:$0xff] }
 0x936   : > { %v9361_v24 = vrot.slane %v16840_v21, %v16773_v55 }
 0x937   : > { %v8458_v1 = vmax.f32 %v8362_v26, 0.0 }
 0x938   : > { %v8077_v51 = vpop.f32.mrb[172].mxu0 }
 0x939   : > { %v8078_v17 = vadd.f32 %v16596_v8, %v8077_v51  ;;  %v8079_v25 = vpop.f32.mrb[173].mxu0  ;;  %v16817_v13 = vpack.c.bf16 %v8458_v1, %v8457_v59  ;;  %9330 = vbcast.lane.b32.xlu1 %v9328_v46, 256  ;;  %9334 = vbcast.lane.b32.xlu0 %v9328_v46, 264  ;;  %v9372_v46 = vrot.slane %v16840_v21, %v16782_v18 }
 0x93a   : > { %v8080_v35 = vpop.f32.mrb[174].mxu0 }
 0x93b   : > { %v8367_v39 = vadd.f32 %v16525_v53, %v8078_v17  ;;  %v8081_v31 = vadd.f32 %v16596_v8, %v8080_v35  ;;  %v8082_v11 = vpop.f32.mrb[175].mxu0  ;;  %v16830_v53 = vsub.s32 7, %v18944_v37 }
 0x93d   : > { %v8370_v27 = vadd.f32 %v18945_v36, %v8081_v31  ;;  %v8459_v49 = vmax.f32 %v8367_v39, 0.0  ;;  %9341 = vbcast.lane.b32.xlu1 %v9339_v33, 256  ;;  %9345 = vbcast.lane.b32.xlu0 %v9339_v33, 264  ;;  %v9350_v47 = vrot.slane %v16777_v48, %v16830_v53  ;;  %v18948_v39 = vld [vmem:[#allocation53_spill] sm:$0xff]  ;;  %v18949_v33 = vld [vmem:[#allocation54_spill] sm:$0xff] }
 0x93f   : > { %v8460_v12 = vmax.f32 %v8370_v27, 0.0  ;;  %v9383_v27 = vrot.slane %v16840_v21, %v16792_v61 }
 0x940   : > { %v8085_v41 = vpop.f32.mrb[176].mxu0 }
 0x941   : > { %v16832_v63 = vpack.c.bf16 %v8460_v12, %v8459_v49  ;;  %v8086_v5 = vadd.f32 %v16596_v8, %v8085_v41  ;;  %v8087_v58 = vpop.f32.mrb[177].mxu0  ;;  %9352 = vbcast.lane.b32.xlu1 %v9350_v47, 256  ;;  %9356 = vbcast.lane.b32.xlu0 %v9350_v47, 264 }
 0x942   : > { %v8088_v6 = vpop.f32.mrb[178].mxu0 }
 0x943   : > { %v8375_v32 = vadd.f32 %v18946_v19, %v8086_v5  ;;  %v8089_v45 = vadd.f32 %v16596_v8, %v8088_v6  ;;  %v8090_v23 = vpop.f32.mrb[179].mxu0 }
 0x945   : > { %v8378_v26 = vadd.f32 %v18947_v56, %v8089_v45  ;;  %v8461_v59 = vmax.f32 %v8375_v32, 0.0  ;;  %9363 = vbcast.lane.b32.xlu1 %v9361_v24, 256  ;;  %9367 = vbcast.lane.b32.xlu0 %v9361_v24, 264  ;;  %v9394_v32 = vrot.slane %v16840_v21, %v16798_v0  ;;  %v18950_v45 = vld [vmem:[#allocation45_spill] sm:$0xff]  ;;  %v9405_v24 = vrot.slane %v16840_v21, %v16808_v43 }
 0x947   : > { %v8462_v1 = vmax.f32 %v8378_v26, 0.0 }
 0x948   : > { %v8093_v51 = vpop.f32.mrb[180].mxu0 }
 0x949   : > { %v8094_v48 = vadd.f32 %v16596_v8, %v8093_v51  ;;  %v8095_v17 = vpop.f32.mrb[181].mxu0  ;;  %v16846_v25 = vpack.c.bf16 %v8462_v1, %v8461_v59  ;;  %9374 = vbcast.lane.b32.xlu1 %v9372_v46, 256  ;;  %9378 = vbcast.lane.b32.xlu0 %v9372_v46, 264  ;;  %v18951_v59 = vld [vmem:[#allocation92_spill] sm:$0xff] }
 0x94a   : > { %v8096_v35 = vpop.f32.mrb[182].mxu0 }
 0x94b   : > { %v8383_v31 = vadd.f32 %v18948_v39, %v8094_v48  ;;  %v8097_v11 = vadd.f32 %v16596_v8, %v8096_v35  ;;  %v8098_v36 = vpop.f32.mrb[183].mxu0 }
 0x94c   : > { %v18952_v36 = vld [vmem:[#allocation93_spill] sm:$0xff] }
 0x94d   : > { %v8386_v49 = vadd.f32 %v18949_v33, %v8097_v11  ;;  %v8463_v12 = vmax.f32 %v8383_v31, 0.0  ;;  %9385 = vbcast.lane.b32.xlu1 %v9383_v27, 256  ;;  %9389 = vbcast.lane.b32.xlu0 %v9383_v27, 264  ;;  %v9416_v11 = vrot.slane %v16840_v21, %v16814_v54 }
 0x94f   : > { %v8464_v41 = vmax.f32 %v8386_v49, 0.0 }
 0x950   : > { %v8101_v5 = vpop.f32.mrb[184].mxu0 }
 0x951   : > { %v16855_v58 = vpack.c.bf16 %v8464_v41, %v8463_v12  ;;  %v8102_v6 = vadd.f32 %v16596_v8, %v8101_v5  ;;  %v8103_v47 = vpop.f32.mrb[185].mxu0  ;;  %9396 = vbcast.lane.b32.xlu1 %v9394_v32, 256  ;;  %9400 = vbcast.lane.b32.xlu0 %v9394_v32, 264  ;;  %v9427_v12 = vrot.slane %v16840_v21, %v16824_v52  ;;  %v18953_v41 = vld [vmem:[#allocation52_spill] sm:$0xff] }
 0x952   : > { %v8104_v19 = vpop.f32.mrb[186].mxu0  ;;  %v18954_v32 = vld [vmem:[#allocation44_spill] sm:$0xff] }
 0x953   : > { %v8391_v23 = vadd.f32 %v18950_v45, %v8102_v6  ;;  %v8105_v56 = vadd.f32 %v16596_v8, %v8104_v19  ;;  %v8106_v26 = vpop.f32.mrb[187].mxu0  ;;  %v7870_v6 = vadd.f32 %v16596_v8, %v16569_v4  ;;  %v7862_v45 = vadd.f32 %v16596_v8, %v18954_v32 }
 0x955   : > { %v8394_v1 = vadd.f32 %v18951_v59, %v8105_v56  ;;  %v8465_v51 = vmax.f32 %v8391_v23, 0.0  ;;  %9407 = vbcast.lane.b32.xlu1 %v9405_v24, 256  ;;  %9411 = vbcast.lane.b32.xlu0 %v9405_v24, 264  ;;  %v18955_v56 = vld [vmem:[#allocation50_spill] sm:$0xff] }
 0x956   : > { %v7873_v26 = vadd.f32 %v16596_v8, %v18955_v56 }
 0x957   : > { %v8466_v48 = vmax.f32 %v8394_v1, 0.0 }
 0x958   : > { %v8109_v17 = vpop.f32.mrb[188].mxu0 }
 0x959   : > { %v8110_v35 = vadd.f32 %v16596_v8, %v8109_v17  ;;  %v8111_v46 = vpop.f32.mrb[189].mxu0  ;;  %v16866_v39 = vpack.c.bf16 %v8466_v48, %v8465_v51  ;;  %9418 = vbcast.lane.b32.xlu1 %v9416_v11, 256  ;;  %9422 = vbcast.lane.b32.xlu0 %v9416_v11, 264  ;;  %v18957_v51 = vld [vmem:[#allocation61_spill] sm:$0xff]  ;;  %v18959_v11 = vld [vmem:[#allocation51_spill] sm:$0xff] }
 0x95a   : > { %v8112_v31 = vpop.f32.mrb[190].mxu0  ;;  %v7865_v48 = vadd.f32 %v16596_v8, %v18957_v51  ;;  %v18958_v46 = vld [vmem:[#allocation59_spill] sm:$0xff] }
 0x95b   : > { %v8399_v27 = vadd.f32 %v18952_v36, %v8110_v35  ;;  %v8113_v33 = vadd.f32 %v16596_v8, %v8112_v31  ;;  %v8114_v49 = vpop.f32.mrb[191].mxu0  ;;  %v9438_v35 = vrot.slane %v16840_v21, %v16830_v53  ;;  %v7878_v31 = vadd.f32 %v16596_v8, %v18958_v46  ;;  %v18960_v51 = vld [vmem:[#allocation91_spill] sm:$0xff] }
 0x95c   : > { %v7886_v36 = vadd.f32 %v16596_v8, %v18959_v11 }
 0x95d   : > { %v8402_v5 = vadd.f32 %v18953_v41, %v8113_v33  ;;  %v8467_v47 = vmax.f32 %v8399_v27, 0.0  ;;  %9429 = vbcast.lane.b32.xlu1 %v9427_v12, 256  ;;  %9433 = vbcast.lane.b32.xlu0 %v9427_v12, 264  ;;  %v9264_v12 = vld [vmem:[%s16770_s23 + $0x10] sm:$0xff] }
 0x95e   : > { %v9482_v32 = vrot.slane %v9264_v12, %v16798_v0  ;;  %v9504_v56 = vrot.slane %v9264_v12, %v16814_v54 }
 0x95f   : > { %v8468_v19 = vmax.f32 %v8402_v5, 0.0 }
 0x960   : > { %v12021_v23 = vpop.f32.mrb[192].mxu0 }
 0x961   : > { %v16881_v24 = vpack.c.bf16 %v8468_v19, %v8467_v47  ;;  %v8159_v59 = vadd.f32 %v12021_v23, %v7870_v6  ;;  %v8150_v1 = vpop.f32.mrb[193].mxu0  ;;  %9440 = vbcast.lane.b32.xlu1 %v9438_v35, 256  ;;  %9444 = vbcast.lane.b32.xlu0 %v9438_v35, 264  ;;  %v9449_v6 = vrot.slane %v9264_v12, %v16773_v55 }
 0x962   : > { %v8151_v4 = vadd.f32 %v8150_v1, %v7862_v45  ;;  %v12022_v17 = vpop.f32.mrb[194].mxu0  ;;  %v9460_v47 = vrot.slane %v9264_v12, %v16782_v18  ;;  %v9471_v19 = vrot.slane %v9264_v12, %v16792_v61  ;;  %v9493_v45 = vrot.slane %v9264_v12, %v16808_v43  ;;  %v9265_v1 = vld [vmem:[%s16770_s23 + $0x18] sm:$0xff] }
 0x963   : > { %18956 = vst [vmem:[#allocation28_spill] sm:$0xff] %v16881_v24  ;;  %v8407_v27 = vmax.f32 %v8159_v59, 0.0  ;;  %v8162_v33 = vadd.f32 %v12022_v17, %v7873_v26  ;;  %v8153_v49 = vpop.f32.mrb[195].mxu0  ;;  %v9515_v26 = vrot.slane %v9264_v12, %v16824_v52  ;;  %v9526_v59 = vrot.slane %v9264_v12, %v16830_v53 }
 0x964   : > { %v8405_v41 = vmax.f32 %v8151_v4, 0.0  ;;  %v8154_v5 = vadd.f32 %v8153_v49, %v7865_v48  ;;  %v7889_v48 = vadd.f32 %v16596_v8, %v18960_v51  ;;  %v9548_v17 = vrot.slane %v9265_v1, %v16782_v18 }
 0x965   : > { %v8408_v21 = vmax.f32 %v8162_v33, 0.0  ;;  %v9559_v35 = vrot.slane %v9265_v1, %v16792_v61  ;;  %9451 = vbcast.lane.b32.xlu1 %v9449_v6, 256  ;;  %9455 = vbcast.lane.b32.xlu0 %v9449_v6, 264  ;;  %v9570_v33 = vrot.slane %v9265_v1, %v16798_v0  ;;  %v9581_v49 = vrot.slane %v9265_v1, %v16808_v43 }
 0x966   : > { %v8406_v23 = vmax.f32 %v8154_v5, 0.0  ;;  %v9592_v12 = vrot.slane %v9265_v1, %v16814_v54  ;;  %v9603_v24 = vrot.slane %v9265_v1, %v16824_v52 }
 0x967   : > { %v8470_v4 = vpack.c.bf16 %v8408_v21, %v8407_v27  ;;  %v9614_v27 = vrot.slane %v9265_v1, %v16830_v53  ;;  %v18961_v21 = vld [vmem:[#allocation36_spill] sm:$0xff] }
 0x968   : > { %v8469_v46 = vpack.c.bf16 %v8406_v23, %v8405_v41  ;;  %v12025_v11 = vpop.f32.mrb[196].mxu0  ;;  %v7881_v18 = vadd.f32 %v16596_v8, %v18961_v21  ;;  %v9537_v8 = vrot.slane %v9265_v1, %v16773_v55  ;;  %v16982_v55 = vld [vmem:[%s17490_s9] ss:$0 sm:$0xff] }
 0x969   : > { %v8175_v5 = vadd.f32 %v12025_v11, %v7886_v36  ;;  %v8166_v37 = vpop.f32.mrb[197].mxu0  ;;  %9462 = vbcast.lane.b32.xlu1 %v9460_v47, 256  ;;  %9466 = vbcast.lane.b32.xlu0 %v9460_v47, 264 }
 0x96a   : > { %v8167_v61 = vadd.f32 %v8166_v37, %v7878_v31  ;;  %v12026_v41 = vpop.f32.mrb[198].mxu0  ;;  %12099 = vmatprep.mubr.bf16.mxu1 %v8469_v46 }
 0x96b   : > { %v8178_v23 = vadd.f32 %v12026_v41, %v7889_v48  ;;  %v8169_v6 = vpop.f32.mrb[199].mxu0  ;;  %12100 = vmatmul.mubr.bf16.vlgmr.msra.gmra.mrb[120].mxu1 %v8470_v4  ;;  %v8411_v43 = vmax.f32 %v8175_v5, 0.0 }
 0x96c   : > { %v8170_v0 = vadd.f32 %v8169_v6, %v7881_v18  ;;  %v8409_v51 = vmax.f32 %v8167_v61, 0.0 }
 0x96d   : > { %v8412_v36 = vmax.f32 %v8178_v23, 0.0  ;;  %9473 = vbcast.lane.b32.xlu1 %v9471_v19, 256  ;;  %9477 = vbcast.lane.b32.xlu0 %v9471_v19, 264 }
 0x96e   : > { %v8410_v54 = vmax.f32 %v8170_v0, 0.0 }
 0x96f   : > { %v8472_v11 = vpack.c.bf16 %v8412_v36, %v8411_v43 }
 0x970   : > { %v8471_v52 = vpack.c.bf16 %v8410_v54, %v8409_v51 }
 0x971   : > { %9484 = vbcast.lane.b32.xlu1 %v9482_v32, 256  ;;  %9488 = vbcast.lane.b32.xlu0 %v9482_v32, 264 }
 0x972   : > { %12103 = vmatprep.mubr.bf16.mxu1 %v8471_v52 }
 0x973   : > { %12104 = vmatmul.mubr.bf16.gmra.mrb[124].mxu1 %v8472_v11 }
 0x974   : > { %12107 = vmatprep.mubr.bf16.mxu1 %v16612_v29  ;;  %v18962_v29 = vld [vmem:[#allocation28_spill] sm:$0xff] }
 0x975   : > { %9495 = vbcast.lane.b32.xlu1 %v9493_v45, 256  ;;  %9499 = vbcast.lane.b32.xlu0 %v9493_v45, 264 }
 0x979   : > { %9506 = vbcast.lane.b32.xlu1 %v9504_v56, 256  ;;  %9510 = vbcast.lane.b32.xlu0 %v9504_v56, 264 }
 0x97b   : > { %12108 = vmatmul.mubr.bf16.gmra.mrb[128].mxu1 %v16626_v38  ;;  %v16941_v38 = vpop.permute.xlu1 %9131 }
 0x97c   : > { %12111 = vmatprep.mubr.bf16.mxu1 %v16639_v50 }
 0x97d   : > { %9517 = vbcast.lane.b32.xlu1 %v9515_v26, 256  ;;  %9521 = vbcast.lane.b32.xlu0 %v9515_v26, 264 }
 0x981   : > { %9528 = vbcast.lane.b32.xlu1 %v9526_v59, 256  ;;  %9532 = vbcast.lane.b32.xlu0 %v9526_v59, 264 }
 0x983   : > { %12112 = vmatmul.mubr.bf16.gmra.mrb[132].mxu1 %v16644_v57 }
 0x984   : > { %12115 = vmatprep.mubr.bf16.mxu1 %v16654_v9 }
 0x985   : > { %9539 = vbcast.lane.b32.xlu1 %v9537_v8, 256  ;;  %9543 = vbcast.lane.b32.xlu0 %v9537_v8, 264 }
 0x989   : > { %9550 = vbcast.lane.b32.xlu1 %v9548_v17, 256  ;;  %9554 = vbcast.lane.b32.xlu0 %v9548_v17, 264 }
 0x98b   : > { %12116 = vmatmul.mubr.bf16.gmra.mrb[136].mxu1 %v16659_v7 }
 0x98c   : > { %12119 = vmatprep.mubr.bf16.mxu1 %v16669_v34 }
 0x98d   : > { %9561 = vbcast.lane.b32.xlu1 %v9559_v35, 256  ;;  %9565 = vbcast.lane.b32.xlu0 %v9559_v35, 264 }
 0x991   : > { %9572 = vbcast.lane.b32.xlu1 %v9570_v33, 256  ;;  %9576 = vbcast.lane.b32.xlu0 %v9570_v33, 264 }
 0x993   : > { %12120 = vmatmul.mubr.bf16.gmra.mrb[140].mxu1 %v16674_v40 }
 0x994   : > { %12123 = vmatprep.mubr.bf16.mxu1 %v16684_v62 }
 0x995   : > { %9583 = vbcast.lane.b32.xlu1 %v9581_v49, 256  ;;  %9587 = vbcast.lane.b32.xlu0 %v9581_v49, 264 }
 0x997   : > { %v16943_v50 = vpop.permute.xlu0 %9275  ;;  %v16945_v57 = vpop.permute.xlu1 %9279 }
 0x999   : > { %9594 = vbcast.lane.b32.xlu1 %v9592_v12, 256  ;;  %9598 = vbcast.lane.b32.xlu0 %v9592_v12, 264 }
 0x99b   : > { %12124 = vmatmul.mubr.bf16.gmra.mrb[144].mxu1 %v16689_v44  ;;  %v16947_v9 = vpop.permute.xlu0 %9290  ;;  %v16949_v7 = vpop.permute.xlu1 %9286 }
 0x99c   : > { %12127 = vmatprep.mubr.bf16.mxu1 %v16699_v10 }
 0x99d   : > { %9605 = vbcast.lane.b32.xlu1 %v9603_v24, 256  ;;  %9609 = vbcast.lane.b32.xlu0 %v9603_v24, 264 }
 0x99f   : > { %v16951_v34 = vpop.permute.xlu0 %9301  ;;  %v16953_v40 = vpop.permute.xlu1 %9297 }
 0x9a1   : > { %9616 = vbcast.lane.b32.xlu1 %v9614_v27, 256  ;;  %9620 = vbcast.lane.b32.xlu0 %v9614_v27, 264 }
 0x9a3   : > { %12128 = vmatmul.mubr.bf16.gmra.mrb[148].mxu1 %v16704_v14  ;;  %v16955_v62 = vpop.permute.xlu0 %9312  ;;  %v16957_v44 = vpop.permute.xlu1 %9308 }
 0x9a4   : > { %12131 = vmatprep.mubr.bf16.mxu1 %v16714_v2 }
 0x9a7   : > { %v16959_v10 = vpop.permute.xlu0 %9323  ;;  %v16961_v14 = vpop.permute.xlu1 %9319 }
 0x9ab   : > { %12132 = vmatmul.mubr.bf16.gmra.mrb[152].mxu1 %v16719_v22  ;;  %v16963_v2 = vpop.permute.xlu0 %9334  ;;  %v16965_v22 = vpop.permute.xlu1 %9330 }
 0x9ac   : > { %12135 = vmatprep.mubr.bf16.mxu1 %v16726_v42 }
 0x9af   : > { %v16967_v42 = vpop.permute.xlu0 %9345 }
 0x9b3   : > { %12136 = vmatmul.mubr.bf16.gmra.mrb[156].mxu1 %v16731_v30  ;;  %v16969_v30 = vpop.permute.xlu1 %9341 }
 0x9b4   : > { %12139 = vmatprep.mubr.bf16.mxu1 %v16738_v16  ;;  %v16974_v16 = vld [vmem:[%s17489_s8] ss:$0 sm:$0xff] }
 0x9bb   : > { %12140 = vmatmul.mubr.bf16.gmra.mrb[160].mxu1 %v16743_v28  ;;  %v16976_v28 = vpop.permute.xlu0 %9356 }
 0x9bc   : > { %12143 = vmatprep.mubr.bf16.mxu1 %v16750_v3 }
 0x9bf   : > { %v16990_v31 = vpop.permute.xlu0 %9367 }
 0x9c3   : > { %12144 = vmatmul.mubr.bf16.gmra.mrb[164].mxu1 %v16757_v20  ;;  %v17000_v49 = vpop.permute.xlu0 %9378 }
 0x9c4   : > { %12147 = vmatprep.mubr.bf16.mxu1 %v16785_v60 }
 0x9c7   : > { %v17009_v36 = vpop.permute.xlu0 %9389 }
 0x9cb   : > { %12148 = vmatmul.mubr.bf16.gmra.mrb[168].mxu1 %v16800_v15 }
 0x9cc   : > { %12151 = vmatprep.mubr.bf16.mxu1 %v16817_v13  ;;  %v16985_v13 = vpop.permute.xlu1 %9352 }
 0x9d0   : > { %v16993_v56 = vpop.permute.xlu1 %9363 }
 0x9d3   : > { %12152 = vmatmul.mubr.bf16.gmra.mrb[172].mxu1 %v16832_v63 }
 0x9d4   : > { %12155 = vmatprep.mubr.bf16.mxu1 %v16846_v25  ;;  %v17004_v18 = vpop.permute.xlu1 %9374 }
 0x9db   : > { %12156 = vmatmul.mubr.bf16.gmra.mrb[176].mxu1 %v16855_v58 }
 0x9dc   : > { %12159 = vmatprep.mubr.bf16.mxu1 %v16866_v39 }
 0x9e3   : > { %12160 = vmatmul.mubr.bf16.gmra.mrb[180].mxu1 %v18962_v29 }
 0xa3e   : > { %v12101_v3 = vpop.f32.mrb[120].mxu1 }
 0xa3f   : > { %v8615_v20 = vadd.f32 %v12101_v3, %v16974_v16  ;;  %v8606_v37 = vpop.f32.mrb[121].mxu1  ;;  %v17014_v3 = vpop.permute.xlu1 %9385 }
 0xa40   : > { %v8607_v60 = vadd.f32 %v16974_v16, %v8606_v37  ;;  %v12102_v15 = vpop.f32.mrb[122].mxu1 }
 0xa41   : > { %v8863_v53 = vmax.f32 %v8615_v20, 0.0  ;;  %v8609_v63 = vpop.f32.mrb[123].mxu1  ;;  %v8618_v25 = vadd.f32 %v12102_v15, %v16974_v16 }
 0xa42   : > { %v8610_v58 = vadd.f32 %v16974_v16, %v8609_v63  ;;  %v8861_v24 = vmax.f32 %v8607_v60, 0.0 }
 0xa43   : > { %v8934_v39 = vmul.f32 %v16982_v55, %v8863_v53  ;;  %v8864_v19 = vmax.f32 %v8618_v25, 0.0  ;;  %v17018_v53 = vpop.permute.xlu0 %9400 }
 0xa44   : > { %v8862_v47 = vmax.f32 %v8610_v58, 0.0  ;;  %v8932_v26 = vmul.f32 %v16982_v55, %v8861_v24 }
 0xa45   : > { %9000 = vadd.xlane.f32.xlu0 %v8934_v39  ;;  %v8935_v33 = vmul.f32 %v16982_v55, %v8864_v19 }
 0xa46   : > { %v8933_v32 = vmul.f32 %v16982_v55, %v8862_v47  ;;  %v12105_v45 = vpop.f32.mrb[124].mxu1 }
 0xa47   : > { %v8631_v59 = vadd.f32 %v12105_v45, %v16974_v16  ;;  %v8622_v1 = vpop.f32.mrb[125].mxu1  ;;  %v17024_v45 = vpop.permute.xlu1 %9396 }
 0xa48   : > { %v8623_v48 = vadd.f32 %v16974_v16, %v8622_v1  ;;  %v12106_v4 = vpop.f32.mrb[126].mxu1  ;;  %8998 = vadd.xlane.f32.xlu1 %v8933_v32 }
 0xa49   : > { %v8867_v17 = vmax.f32 %v8631_v59, 0.0  ;;  %v8634_v35 = vadd.f32 %v12106_v4, %v16974_v16  ;;  %v8625_v46 = vpop.f32.mrb[127].mxu1  ;;  %8996 = vadd.xlane.f32.xlu0 %v8932_v26 }
 0xa4a   : > { %v8865_v12 = vmax.f32 %v8623_v48, 0.0  ;;  %v8626_v21 = vadd.f32 %v16974_v16, %v8625_v46 }
 0xa4b   : > { %v8938_v5 = vmul.f32 %v16982_v55, %v8867_v17  ;;  %v8868_v27 = vmax.f32 %v8634_v35, 0.0 }
 0xa4c   : > { %v8936_v41 = vmul.f32 %v16982_v55, %v8865_v12  ;;  %v8866_v6 = vmax.f32 %v8626_v21, 0.0  ;;  %v17032_v12 = vpop.permute.xlu1 %9407 }
 0xa4d   : > { %9008 = vadd.xlane.f32.xlu1 %v8938_v5  ;;  %9002 = vadd.xlane.f32.xlu0 %v8935_v33  ;;  %v8939_v23 = vmul.f32 %v16982_v55, %v8868_v27  ;;  %v17030_v33 = vpop.permute.xlu0 %9411 }
 0xa4e   : > { %v12109_v61 = vpop.f32.mrb[128].mxu1  ;;  %v8937_v20 = vmul.f32 %v16982_v55, %v8866_v6 }
 0xa4f   : > { %v8647_v0 = vadd.f32 %v12109_v61, %v16974_v16  ;;  %v8638_v43 = vpop.f32.mrb[129].mxu1 }
 0xa50   : > { %v8639_v51 = vadd.f32 %v16974_v16, %v8638_v43  ;;  %v12110_v54 = vpop.f32.mrb[130].mxu1 }
 0xa51   : > { %v8871_v11 = vmax.f32 %v8647_v0, 0.0  ;;  %v8650_v52 = vadd.f32 %v12110_v54, %v16974_v16  ;;  %v8641_v8 = vpop.f32.mrb[131].mxu1  ;;  %9004 = vadd.xlane.f32.xlu1 %v8936_v41  ;;  %9010 = vadd.xlane.f32.xlu0 %v8939_v23 }
 0xa52   : > { %v8642_v29 = vadd.f32 %v16974_v16, %v8641_v8  ;;  %v8869_v60 = vmax.f32 %v8639_v51, 0.0 }
 0xa53   : > { %v8942_v37 = vmul.f32 %v16982_v55, %v8871_v11  ;;  %v8872_v15 = vmax.f32 %v8650_v52, 0.0  ;;  %v17039_v11 = vpop.permute.xlu0 %9422 }
 0xa54   : > { %v8870_v63 = vmax.f32 %v8642_v29, 0.0  ;;  %v8940_v58 = vmul.f32 %v16982_v55, %v8869_v60  ;;  %v17044_v60 = vpop.permute.xlu1 %9418 }
 0xa55   : > { %9016 = vadd.xlane.f32.xlu1 %v8942_v37  ;;  %9006 = vadd.xlane.f32.xlu0 %v8937_v20  ;;  %v8943_v39 = vmul.f32 %v16982_v55, %v8872_v15 }
 0xa56   : > { %v12113_v25 = vpop.f32.mrb[132].mxu1  ;;  %v8941_v48 = vmul.f32 %v16982_v55, %v8870_v63 }
 0xa57   : > { %v8663_v24 = vadd.f32 %v12113_v25, %v16974_v16  ;;  %v8654_v47 = vpop.f32.mrb[133].mxu1 }
 0xa58   : > { %v8655_v19 = vadd.f32 %v16974_v16, %v8654_v47  ;;  %v12114_v32 = vpop.f32.mrb[134].mxu1  ;;  %v17049_v47 = vpop.permute.xlu0 %9433 }
 0xa59   : > { %v8875_v26 = vmax.f32 %v8663_v24, 0.0  ;;  %v8666_v59 = vadd.f32 %v12114_v32, %v16974_v16  ;;  %v8657_v1 = vpop.f32.mrb[135].mxu1  ;;  %9012 = vadd.xlane.f32.xlu1 %v8940_v58  ;;  %9018 = vadd.xlane.f32.xlu0 %v8943_v39 }
 0xa5a   : > { %v8873_v17 = vmax.f32 %v8655_v19, 0.0  ;;  %v8658_v46 = vadd.f32 %v16974_v16, %v8657_v1 }
 0xa5b   : > { %v8946_v4 = vmul.f32 %v16982_v55, %v8875_v26  ;;  %v8876_v35 = vmax.f32 %v8666_v59, 0.0 }
 0xa5c   : > { %v8944_v27 = vmul.f32 %v16982_v55, %v8873_v17  ;;  %v8874_v61 = vmax.f32 %v8658_v46, 0.0 }
 0xa5d   : > { %9024 = vadd.xlane.f32.xlu1 %v8946_v4  ;;  %9014 = vadd.xlane.f32.xlu0 %v8941_v48  ;;  %v8947_v21 = vmul.f32 %v16982_v55, %v8876_v35  ;;  %v17054_v4 = vpop.permute.xlu1 %9429 }
 0xa5e   : > { %v12117_v5 = vpop.f32.mrb[136].mxu1  ;;  %v8945_v8 = vmul.f32 %v16982_v55, %v8874_v61 }
 0xa5f   : > { %v8679_v41 = vadd.f32 %v12117_v5, %v16974_v16  ;;  %v8670_v23 = vpop.f32.mrb[137].mxu1 }
 0xa60   : > { %v8671_v6 = vadd.f32 %v16974_v16, %v8670_v23  ;;  %v12118_v0 = vpop.f32.mrb[138].mxu1 }
 0xa61   : > { %v8879_v43 = vmax.f32 %v8679_v41, 0.0  ;;  %v8682_v51 = vadd.f32 %v12118_v0, %v16974_v16  ;;  %v8673_v54 = vpop.f32.mrb[139].mxu1  ;;  %9020 = vadd.xlane.f32.xlu1 %v8944_v27  ;;  %9026 = vadd.xlane.f32.xlu0 %v8947_v21  ;;  %v17058_v27 = vpop.permute.xlu0 %9444 }
 0xa62   : > { %v8674_v52 = vadd.f32 %v16974_v16, %v8673_v54  ;;  %v8877_v20 = vmax.f32 %v8671_v6, 0.0  ;;  %v17064_v54 = vpop.permute.xlu1 %9440 }
 0xa63   : > { %v8950_v29 = vmul.f32 %v16982_v55, %v8879_v43  ;;  %v8880_v37 = vmax.f32 %v8682_v51, 0.0 }
 0xa64   : > { %v8878_v15 = vmax.f32 %v8674_v52, 0.0  ;;  %v8948_v25 = vmul.f32 %v16982_v55, %v8877_v20 }
 0xa65   : > { %9032 = vadd.xlane.f32.xlu1 %v8950_v29  ;;  %9022 = vadd.xlane.f32.xlu0 %v8945_v8  ;;  %v8951_v58 = vmul.f32 %v16982_v55, %v8880_v37 }
 0xa66   : > { %v12121_v63 = vpop.f32.mrb[140].mxu1  ;;  %v8949_v48 = vmul.f32 %v16982_v55, %v8878_v15 }
 0xa67   : > { %v8695_v39 = vadd.f32 %v12121_v63, %v16974_v16  ;;  %v8686_v24 = vpop.f32.mrb[141].mxu1 }
 0xa68   : > { %v8687_v19 = vadd.f32 %v16974_v16, %v8686_v24  ;;  %v12122_v32 = vpop.f32.mrb[142].mxu1 }
 0xa69   : > { %v8883_v26 = vmax.f32 %v8695_v39, 0.0  ;;  %v8698_v59 = vadd.f32 %v12122_v32, %v16974_v16  ;;  %v8689_v1 = vpop.f32.mrb[143].mxu1  ;;  %9028 = vadd.xlane.f32.xlu1 %v8948_v25  ;;  %9034 = vadd.xlane.f32.xlu0 %v8951_v58  ;;  %v17070_v58 = vpop.permute.xlu0 %9455 }
 0xa6a   : > { %v8881_v35 = vmax.f32 %v8687_v19, 0.0  ;;  %v8690_v5 = vadd.f32 %v16974_v16, %v8689_v1  ;;  %v17072_v19 = vpop.permute.xlu1 %9451 }
 0xa6b   : > { %v8954_v17 = vmul.f32 %v16982_v55, %v8883_v26  ;;  %v8884_v46 = vmax.f32 %v8698_v59, 0.0 }
 0xa6c   : > { %v8952_v61 = vmul.f32 %v16982_v55, %v8881_v35  ;;  %v8882_v23 = vmax.f32 %v8690_v5, 0.0 }
 0xa6d   : > { %9040 = vadd.xlane.f32.xlu1 %v8954_v17  ;;  %9030 = vadd.xlane.f32.xlu0 %v8949_v48  ;;  %v8955_v41 = vmul.f32 %v16982_v55, %v8884_v46 }
 0xa6e   : > { %v12125_v21 = vpop.f32.mrb[144].mxu1  ;;  %v8953_v37 = vmul.f32 %v16982_v55, %v8882_v23 }
 0xa6f   : > { %v8711_v6 = vadd.f32 %v12125_v21, %v16974_v16  ;;  %v8702_v0 = vpop.f32.mrb[145].mxu1  ;;  %v17079_v21 = vpop.permute.xlu0 %9466 }
 0xa70   : > { %v8703_v43 = vadd.f32 %v16974_v16, %v8702_v0  ;;  %v12126_v51 = vpop.f32.mrb[146].mxu1 }
 0xa71   : > { %v8887_v52 = vmax.f32 %v8711_v6, 0.0  ;;  %v8714_v8 = vadd.f32 %v12126_v51, %v16974_v16  ;;  %v8705_v29 = vpop.f32.mrb[147].mxu1  ;;  %9036 = vadd.xlane.f32.xlu1 %v8952_v61  ;;  %9042 = vadd.xlane.f32.xlu0 %v8955_v41 }
 0xa72   : > { %v8706_v20 = vadd.f32 %v16974_v16, %v8705_v29  ;;  %v8885_v63 = vmax.f32 %v8703_v43, 0.0  ;;  %v17084_v43 = vpop.permute.xlu1 %9462 }
 0xa73   : > { %v8958_v15 = vmul.f32 %v16982_v55, %v8887_v52  ;;  %v8888_v25 = vmax.f32 %v8714_v8, 0.0 }
 0xa74   : > { %v8886_v39 = vmax.f32 %v8706_v20, 0.0  ;;  %v8956_v32 = vmul.f32 %v16982_v55, %v8885_v63 }
 0xa75   : > { %9048 = vadd.xlane.f32.xlu1 %v8958_v15  ;;  %9038 = vadd.xlane.f32.xlu0 %v8953_v37  ;;  %v8959_v26 = vmul.f32 %v16982_v55, %v8888_v25  ;;  %v17089_v15 = vpop.permute.xlu0 %9477 }
 0xa76   : > { %v12129_v24 = vpop.f32.mrb[148].mxu1  ;;  %v8957_v61 = vmul.f32 %v16982_v55, %v8886_v39 }
 0xa77   : > { %v8727_v59 = vadd.f32 %v12129_v24, %v16974_v16  ;;  %v8718_v1 = vpop.f32.mrb[149].mxu1 }
 0xa78   : > { %v8719_v48 = vadd.f32 %v16974_v16, %v8718_v1  ;;  %v12130_v17 = vpop.f32.mrb[150].mxu1 }
 0xa79   : > { %v8891_v35 = vmax.f32 %v8727_v59, 0.0  ;;  %v8730_v46 = vadd.f32 %v12130_v17, %v16974_v16  ;;  %v8721_v5 = vpop.f32.mrb[151].mxu1  ;;  %9044 = vadd.xlane.f32.xlu1 %v8956_v32  ;;  %9050 = vadd.xlane.f32.xlu0 %v8959_v26  ;;  %v17094_v59 = vpop.permute.xlu1 %9473 }
 0xa7a   : > { %v8889_v23 = vmax.f32 %v8719_v48, 0.0  ;;  %v8722_v0 = vadd.f32 %v16974_v16, %v8721_v5 }
 0xa7b   : > { %v8962_v41 = vmul.f32 %v16982_v55, %v8891_v35  ;;  %v8892_v6 = vmax.f32 %v8730_v46, 0.0  ;;  %v17098_v46 = vpop.permute.xlu0 %9488 }
 0xa7c   : > { %v8960_v52 = vmul.f32 %v16982_v55, %v8889_v23  ;;  %v8890_v29 = vmax.f32 %v8722_v0, 0.0 }
 0xa7d   : > { %9056 = vadd.xlane.f32.xlu1 %v8962_v41  ;;  %9046 = vadd.xlane.f32.xlu0 %v8957_v61  ;;  %v8963_v8 = vmul.f32 %v16982_v55, %v8892_v6 }
 0xa7e   : > { %v12133_v51 = vpop.f32.mrb[152].mxu1  ;;  %v8961_v1 = vmul.f32 %v16982_v55, %v8890_v29 }
 0xa7f   : > { %v8743_v20 = vadd.f32 %v12133_v51, %v16974_v16  ;;  %v8734_v37 = vpop.f32.mrb[153].mxu1 }
 0xa80   : > { %v8735_v63 = vadd.f32 %v16974_v16, %v8734_v37  ;;  %v12134_v25 = vpop.f32.mrb[154].mxu1 }
 0xa81   : > { %v8895_v39 = vmax.f32 %v8743_v20, 0.0  ;;  %v8746_v24 = vadd.f32 %v12134_v25, %v16974_v16  ;;  %v8737_v32 = vpop.f32.mrb[155].mxu1  ;;  %9052 = vadd.xlane.f32.xlu1 %v8960_v52  ;;  %9058 = vadd.xlane.f32.xlu0 %v8963_v8  ;;  %v17104_v8 = vpop.permute.xlu1 %9484 }
 0xa82   : > { %v8738_v26 = vadd.f32 %v16974_v16, %v8737_v32  ;;  %v8893_v17 = vmax.f32 %v8735_v63, 0.0 }
 0xa83   : > { %v8966_v48 = vmul.f32 %v16982_v55, %v8895_v39  ;;  %v8896_v35 = vmax.f32 %v8746_v24, 0.0 }
 0xa84   : > { %v8894_v5 = vmax.f32 %v8738_v26, 0.0  ;;  %v8964_v41 = vmul.f32 %v16982_v55, %v8893_v17  ;;  %v17110_v26 = vpop.permute.xlu0 %9499 }
 0xa85   : > { %9064 = vadd.xlane.f32.xlu1 %v8966_v48  ;;  %9054 = vadd.xlane.f32.xlu0 %v8961_v1  ;;  %v8967_v23 = vmul.f32 %v16982_v55, %v8896_v35  ;;  %18963 = vst [vmem:[#allocation56_spill] sm:$0xff] %v17110_v26  ;;  %v17112_v48 = vpop.permute.xlu1 %9495 }
 0xa86   : > { %v12137_v61 = vpop.f32.mrb[156].mxu1  ;;  %v8965_v63 = vmul.f32 %v16982_v55, %v8894_v5 }
 0xa87   : > { %v8759_v6 = vadd.f32 %v12137_v61, %v16974_v16  ;;  %v8750_v0 = vpop.f32.mrb[157].mxu1 }
 0xa88   : > { %v8751_v51 = vadd.f32 %v16974_v16, %v8750_v0  ;;  %v12138_v52 = vpop.f32.mrb[158].mxu1 }
 0xa89   : > { %v8899_v29 = vmax.f32 %v8759_v6, 0.0  ;;  %v8762_v20 = vadd.f32 %v12138_v52, %v16974_v16  ;;  %v8753_v37 = vpop.f32.mrb[159].mxu1  ;;  %9060 = vadd.xlane.f32.xlu1 %v8964_v41  ;;  %9066 = vadd.xlane.f32.xlu0 %v8967_v23 }
 0xa8a   : > { %v8897_v39 = vmax.f32 %v8751_v51, 0.0  ;;  %v8754_v32 = vadd.f32 %v16974_v16, %v8753_v37 }
 0xa8b   : > { %v8970_v25 = vmul.f32 %v16982_v55, %v8899_v29  ;;  %v8900_v24 = vmax.f32 %v8762_v20, 0.0  ;;  %v17119_v29 = vpop.permute.xlu0 %9510 }
 0xa8c   : > { %v8968_v17 = vmul.f32 %v16982_v55, %v8897_v39  ;;  %v8898_v61 = vmax.f32 %v8754_v32, 0.0 }
 0xa8d   : > { %9072 = vadd.xlane.f32.xlu1 %v8970_v25  ;;  %9062 = vadd.xlane.f32.xlu0 %v8965_v63  ;;  %v8971_v35 = vmul.f32 %v16982_v55, %v8900_v24  ;;  %v17124_v24 = vpop.permute.xlu1 %9506 }
 0xa8e   : > { %v12141_v1 = vpop.f32.mrb[160].mxu1  ;;  %v8969_v37 = vmul.f32 %v16982_v55, %v8898_v61 }
 0xa8f   : > { %v8775_v5 = vadd.f32 %v12141_v1, %v16974_v16  ;;  %v8766_v41 = vpop.f32.mrb[161].mxu1 }
 0xa90   : > { %v8767_v23 = vadd.f32 %v16974_v16, %v8766_v41  ;;  %v12142_v6 = vpop.f32.mrb[162].mxu1 }
 0xa91   : > { %v8903_v0 = vmax.f32 %v8775_v5, 0.0  ;;  %v8778_v51 = vadd.f32 %v12142_v6, %v16974_v16  ;;  %v8769_v52 = vpop.f32.mrb[163].mxu1  ;;  %9068 = vadd.xlane.f32.xlu1 %v8968_v17  ;;  %9074 = vadd.xlane.f32.xlu0 %v8971_v35  ;;  %v17129_v6 = vpop.permute.xlu0 %9521 }
 0xa92   : > { %v8770_v20 = vadd.f32 %v16974_v16, %v8769_v52  ;;  %v8901_v25 = vmax.f32 %v8767_v23, 0.0  ;;  %18964 = vst [vmem:[#allocation41_spill] sm:$0xff] %v17129_v6 }
 0xa93   : > { %v8974_v63 = vmul.f32 %v16982_v55, %v8903_v0  ;;  %v8904_v39 = vmax.f32 %v8778_v51, 0.0 }
 0xa94   : > { %v8902_v32 = vmax.f32 %v8770_v20, 0.0  ;;  %v8972_v5 = vmul.f32 %v16982_v55, %v8901_v25 }
 0xa95   : > { %9080 = vadd.xlane.f32.xlu1 %v8974_v63  ;;  %9070 = vadd.xlane.f32.xlu0 %v8969_v37  ;;  %v8975_v17 = vmul.f32 %v16982_v55, %v8904_v39  ;;  %v17134_v37 = vpop.permute.xlu1 %9517 }
 0xa96   : > { %v12145_v1 = vpop.f32.mrb[164].mxu1  ;;  %v8973_v20 = vmul.f32 %v16982_v55, %v8902_v32  ;;  %18965 = vst [vmem:[#allocation49_spill] sm:$0xff] %v17134_v37 }
 0xa97   : > { %v8791_v35 = vadd.f32 %v12145_v1, %v16974_v16  ;;  %v8782_v41 = vpop.f32.mrb[165].mxu1 }
 0xa98   : > { %v8783_v61 = vadd.f32 %v16974_v16, %v8782_v41  ;;  %v12146_v0 = vpop.f32.mrb[166].mxu1  ;;  %v17138_v41 = vpop.permute.xlu0 %9532 }
 0xa99   : > { %v8907_v23 = vmax.f32 %v8791_v35, 0.0  ;;  %v8794_v51 = vadd.f32 %v12146_v0, %v16974_v16  ;;  %v8785_v52 = vpop.f32.mrb[167].mxu1  ;;  %9076 = vadd.xlane.f32.xlu1 %v8972_v5  ;;  %9082 = vadd.xlane.f32.xlu0 %v8975_v17  ;;  %18966 = vst [vmem:[#allocation57_spill] sm:$0xff] %v17138_v41 }
 0xa9a   : > { %v8905_v25 = vmax.f32 %v8783_v61, 0.0  ;;  %v8786_v1 = vadd.f32 %v16974_v16, %v8785_v52  ;;  %v17144_v61 = vpop.permute.xlu1 %9528 }
 0xa9b   : > { %v8978_v63 = vmul.f32 %v16982_v55, %v8907_v23  ;;  %v8908_v39 = vmax.f32 %v8794_v51, 0.0  ;;  %18967 = vst [vmem:[#allocation58_spill] sm:$0xff] %v17144_v61 }
 0xa9c   : > { %v8976_v0 = vmul.f32 %v16982_v55, %v8905_v25  ;;  %v8906_v17 = vmax.f32 %v8786_v1, 0.0  ;;  %v17150_v41 = vpop.permute.xlu0 %9543 }
 0xa9d   : > { %9088 = vadd.xlane.f32.xlu1 %v8978_v63  ;;  %9078 = vadd.xlane.f32.xlu0 %v8973_v20  ;;  %v8979_v5 = vmul.f32 %v16982_v55, %v8908_v39  ;;  %18968 = vst [vmem:[#allocation35_spill] sm:$0xff] %v17150_v41 }
 0xa9e   : > { %v12149_v35 = vpop.f32.mrb[168].mxu1  ;;  %v8977_v25 = vmul.f32 %v16982_v55, %v8906_v17 }
 0xa9f   : > { %v8807_v32 = vadd.f32 %v12149_v35, %v16974_v16  ;;  %v8798_v6 = vpop.f32.mrb[169].mxu1 }
 0xaa0   : > { %v8799_v37 = vadd.f32 %v16974_v16, %v8798_v6  ;;  %v12150_v23 = vpop.f32.mrb[170].mxu1 }
 0xaa1   : > { %v8911_v51 = vmax.f32 %v8807_v32, 0.0  ;;  %v8810_v52 = vadd.f32 %v12150_v23, %v16974_v16  ;;  %v8801_v20 = vpop.f32.mrb[171].mxu1  ;;  %9084 = vadd.xlane.f32.xlu1 %v8976_v0  ;;  %9090 = vadd.xlane.f32.xlu0 %v8979_v5  ;;  %v17152_v32 = vpop.permute.xlu1 %9539 }
 0xaa2   : > { %v8802_v63 = vadd.f32 %v16974_v16, %v8801_v20  ;;  %v8909_v1 = vmax.f32 %v8799_v37, 0.0  ;;  %18969 = vst [vmem:[#allocation62_spill] sm:$0xff] %v17152_v32 }
 0xaa3   : > { %v8982_v39 = vmul.f32 %v16982_v55, %v8911_v51  ;;  %v8912_v35 = vmax.f32 %v8810_v52, 0.0 }
 0xaa4   : > { %v8910_v6 = vmax.f32 %v8802_v63, 0.0  ;;  %v8980_v23 = vmul.f32 %v16982_v55, %v8909_v1  ;;  %v17159_v63 = vpop.permute.xlu0 %9554 }
 0xaa5   : > { %9096 = vadd.xlane.f32.xlu1 %v8982_v39  ;;  %9086 = vadd.xlane.f32.xlu0 %v8977_v25  ;;  %v8983_v0 = vmul.f32 %v16982_v55, %v8912_v35  ;;  %18970 = vst [vmem:[#allocation48_spill] sm:$0xff] %v17159_v63  ;;  %v17164_v32 = vpop.permute.xlu1 %9550 }
 0xaa6   : > { %v12153_v26 = vpop.f32.mrb[172].mxu1  ;;  %v8981_v25 = vmul.f32 %v16982_v55, %v8910_v6  ;;  %18971 = vst [vmem:[#allocation63_spill] sm:$0xff] %v17164_v32 }
 0xaa7   : > { %v8823_v5 = vadd.f32 %v12153_v26, %v16974_v16  ;;  %v8814_v20 = vpop.f32.mrb[173].mxu1 }
 0xaa8   : > { %v8815_v17 = vadd.f32 %v16974_v16, %v8814_v20  ;;  %v12154_v51 = vpop.f32.mrb[174].mxu1  ;;  %v17169_v6 = vpop.permute.xlu0 %9565 }
 0xaa9   : > { %v8915_v37 = vmax.f32 %v8823_v5, 0.0  ;;  %v8826_v52 = vadd.f32 %v12154_v51, %v16974_v16  ;;  %v8817_v41 = vpop.f32.mrb[175].mxu1  ;;  %9092 = vadd.xlane.f32.xlu1 %v8980_v23  ;;  %9098 = vadd.xlane.f32.xlu0 %v8983_v0  ;;  %18972 = vst [vmem:[#allocation34_spill] sm:$0xff] %v17169_v6 }
 0xaaa   : > { %v8913_v1 = vmax.f32 %v8815_v17, 0.0  ;;  %v8818_v26 = vadd.f32 %v16974_v16, %v8817_v41 }
 0xaab   : > { %v8986_v39 = vmul.f32 %v16982_v55, %v8915_v37  ;;  %v8916_v35 = vmax.f32 %v8826_v52, 0.0 }
 0xaac   : > { %v8984_v20 = vmul.f32 %v16982_v55, %v8913_v1  ;;  %v8914_v0 = vmax.f32 %v8818_v26, 0.0 }
 0xaad   : > { %9104 = vadd.xlane.f32.xlu1 %v8986_v39  ;;  %9094 = vadd.xlane.f32.xlu0 %v8981_v25  ;;  %v8987_v23 = vmul.f32 %v16982_v55, %v8916_v35  ;;  %v17174_v39 = vpop.permute.xlu1 %9561 }
 0xaae   : > { %v12157_v5 = vpop.f32.mrb[176].mxu1  ;;  %18973 = vst [vmem:[#allocation42_spill] sm:$0xff] %v17174_v39  ;;  %v8985_v1 = vmul.f32 %v16982_v55, %v8914_v0 }
 0xaaf   : > { %v8839_v51 = vadd.f32 %v12157_v5, %v16974_v16  ;;  %v8830_v63 = vpop.f32.mrb[177].mxu1 }
 0xab0   : > { %v8831_v17 = vadd.f32 %v16974_v16, %v8830_v63  ;;  %v12158_v37 = vpop.f32.mrb[178].mxu1  ;;  %v17178_v63 = vpop.permute.xlu0 %9576 }
 0xab1   : > { %v8919_v52 = vmax.f32 %v8839_v51, 0.0  ;;  %v8842_v41 = vadd.f32 %v12158_v37, %v16974_v16  ;;  %v8833_v32 = vpop.f32.mrb[179].mxu1  ;;  %9100 = vadd.xlane.f32.xlu1 %v8984_v20  ;;  %9106 = vadd.xlane.f32.xlu0 %v8987_v23  ;;  %v17184_v61 = vpop.permute.xlu1 %9572 }
 0xab2   : > { %v8834_v25 = vadd.f32 %v16974_v16, %v8833_v32  ;;  %v8917_v26 = vmax.f32 %v8831_v17, 0.0 }
 0xab3   : > { %v8990_v35 = vmul.f32 %v16982_v55, %v8919_v52  ;;  %v8920_v5 = vmax.f32 %v8842_v41, 0.0 }
 0xab4   : > { %v8918_v51 = vmax.f32 %v8834_v25, 0.0  ;;  %v8988_v37 = vmul.f32 %v16982_v55, %v8917_v26 }
 0xab5   : > { %9112 = vadd.xlane.f32.xlu1 %v8990_v35  ;;  %9102 = vadd.xlane.f32.xlu0 %v8985_v1  ;;  %v8991_v20 = vmul.f32 %v16982_v55, %v8920_v5  ;;  %v17190_v5 = vpop.permute.xlu0 %9587 }
 0xab6   : > { %v12161_v6 = vpop.f32.mrb[180].mxu1  ;;  %v8989_v25 = vmul.f32 %v16982_v55, %v8918_v51  ;;  %18974 = vst [vmem:[#allocation66_spill] sm:$0xff] %v17190_v5 }
 0xab7   : > { %v8855_v32 = vadd.f32 %v12161_v6, %v16974_v16  ;;  %v8846_v23 = vpop.f32.mrb[181].mxu1 }
 0xab8   : > { %v8847_v39 = vadd.f32 %v16974_v16, %v8846_v23  ;;  %v12162_v0 = vpop.f32.mrb[182].mxu1  ;;  %v17192_v23 = vpop.permute.xlu1 %9583 }
 0xab9   : > { %v8923_v17 = vmax.f32 %v8855_v32, 0.0  ;;  %v8858_v52 = vadd.f32 %v12162_v0, %v16974_v16  ;;  %9108 = vadd.xlane.f32.xlu1 %v8988_v37  ;;  %v8849_v41 = vpop.f32.mrb[183].mxu1  ;;  %9114 = vadd.xlane.f32.xlu0 %v8991_v20  ;;  %v17196_v51 = vpop.permute.xlu0 %9598 }
 0xaba   : > { %v8921_v35 = vmax.f32 %v8847_v39, 0.0  ;;  %v8850_v6 = vadd.f32 %v16974_v16, %v8849_v41  ;;  %18975 = vst [vmem:[#allocation46_spill] sm:$0xff] %v17196_v51 }
 0xabb   : > { %v8994_v1 = vmul.f32 %v16982_v55, %v8923_v17  ;;  %v8924_v26 = vmax.f32 %v8858_v52, 0.0 }
 0xabc   : > { %v8992_v32 = vmul.f32 %v16982_v55, %v8921_v35  ;;  %v8922_v0 = vmax.f32 %v8850_v6, 0.0  ;;  %v17199_v20 = vpop.permute.xlu1 %9594 }
 0xabd   : > { %9120 = vadd.xlane.f32.xlu1 %v8994_v1  ;;  %9110 = vadd.xlane.f32.xlu0 %v8989_v25  ;;  %v8995_v37 = vmul.f32 %v16982_v55, %v8924_v26  ;;  %v17201_v16 = vpop.permute.xlu0 %9609 }
 0xabe   : > { %v8993_v39 = vmul.f32 %v16982_v55, %v8922_v0  ;;  %18976 = vst [vmem:[#allocation64_spill] sm:$0xff] %v17201_v16 }
 0xac0   : > { %v17203_v17 = vpop.permute.xlu1 %9605 }
 0xac1   : > { %9116 = vadd.xlane.f32.xlu1 %v8992_v32  ;;  %9122 = vadd.xlane.f32.xlu0 %v8995_v37  ;;  %18977 = vst [vmem:[#allocation65_spill] sm:$0xff] %v17203_v17  ;;  %v17205_v52 = vpop.permute.xlu0 %9620 }
 0xac2   : > { %18978 = vst [vmem:[#allocation67_spill] sm:$0xff] %v17205_v52 }
 0xac4   : > { %v17207_v41 = vpop.permute.xlu1 %9616 }
 0xac5   : > { %9118 = vadd.xlane.f32.xlu0 %v8993_v39  ;;  %18979 = vst [vmem:[#allocation47_spill] sm:$0xff] %v17207_v41 }
 0xad2   : > { %v9001_v25 = vpop.xlane.xlu0 %9000 }
 0xad3   : > { %v9136_v1 = vadd.f32 %v16941_v38, %v9001_v25 }
 0xad5   : > { %v9200_v35 = vmax.f32 %v9136_v1, 0.0  ;;  %v8999_v26 = vpop.xlane.xlu1 %8998 }
 0xad6   : > { %v8997_v6 = vpop.xlane.xlu0 %8996  ;;  %v9135_v0 = vadd.f32 %v16941_v38, %v8999_v26 }
 0xad7   : > { %v9688_v32 = vmul.f32 %v16949_v7, %v9200_v35  ;;  %v9134_v55 = vadd.f32 %v16941_v38, %v8997_v6 }
 0xad8   : > { %v9199_v5 = vmax.f32 %v9135_v0, 0.0 }
 0xad9   : > { %v9198_v37 = vmax.f32 %v9134_v55, 0.0  ;;  %9821 = vperm.xlu1 %12191, %v9688_v32  }
 0xada   : > { %v9009_v39 = vpop.xlane.xlu1 %9008  ;;  %v9003_v16 = vpop.xlane.xlu0 %9002 }
 0xadb   : > { %v9686_v52 = vmul.f32 %v16943_v50, %v9198_v37  ;;  %v9140_v41 = vadd.f32 %v16941_v38, %v9009_v39  ;;  %v9137_v17 = vadd.f32 %v16941_v38, %v9003_v16 }
 0xadd   : > { %v9204_v25 = vmax.f32 %v9140_v41, 0.0  ;;  %v9201_v1 = vmax.f32 %v9137_v17, 0.0  ;;  %9815 = vperm.xlu1 %12191, %v9686_v52   ;;  %v9687_v17 = vmul.f32 %v16945_v57, %v9199_v5 }
 0xade   : > { %v9005_v51 = vpop.xlane.xlu1 %9004  ;;  %v9011_v7 = vpop.xlane.xlu0 %9010 }
 0xadf   : > { %v9692_v35 = vmul.f32 %v16957_v44, %v9204_v25  ;;  %v9689_v6 = vmul.f32 %v16947_v9, %v9201_v1  ;;  %v9138_v26 = vadd.f32 %v16941_v38, %v9005_v51  ;;  %v9141_v32 = vadd.f32 %v16941_v38, %v9011_v7 }
 0xae1   : > { %v9202_v55 = vmax.f32 %v9138_v26, 0.0  ;;  %9833 = vperm.xlu1 %12191, %v9692_v35   ;;  %9824 = vperm.xlu0 %12190, %v9689_v6   ;;  %v9205_v50 = vmax.f32 %v9141_v32, 0.0 }
 0xae2   : > { %v9017_v37 = vpop.xlane.xlu1 %9016  ;;  %v9007_v16 = vpop.xlane.xlu0 %9006 }
 0xae3   : > { %v9690_v52 = vmul.f32 %v16953_v40, %v9202_v55  ;;  %v9144_v41 = vadd.f32 %v16941_v38, %v9017_v37  ;;  %v9139_v44 = vadd.f32 %v16941_v38, %v9007_v16  ;;  %v9693_v9 = vmul.f32 %v16955_v62, %v9205_v50 }
 0xae5   : > { %v9208_v0 = vmax.f32 %v9144_v41, 0.0  ;;  %9827 = vperm.xlu1 %12191, %v9690_v52   ;;  %9818 = vperm.xlu0 %12190, %v9687_v17   ;;  %v9203_v1 = vmax.f32 %v9139_v44, 0.0 }
 0xae6   : > { %v9013_v51 = vpop.xlane.xlu1 %9012  ;;  %v9019_v39 = vpop.xlane.xlu0 %9018 }
 0xae7   : > { %v9696_v25 = vmul.f32 %v16965_v22, %v9208_v0  ;;  %v9142_v7 = vadd.f32 %v16941_v38, %v9013_v51  ;;  %v9145_v57 = vadd.f32 %v16941_v38, %v9019_v39  ;;  %v9691_v26 = vmul.f32 %v16951_v34, %v9203_v1 }
 0xae9   : > { %v9206_v5 = vmax.f32 %v9142_v7, 0.0  ;;  %9845 = vperm.xlu1 %12191, %v9696_v25   ;;  %9836 = vperm.xlu0 %12190, %v9693_v9   ;;  %v9209_v40 = vmax.f32 %v9145_v57, 0.0 }
 0xaea   : > { %v9025_v35 = vpop.xlane.xlu1 %9024  ;;  %v9015_v6 = vpop.xlane.xlu0 %9014 }
 0xaeb   : > { %v9694_v32 = vmul.f32 %v16961_v14, %v9206_v5  ;;  %v9148_v62 = vadd.f32 %v16941_v38, %v9025_v35  ;;  %v9143_v55 = vadd.f32 %v16941_v38, %v9015_v6  ;;  %v9697_v50 = vmul.f32 %v16963_v2, %v9209_v40 }
 0xaed   : > { %v9212_v22 = vmax.f32 %v9148_v62, 0.0  ;;  %9839 = vperm.xlu1 %12191, %v9694_v32   ;;  %9830 = vperm.xlu0 %12190, %v9691_v26   ;;  %v9207_v52 = vmax.f32 %v9143_v55, 0.0 }
 0xaee   : > { %v9021_v37 = vpop.xlane.xlu1 %9020  ;;  %v9027_v16 = vpop.xlane.xlu0 %9026 }
 0xaef   : > { %v9700_v17 = vmul.f32 %v16985_v13, %v9212_v22  ;;  %v9146_v41 = vadd.f32 %v16941_v38, %v9021_v37  ;;  %v9149_v34 = vadd.f32 %v16941_v38, %v9027_v16  ;;  %v9695_v51 = vmul.f32 %v16959_v10, %v9207_v52 }
 0xaf1   : > { %v9210_v44 = vmax.f32 %v9146_v41, 0.0  ;;  %9857 = vperm.xlu1 %12191, %v9700_v17   ;;  %9848 = vperm.xlu0 %12190, %v9697_v50   ;;  %v9213_v14 = vmax.f32 %v9149_v34, 0.0 }
 0xaf2   : > { %v9033_v0 = vpop.xlane.xlu1 %9032  ;;  %v9023_v9 = vpop.xlane.xlu0 %9022 }
 0xaf3   : > { %v9698_v39 = vmul.f32 %v16969_v30, %v9210_v44  ;;  %v9152_v2 = vadd.f32 %v16941_v38, %v9033_v0  ;;  %v9147_v25 = vadd.f32 %v16941_v38, %v9023_v9  ;;  %v9701_v1 = vmul.f32 %v16976_v28, %v9213_v14 }
 0xaf5   : > { %v9216_v13 = vmax.f32 %v9152_v2, 0.0  ;;  %9851 = vperm.xlu1 %12191, %v9698_v39   ;;  %9842 = vperm.xlu0 %12190, %v9695_v51   ;;  %v9211_v40 = vmax.f32 %v9147_v25, 0.0 }
 0xaf6   : > { %v9029_v7 = vpop.xlane.xlu1 %9028  ;;  %v9035_v57 = vpop.xlane.xlu0 %9034 }
 0xaf7   : > { %v9704_v5 = vmul.f32 %v17004_v18, %v9216_v13  ;;  %v9150_v35 = vadd.f32 %v16941_v38, %v9029_v7  ;;  %v9153_v10 = vadd.f32 %v16941_v38, %v9035_v57  ;;  %v9699_v62 = vmul.f32 %v16967_v42, %v9211_v40 }
 0xaf9   : > { %v9214_v6 = vmax.f32 %v9150_v35, 0.0  ;;  %9869 = vperm.xlu1 %12191, %v9704_v5   ;;  %9860 = vperm.xlu0 %12190, %v9701_v1   ;;  %v9217_v30 = vmax.f32 %v9153_v10, 0.0 }
 0xafa   : > { %v9041_v26 = vpop.xlane.xlu1 %9040  ;;  %v9031_v32 = vpop.xlane.xlu0 %9030 }
 0xafb   : > { %v9702_v55 = vmul.f32 %v16993_v56, %v9214_v6  ;;  %v9156_v28 = vadd.f32 %v16941_v38, %v9041_v26  ;;  %v9151_v22 = vadd.f32 %v16941_v38, %v9031_v32  ;;  %v9705_v50 = vmul.f32 %v17000_v49, %v9217_v30 }
 0xafd   : > { %v9220_v18 = vmax.f32 %v9156_v28, 0.0  ;;  %9863 = vperm.xlu1 %12191, %v9702_v55   ;;  %9854 = vperm.xlu0 %12190, %v9699_v62   ;;  %v9215_v52 = vmax.f32 %v9151_v22, 0.0 }
 0xafe   : > { %v9037_v37 = vpop.xlane.xlu1 %9036  ;;  %v9043_v16 = vpop.xlane.xlu0 %9042 }
 0xaff   : > { %v9708_v17 = vmul.f32 %v17024_v45, %v9220_v18  ;;  %v9154_v41 = vadd.f32 %v16941_v38, %v9037_v37  ;;  %v9157_v42 = vadd.f32 %v16941_v38, %v9043_v16  ;;  %v9703_v0 = vmul.f32 %v16990_v31, %v9215_v52 }
 0xb01   : > { %v9218_v34 = vmax.f32 %v9154_v41, 0.0  ;;  %9881 = vperm.xlu1 %12191, %v9708_v17   ;;  %9872 = vperm.xlu0 %12190, %v9705_v50   ;;  %v9221_v56 = vmax.f32 %v9157_v42, 0.0 }
 0xb02   : > { %v9049_v44 = vpop.xlane.xlu1 %9048  ;;  %v9039_v14 = vpop.xlane.xlu0 %9038 }
 0xb03   : > { %v9706_v9 = vmul.f32 %v17014_v3, %v9218_v34  ;;  %v9160_v49 = vadd.f32 %v16941_v38, %v9049_v44  ;;  %v9155_v51 = vadd.f32 %v16941_v38, %v9039_v14  ;;  %v9709_v39 = vmul.f32 %v17018_v53, %v9221_v56 }
 0xb05   : > { %v9224_v45 = vmax.f32 %v9160_v49, 0.0  ;;  %9875 = vperm.xlu1 %12191, %v9706_v9   ;;  %9866 = vperm.xlu0 %12190, %v9703_v0   ;;  %v9219_v1 = vmax.f32 %v9155_v51, 0.0 }
 0xb06   : > { %v9045_v2 = vpop.xlane.xlu1 %9044  ;;  %v9051_v25 = vpop.xlane.xlu0 %9050 }
 0xb07   : > { %v9712_v13 = vmul.f32 %v17044_v60, %v9224_v45  ;;  %v9158_v7 = vadd.f32 %v16941_v38, %v9045_v2  ;;  %v9161_v31 = vadd.f32 %v16941_v38, %v9051_v25  ;;  %v9707_v35 = vmul.f32 %v17009_v36, %v9219_v1 }
 0xb09   : > { %v9222_v57 = vmax.f32 %v9158_v7, 0.0  ;;  %9893 = vperm.xlu1 %12191, %v9712_v13   ;;  %9884 = vperm.xlu0 %12190, %v9709_v39   ;;  %v9225_v3 = vmax.f32 %v9161_v31, 0.0 }
 0xb0a   : > { %v9057_v5 = vpop.xlane.xlu1 %9056  ;;  %v9047_v40 = vpop.xlane.xlu0 %9046 }
 0xb0b   : > { %v9710_v10 = vmul.f32 %v17032_v12, %v9222_v57  ;;  %v9164_v53 = vadd.f32 %v16941_v38, %v9057_v5  ;;  %v9159_v6 = vadd.f32 %v16941_v38, %v9047_v40  ;;  %v9713_v30 = vmul.f32 %v17039_v11, %v9225_v3 }
 0xb0d   : > { %v9228_v60 = vmax.f32 %v9164_v53, 0.0  ;;  %9887 = vperm.xlu1 %12191, %v9710_v10   ;;  %9878 = vperm.xlu0 %12190, %v9707_v35   ;;  %v9223_v55 = vmax.f32 %v9159_v6, 0.0 }
 0xb0e   : > { %v9053_v26 = vpop.xlane.xlu1 %9052  ;;  %v9059_v32 = vpop.xlane.xlu0 %9058 }
 0xb0f   : > { %v9716_v62 = vmul.f32 %v17064_v54, %v9228_v60  ;;  %v9162_v28 = vadd.f32 %v16941_v38, %v9053_v26  ;;  %v9165_v36 = vadd.f32 %v16941_v38, %v9059_v32  ;;  %v9711_v37 = vmul.f32 %v17030_v33, %v9223_v55 }
 0xb11   : > { %v9226_v22 = vmax.f32 %v9162_v28, 0.0  ;;  %9905 = vperm.xlu1 %12191, %v9716_v62   ;;  %9896 = vperm.xlu0 %12190, %v9713_v30   ;;  %v9229_v12 = vmax.f32 %v9165_v36, 0.0 }
 0xb12   : > { %v9065_v18 = vpop.xlane.xlu1 %9064  ;;  %v9055_v50 = vpop.xlane.xlu0 %9054 }
 0xb13   : > { %v9714_v16 = vmul.f32 %v17054_v4, %v9226_v22  ;;  %v9168_v11 = vadd.f32 %v16941_v38, %v9065_v18  ;;  %v9163_v17 = vadd.f32 %v16941_v38, %v9055_v50  ;;  %v9717_v52 = vmul.f32 %v17058_v27, %v9229_v12 }
 0xb15   : > { %v9232_v54 = vmax.f32 %v9168_v11, 0.0  ;;  %9899 = vperm.xlu1 %12191, %v9714_v16   ;;  %9890 = vperm.xlu0 %12190, %v9711_v37   ;;  %v9227_v56 = vmax.f32 %v9163_v17, 0.0  ;;  %v18980_v37 = vld [vmem:[#allocation58_spill] sm:$0xff] }
 0xb16   : > { %v9061_v41 = vpop.xlane.xlu1 %9060  ;;  %v9067_v42 = vpop.xlane.xlu0 %9066 }
 0xb17   : > { %v9720_v34 = vmul.f32 %v17084_v43, %v9232_v54  ;;  %v9166_v44 = vadd.f32 %v16941_v38, %v9061_v41  ;;  %v9169_v33 = vadd.f32 %v16941_v38, %v9067_v42  ;;  %v9715_v49 = vmul.f32 %v17049_v47, %v9227_v56  ;;  %v18981_v42 = vld [vmem:[#allocation56_spill] sm:$0xff]  ;;  %v18982_v56 = vld [vmem:[#allocation49_spill] sm:$0xff] }
 0xb19   : > { %v9230_v14 = vmax.f32 %v9166_v44, 0.0  ;;  %9917 = vperm.xlu1 %12191, %v9720_v34   ;;  %9908 = vperm.xlu0 %12190, %v9717_v52   ;;  %v9233_v4 = vmax.f32 %v9169_v33, 0.0 }
 0xb1a   : > { %v9073_v0 = vpop.xlane.xlu1 %9072  ;;  %v9063_v9 = vpop.xlane.xlu0 %9062 }
 0xb1b   : > { %v9718_v51 = vmul.f32 %v17072_v19, %v9230_v14  ;;  %v9172_v27 = vadd.f32 %v16941_v38, %v9073_v0  ;;  %v9167_v45 = vadd.f32 %v16941_v38, %v9063_v9  ;;  %v9721_v39 = vmul.f32 %v17079_v21, %v9233_v4  ;;  %v18983_v4 = vld [vmem:[#allocation57_spill] sm:$0xff] }
 0xb1d   : > { %v9236_v43 = vmax.f32 %v9172_v27, 0.0  ;;  %9911 = vperm.xlu1 %12191, %v9718_v51   ;;  %9902 = vperm.xlu0 %12190, %v9715_v49   ;;  %v9231_v1 = vmax.f32 %v9167_v45, 0.0  ;;  %v18984_v51 = vld [vmem:[#allocation63_spill] sm:$0xff] }
 0xb1e   : > { %v9069_v2 = vpop.xlane.xlu1 %9068  ;;  %v9075_v25 = vpop.xlane.xlu0 %9074 }
 0xb1f   : > { %v9724_v13 = vmul.f32 %v17104_v8, %v9236_v43  ;;  %v9170_v7 = vadd.f32 %v16941_v38, %v9069_v2  ;;  %v9173_v47 = vadd.f32 %v16941_v38, %v9075_v25  ;;  %v9719_v5 = vmul.f32 %v17070_v58, %v9231_v1 }
 0xb21   : > { %v9234_v31 = vmax.f32 %v9170_v7, 0.0  ;;  %9929 = vperm.xlu1 %12191, %v9724_v13   ;;  %9920 = vperm.xlu0 %12190, %v9721_v39   ;;  %v9237_v19 = vmax.f32 %v9173_v47, 0.0  ;;  %v18985_v7 = vld [vmem:[#allocation41_spill] sm:$0xff] }
 0xb22   : > { %v9081_v57 = vpop.xlane.xlu1 %9080  ;;  %v9071_v3 = vpop.xlane.xlu0 %9070 }
 0xb23   : > { %v9722_v40 = vmul.f32 %v17094_v59, %v9234_v31  ;;  %v9176_v21 = vadd.f32 %v16941_v38, %v9081_v57  ;;  %v9171_v35 = vadd.f32 %v16941_v38, %v9071_v3  ;;  %v9725_v10 = vmul.f32 %v17098_v46, %v9237_v19  ;;  %v18986_v31 = vld [vmem:[#allocation62_spill] sm:$0xff] }
 0xb25   : > { %v9240_v8 = vmax.f32 %v9176_v21, 0.0  ;;  %9923 = vperm.xlu1 %12191, %v9722_v40   ;;  %9914 = vperm.xlu0 %12190, %v9719_v5   ;;  %v9235_v30 = vmax.f32 %v9171_v35, 0.0  ;;  %v18987_v40 = vld [vmem:[#allocation48_spill] sm:$0xff] }
 0xb26   : > { %v9077_v53 = vpop.xlane.xlu1 %9076  ;;  %v9083_v6 = vpop.xlane.xlu0 %9082 }
 0xb27   : > { %v9728_v60 = vmul.f32 %v17124_v24, %v9240_v8  ;;  %v9174_v26 = vadd.f32 %v16941_v38, %v9077_v53  ;;  %v9177_v58 = vadd.f32 %v16941_v38, %v9083_v6  ;;  %v9723_v28 = vmul.f32 %v17089_v15, %v9235_v30 }
 0xb29   : > { %v9238_v32 = vmax.f32 %v9174_v26, 0.0  ;;  %9941 = vperm.xlu1 %12191, %v9728_v60   ;;  %9932 = vperm.xlu0 %12190, %v9725_v10   ;;  %v9241_v59 = vmax.f32 %v9177_v58, 0.0 }
 0xb2a   : > { %v9089_v62 = vpop.xlane.xlu1 %9088  ;;  %v9079_v55 = vpop.xlane.xlu0 %9078 }
 0xb2b   : > { %v9726_v36 = vmul.f32 %v17112_v48, %v9238_v32  ;;  %v9180_v46 = vadd.f32 %v16941_v38, %v9089_v62  ;;  %v9175_v22 = vadd.f32 %v16941_v38, %v9079_v55  ;;  %v9729_v12 = vmul.f32 %v17119_v29, %v9241_v59  ;;  %v18988_v59 = vld [vmem:[#allocation35_spill] sm:$0xff]  ;;  %v18989_v55 = vld [vmem:[#allocation42_spill] sm:$0xff] }
 0xb2d   : > { %v9244_v24 = vmax.f32 %v9180_v46, 0.0  ;;  %9935 = vperm.xlu1 %12191, %v9726_v36   ;;  %9926 = vperm.xlu0 %12190, %v9723_v28   ;;  %v9239_v11 = vmax.f32 %v9175_v22, 0.0 }
 0xb2e   : > { %v9085_v18 = vpop.xlane.xlu1 %9084  ;;  %v9091_v50 = vpop.xlane.xlu0 %9090 }
 0xb2f   : > { %v9732_v16 = vmul.f32 %v18980_v37, %v9244_v24  ;;  %v9178_v17 = vadd.f32 %v16941_v38, %v9085_v18  ;;  %v9181_v15 = vadd.f32 %v16941_v38, %v9091_v50  ;;  %v9727_v34 = vmul.f32 %v18981_v42, %v9239_v11 }
 0xb31   : > { %v9242_v54 = vmax.f32 %v9178_v17, 0.0  ;;  %9953 = vperm.xlu1 %12191, %v9732_v16   ;;  %9944 = vperm.xlu0 %12190, %v9729_v12   ;;  %v9245_v48 = vmax.f32 %v9181_v15, 0.0 }
 0xb32   : > { %v9097_v52 = vpop.xlane.xlu1 %9096  ;;  %v9087_v41 = vpop.xlane.xlu0 %9086 }
 0xb33   : > { %v9730_v44 = vmul.f32 %v18982_v56, %v9242_v54  ;;  %v9184_v29 = vadd.f32 %v16941_v38, %v9097_v52  ;;  %v9179_v33 = vadd.f32 %v16941_v38, %v9087_v41  ;;  %v9733_v0 = vmul.f32 %v18983_v4, %v9245_v48  ;;  %v18990_v54 = vld [vmem:[#allocation34_spill] sm:$0xff] }
 0xb34   : > { %v18991_v56 = vld [vmem:[#allocation46_spill] sm:$0xff] }
 0xb35   : > { %v9248_v14 = vmax.f32 %v9184_v29, 0.0  ;;  %9947 = vperm.xlu1 %12191, %v9730_v44   ;;  %9938 = vperm.xlu0 %12190, %v9727_v34   ;;  %v9243_v45 = vmax.f32 %v9179_v33, 0.0 }
 0xb36   : > { %v9093_v9 = vpop.xlane.xlu1 %9092  ;;  %v9099_v49 = vpop.xlane.xlu0 %9098 }
 0xb37   : > { %v9736_v27 = vmul.f32 %v18984_v51, %v9248_v14  ;;  %v9182_v43 = vadd.f32 %v16941_v38, %v9093_v9  ;;  %v9185_v39 = vadd.f32 %v16941_v38, %v9099_v49  ;;  %v9731_v47 = vmul.f32 %v18985_v7, %v9243_v45  ;;  %v18992_v9 = vld [vmem:[#allocation66_spill] sm:$0xff]  ;;  %v18993_v49 = vld [vmem:[#allocation65_spill] sm:$0xff] }
 0xb39   : > { %v9246_v2 = vmax.f32 %v9182_v43, 0.0  ;;  %9965 = vperm.xlu1 %12191, %v9736_v27   ;;  %9956 = vperm.xlu0 %12190, %v9733_v0   ;;  %v9249_v25 = vmax.f32 %v9185_v39, 0.0  ;;  %v18994_v39 = vld [vmem:[#allocation47_spill] sm:$0xff] }
 0xb3a   : > { %v9105_v13 = vpop.xlane.xlu1 %9104  ;;  %v9095_v1 = vpop.xlane.xlu0 %9094 }
 0xb3b   : > { %v9734_v19 = vmul.f32 %v18986_v31, %v9246_v2  ;;  %v9188_v57 = vadd.f32 %v16941_v38, %v9105_v13  ;;  %v9183_v3 = vadd.f32 %v16941_v38, %v9095_v1  ;;  %v9737_v21 = vmul.f32 %v18987_v40, %v9249_v25  ;;  %v18995_v13 = vld [vmem:[#allocation64_spill] sm:$0xff] }
 0xb3d   : > { %v9252_v5 = vmax.f32 %v9188_v57, 0.0  ;;  %9959 = vperm.xlu1 %12191, %v9734_v19   ;;  %9950 = vperm.xlu0 %12190, %v9731_v47   ;;  %v9247_v53 = vmax.f32 %v9183_v3, 0.0  ;;  %v18996_v47 = vld [vmem:[#allocation67_spill] sm:$0xff] }
 0xb3e   : > { %v9101_v35 = vpop.xlane.xlu1 %9100  ;;  %v9107_v8 = vpop.xlane.xlu0 %9106 }
 0xb3f   : > { %v9740_v10 = vmul.f32 %v17184_v61, %v9252_v5  ;;  %v9186_v6 = vadd.f32 %v16941_v38, %v9101_v35  ;;  %v9189_v60 = vadd.f32 %v16941_v38, %v9107_v8  ;;  %v9735_v62 = vmul.f32 %v18988_v59, %v9247_v53  ;;  %v18997_v35 = vld [vmem:[#allocation5_spill] sm:$0xff] }
 0xb40   : > { %v10010_v8 = vadd.s32 4294967288, %v18997_v35 }
 0xb41   : > { %v9250_v30 = vmax.f32 %v9186_v6, 0.0  ;;  %9977 = vperm.xlu1 %12191, %v9740_v10   ;;  %9968 = vperm.xlu0 %12190, %v9737_v21   ;;  %v9253_v26 = vmax.f32 %v9189_v60, 0.0  ;;  %v18998_v6 = vld [vmem:[#allocation6_spill] sm:$0xff] }
 0xb42   : > { %v9113_v58 = vpop.xlane.xlu1 %9112  ;;  %v9103_v32 = vpop.xlane.xlu0 %9102  ;;  %v17339_v60 = vsub.s32 %v10010_v8, %v18998_v6 }
 0xb43   : > { %v9738_v28 = vmul.f32 %v18989_v55, %v9250_v30  ;;  %v9192_v36 = vadd.f32 %v16941_v38, %v9113_v58  ;;  %v9187_v46 = vadd.f32 %v16941_v38, %v9103_v32  ;;  %v9741_v22 = vmul.f32 %v17178_v63, %v9253_v26 }
 0xb44   : > { %v17343_v30 = vsub.s32 %v18997_v35, %v18998_v6 }
 0xb45   : > { %v9256_v61 = vmax.f32 %v9192_v36, 0.0  ;;  %9971 = vperm.xlu1 %12191, %v9738_v28   ;;  %9962 = vperm.xlu0 %12190, %v9735_v62   ;;  %v9251_v50 = vmax.f32 %v9187_v46, 0.0 }
 0xb46   : > { %v9109_v24 = vpop.xlane.xlu1 %9108  ;;  %v9115_v12 = vpop.xlane.xlu0 %9114 }
 0xb47   : > { %v9744_v18 = vmul.f32 %v17199_v20, %v9256_v61  ;;  %v9190_v37 = vadd.f32 %v16941_v38, %v9109_v24  ;;  %v9193_v16 = vadd.f32 %v16941_v38, %v9115_v12  ;;  %v9739_v48 = vmul.f32 %v18990_v54, %v9251_v50 }
 0xb49   : > { %v9254_v11 = vmax.f32 %v9190_v37, 0.0  ;;  %9989 = vperm.xlu1 %12191, %v9744_v18   ;;  %9980 = vperm.xlu0 %12190, %v9741_v22   ;;  %v9257_v41 = vmax.f32 %v9193_v16, 0.0 }
 0xb4a   : > { %v9121_v17 = vpop.xlane.xlu1 %9120  ;;  %v9111_v15 = vpop.xlane.xlu0 %9110 }
 0xb4b   : > { %v9742_v52 = vmul.f32 %v17192_v23, %v9254_v11  ;;  %v9191_v63 = vadd.f32 %v16941_v38, %v9111_v15  ;;  %v9196_v20 = vadd.f32 %v16941_v38, %v9121_v17  ;;  %v9745_v44 = vmul.f32 %v18991_v56, %v9257_v41 }
 0xb4d   : > { %9983 = vperm.xlu1 %12191, %v9742_v52   ;;  %9974 = vperm.xlu0 %12190, %v9739_v48   ;;  %v9255_v29 = vmax.f32 %v9191_v63, 0.0  ;;  %v9260_v4 = vmax.f32 %v9196_v20, 0.0 }
 0xb4e   : > { %v9117_v42 = vpop.xlane.xlu1 %9116  ;;  %v9123_v34 = vpop.xlane.xlu0 %9122 }
 0xb4f   : > { %v9194_v33 = vadd.f32 %v16941_v38, %v9117_v42  ;;  %v9743_v23 = vmul.f32 %v18992_v9, %v9255_v29  ;;  %v9197_v27 = vadd.f32 %v16941_v38, %v9123_v34  ;;  %v9748_v2 = vmul.f32 %v18994_v39, %v9260_v4 }
 0xb51   : > { %v9258_v14 = vmax.f32 %v9194_v33, 0.0  ;;  %9992 = vperm.xlu0 %12190, %v9745_v44   ;;  %v9261_v25 = vmax.f32 %v9197_v27, 0.0 }
 0xb52   : > { %v9119_v0 = vpop.xlane.xlu0 %9118 }
 0xb53   : > { %v9746_v51 = vmul.f32 %v18993_v49, %v9258_v14  ;;  %v9195_v45 = vadd.f32 %v16941_v38, %v9119_v0  ;;  %v9749_v31 = vmul.f32 %v18996_v47, %v9261_v25 }
 0xb55   : > { %v9259_v43 = vmax.f32 %v9195_v45, 0.0  ;;  %9995 = vperm.xlu1 %12191, %v9746_v51   ;;  %9986 = vperm.xlu0 %12190, %v9743_v23  }
 0xb57   : > { %v9747_v1 = vmul.f32 %v18995_v13, %v9259_v43 }
 0xb58   : > { %v9822_v7 = vpop.permute.xlu1 %9821 }
 0xb59   : > { %10001 = vperm.xlu1 %12191, %v9748_v2   ;;  %9998 = vperm.xlu0 %12190, %v9747_v1   ;;  %v10020_v36 = vrot.slane %v9822_v7, %v17343_v30 }
 0xb5c   : > { %v9816_v19 = vpop.permute.xlu1 %9815 }
 0xb5d   : > { %10004 = vperm.xlu0 %12190, %v9749_v31   ;;  %v10009_v62 = vrot.slane %v9816_v19, %v17343_v30 }
 0xb60   : > { %v9834_v57 = vpop.permute.xlu1 %9833  ;;  %v9825_v3 = vpop.permute.xlu0 %9824 }
 0xb61   : > { %v10024_v55 = vrot.slane %v9825_v3, %v17339_v60  ;;  %v10038_v11 = vrot.slane %v9834_v57, %v17343_v30 }
 0xb63   : > { %v10025_v18 = vsel %vm10015_vm6, %v10024_v55, %v10020_v36 }
 0xb64   : > { %v9828_v5 = vpop.permute.xlu1 %9827  ;;  %v9819_v40 = vpop.permute.xlu0 %9818 }
 0xb65   : > { %v10014_v26 = vrot.slane %v9819_v40, %v17339_v60  ;;  %v10029_v28 = vrot.slane %v9828_v5, %v17343_v30 }
 0xb67   : > { %v10016_v46 = vsel %vm10015_vm6, %v10014_v26, %v10009_v62 }
 0xb68   : > { %v9846_v38 = vpop.permute.xlu1 %9845  ;;  %v9837_v21 = vpop.permute.xlu0 %9836  ;;  %v10297_v37 = vsel %vm10296_vm12, %v10025_v18, %v10016_v46 }
 0xb69   : > { %v10042_v50 = vrot.slane %v9837_v21, %v17339_v60  ;;  %v10056_v20 = vrot.slane %v9846_v38, %v17343_v30 }
 0xb6b   : > { %v10043_v52 = vsel %vm10015_vm6, %v10042_v50, %v10038_v11 }
 0xb6c   : > { %v9840_v10 = vpop.permute.xlu1 %9839  ;;  %v9831_v53 = vpop.permute.xlu0 %9830 }
 0xb6d   : > { %v10033_v59 = vrot.slane %v9831_v53, %v17339_v60  ;;  %v10047_v16 = vrot.slane %v9840_v10, %v17343_v30 }
 0xb6f   : > { %v10034_v24 = vsel %vm10015_vm6, %v10033_v59, %v10029_v28 }
 0xb70   : > { %v9858_v58 = vpop.permute.xlu1 %9857  ;;  %v9849_v32 = vpop.permute.xlu0 %9848  ;;  %v10299_v17 = vsel %vm10298_vm5, %v10034_v24, %v10297_v37 }
 0xb71   : > { %v10060_v41 = vrot.slane %v9849_v32, %v17339_v60  ;;  %v10301_v63 = vsel %vm10300_vm1, %v10043_v52, %v10299_v17  ;;  %v10074_v14 = vrot.slane %v9858_v58, %v17343_v30 }
 0xb73   : > { %v10061_v4 = vsel %vm10015_vm6, %v10060_v41, %v10056_v20 }
 0xb74   : > { %v9852_v61 = vpop.permute.xlu1 %9851  ;;  %v9843_v22 = vpop.permute.xlu0 %9842 }
 0xb75   : > { %v10051_v12 = vrot.slane %v9843_v22, %v17339_v60  ;;  %v10065_v29 = vrot.slane %v9852_v61, %v17343_v30 }
 0xb77   : > { %v10052_v48 = vsel %vm10015_vm6, %v10051_v12, %v10047_v16 }
 0xb78   : > { %v9870_v15 = vpop.permute.xlu1 %9869  ;;  %v9861_v54 = vpop.permute.xlu0 %9860  ;;  %v10303_v42 = vsel %vm10302_vm15, %v10052_v48, %v10301_v63 }
 0xb79   : > { %v10078_v34 = vrot.slane %v9861_v54, %v17339_v60  ;;  %v10305_v9 = vsel %vm10304_vm13, %v10061_v4, %v10303_v42  ;;  %v10092_v38 = vrot.slane %v9870_v15, %v17343_v30 }
 0xb7b   : > { %v10079_v51 = vsel %vm10015_vm6, %v10078_v34, %v10074_v14 }
 0xb7c   : > { %v9864_v56 = vpop.permute.xlu1 %9863  ;;  %v9855_v44 = vpop.permute.xlu0 %9854 }
 0xb7d   : > { %v10069_v33 = vrot.slane %v9855_v44, %v17339_v60  ;;  %v10083_v3 = vrot.slane %v9864_v56, %v17343_v30 }
 0xb7f   : > { %v10070_v0 = vsel %vm10015_vm6, %v10069_v33, %v10065_v29 }
 0xb80   : > { %v9882_v23 = vpop.permute.xlu1 %9881  ;;  %v9873_v49 = vpop.permute.xlu0 %9872  ;;  %v10307_v27 = vsel %vm10306_vm2, %v10070_v0, %v10305_v9 }
 0xb81   : > { %v10309_v45 = vsel %vm10308_vm11, %v10079_v51, %v10307_v27  ;;  %v10096_v5 = vrot.slane %v9873_v49, %v17339_v60  ;;  %v10110_v59 = vrot.slane %v9882_v23, %v17343_v30 }
 0xb82   : > { %v10336_v43 = vsel %vm10335_vm14, %v10309_v45, 0.0 }
 0xb83   : > { %10337 = vadd.xlane.f32.xlu1 %v10336_v43  ;;  %v10097_v6 = vsel %vm10015_vm6, %v10096_v5, %v10092_v38 }
 0xb84   : > { %v9876_v39 = vpop.permute.xlu1 %9875  ;;  %v9867_v2 = vpop.permute.xlu0 %9866 }
 0xb85   : > { %v10087_v47 = vrot.slane %v9867_v2, %v17339_v60  ;;  %v10101_v40 = vrot.slane %v9876_v39, %v17343_v30 }
 0xb87   : > { %v10088_v21 = vsel %vm10015_vm6, %v10087_v47, %v10083_v3 }
 0xb88   : > { %v9894_v25 = vpop.permute.xlu1 %9893  ;;  %v9885_v13 = vpop.permute.xlu0 %9884  ;;  %v10310_v58 = vsel %vm10296_vm12, %v10097_v6, %v10088_v21 }
 0xb89   : > { %v10114_v26 = vrot.slane %v9885_v13, %v17339_v60  ;;  %v10128_v24 = vrot.slane %v9894_v25, %v17343_v30 }
 0xb8b   : > { %v10115_v46 = vsel %vm10015_vm6, %v10114_v26, %v10110_v59 }
 0xb8c   : > { %v9888_v1 = vpop.permute.xlu1 %9887  ;;  %v9879_v7 = vpop.permute.xlu0 %9878 }
 0xb8d   : > { %v10105_v57 = vrot.slane %v9879_v7, %v17339_v60  ;;  %v10119_v32 = vrot.slane %v9888_v1, %v17343_v30 }
 0xb8f   : > { %v10106_v10 = vsel %vm10015_vm6, %v10105_v57, %v10101_v40 }
 0xb90   : > { %v9906_v31 = vpop.permute.xlu1 %9905  ;;  %v9897_v19 = vpop.permute.xlu0 %9896  ;;  %v10311_v62 = vsel %vm10298_vm5, %v10106_v10, %v10310_v58 }
 0xb91   : > { %v10132_v61 = vrot.slane %v9897_v19, %v17339_v60  ;;  %v10312_v22 = vsel %vm10300_vm1, %v10115_v46, %v10311_v62  ;;  %v10146_v17 = vrot.slane %v9906_v31, %v17343_v30 }
 0xb93   : > { %v10133_v15 = vsel %vm10015_vm6, %v10132_v61, %v10128_v24 }
 0xb94   : > { %v9900_v35 = vpop.permute.xlu1 %9899  ;;  %v9891_v8 = vpop.permute.xlu0 %9890 }
 0xb95   : > { %v10123_v53 = vrot.slane %v9891_v8, %v17339_v60  ;;  %v10137_v16 = vrot.slane %v9900_v35, %v17343_v30 }
 0xb97   : > { %v10124_v36 = vsel %vm10015_vm6, %v10123_v53, %v10119_v32 }
 0xb98   : > { %v9918_v55 = vpop.permute.xlu1 %9917  ;;  %v9909_v28 = vpop.permute.xlu0 %9908  ;;  %v10313_v12 = vsel %vm10302_vm15, %v10124_v36, %v10312_v22 }
 0xb99   : > { %v10150_v18 = vrot.slane %v9909_v28, %v17339_v60  ;;  %v10314_v48 = vsel %vm10304_vm13, %v10133_v15, %v10313_v12  ;;  %v10164_v43 = vrot.slane %v9918_v55, %v17343_v30 }
 0xb9b   : > { %v10151_v63 = vsel %vm10015_vm6, %v10150_v18, %v10146_v17 }
 0xb9c   : > { %v9912_v50 = vpop.permute.xlu1 %9911  ;;  %v9903_v37 = vpop.permute.xlu0 %9902 }
 0xb9d   : > { %v10141_v11 = vrot.slane %v9903_v37, %v17339_v60  ;;  %v10155_v51 = vrot.slane %v9912_v50, %v17343_v30 }
 0xb9f   : > { %v10142_v54 = vsel %vm10015_vm6, %v10141_v11, %v10137_v16 }
 0xba0   : > { %v9930_v52 = vpop.permute.xlu1 %9929  ;;  %v9921_v41 = vpop.permute.xlu0 %9920  ;;  %v10315_v20 = vsel %vm10306_vm2, %v10142_v54, %v10314_v48 }
 0xba1   : > { %v10316_v42 = vsel %vm10308_vm11, %v10151_v63, %v10315_v20  ;;  %v10168_v27 = vrot.slane %v9921_v41, %v17339_v60  ;;  %v10182_v57 = vrot.slane %v9930_v52, %v17343_v30 }
 0xba2   : > { %v10339_v34 = vsel %vm10335_vm14, %v10316_v42, 0.0 }
 0xba3   : > { %10340 = vadd.xlane.f32.xlu0 %v10339_v34  ;;  %v10169_v7 = vsel %vm10015_vm6, %v10168_v27, %v10164_v43 }
 0xba4   : > { %v9924_v56 = vpop.permute.xlu1 %9923  ;;  %v9915_v44 = vpop.permute.xlu0 %9914 }
 0xba5   : > { %v10159_v0 = vrot.slane %v9915_v44, %v17339_v60  ;;  %v10173_v45 = vrot.slane %v9924_v56, %v17343_v30 }
 0xba7   : > { %v10160_v39 = vsel %vm10015_vm6, %v10159_v0, %v10155_v51 }
 0xba8   : > { %v9942_v29 = vpop.permute.xlu1 %9941  ;;  %v9933_v33 = vpop.permute.xlu0 %9932  ;;  %v10317_v31 = vsel %vm10296_vm12, %v10169_v7, %v10160_v39 }
 0xba9   : > { %v10186_v47 = vrot.slane %v9933_v33, %v17339_v60  ;;  %v10200_v10 = vrot.slane %v9942_v29, %v17343_v30 }
 0xbab   : > { %v10187_v21 = vsel %vm10015_vm6, %v10186_v47, %v10182_v57 }
 0xbac   : > { %v9936_v14 = vpop.permute.xlu1 %9935  ;;  %v9927_v4 = vpop.permute.xlu0 %9926 }
 0xbad   : > { %v10177_v49 = vrot.slane %v9927_v4, %v17339_v60  ;;  %v10191_v19 = vrot.slane %v9936_v14, %v17343_v30 }
 0xbaf   : > { %v10178_v13 = vsel %vm10015_vm6, %v10177_v49, %v10173_v45 }
 0xbb0   : > { %v9954_v9 = vpop.permute.xlu1 %9953  ;;  %v9945_v23 = vpop.permute.xlu0 %9944  ;;  %v10318_v3 = vsel %vm10298_vm5, %v10178_v13, %v10317_v31 }
 0xbb1   : > { %v10204_v35 = vrot.slane %v9945_v23, %v17339_v60  ;;  %v10319_v8 = vsel %vm10300_vm1, %v10187_v21, %v10318_v3  ;;  %v10218_v62 = vrot.slane %v9954_v9, %v17343_v30 }
 0xbb3   : > { %v10205_v55 = vsel %vm10015_vm6, %v10204_v35, %v10200_v10  ;;  %v11376_v10 = vld [vmem:[#allocation4] ss:$0 sm:$0xff] }
 0xbb4   : > { %v9948_v2 = vpop.permute.xlu1 %9947  ;;  %v9939_v25 = vpop.permute.xlu0 %9938 }
 0xbb5   : > { %v10195_v1 = vrot.slane %v9939_v25, %v17339_v60  ;;  %v10209_v32 = vrot.slane %v9948_v2, %v17343_v30 }
 0xbb7   : > { %v10196_v38 = vsel %vm10015_vm6, %v10195_v1, %v10191_v19 }
 0xbb8   : > { %v9966_v5 = vpop.permute.xlu1 %9965  ;;  %v9957_v40 = vpop.permute.xlu0 %9956  ;;  %v10320_v53 = vsel %vm10302_vm15, %v10196_v38, %v10319_v8  ;;  %v11375_v8 = vld [vmem:[#allocation3] ss:$0 sm:$0xff] }
 0xbb9   : > { %v10222_v6 = vrot.slane %v9957_v40, %v17339_v60  ;;  %v10321_v36 = vsel %vm10304_vm13, %v10205_v55, %v10320_v53  ;;  %v10236_v42 = vrot.slane %v9966_v5, %v17343_v30 }
 0xbbb   : > { %v10223_v22 = vsel %vm10015_vm6, %v10222_v6, %v10218_v62 }
 0xbbc   : > { %v9960_v26 = vpop.permute.xlu1 %9959  ;;  %v9951_v58 = vpop.permute.xlu0 %9950 }
 0xbbd   : > { %v10213_v59 = vrot.slane %v9951_v58, %v17339_v60  ;;  %v10227_v41 = vrot.slane %v9960_v26, %v17343_v30 }
 0xbbf   : > { %v10214_v28 = vsel %vm10015_vm6, %v10213_v59, %v10209_v32 }
 0xbc0   : > { %v9978_v46 = vpop.permute.xlu1 %9977  ;;  %v9969_v61 = vpop.permute.xlu0 %9968  ;;  %v10322_v24 = vsel %vm10306_vm2, %v10214_v28, %v10321_v36 }
 0xbc1   : > { %v10323_v12 = vsel %vm10308_vm11, %v10223_v22, %v10322_v24  ;;  %v10240_v63 = vrot.slane %v9969_v61, %v17339_v60  ;;  %v10254_v23 = vrot.slane %v9978_v46, %v17343_v30 }
 0xbc2   : > { %v10342_v18 = vsel %vm10335_vm14, %v10323_v12, 0.0 }
 0xbc3   : > { %10343 = vadd.xlane.f32.xlu0 %v10342_v18  ;;  %v10241_v33 = vsel %vm10015_vm6, %v10240_v63, %v10236_v42 }
 0xbc4   : > { %v9972_v50 = vpop.permute.xlu1 %9971  ;;  %v9963_v37 = vpop.permute.xlu0 %9962 }
 0xbc5   : > { %v10231_v15 = vrot.slane %v9963_v37, %v17339_v60  ;;  %v10245_v20 = vrot.slane %v9972_v50, %v17343_v30 }
 0xbc7   : > { %v10232_v34 = vsel %vm10015_vm6, %v10231_v15, %v10227_v41 }
 0xbc8   : > { %v9981_v16 = vpop.permute.xlu0 %9980  ;;  %v9990_v11 = vpop.permute.xlu1 %9989  ;;  %v10324_v0 = vsel %vm10296_vm12, %v10241_v33, %v10232_v34 }
 0xbc9   : > { %v10258_v14 = vrot.slane %v9981_v16, %v17339_v60  ;;  %v10272_v1 = vrot.slane %v9990_v11, %v17343_v30 }
 0xbcb   : > { %v10259_v45 = vsel %vm10015_vm6, %v10258_v14, %v10254_v23 }
 0xbcc   : > { %v9975_v17 = vpop.permute.xlu0 %9974  ;;  %v9984_v54 = vpop.permute.xlu1 %9983 }
 0xbcd   : > { %v10249_v48 = vrot.slane %v9975_v17, %v17339_v60  ;;  %v10263_v9 = vrot.slane %v9984_v54, %v17343_v30 }
 0xbcf   : > { %v10250_v56 = vsel %vm10015_vm6, %v10249_v48, %v10245_v20 }
 0xbd0   : > { %v9993_v52 = vpop.permute.xlu0 %9992  ;;  %v10325_v49 = vsel %vm10298_vm5, %v10250_v56, %v10324_v0 }
 0xbd1   : > { %v10276_v43 = vrot.slane %v9993_v52, %v17339_v60  ;;  %v10326_v25 = vsel %vm10300_vm1, %v10259_v45, %v10325_v49 }
 0xbd3   : > { %v10277_v19 = vsel %vm10015_vm6, %v10276_v43, %v10272_v1 }
 0xbd4   : > { %v9996_v44 = vpop.permute.xlu1 %9995  ;;  %v9987_v29 = vpop.permute.xlu0 %9986 }
 0xbd5   : > { %v10267_v4 = vrot.slane %v9987_v29, %v17339_v60  ;;  %v10281_v2 = vrot.slane %v9996_v44, %v17343_v30 }
 0xbd7   : > { %v10268_v51 = vsel %vm10015_vm6, %v10267_v4, %v10263_v9 }
 0xbd8   : > { %v9999_v27 = vpop.permute.xlu0 %9998  ;;  %v10002_v13 = vpop.permute.xlu1 %10001  ;;  %v10327_v7 = vsel %vm10302_vm15, %v10268_v51, %v10326_v25 }
 0xbd9   : > { %v10285_v39 = vrot.slane %v9999_v27, %v17339_v60  ;;  %v10290_v57 = vrot.slane %v10002_v13, %v17343_v30  ;;  %v10328_v5 = vsel %vm10304_vm13, %v10277_v19, %v10327_v7 }
 0xbdb   : > { %v10286_v47 = vsel %vm10015_vm6, %v10285_v39, %v10281_v2 }
 0xbdc   : > { %v10005_v31 = vpop.permute.xlu0 %10004  ;;  %v10329_v38 = vsel %vm10306_vm2, %v10286_v47, %v10328_v5 }
 0xbdd   : > { %v10294_v3 = vrot.slane %v10005_v31, %v17339_v60 }
 0xbdf   : > { %v10295_v40 = vsel %vm10015_vm6, %v10294_v3, %v10290_v57 }
 0xbe0   : > { %v10330_v21 = vsel %vm10308_vm11, %v10295_v40, %v10329_v38 }
 0xbe1   : > { %v10345_v35 = vsel %vm10335_vm14, %v10330_v21, 0.0 }
 0xbe2   : > { %10346 = vadd.xlane.f32.xlu1 %v10345_v35 }
 0xc10   : > { %v10338_v53 = vpop.xlane.xlu1 %10337 }
 0xc11   : > { %v10355_v6 = vmul.f32 %v11375_v8, %v10338_v53 }
 0xc13   : > { %v10366_v60 = vadd.f32 %v11376_v10, %v10355_v6 }
 0xc15   : > { %10371 = vst.msk [vmem:[%s470_s30] sm:$0xff] %vm10370_vm7, %v10366_v60 }
 0xc30   : > { %v10341_v30 = vpop.xlane.xlu0 %10340 }
 0xc31   : > { %v10356_v26 = vmul.f32 %v11375_v8, %v10341_v30 }
 0xc33   : > { %v10367_v58 = vadd.f32 %v11376_v10, %v10356_v26 }
 0xc35   : > { %10372 = vst.msk [vmem:[%s470_s30 + $0x8] sm:$0xff] %vm10370_vm7, %v10367_v58 }
 0xc50   : > { %v10344_v32 = vpop.xlane.xlu0 %10343 }
 0xc51   : > { %v10357_v59 = vmul.f32 %v11375_v8, %v10344_v32 }
 0xc53   : > { %v10368_v62 = vadd.f32 %v11376_v10, %v10357_v59 }
 0xc55   : > { %10373 = vst.msk [vmem:[%s470_s30 + $0x10] sm:$0xff] %vm10370_vm7, %v10368_v62 }
 0xc6f   : > { %v10347_v55 = vpop.xlane.xlu1 %10346 }
 0xc70   : > { %v10358_v28 = vmul.f32 %v11375_v8, %v10347_v55 }
 0xc72   : > { %v10369_v36 = vadd.f32 %v11376_v10, %v10358_v28 }
 0xc74   : > { %10374 = vst.msk [vmem:[%s470_s30 + $0x18] sm:$0xff] %vm10370_vm7, %v10369_v36 }
 0xc75 PF: > { %s29_s14 = sadd.s32 1, %s12321_s14  }
 0xc76   : > { %p26_p5 = scmp.ge.s32.totalorder %s29_s14, 4  }
 0xc78   :  { %28 = sbr.rel (!%p26_p5) target bundleno = 4 (0x4), region = 109 }

</bundles_post_ra>
